<compile_context>
chip_gen: v7x
topology: tpu7x:2x2x1
jax: 0.10.0
libtpu: 0.0.40
codegen_flags: <defaults>
</compile_context>

<pallas_src>
import jax
import jax.numpy as jnp
from jax.experimental import pallas as pl
from jax.experimental.pallas import tpu as pltpu

BN_EPS = 1e-5
LANE = 128           # conv channels carried lane-padded to 128 inside the kernel


def _rows(H, W):
    # Row-major padded buffer: 1 top halo + H image rows + 1 bottom halo
    # + 1 guard row so the flat-offset tap slices never read out of bounds.
    return (H + 3) * (W + 2)


ROWS1 = _rows(64, 64)          # 67 * 66 = 4422 padded rows for the 64x64 input


def _fold_bn(gamma, beta, mean, var):
    scale = gamma / jnp.sqrt(var + BN_EPS)
    return scale, beta - mean * scale


def _pad_lane(v, n=LANE):
    # Zero-pad a per-channel vector to the lane width (padded lanes MUST stay 0
    # so padded channels remain exactly zero through conv/bias/ReLU/BN).
    return jnp.pad(v, (0, n - v.shape[0])).reshape(1, n)


# ----------------------------- Pallas kernels ------------------------------

def _conv_stack_kernel(x_ref, w1_ref, w2_ref, w3_ref, w4_ref, ep_ref, o_ref,
                       buf2_ref, buf3_ref, buf4_ref):
    """Fused 4x (Conv3x3 + bias + ReLU + BN(eval) + MaxPool2x2) for one image.

    x_ref:   (1, ROWS1, 1)   spatially padded 64x64 image, row stride 66
    wN_ref:  (9, cin_p, 128) tap-major conv weights (w1 f32, w2..w4 bf16)
    ep_ref:  (12, 128)       per-layer [bias, scale, shift] rows (f32)
    o_ref:   (1, 16, 128)    pooled layer-4 output, rows = y*4+x, lanes = channels
    bufN:    VMEM scratch holding the next layer's zero-haloed padded input (f32)
    """
    # Halo / guard rows of the inter-layer buffers must be exactly zero.
    buf2_ref[...] = jnp.zeros(buf2_ref.shape, buf2_ref.dtype)
    buf3_ref[...] = jnp.zeros(buf3_ref.shape, buf3_ref.dtype)
    buf4_ref[...] = jnp.zeros(buf4_ref.shape, buf4_ref.dtype)

    def run_layer(layer, H, W, w_ref, load, store, cin_is_one=False):
        Wp, Ho, Wo = W + 2, H // 2, W // 2
        bias = ep_ref[3 * layer + 0:3 * layer + 1, :]       # (1, 128) f32
        scale = ep_ref[3 * layer + 1:3 * layer + 2, :]
        shift = ep_ref[3 * layer + 2:3 * layer + 3, :]

        # One strip == 2 conv rows == 1 pooled row; accumulator is (2*Wp, 128).
        @pl.loop(0, Ho)
        def _strip(s):
            acc = None
            for dy in range(3):
                for dx in range(3):
                    # Contiguous flat-offset tap slice (junk columns cropped later).
                    xs = load(pl.ds((2 * s + dy) * Wp + dx, 2 * Wp))
                    wt = w_ref[dy * 3 + dx]
                    if cin_is_one:
                        c = xs * wt                      # (2*Wp,1)*(1,128) VPU outer product
                    else:
                        c = jnp.dot(xs.astype(jnp.bfloat16), wt,
                                    preferred_element_type=jnp.float32)
                    acc = c if acc is None else acc + c
            # bias + ReLU + BatchNorm(eval), then 2x2 max-pool on the strip value.
            y = jnp.maximum(acc + bias, 0.0) * scale + shift        # (2*Wp, 128) f32
            r = jnp.maximum(y[:Wp, :], y[Wp:, :])                   # pool row pairs
            p = r[:W, :].reshape(Wo, 2, LANE).max(axis=1)           # crop junk + pool cols
            store(s, Wo, p)

    def store_into(buf_ref):
        def _store(s, Wo, v):
            # Interior of padded row (s+1) of the next layer's buffer.
            buf_ref[pl.ds((s + 1) * (Wo + 2) + 1, Wo), :] = v
        return _store

    def store_out(s, Wo, v):
        o_ref[0, pl.ds(s * Wo, Wo), :] = v

    run_layer(0, 64, 64, w1_ref, lambda sl: x_ref[0, sl, :],
              store_into(buf2_ref), cin_is_one=True)
    run_layer(1, 32, 32, w2_ref, lambda sl: buf2_ref[sl, :], store_into(buf3_ref))
    run_layer(2, 16, 16, w3_ref, lambda sl: buf3_ref[sl, :], store_into(buf4_ref))
    run_layer(3, 8, 8, w4_ref, lambda sl: buf4_ref[sl, :], store_out)


def _dense_head_kernel(x_ref, w1_ref, e1_ref, w2_ref, e2_ref, w3_ref, e3_ref,
                       wh_ref, bh_ref, o_ref):
    """Fused DenseBlock x3 (Linear+ReLU+BN1d eval) + Linear + Softmax.

    Weights stay resident in VMEM; intermediates never touch HBM.
    eN_ref rows: [bias, scale, shift].  Dropout is identity in eval mode.
    """
    def dense_block(h, w_ref, e_ref):
        y = jnp.dot(h, w_ref[...], preferred_element_type=jnp.float32)
        b, s, t = e_ref[0:1, :], e_ref[1:2, :], e_ref[2:3, :]
        return jnp.maximum(y + b, 0.0) * s + t

    h = dense_block(x_ref[...], w1_ref, e1_ref)                     # (Bp, 512) f32
    h = dense_block(h.astype(jnp.bfloat16), w2_ref, e2_ref)         # (Bp, 128) f32
    h = dense_block(h.astype(jnp.bfloat16), w3_ref, e3_ref)         # (Bp, 32)  f32
    logits = jnp.dot(h, wh_ref[...], preferred_element_type=jnp.float32) + bh_ref[...]
    m = jnp.max(logits, axis=1, keepdims=True)
    e = jnp.exp(logits - m)
    o_ref[...] = e / jnp.sum(e, axis=1, keepdims=True)


# ------------------------------- wrappers -----------------------------------

def conv_stack(x_pad, w1, w2, w3, w4, ep):
    """Fused conv stack.  x_pad: (B, ROWS1, 1) f32 -> (B, 16, 128) f32 features."""
    B = x_pad.shape[0]
    # TODO(synk): for v5e/v6e, blocking several images per grid step would
    # amortize pipeline overhead; for v7x with B=1 a row-strip parallel axis
    # would be needed to use both TensorCores.
    return pl.pallas_call(
        _conv_stack_kernel,
        out_shape=jax.ShapeDtypeStruct((B, 16, LANE), jnp.float32),
        grid=(B,),
        in_specs=[
            pl.BlockSpec((1, ROWS1, 1), lambda b: (b, 0, 0)),
            pl.BlockSpec((9, 1, LANE), lambda b: (0, 0, 0)),
            pl.BlockSpec((9, LANE, LANE), lambda b: (0, 0, 0)),
            pl.BlockSpec((9, LANE, LANE), lambda b: (0, 0, 0)),
            pl.BlockSpec((9, LANE, LANE), lambda b: (0, 0, 0)),
            pl.BlockSpec((12, LANE), lambda b: (0, 0)),
        ],
        out_specs=pl.BlockSpec((1, 16, LANE), lambda b: (b, 0, 0)),
        scratch_shapes=[
            pltpu.VMEM((_rows(32, 32), LANE), jnp.float32),   # layer-2 padded input
            pltpu.VMEM((_rows(16, 16), LANE), jnp.float32),   # layer-3 padded input
            pltpu.VMEM((_rows(8, 8), LANE), jnp.float32),     # layer-4 padded input
        ],
        compiler_params=pltpu.CompilerParams(
            dimension_semantics=("parallel",),
            vmem_limit_bytes=32 * 1024 * 1024),
    )(x_pad, w1, w2, w3, w4, ep)


def dense_head(feats, dense, head_w, head_b):
    """Fused classifier.  feats: (B, 1024) bf16 in NHWC-flatten order."""
    B = feats.shape[0]
    nc = head_w.shape[1]
    Bp = max(8, ((B + 7) // 8) * 8)             # full sublanes for the matmuls
    xp = jnp.pad(feats, ((0, Bp - B), (0, 0)))
    args = [xp]
    for w, e in dense:
        args += [w, e]
    args += [head_w, head_b]
    out = pl.pallas_call(
        _dense_head_kernel,
        out_shape=jax.ShapeDtypeStruct((Bp, nc), jnp.float32),
        in_specs=[pl.BlockSpec(memory_space=pltpu.MemorySpace.VMEM)] * len(args),
        out_specs=pl.BlockSpec(memory_space=pltpu.MemorySpace.VMEM),
    )(*args)
    return out[:B]


# ----------------------------- parameters -----------------------------------

def init_params(key, num_class):
    """Deterministic synthetic params matching CnnModel._initialize_weights (HWIO convs)."""
    num_chan = 8
    conv_cfg = [(1, num_chan), (num_chan, 2 * num_chan),
                (2 * num_chan, 4 * num_chan), (4 * num_chan, 8 * num_chan)]
    dense_cfg = [(1024, 512), (512, 128), (128, 32)]
    keys = jax.random.split(key, len(conv_cfg) + len(dense_cfg) + 1)
    params = {"conv": [], "dense": []}
    for i, (cin, cout) in enumerate(conv_cfg):
        std = (2.0 / (cout * 9)) ** 0.5                    # kaiming_normal_, fan_out
        w = std * jax.random.normal(keys[i], (3, 3, cin, cout), jnp.float32)
        params["conv"].append(dict(
            w=w, b=jnp.zeros((cout,), jnp.float32),
            gamma=jnp.ones((cout,), jnp.float32), beta=jnp.zeros((cout,), jnp.float32),
            mean=jnp.zeros((cout,), jnp.float32), var=jnp.ones((cout,), jnp.float32)))
    for j, (cin, cout) in enumerate(dense_cfg):
        w = 0.01 * jax.random.normal(keys[len(conv_cfg) + j], (cin, cout), jnp.float32)
        params["dense"].append(dict(
            w=w, b=jnp.zeros((cout,), jnp.float32),
            gamma=jnp.ones((cout,), jnp.float32), beta=jnp.zeros((cout,), jnp.float32),
            mean=jnp.zeros((cout,), jnp.float32), var=jnp.ones((cout,), jnp.float32)))
    w_head = 0.01 * jax.random.normal(keys[-1], (32, num_class), jnp.float32)
    params["head"] = dict(w=w_head, b=jnp.zeros((num_class,), jnp.float32))
    return params


def prepare_params(params):
    """One-time weight prep: lane padding, BN folding, bf16 casts, flatten permute."""
    def conv_taps(w, cin_p, dtype):
        cin, cout = w.shape[2], w.shape[3]
        wp = jnp.pad(w, ((0, 0), (0, 0), (0, cin_p - cin), (0, LANE - cout)))
        return wp.reshape(9, cin_p, LANE).astype(dtype)

    conv = params["conv"]
    w1 = conv_taps(conv[0]["w"], 1, jnp.float32)           # Cin=1 layer stays on the VPU
    w2 = conv_taps(conv[1]["w"], LANE, jnp.bfloat16)
    w3 = conv_taps(conv[2]["w"], LANE, jnp.bfloat16)
    w4 = conv_taps(conv[3]["w"], LANE, jnp.bfloat16)
    ep_rows = []
    for p in conv:
        scale, shift = _fold_bn(p["gamma"], p["beta"], p["mean"], p["var"])
        ep_rows += [_pad_lane(p["b"]), _pad_lane(scale), _pad_lane(shift)]
    ep = jnp.concatenate(ep_rows, axis=0).astype(jnp.float32)        # (12, 128)

    # Permute classifier w1 rows from torch NCHW-flatten (c,y,x) order to the
    # conv kernel's NHWC-flatten (y,x,c) order -> no feature transpose needed.
    d = params["dense"]
    w1d = jnp.transpose(d[0]["w"].reshape(64, 4, 4, 512), (1, 2, 0, 3)).reshape(1024, 512)
    dense = []
    for i, p in enumerate(d):
        w = w1d if i == 0 else p["w"]
        scale, shift = _fold_bn(p["gamma"], p["beta"], p["mean"], p["var"])
        e = jnp.stack([p["b"], scale, shift], axis=0).astype(jnp.float32)
        dense.append((w.astype(jnp.bfloat16), e))
    head_w = params["head"]["w"].astype(jnp.float32)
    head_b = params["head"]["b"].reshape(1, -1).astype(jnp.float32)
    return dict(w1=w1, w2=w2, w3=w3, w4=w4, ep=ep,
                dense=dense, head_w=head_w, head_b=head_b)


@jax.jit
def cnn_model_forward(prep, x_nchw):
    """Eval-mode forward of CnnModel.  x_nchw: (B, 1, 64, 64) f32 -> (B, num_class)."""
    # TODO(synk): Dropout is identity and BatchNorm uses running stats (eval mode);
    # training-mode batch statistics / dropout RNG are not reproduced.
    B = x_nchw.shape[0]
    x = x_nchw[:, 0, :, :].astype(jnp.float32)                      # (B, 64, 64)
    # 1-px conv halo + 1 extra zero guard row for the flat-offset tap slices.
    xp = jnp.pad(x, ((0, 0), (1, 2), (1, 1)))                       # (B, 67, 66)
    x_pad = xp.reshape(B, ROWS1, 1)
    conv_out = conv_stack(x_pad, prep["w1"], prep["w2"], prep["w3"], prep["w4"],
                          prep["ep"])                               # (B, 16, 128)
    feats = conv_out[:, :, :64].reshape(B, 1024).astype(jnp.bfloat16)
    return dense_head(feats, prep["dense"], prep["head_w"], prep["head_b"])


if __name__ == "__main__":
    key = jax.random.PRNGKey(0)
    pkey, xkey = jax.random.split(key)
    num_class = 7
    params = init_params(pkey, num_class)
    prep = prepare_params(params)
    # Flatten -> 1024 implies 64 channels * 4 * 4 spatial, i.e. 64x64 1-channel input.
    x = jax.random.normal(xkey, (2, 1, 64, 64), jnp.float32)
    out = jax.block_until_ready(cnn_model_forward(prep, x))
    assert out.shape == (2, num_class), out.shape
    assert bool(jnp.all(jnp.isfinite(out)))
    assert bool(jnp.allclose(jnp.sum(out, axis=1), 1.0, atol=1e-4))
    print("KERNEL_OK")
</pallas_src>

<mosaic_0001>
module attributes {stable_mosaic.version = 11 : i64} {
  func.func @_conv_stack_kernel(%arg0: i32, %arg1: memref<1x4422x1xf32, #tpu.memory_space<vmem>>, %arg2: memref<9x1x128xf32, #tpu.memory_space<vmem>>, %arg3: memref<9x128x128xbf16, #tpu.memory_space<vmem>>, %arg4: memref<9x128x128xbf16, #tpu.memory_space<vmem>>, %arg5: memref<9x128x128xbf16, #tpu.memory_space<vmem>>, %arg6: memref<12x128xf32, #tpu.memory_space<vmem>>, %arg7: memref<1x16x128xf32, #tpu.memory_space<vmem>>, %arg8: memref<1190x128xf32, #tpu.memory_space<vmem>>, %arg9: memref<342x128xf32, #tpu.memory_space<vmem>>, %arg10: memref<110x128xf32, #tpu.memory_space<vmem>>) attributes {dimension_semantics = [#tpu.dimension_semantics<parallel>], iteration_bounds = array<i64: 2>, scalar_prefetch = 0 : i64, scratch_operands = 3 : i64, tpu.core_type = #tpu.core_type<tc>, window_params = [{transform_indices = @transform_0, window_bounds = array<i64: 1, 4422, 1>}, {pipeline_mode = #tpu.pipeline_mode<synchronous>, transform_indices = @transform_1, window_bounds = array<i64: 9, 1, 128>}, {pipeline_mode = #tpu.pipeline_mode<synchronous>, transform_indices = @transform_2, window_bounds = array<i64: 9, 128, 128>}, {pipeline_mode = #tpu.pipeline_mode<synchronous>, transform_indices = @transform_3, window_bounds = array<i64: 9, 128, 128>}, {pipeline_mode = #tpu.pipeline_mode<synchronous>, transform_indices = @transform_4, window_bounds = array<i64: 9, 128, 128>}, {pipeline_mode = #tpu.pipeline_mode<synchronous>, transform_indices = @transform_5, window_bounds = array<i64: 12, 128>}, {transform_indices = @transform_6, window_bounds = array<i64: 1, 16, 128>}]} {
    %cst = arith.constant 0.000000e+00 : f32
    %0 = vector.broadcast %cst : f32 to vector<1190x128xf32>
    %c0 = arith.constant 0 : index
    %c0_0 = arith.constant 0 : index
    %1 = vector.load %arg8[%c0, %c0_0] : memref<1190x128xf32, #tpu.memory_space<vmem>>, vector<1190x128xf32>
    tpu.vector_store %arg8[%c0, %c0_0], %0 {strides = array<i32>} : memref<1190x128xf32, #tpu.memory_space<vmem>>, vector<1190x128xf32>,
    %cst_1 = arith.constant 0.000000e+00 : f32
    %2 = vector.broadcast %cst_1 : f32 to vector<342x128xf32>
    %c0_2 = arith.constant 0 : index
    %c0_3 = arith.constant 0 : index
    %3 = vector.load %arg9[%c0_2, %c0_3] : memref<342x128xf32, #tpu.memory_space<vmem>>, vector<342x128xf32>
    tpu.vector_store %arg9[%c0_2, %c0_3], %2 {strides = array<i32>} : memref<342x128xf32, #tpu.memory_space<vmem>>, vector<342x128xf32>,
    %cst_4 = arith.constant 0.000000e+00 : f32
    %4 = vector.broadcast %cst_4 : f32 to vector<110x128xf32>
    %c0_5 = arith.constant 0 : index
    %c0_6 = arith.constant 0 : index
    %5 = vector.load %arg10[%c0_5, %c0_6] : memref<110x128xf32, #tpu.memory_space<vmem>>, vector<110x128xf32>
    tpu.vector_store %arg10[%c0_5, %c0_6], %4 {strides = array<i32>} : memref<110x128xf32, #tpu.memory_space<vmem>>, vector<110x128xf32>,
    %c0_7 = arith.constant 0 : index
    %c0_8 = arith.constant 0 : index
    %6 = vector.load %arg6[%c0_7, %c0_8] : memref<12x128xf32, #tpu.memory_space<vmem>>, vector<1x128xf32>
    %c1 = arith.constant 1 : index
    %c0_9 = arith.constant 0 : index
    %7 = vector.load %arg6[%c1, %c0_9] : memref<12x128xf32, #tpu.memory_space<vmem>>, vector<1x128xf32>
    %c2 = arith.constant 2 : index
    %c0_10 = arith.constant 0 : index
    %8 = vector.load %arg6[%c2, %c0_10] : memref<12x128xf32, #tpu.memory_space<vmem>>, vector<1x128xf32>
    %c0_i32 = arith.constant 0 : i32
    %c32_i32 = arith.constant 32 : i32
    %9 = arith.addi %c0_i32, %c32_i32 : i32
    %c1_i32 = arith.constant 1 : i32
    scf.for %arg11 = %c0_i32 to %9 step %c1_i32  : i32 {
      %c1_i32_30 = arith.constant 1 : i32
      %22 = arith.muli %arg11, %c1_i32_30 : i32
      %c0_i32_31 = arith.constant 0 : i32
      %23 = arith.addi %c0_i32_31, %22 : i32
      %c2_i32 = arith.constant 2 : i32
      %24 = arith.muli %c2_i32, %23 : i32
      %c0_i32_32 = arith.constant 0 : i32
      %25 = arith.addi %24, %c0_i32_32 : i32
      %c66_i32 = arith.constant 66 : i32
      %26 = arith.muli %25, %c66_i32 : i32
      %c0_i32_33 = arith.constant 0 : i32
      %27 = arith.addi %26, %c0_i32_33 : i32
      %c0_34 = arith.constant 0 : index
      %28 = arith.index_cast %27 : i32 to index
      %c0_35 = arith.constant 0 : index
      %29 = vector.load %arg1[%c0_34, %28, %c0_35] : memref<1x4422x1xf32, #tpu.memory_space<vmem>>, vector<1x132x1xf32>
      %30 = vector.shape_cast %29 : vector<1x132x1xf32> to vector<132x1xf32>
      %c0_36 = arith.constant 0 : index
      %c0_37 = arith.constant 0 : index
      %c0_38 = arith.constant 0 : index
      %31 = vector.load %arg2[%c0_36, %c0_37, %c0_38] : memref<9x1x128xf32, #tpu.memory_space<vmem>>, vector<1x1x128xf32>
      %32 = vector.shape_cast %31 : vector<1x1x128xf32> to vector<1x128xf32>
      %33 = vector.broadcast %30 : vector<132x1xf32> to vector<132x128xf32>
      %34 = vector.broadcast %32 : vector<1x128xf32> to vector<132x128xf32>
      %35 = arith.mulf %33, %34 : vector<132x128xf32>
      %c2_i32_39 = arith.constant 2 : i32
      %36 = arith.muli %c2_i32_39, %23 : i32
      %c0_i32_40 = arith.constant 0 : i32
      %37 = arith.addi %36, %c0_i32_40 : i32
      %c66_i32_41 = arith.constant 66 : i32
      %38 = arith.muli %37, %c66_i32_41 : i32
      %c1_i32_42 = arith.constant 1 : i32
      %39 = arith.addi %38, %c1_i32_42 : i32
      %c0_43 = arith.constant 0 : index
      %40 = arith.index_cast %39 : i32 to index
      %c0_44 = arith.constant 0 : index
      %41 = vector.load %arg1[%c0_43, %40, %c0_44] : memref<1x4422x1xf32, #tpu.memory_space<vmem>>, vector<1x132x1xf32>
      %42 = vector.shape_cast %41 : vector<1x132x1xf32> to vector<132x1xf32>
      %c1_45 = arith.constant 1 : index
      %c0_46 = arith.constant 0 : index
      %c0_47 = arith.constant 0 : index
      %43 = vector.load %arg2[%c1_45, %c0_46, %c0_47] : memref<9x1x128xf32, #tpu.memory_space<vmem>>, vector<1x1x128xf32>
      %44 = vector.shape_cast %43 : vector<1x1x128xf32> to vector<1x128xf32>
      %45 = vector.broadcast %42 : vector<132x1xf32> to vector<132x128xf32>
      %46 = vector.broadcast %44 : vector<1x128xf32> to vector<132x128xf32>
      %47 = arith.mulf %45, %46 : vector<132x128xf32>
      %48 = arith.addf %35, %47 : vector<132x128xf32>
      %c2_i32_48 = arith.constant 2 : i32
      %49 = arith.muli %c2_i32_48, %23 : i32
      %c0_i32_49 = arith.constant 0 : i32
      %50 = arith.addi %49, %c0_i32_49 : i32
      %c66_i32_50 = arith.constant 66 : i32
      %51 = arith.muli %50, %c66_i32_50 : i32
      %c2_i32_51 = arith.constant 2 : i32
      %52 = arith.addi %51, %c2_i32_51 : i32
      %c0_52 = arith.constant 0 : index
      %53 = arith.index_cast %52 : i32 to index
      %c0_53 = arith.constant 0 : index
      %54 = vector.load %arg1[%c0_52, %53, %c0_53] : memref<1x4422x1xf32, #tpu.memory_space<vmem>>, vector<1x132x1xf32>
      %55 = vector.shape_cast %54 : vector<1x132x1xf32> to vector<132x1xf32>
      %c2_54 = arith.constant 2 : index
      %c0_55 = arith.constant 0 : index
      %c0_56 = arith.constant 0 : index
      %56 = vector.load %arg2[%c2_54, %c0_55, %c0_56] : memref<9x1x128xf32, #tpu.memory_space<vmem>>, vector<1x1x128xf32>
      %57 = vector.shape_cast %56 : vector<1x1x128xf32> to vector<1x128xf32>
      %58 = vector.broadcast %55 : vector<132x1xf32> to vector<132x128xf32>
      %59 = vector.broadcast %57 : vector<1x128xf32> to vector<132x128xf32>
      %60 = arith.mulf %58, %59 : vector<132x128xf32>
      %61 = arith.addf %48, %60 : vector<132x128xf32>
      %c2_i32_57 = arith.constant 2 : i32
      %62 = arith.muli %c2_i32_57, %23 : i32
      %c1_i32_58 = arith.constant 1 : i32
      %63 = arith.addi %62, %c1_i32_58 : i32
      %c66_i32_59 = arith.constant 66 : i32
      %64 = arith.muli %63, %c66_i32_59 : i32
      %c0_i32_60 = arith.constant 0 : i32
      %65 = arith.addi %64, %c0_i32_60 : i32
      %c0_61 = arith.constant 0 : index
      %66 = arith.index_cast %65 : i32 to index
      %c0_62 = arith.constant 0 : index
      %67 = vector.load %arg1[%c0_61, %66, %c0_62] : memref<1x4422x1xf32, #tpu.memory_space<vmem>>, vector<1x132x1xf32>
      %68 = vector.shape_cast %67 : vector<1x132x1xf32> to vector<132x1xf32>
      %c3_63 = arith.constant 3 : index
      %c0_64 = arith.constant 0 : index
      %c0_65 = arith.constant 0 : index
      %69 = vector.load %arg2[%c3_63, %c0_64, %c0_65] : memref<9x1x128xf32, #tpu.memory_space<vmem>>, vector<1x1x128xf32>
      %70 = vector.shape_cast %69 : vector<1x1x128xf32> to vector<1x128xf32>
      %71 = vector.broadcast %68 : vector<132x1xf32> to vector<132x128xf32>
      %72 = vector.broadcast %70 : vector<1x128xf32> to vector<132x128xf32>
      %73 = arith.mulf %71, %72 : vector<132x128xf32>
      %74 = arith.addf %61, %73 : vector<132x128xf32>
      %c2_i32_66 = arith.constant 2 : i32
      %75 = arith.muli %c2_i32_66, %23 : i32
      %c1_i32_67 = arith.constant 1 : i32
      %76 = arith.addi %75, %c1_i32_67 : i32
      %c66_i32_68 = arith.constant 66 : i32
      %77 = arith.muli %76, %c66_i32_68 : i32
      %c1_i32_69 = arith.constant 1 : i32
      %78 = arith.addi %77, %c1_i32_69 : i32
      %c0_70 = arith.constant 0 : index
      %79 = arith.index_cast %78 : i32 to index
      %c0_71 = arith.constant 0 : index
      %80 = vector.load %arg1[%c0_70, %79, %c0_71] : memref<1x4422x1xf32, #tpu.memory_space<vmem>>, vector<1x132x1xf32>
      %81 = vector.shape_cast %80 : vector<1x132x1xf32> to vector<132x1xf32>
      %c4_72 = arith.constant 4 : index
      %c0_73 = arith.constant 0 : index
      %c0_74 = arith.constant 0 : index
      %82 = vector.load %arg2[%c4_72, %c0_73, %c0_74] : memref<9x1x128xf32, #tpu.memory_space<vmem>>, vector<1x1x128xf32>
      %83 = vector.shape_cast %82 : vector<1x1x128xf32> to vector<1x128xf32>
      %84 = vector.broadcast %81 : vector<132x1xf32> to vector<132x128xf32>
      %85 = vector.broadcast %83 : vector<1x128xf32> to vector<132x128xf32>
      %86 = arith.mulf %84, %85 : vector<132x128xf32>
      %87 = arith.addf %74, %86 : vector<132x128xf32>
      %c2_i32_75 = arith.constant 2 : i32
      %88 = arith.muli %c2_i32_75, %23 : i32
      %c1_i32_76 = arith.constant 1 : i32
      %89 = arith.addi %88, %c1_i32_76 : i32
      %c66_i32_77 = arith.constant 66 : i32
      %90 = arith.muli %89, %c66_i32_77 : i32
      %c2_i32_78 = arith.constant 2 : i32
      %91 = arith.addi %90, %c2_i32_78 : i32
      %c0_79 = arith.constant 0 : index
      %92 = arith.index_cast %91 : i32 to index
      %c0_80 = arith.constant 0 : index
      %93 = vector.load %arg1[%c0_79, %92, %c0_80] : memref<1x4422x1xf32, #tpu.memory_space<vmem>>, vector<1x132x1xf32>
      %94 = vector.shape_cast %93 : vector<1x132x1xf32> to vector<132x1xf32>
      %c5_81 = arith.constant 5 : index
      %c0_82 = arith.constant 0 : index
      %c0_83 = arith.constant 0 : index
      %95 = vector.load %arg2[%c5_81, %c0_82, %c0_83] : memref<9x1x128xf32, #tpu.memory_space<vmem>>, vector<1x1x128xf32>
      %96 = vector.shape_cast %95 : vector<1x1x128xf32> to vector<1x128xf32>
      %97 = vector.broadcast %94 : vector<132x1xf32> to vector<132x128xf32>
      %98 = vector.broadcast %96 : vector<1x128xf32> to vector<132x128xf32>
      %99 = arith.mulf %97, %98 : vector<132x128xf32>
      %100 = arith.addf %87, %99 : vector<132x128xf32>
      %c2_i32_84 = arith.constant 2 : i32
      %101 = arith.muli %c2_i32_84, %23 : i32
      %c2_i32_85 = arith.constant 2 : i32
      %102 = arith.addi %101, %c2_i32_85 : i32
      %c66_i32_86 = arith.constant 66 : i32
      %103 = arith.muli %102, %c66_i32_86 : i32
      %c0_i32_87 = arith.constant 0 : i32
      %104 = arith.addi %103, %c0_i32_87 : i32
      %c0_88 = arith.constant 0 : index
      %105 = arith.index_cast %104 : i32 to index
      %c0_89 = arith.constant 0 : index
      %106 = vector.load %arg1[%c0_88, %105, %c0_89] : memref<1x4422x1xf32, #tpu.memory_space<vmem>>, vector<1x132x1xf32>
      %107 = vector.shape_cast %106 : vector<1x132x1xf32> to vector<132x1xf32>
      %c6_90 = arith.constant 6 : index
      %c0_91 = arith.constant 0 : index
      %c0_92 = arith.constant 0 : index
      %108 = vector.load %arg2[%c6_90, %c0_91, %c0_92] : memref<9x1x128xf32, #tpu.memory_space<vmem>>, vector<1x1x128xf32>
      %109 = vector.shape_cast %108 : vector<1x1x128xf32> to vector<1x128xf32>
      %110 = vector.broadcast %107 : vector<132x1xf32> to vector<132x128xf32>
      %111 = vector.broadcast %109 : vector<1x128xf32> to vector<132x128xf32>
      %112 = arith.mulf %110, %111 : vector<132x128xf32>
      %113 = arith.addf %100, %112 : vector<132x128xf32>
      %c2_i32_93 = arith.constant 2 : i32
      %114 = arith.muli %c2_i32_93, %23 : i32
      %c2_i32_94 = arith.constant 2 : i32
      %115 = arith.addi %114, %c2_i32_94 : i32
      %c66_i32_95 = arith.constant 66 : i32
      %116 = arith.muli %115, %c66_i32_95 : i32
      %c1_i32_96 = arith.constant 1 : i32
      %117 = arith.addi %116, %c1_i32_96 : i32
      %c0_97 = arith.constant 0 : index
      %118 = arith.index_cast %117 : i32 to index
      %c0_98 = arith.constant 0 : index
      %119 = vector.load %arg1[%c0_97, %118, %c0_98] : memref<1x4422x1xf32, #tpu.memory_space<vmem>>, vector<1x132x1xf32>
      %120 = vector.shape_cast %119 : vector<1x132x1xf32> to vector<132x1xf32>
      %c7_99 = arith.constant 7 : index
      %c0_100 = arith.constant 0 : index
      %c0_101 = arith.constant 0 : index
      %121 = vector.load %arg2[%c7_99, %c0_100, %c0_101] : memref<9x1x128xf32, #tpu.memory_space<vmem>>, vector<1x1x128xf32>
      %122 = vector.shape_cast %121 : vector<1x1x128xf32> to vector<1x128xf32>
      %123 = vector.broadcast %120 : vector<132x1xf32> to vector<132x128xf32>
      %124 = vector.broadcast %122 : vector<1x128xf32> to vector<132x128xf32>
      %125 = arith.mulf %123, %124 : vector<132x128xf32>
      %126 = arith.addf %113, %125 : vector<132x128xf32>
      %c2_i32_102 = arith.constant 2 : i32
      %127 = arith.muli %c2_i32_102, %23 : i32
      %c2_i32_103 = arith.constant 2 : i32
      %128 = arith.addi %127, %c2_i32_103 : i32
      %c66_i32_104 = arith.constant 66 : i32
      %129 = arith.muli %128, %c66_i32_104 : i32
      %c2_i32_105 = arith.constant 2 : i32
      %130 = arith.addi %129, %c2_i32_105 : i32
      %c0_106 = arith.constant 0 : index
      %131 = arith.index_cast %130 : i32 to index
      %c0_107 = arith.constant 0 : index
      %132 = vector.load %arg1[%c0_106, %131, %c0_107] : memref<1x4422x1xf32, #tpu.memory_space<vmem>>, vector<1x132x1xf32>
      %133 = vector.shape_cast %132 : vector<1x132x1xf32> to vector<132x1xf32>
      %c8_108 = arith.constant 8 : index
      %c0_109 = arith.constant 0 : index
      %c0_110 = arith.constant 0 : index
      %134 = vector.load %arg2[%c8_108, %c0_109, %c0_110] : memref<9x1x128xf32, #tpu.memory_space<vmem>>, vector<1x1x128xf32>
      %135 = vector.shape_cast %134 : vector<1x1x128xf32> to vector<1x128xf32>
      %136 = vector.broadcast %133 : vector<132x1xf32> to vector<132x128xf32>
      %137 = vector.broadcast %135 : vector<1x128xf32> to vector<132x128xf32>
      %138 = arith.mulf %136, %137 : vector<132x128xf32>
      %139 = arith.addf %126, %138 : vector<132x128xf32>
      %140 = vector.broadcast %6 : vector<1x128xf32> to vector<132x128xf32>
      %141 = arith.addf %139, %140 : vector<132x128xf32>
      %cst_111 = arith.constant 0.000000e+00 : f32
      %142 = vector.broadcast %cst_111 : f32 to vector<132x128xf32>
      %143 = arith.maximumf %141, %142 : vector<132x128xf32>
      %144 = vector.broadcast %7 : vector<1x128xf32> to vector<132x128xf32>
      %145 = arith.mulf %143, %144 : vector<132x128xf32>
      %146 = vector.broadcast %8 : vector<1x128xf32> to vector<132x128xf32>
      %147 = arith.addf %145, %146 : vector<132x128xf32>
      %148 = vector.extract_strided_slice %147 {offsets = [0, 0], sizes = [66, 128], strides = [1, 1]} : vector<132x128xf32> to vector<66x128xf32>
      %149 = vector.extract_strided_slice %147 {offsets = [66, 0], sizes = [66, 128], strides = [1, 1]} : vector<132x128xf32> to vector<66x128xf32>
      %150 = arith.maximumf %148, %149 : vector<66x128xf32>
      %151 = vector.extract_strided_slice %150 {offsets = [0, 0], sizes = [64, 128], strides = [1, 1]} : vector<66x128xf32> to vector<64x128xf32>
      %152 = vector.shape_cast %151 : vector<64x128xf32> to vector<32x2x128xf32>
      %cst_112 = arith.constant dense<0xFF800000> : vector<32x128xf32>
      %153 = vector.multi_reduction <maximumf>, %152, %cst_112 [1] : vector<32x2x128xf32> to vector<32x128xf32>
      %c1_i32_113 = arith.constant 1 : i32
      %154 = arith.addi %23, %c1_i32_113 : i32
      %c34_i32 = arith.constant 34 : i32
      %155 = arith.muli %154, %c34_i32 : i32
      %c1_i32_114 = arith.constant 1 : i32
      %156 = arith.addi %155, %c1_i32_114 : i32
      %157 = arith.index_cast %156 : i32 to index
      %c0_115 = arith.constant 0 : index
      %158 = vector.load %arg8[%157, %c0_115] : memref<1190x128xf32, #tpu.memory_space<vmem>>, vector<32x128xf32>
      tpu.vector_store %arg8[%157, %c0_115], %153 {strides = array<i32>} : memref<1190x128xf32, #tpu.memory_space<vmem>>, vector<32x128xf32>,
    }
    %c32_i32_11 = arith.constant 32 : i32
    %c3 = arith.constant 3 : index
    %c0_12 = arith.constant 0 : index
    %10 = vector.load %arg6[%c3, %c0_12] : memref<12x128xf32, #tpu.memory_space<vmem>>, vector<1x128xf32>
    %c4 = arith.constant 4 : index
    %c0_13 = arith.constant 0 : index
    %11 = vector.load %arg6[%c4, %c0_13] : memref<12x128xf32, #tpu.memory_space<vmem>>, vector<1x128xf32>
    %c5 = arith.constant 5 : index
    %c0_14 = arith.constant 0 : index
    %12 = vector.load %arg6[%c5, %c0_14] : memref<12x128xf32, #tpu.memory_space<vmem>>, vector<1x128xf32>
    %c0_i32_15 = arith.constant 0 : i32
    %c16_i32 = arith.constant 16 : i32
    %13 = arith.addi %c0_i32_15, %c16_i32 : i32
    %c1_i32_16 = arith.constant 1 : i32
    scf.for %arg11 = %c0_i32_15 to %13 step %c1_i32_16  : i32 {
      %c1_i32_30 = arith.constant 1 : i32
      %22 = arith.muli %arg11, %c1_i32_30 : i32
      %c0_i32_31 = arith.constant 0 : i32
      %23 = arith.addi %c0_i32_31, %22 : i32
      %c2_i32 = arith.constant 2 : i32
      %24 = arith.muli %c2_i32, %23 : i32
      %c0_i32_32 = arith.constant 0 : i32
      %25 = arith.addi %24, %c0_i32_32 : i32
      %c34_i32 = arith.constant 34 : i32
      %26 = arith.muli %25, %c34_i32 : i32
      %c0_i32_33 = arith.constant 0 : i32
      %27 = arith.addi %26, %c0_i32_33 : i32
      %28 = arith.index_cast %27 : i32 to index
      %c0_34 = arith.constant 0 : index
      %29 = vector.load %arg8[%28, %c0_34] : memref<1190x128xf32, #tpu.memory_space<vmem>>, vector<68x128xf32>
      %c0_35 = arith.constant 0 : index
      %c0_36 = arith.constant 0 : index
      %c0_37 = arith.constant 0 : index
      %30 = vector.load %arg3[%c0_35, %c0_36, %c0_37] : memref<9x128x128xbf16, #tpu.memory_space<vmem>>, vector<1x128x128xbf16>
      %31 = vector.shape_cast %30 : vector<1x128x128xbf16> to vector<128x128xbf16>
      %32 = arith.truncf %29 : vector<68x128xf32> to vector<68x128xbf16>
      %cst_38 = arith.constant dense<0.000000e+00> : vector<68x128xf32>
      %33 = tpu.matmul %32, %31, %cst_38 {dimension_numbers = #tpu.dot_dimension_numbers<[1], [0], [0], [1], [0, 0, 1, 1], [], []>} : vector<68x128xbf16>, vector<128x128xbf16>, vector<68x128xf32> -> vector<68x128xf32>
      %c2_i32_39 = arith.constant 2 : i32
      %34 = arith.muli %c2_i32_39, %23 : i32
      %c0_i32_40 = arith.constant 0 : i32
      %35 = arith.addi %34, %c0_i32_40 : i32
      %c34_i32_41 = arith.constant 34 : i32
      %36 = arith.muli %35, %c34_i32_41 : i32
      %c1_i32_42 = arith.constant 1 : i32
      %37 = arith.addi %36, %c1_i32_42 : i32
      %38 = arith.index_cast %37 : i32 to index
      %c0_43 = arith.constant 0 : index
      %39 = vector.load %arg8[%38, %c0_43] : memref<1190x128xf32, #tpu.memory_space<vmem>>, vector<68x128xf32>
      %c1_44 = arith.constant 1 : index
      %c0_45 = arith.constant 0 : index
      %c0_46 = arith.constant 0 : index
      %40 = vector.load %arg3[%c1_44, %c0_45, %c0_46] : memref<9x128x128xbf16, #tpu.memory_space<vmem>>, vector<1x128x128xbf16>
      %41 = vector.shape_cast %40 : vector<1x128x128xbf16> to vector<128x128xbf16>
      %42 = arith.truncf %39 : vector<68x128xf32> to vector<68x128xbf16>
      %cst_47 = arith.constant dense<0.000000e+00> : vector<68x128xf32>
      %43 = tpu.matmul %42, %41, %cst_47 {dimension_numbers = #tpu.dot_dimension_numbers<[1], [0], [0], [1], [0, 0, 1, 1], [], []>} : vector<68x128xbf16>, vector<128x128xbf16>, vector<68x128xf32> -> vector<68x128xf32>
      %44 = arith.addf %33, %43 : vector<68x128xf32>
      %c2_i32_48 = arith.constant 2 : i32
      %45 = arith.muli %c2_i32_48, %23 : i32
      %c0_i32_49 = arith.constant 0 : i32
      %46 = arith.addi %45, %c0_i32_49 : i32
      %c34_i32_50 = arith.constant 34 : i32
      %47 = arith.muli %46, %c34_i32_50 : i32
      %c2_i32_51 = arith.constant 2 : i32
      %48 = arith.addi %47, %c2_i32_51 : i32
      %49 = arith.index_cast %48 : i32 to index
      %c0_52 = arith.constant 0 : index
      %50 = vector.load %arg8[%49, %c0_52] : memref<1190x128xf32, #tpu.memory_space<vmem>>, vector<68x128xf32>
      %c2_53 = arith.constant 2 : index
      %c0_54 = arith.constant 0 : index
      %c0_55 = arith.constant 0 : index
      %51 = vector.load %arg3[%c2_53, %c0_54, %c0_55] : memref<9x128x128xbf16, #tpu.memory_space<vmem>>, vector<1x128x128xbf16>
      %52 = vector.shape_cast %51 : vector<1x128x128xbf16> to vector<128x128xbf16>
      %53 = arith.truncf %50 : vector<68x128xf32> to vector<68x128xbf16>
      %cst_56 = arith.constant dense<0.000000e+00> : vector<68x128xf32>
      %54 = tpu.matmul %53, %52, %cst_56 {dimension_numbers = #tpu.dot_dimension_numbers<[1], [0], [0], [1], [0, 0, 1, 1], [], []>} : vector<68x128xbf16>, vector<128x128xbf16>, vector<68x128xf32> -> vector<68x128xf32>
      %55 = arith.addf %44, %54 : vector<68x128xf32>
      %c2_i32_57 = arith.constant 2 : i32
      %56 = arith.muli %c2_i32_57, %23 : i32
      %c1_i32_58 = arith.constant 1 : i32
      %57 = arith.addi %56, %c1_i32_58 : i32
      %c34_i32_59 = arith.constant 34 : i32
      %58 = arith.muli %57, %c34_i32_59 : i32
      %c0_i32_60 = arith.constant 0 : i32
      %59 = arith.addi %58, %c0_i32_60 : i32
      %60 = arith.index_cast %59 : i32 to index
      %c0_61 = arith.constant 0 : index
      %61 = vector.load %arg8[%60, %c0_61] : memref<1190x128xf32, #tpu.memory_space<vmem>>, vector<68x128xf32>
      %c3_62 = arith.constant 3 : index
      %c0_63 = arith.constant 0 : index
      %c0_64 = arith.constant 0 : index
      %62 = vector.load %arg3[%c3_62, %c0_63, %c0_64] : memref<9x128x128xbf16, #tpu.memory_space<vmem>>, vector<1x128x128xbf16>
      %63 = vector.shape_cast %62 : vector<1x128x128xbf16> to vector<128x128xbf16>
      %64 = arith.truncf %61 : vector<68x128xf32> to vector<68x128xbf16>
      %cst_65 = arith.constant dense<0.000000e+00> : vector<68x128xf32>
      %65 = tpu.matmul %64, %63, %cst_65 {dimension_numbers = #tpu.dot_dimension_numbers<[1], [0], [0], [1], [0, 0, 1, 1], [], []>} : vector<68x128xbf16>, vector<128x128xbf16>, vector<68x128xf32> -> vector<68x128xf32>
      %66 = arith.addf %55, %65 : vector<68x128xf32>
      %c2_i32_66 = arith.constant 2 : i32
      %67 = arith.muli %c2_i32_66, %23 : i32
      %c1_i32_67 = arith.constant 1 : i32
      %68 = arith.addi %67, %c1_i32_67 : i32
      %c34_i32_68 = arith.constant 34 : i32
      %69 = arith.muli %68, %c34_i32_68 : i32
      %c1_i32_69 = arith.constant 1 : i32
      %70 = arith.addi %69, %c1_i32_69 : i32
      %71 = arith.index_cast %70 : i32 to index
      %c0_70 = arith.constant 0 : index
      %72 = vector.load %arg8[%71, %c0_70] : memref<1190x128xf32, #tpu.memory_space<vmem>>, vector<68x128xf32>
      %c4_71 = arith.constant 4 : index
      %c0_72 = arith.constant 0 : index
      %c0_73 = arith.constant 0 : index
      %73 = vector.load %arg3[%c4_71, %c0_72, %c0_73] : memref<9x128x128xbf16, #tpu.memory_space<vmem>>, vector<1x128x128xbf16>
      %74 = vector.shape_cast %73 : vector<1x128x128xbf16> to vector<128x128xbf16>
      %75 = arith.truncf %72 : vector<68x128xf32> to vector<68x128xbf16>
      %cst_74 = arith.constant dense<0.000000e+00> : vector<68x128xf32>
      %76 = tpu.matmul %75, %74, %cst_74 {dimension_numbers = #tpu.dot_dimension_numbers<[1], [0], [0], [1], [0, 0, 1, 1], [], []>} : vector<68x128xbf16>, vector<128x128xbf16>, vector<68x128xf32> -> vector<68x128xf32>
      %77 = arith.addf %66, %76 : vector<68x128xf32>
      %c2_i32_75 = arith.constant 2 : i32
      %78 = arith.muli %c2_i32_75, %23 : i32
      %c1_i32_76 = arith.constant 1 : i32
      %79 = arith.addi %78, %c1_i32_76 : i32
      %c34_i32_77 = arith.constant 34 : i32
      %80 = arith.muli %79, %c34_i32_77 : i32
      %c2_i32_78 = arith.constant 2 : i32
      %81 = arith.addi %80, %c2_i32_78 : i32
      %82 = arith.index_cast %81 : i32 to index
      %c0_79 = arith.constant 0 : index
      %83 = vector.load %arg8[%82, %c0_79] : memref<1190x128xf32, #tpu.memory_space<vmem>>, vector<68x128xf32>
      %c5_80 = arith.constant 5 : index
      %c0_81 = arith.constant 0 : index
      %c0_82 = arith.constant 0 : index
      %84 = vector.load %arg3[%c5_80, %c0_81, %c0_82] : memref<9x128x128xbf16, #tpu.memory_space<vmem>>, vector<1x128x128xbf16>
      %85 = vector.shape_cast %84 : vector<1x128x128xbf16> to vector<128x128xbf16>
      %86 = arith.truncf %83 : vector<68x128xf32> to vector<68x128xbf16>
      %cst_83 = arith.constant dense<0.000000e+00> : vector<68x128xf32>
      %87 = tpu.matmul %86, %85, %cst_83 {dimension_numbers = #tpu.dot_dimension_numbers<[1], [0], [0], [1], [0, 0, 1, 1], [], []>} : vector<68x128xbf16>, vector<128x128xbf16>, vector<68x128xf32> -> vector<68x128xf32>
      %88 = arith.addf %77, %87 : vector<68x128xf32>
      %c2_i32_84 = arith.constant 2 : i32
      %89 = arith.muli %c2_i32_84, %23 : i32
      %c2_i32_85 = arith.constant 2 : i32
      %90 = arith.addi %89, %c2_i32_85 : i32
      %c34_i32_86 = arith.constant 34 : i32
      %91 = arith.muli %90, %c34_i32_86 : i32
      %c0_i32_87 = arith.constant 0 : i32
      %92 = arith.addi %91, %c0_i32_87 : i32
      %93 = arith.index_cast %92 : i32 to index
      %c0_88 = arith.constant 0 : index
      %94 = vector.load %arg8[%93, %c0_88] : memref<1190x128xf32, #tpu.memory_space<vmem>>, vector<68x128xf32>
      %c6_89 = arith.constant 6 : index
      %c0_90 = arith.constant 0 : index
      %c0_91 = arith.constant 0 : index
      %95 = vector.load %arg3[%c6_89, %c0_90, %c0_91] : memref<9x128x128xbf16, #tpu.memory_space<vmem>>, vector<1x128x128xbf16>
      %96 = vector.shape_cast %95 : vector<1x128x128xbf16> to vector<128x128xbf16>
      %97 = arith.truncf %94 : vector<68x128xf32> to vector<68x128xbf16>
      %cst_92 = arith.constant dense<0.000000e+00> : vector<68x128xf32>
      %98 = tpu.matmul %97, %96, %cst_92 {dimension_numbers = #tpu.dot_dimension_numbers<[1], [0], [0], [1], [0, 0, 1, 1], [], []>} : vector<68x128xbf16>, vector<128x128xbf16>, vector<68x128xf32> -> vector<68x128xf32>
      %99 = arith.addf %88, %98 : vector<68x128xf32>
      %c2_i32_93 = arith.constant 2 : i32
      %100 = arith.muli %c2_i32_93, %23 : i32
      %c2_i32_94 = arith.constant 2 : i32
      %101 = arith.addi %100, %c2_i32_94 : i32
      %c34_i32_95 = arith.constant 34 : i32
      %102 = arith.muli %101, %c34_i32_95 : i32
      %c1_i32_96 = arith.constant 1 : i32
      %103 = arith.addi %102, %c1_i32_96 : i32
      %104 = arith.index_cast %103 : i32 to index
      %c0_97 = arith.constant 0 : index
      %105 = vector.load %arg8[%104, %c0_97] : memref<1190x128xf32, #tpu.memory_space<vmem>>, vector<68x128xf32>
      %c7_98 = arith.constant 7 : index
      %c0_99 = arith.constant 0 : index
      %c0_100 = arith.constant 0 : index
      %106 = vector.load %arg3[%c7_98, %c0_99, %c0_100] : memref<9x128x128xbf16, #tpu.memory_space<vmem>>, vector<1x128x128xbf16>
      %107 = vector.shape_cast %106 : vector<1x128x128xbf16> to vector<128x128xbf16>
      %108 = arith.truncf %105 : vector<68x128xf32> to vector<68x128xbf16>
      %cst_101 = arith.constant dense<0.000000e+00> : vector<68x128xf32>
      %109 = tpu.matmul %108, %107, %cst_101 {dimension_numbers = #tpu.dot_dimension_numbers<[1], [0], [0], [1], [0, 0, 1, 1], [], []>} : vector<68x128xbf16>, vector<128x128xbf16>, vector<68x128xf32> -> vector<68x128xf32>
      %110 = arith.addf %99, %109 : vector<68x128xf32>
      %c2_i32_102 = arith.constant 2 : i32
      %111 = arith.muli %c2_i32_102, %23 : i32
      %c2_i32_103 = arith.constant 2 : i32
      %112 = arith.addi %111, %c2_i32_103 : i32
      %c34_i32_104 = arith.constant 34 : i32
      %113 = arith.muli %112, %c34_i32_104 : i32
      %c2_i32_105 = arith.constant 2 : i32
      %114 = arith.addi %113, %c2_i32_105 : i32
      %115 = arith.index_cast %114 : i32 to index
      %c0_106 = arith.constant 0 : index
      %116 = vector.load %arg8[%115, %c0_106] : memref<1190x128xf32, #tpu.memory_space<vmem>>, vector<68x128xf32>
      %c8_107 = arith.constant 8 : index
      %c0_108 = arith.constant 0 : index
      %c0_109 = arith.constant 0 : index
      %117 = vector.load %arg3[%c8_107, %c0_108, %c0_109] : memref<9x128x128xbf16, #tpu.memory_space<vmem>>, vector<1x128x128xbf16>
      %118 = vector.shape_cast %117 : vector<1x128x128xbf16> to vector<128x128xbf16>
      %119 = arith.truncf %116 : vector<68x128xf32> to vector<68x128xbf16>
      %cst_110 = arith.constant dense<0.000000e+00> : vector<68x128xf32>
      %120 = tpu.matmul %119, %118, %cst_110 {dimension_numbers = #tpu.dot_dimension_numbers<[1], [0], [0], [1], [0, 0, 1, 1], [], []>} : vector<68x128xbf16>, vector<128x128xbf16>, vector<68x128xf32> -> vector<68x128xf32>
      %121 = arith.addf %110, %120 : vector<68x128xf32>
      %122 = vector.broadcast %10 : vector<1x128xf32> to vector<68x128xf32>
      %123 = arith.addf %121, %122 : vector<68x128xf32>
      %cst_111 = arith.constant 0.000000e+00 : f32
      %124 = vector.broadcast %cst_111 : f32 to vector<68x128xf32>
      %125 = arith.maximumf %123, %124 : vector<68x128xf32>
      %126 = vector.broadcast %11 : vector<1x128xf32> to vector<68x128xf32>
      %127 = arith.mulf %125, %126 : vector<68x128xf32>
      %128 = vector.broadcast %12 : vector<1x128xf32> to vector<68x128xf32>
      %129 = arith.addf %127, %128 : vector<68x128xf32>
      %130 = vector.extract_strided_slice %129 {offsets = [0, 0], sizes = [34, 128], strides = [1, 1]} : vector<68x128xf32> to vector<34x128xf32>
      %131 = vector.extract_strided_slice %129 {offsets = [34, 0], sizes = [34, 128], strides = [1, 1]} : vector<68x128xf32> to vector<34x128xf32>
      %132 = arith.maximumf %130, %131 : vector<34x128xf32>
      %133 = vector.extract_strided_slice %132 {offsets = [0, 0], sizes = [32, 128], strides = [1, 1]} : vector<34x128xf32> to vector<32x128xf32>
      %134 = vector.shape_cast %133 : vector<32x128xf32> to vector<16x2x128xf32>
      %cst_112 = arith.constant dense<0xFF800000> : vector<16x128xf32>
      %135 = vector.multi_reduction <maximumf>, %134, %cst_112 [1] : vector<16x2x128xf32> to vector<16x128xf32>
      %c1_i32_113 = arith.constant 1 : i32
      %136 = arith.addi %23, %c1_i32_113 : i32
      %c18_i32 = arith.constant 18 : i32
      %137 = arith.muli %136, %c18_i32 : i32
      %c1_i32_114 = arith.constant 1 : i32
      %138 = arith.addi %137, %c1_i32_114 : i32
      %139 = arith.index_cast %138 : i32 to index
      %c0_115 = arith.constant 0 : index
      %140 = vector.load %arg9[%139, %c0_115] : memref<342x128xf32, #tpu.memory_space<vmem>>, vector<16x128xf32>
      tpu.vector_store %arg9[%139, %c0_115], %135 {strides = array<i32>} : memref<342x128xf32, #tpu.memory_space<vmem>>, vector<16x128xf32>,
    }
    %c16_i32_17 = arith.constant 16 : i32
    %c6 = arith.constant 6 : index
    %c0_18 = arith.constant 0 : index
    %14 = vector.load %arg6[%c6, %c0_18] : memref<12x128xf32, #tpu.memory_space<vmem>>, vector<1x128xf32>
    %c7 = arith.constant 7 : index
    %c0_19 = arith.constant 0 : index
    %15 = vector.load %arg6[%c7, %c0_19] : memref<12x128xf32, #tpu.memory_space<vmem>>, vector<1x128xf32>
    %c8 = arith.constant 8 : index
    %c0_20 = arith.constant 0 : index
    %16 = vector.load %arg6[%c8, %c0_20] : memref<12x128xf32, #tpu.memory_space<vmem>>, vector<1x128xf32>
    %c0_i32_21 = arith.constant 0 : i32
    %c8_i32 = arith.constant 8 : i32
    %17 = arith.addi %c0_i32_21, %c8_i32 : i32
    %c1_i32_22 = arith.constant 1 : i32
    scf.for %arg11 = %c0_i32_21 to %17 step %c1_i32_22  : i32 {
      %c1_i32_30 = arith.constant 1 : i32
      %22 = arith.muli %arg11, %c1_i32_30 : i32
      %c0_i32_31 = arith.constant 0 : i32
      %23 = arith.addi %c0_i32_31, %22 : i32
      %c2_i32 = arith.constant 2 : i32
      %24 = arith.muli %c2_i32, %23 : i32
      %c0_i32_32 = arith.constant 0 : i32
      %25 = arith.addi %24, %c0_i32_32 : i32
      %c18_i32 = arith.constant 18 : i32
      %26 = arith.muli %25, %c18_i32 : i32
      %c0_i32_33 = arith.constant 0 : i32
      %27 = arith.addi %26, %c0_i32_33 : i32
      %28 = arith.index_cast %27 : i32 to index
      %c0_34 = arith.constant 0 : index
      %29 = vector.load %arg9[%28, %c0_34] : memref<342x128xf32, #tpu.memory_space<vmem>>, vector<36x128xf32>
      %c0_35 = arith.constant 0 : index
      %c0_36 = arith.constant 0 : index
      %c0_37 = arith.constant 0 : index
      %30 = vector.load %arg4[%c0_35, %c0_36, %c0_37] : memref<9x128x128xbf16, #tpu.memory_space<vmem>>, vector<1x128x128xbf16>
      %31 = vector.shape_cast %30 : vector<1x128x128xbf16> to vector<128x128xbf16>
      %32 = arith.truncf %29 : vector<36x128xf32> to vector<36x128xbf16>
      %cst_38 = arith.constant dense<0.000000e+00> : vector<36x128xf32>
      %33 = tpu.matmul %32, %31, %cst_38 {dimension_numbers = #tpu.dot_dimension_numbers<[1], [0], [0], [1], [0, 0, 1, 1], [], []>} : vector<36x128xbf16>, vector<128x128xbf16>, vector<36x128xf32> -> vector<36x128xf32>
      %c2_i32_39 = arith.constant 2 : i32
      %34 = arith.muli %c2_i32_39, %23 : i32
      %c0_i32_40 = arith.constant 0 : i32
      %35 = arith.addi %34, %c0_i32_40 : i32
      %c18_i32_41 = arith.constant 18 : i32
      %36 = arith.muli %35, %c18_i32_41 : i32
      %c1_i32_42 = arith.constant 1 : i32
      %37 = arith.addi %36, %c1_i32_42 : i32
      %38 = arith.index_cast %37 : i32 to index
      %c0_43 = arith.constant 0 : index
      %39 = vector.load %arg9[%38, %c0_43] : memref<342x128xf32, #tpu.memory_space<vmem>>, vector<36x128xf32>
      %c1_44 = arith.constant 1 : index
      %c0_45 = arith.constant 0 : index
      %c0_46 = arith.constant 0 : index
      %40 = vector.load %arg4[%c1_44, %c0_45, %c0_46] : memref<9x128x128xbf16, #tpu.memory_space<vmem>>, vector<1x128x128xbf16>
      %41 = vector.shape_cast %40 : vector<1x128x128xbf16> to vector<128x128xbf16>
      %42 = arith.truncf %39 : vector<36x128xf32> to vector<36x128xbf16>
      %cst_47 = arith.constant dense<0.000000e+00> : vector<36x128xf32>
      %43 = tpu.matmul %42, %41, %cst_47 {dimension_numbers = #tpu.dot_dimension_numbers<[1], [0], [0], [1], [0, 0, 1, 1], [], []>} : vector<36x128xbf16>, vector<128x128xbf16>, vector<36x128xf32> -> vector<36x128xf32>
      %44 = arith.addf %33, %43 : vector<36x128xf32>
      %c2_i32_48 = arith.constant 2 : i32
      %45 = arith.muli %c2_i32_48, %23 : i32
      %c0_i32_49 = arith.constant 0 : i32
      %46 = arith.addi %45, %c0_i32_49 : i32
      %c18_i32_50 = arith.constant 18 : i32
      %47 = arith.muli %46, %c18_i32_50 : i32
      %c2_i32_51 = arith.constant 2 : i32
      %48 = arith.addi %47, %c2_i32_51 : i32
      %49 = arith.index_cast %48 : i32 to index
      %c0_52 = arith.constant 0 : index
      %50 = vector.load %arg9[%49, %c0_52] : memref<342x128xf32, #tpu.memory_space<vmem>>, vector<36x128xf32>
      %c2_53 = arith.constant 2 : index
      %c0_54 = arith.constant 0 : index
      %c0_55 = arith.constant 0 : index
      %51 = vector.load %arg4[%c2_53, %c0_54, %c0_55] : memref<9x128x128xbf16, #tpu.memory_space<vmem>>, vector<1x128x128xbf16>
      %52 = vector.shape_cast %51 : vector<1x128x128xbf16> to vector<128x128xbf16>
      %53 = arith.truncf %50 : vector<36x128xf32> to vector<36x128xbf16>
      %cst_56 = arith.constant dense<0.000000e+00> : vector<36x128xf32>
      %54 = tpu.matmul %53, %52, %cst_56 {dimension_numbers = #tpu.dot_dimension_numbers<[1], [0], [0], [1], [0, 0, 1, 1], [], []>} : vector<36x128xbf16>, vector<128x128xbf16>, vector<36x128xf32> -> vector<36x128xf32>
      %55 = arith.addf %44, %54 : vector<36x128xf32>
      %c2_i32_57 = arith.constant 2 : i32
      %56 = arith.muli %c2_i32_57, %23 : i32
      %c1_i32_58 = arith.constant 1 : i32
      %57 = arith.addi %56, %c1_i32_58 : i32
      %c18_i32_59 = arith.constant 18 : i32
      %58 = arith.muli %57, %c18_i32_59 : i32
      %c0_i32_60 = arith.constant 0 : i32
      %59 = arith.addi %58, %c0_i32_60 : i32
      %60 = arith.index_cast %59 : i32 to index
      %c0_61 = arith.constant 0 : index
      %61 = vector.load %arg9[%60, %c0_61] : memref<342x128xf32, #tpu.memory_space<vmem>>, vector<36x128xf32>
      %c3_62 = arith.constant 3 : index
      %c0_63 = arith.constant 0 : index
      %c0_64 = arith.constant 0 : index
      %62 = vector.load %arg4[%c3_62, %c0_63, %c0_64] : memref<9x128x128xbf16, #tpu.memory_space<vmem>>, vector<1x128x128xbf16>
      %63 = vector.shape_cast %62 : vector<1x128x128xbf16> to vector<128x128xbf16>
      %64 = arith.truncf %61 : vector<36x128xf32> to vector<36x128xbf16>
      %cst_65 = arith.constant dense<0.000000e+00> : vector<36x128xf32>
      %65 = tpu.matmul %64, %63, %cst_65 {dimension_numbers = #tpu.dot_dimension_numbers<[1], [0], [0], [1], [0, 0, 1, 1], [], []>} : vector<36x128xbf16>, vector<128x128xbf16>, vector<36x128xf32> -> vector<36x128xf32>
      %66 = arith.addf %55, %65 : vector<36x128xf32>
      %c2_i32_66 = arith.constant 2 : i32
      %67 = arith.muli %c2_i32_66, %23 : i32
      %c1_i32_67 = arith.constant 1 : i32
      %68 = arith.addi %67, %c1_i32_67 : i32
      %c18_i32_68 = arith.constant 18 : i32
      %69 = arith.muli %68, %c18_i32_68 : i32
      %c1_i32_69 = arith.constant 1 : i32
      %70 = arith.addi %69, %c1_i32_69 : i32
      %71 = arith.index_cast %70 : i32 to index
      %c0_70 = arith.constant 0 : index
      %72 = vector.load %arg9[%71, %c0_70] : memref<342x128xf32, #tpu.memory_space<vmem>>, vector<36x128xf32>
      %c4_71 = arith.constant 4 : index
      %c0_72 = arith.constant 0 : index
      %c0_73 = arith.constant 0 : index
      %73 = vector.load %arg4[%c4_71, %c0_72, %c0_73] : memref<9x128x128xbf16, #tpu.memory_space<vmem>>, vector<1x128x128xbf16>
      %74 = vector.shape_cast %73 : vector<1x128x128xbf16> to vector<128x128xbf16>
      %75 = arith.truncf %72 : vector<36x128xf32> to vector<36x128xbf16>
      %cst_74 = arith.constant dense<0.000000e+00> : vector<36x128xf32>
      %76 = tpu.matmul %75, %74, %cst_74 {dimension_numbers = #tpu.dot_dimension_numbers<[1], [0], [0], [1], [0, 0, 1, 1], [], []>} : vector<36x128xbf16>, vector<128x128xbf16>, vector<36x128xf32> -> vector<36x128xf32>
      %77 = arith.addf %66, %76 : vector<36x128xf32>
      %c2_i32_75 = arith.constant 2 : i32
      %78 = arith.muli %c2_i32_75, %23 : i32
      %c1_i32_76 = arith.constant 1 : i32
      %79 = arith.addi %78, %c1_i32_76 : i32
      %c18_i32_77 = arith.constant 18 : i32
      %80 = arith.muli %79, %c18_i32_77 : i32
      %c2_i32_78 = arith.constant 2 : i32
      %81 = arith.addi %80, %c2_i32_78 : i32
      %82 = arith.index_cast %81 : i32 to index
      %c0_79 = arith.constant 0 : index
      %83 = vector.load %arg9[%82, %c0_79] : memref<342x128xf32, #tpu.memory_space<vmem>>, vector<36x128xf32>
      %c5_80 = arith.constant 5 : index
      %c0_81 = arith.constant 0 : index
      %c0_82 = arith.constant 0 : index
      %84 = vector.load %arg4[%c5_80, %c0_81, %c0_82] : memref<9x128x128xbf16, #tpu.memory_space<vmem>>, vector<1x128x128xbf16>
      %85 = vector.shape_cast %84 : vector<1x128x128xbf16> to vector<128x128xbf16>
      %86 = arith.truncf %83 : vector<36x128xf32> to vector<36x128xbf16>
      %cst_83 = arith.constant dense<0.000000e+00> : vector<36x128xf32>
      %87 = tpu.matmul %86, %85, %cst_83 {dimension_numbers = #tpu.dot_dimension_numbers<[1], [0], [0], [1], [0, 0, 1, 1], [], []>} : vector<36x128xbf16>, vector<128x128xbf16>, vector<36x128xf32> -> vector<36x128xf32>
      %88 = arith.addf %77, %87 : vector<36x128xf32>
      %c2_i32_84 = arith.constant 2 : i32
      %89 = arith.muli %c2_i32_84, %23 : i32
      %c2_i32_85 = arith.constant 2 : i32
      %90 = arith.addi %89, %c2_i32_85 : i32
      %c18_i32_86 = arith.constant 18 : i32
      %91 = arith.muli %90, %c18_i32_86 : i32
      %c0_i32_87 = arith.constant 0 : i32
      %92 = arith.addi %91, %c0_i32_87 : i32
      %93 = arith.index_cast %92 : i32 to index
      %c0_88 = arith.constant 0 : index
      %94 = vector.load %arg9[%93, %c0_88] : memref<342x128xf32, #tpu.memory_space<vmem>>, vector<36x128xf32>
      %c6_89 = arith.constant 6 : index
      %c0_90 = arith.constant 0 : index
      %c0_91 = arith.constant 0 : index
      %95 = vector.load %arg4[%c6_89, %c0_90, %c0_91] : memref<9x128x128xbf16, #tpu.memory_space<vmem>>, vector<1x128x128xbf16>
      %96 = vector.shape_cast %95 : vector<1x128x128xbf16> to vector<128x128xbf16>
      %97 = arith.truncf %94 : vector<36x128xf32> to vector<36x128xbf16>
      %cst_92 = arith.constant dense<0.000000e+00> : vector<36x128xf32>
      %98 = tpu.matmul %97, %96, %cst_92 {dimension_numbers = #tpu.dot_dimension_numbers<[1], [0], [0], [1], [0, 0, 1, 1], [], []>} : vector<36x128xbf16>, vector<128x128xbf16>, vector<36x128xf32> -> vector<36x128xf32>
      %99 = arith.addf %88, %98 : vector<36x128xf32>
      %c2_i32_93 = arith.constant 2 : i32
      %100 = arith.muli %c2_i32_93, %23 : i32
      %c2_i32_94 = arith.constant 2 : i32
      %101 = arith.addi %100, %c2_i32_94 : i32
      %c18_i32_95 = arith.constant 18 : i32
      %102 = arith.muli %101, %c18_i32_95 : i32
      %c1_i32_96 = arith.constant 1 : i32
      %103 = arith.addi %102, %c1_i32_96 : i32
      %104 = arith.index_cast %103 : i32 to index
      %c0_97 = arith.constant 0 : index
      %105 = vector.load %arg9[%104, %c0_97] : memref<342x128xf32, #tpu.memory_space<vmem>>, vector<36x128xf32>
      %c7_98 = arith.constant 7 : index
      %c0_99 = arith.constant 0 : index
      %c0_100 = arith.constant 0 : index
      %106 = vector.load %arg4[%c7_98, %c0_99, %c0_100] : memref<9x128x128xbf16, #tpu.memory_space<vmem>>, vector<1x128x128xbf16>
      %107 = vector.shape_cast %106 : vector<1x128x128xbf16> to vector<128x128xbf16>
      %108 = arith.truncf %105 : vector<36x128xf32> to vector<36x128xbf16>
      %cst_101 = arith.constant dense<0.000000e+00> : vector<36x128xf32>
      %109 = tpu.matmul %108, %107, %cst_101 {dimension_numbers = #tpu.dot_dimension_numbers<[1], [0], [0], [1], [0, 0, 1, 1], [], []>} : vector<36x128xbf16>, vector<128x128xbf16>, vector<36x128xf32> -> vector<36x128xf32>
      %110 = arith.addf %99, %109 : vector<36x128xf32>
      %c2_i32_102 = arith.constant 2 : i32
      %111 = arith.muli %c2_i32_102, %23 : i32
      %c2_i32_103 = arith.constant 2 : i32
      %112 = arith.addi %111, %c2_i32_103 : i32
      %c18_i32_104 = arith.constant 18 : i32
      %113 = arith.muli %112, %c18_i32_104 : i32
      %c2_i32_105 = arith.constant 2 : i32
      %114 = arith.addi %113, %c2_i32_105 : i32
      %115 = arith.index_cast %114 : i32 to index
      %c0_106 = arith.constant 0 : index
      %116 = vector.load %arg9[%115, %c0_106] : memref<342x128xf32, #tpu.memory_space<vmem>>, vector<36x128xf32>
      %c8_107 = arith.constant 8 : index
      %c0_108 = arith.constant 0 : index
      %c0_109 = arith.constant 0 : index
      %117 = vector.load %arg4[%c8_107, %c0_108, %c0_109] : memref<9x128x128xbf16, #tpu.memory_space<vmem>>, vector<1x128x128xbf16>
      %118 = vector.shape_cast %117 : vector<1x128x128xbf16> to vector<128x128xbf16>
      %119 = arith.truncf %116 : vector<36x128xf32> to vector<36x128xbf16>
      %cst_110 = arith.constant dense<0.000000e+00> : vector<36x128xf32>
      %120 = tpu.matmul %119, %118, %cst_110 {dimension_numbers = #tpu.dot_dimension_numbers<[1], [0], [0], [1], [0, 0, 1, 1], [], []>} : vector<36x128xbf16>, vector<128x128xbf16>, vector<36x128xf32> -> vector<36x128xf32>
      %121 = arith.addf %110, %120 : vector<36x128xf32>
      %122 = vector.broadcast %14 : vector<1x128xf32> to vector<36x128xf32>
      %123 = arith.addf %121, %122 : vector<36x128xf32>
      %cst_111 = arith.constant 0.000000e+00 : f32
      %124 = vector.broadcast %cst_111 : f32 to vector<36x128xf32>
      %125 = arith.maximumf %123, %124 : vector<36x128xf32>
      %126 = vector.broadcast %15 : vector<1x128xf32> to vector<36x128xf32>
      %127 = arith.mulf %125, %126 : vector<36x128xf32>
      %128 = vector.broadcast %16 : vector<1x128xf32> to vector<36x128xf32>
      %129 = arith.addf %127, %128 : vector<36x128xf32>
      %130 = vector.extract_strided_slice %129 {offsets = [0, 0], sizes = [18, 128], strides = [1, 1]} : vector<36x128xf32> to vector<18x128xf32>
      %131 = vector.extract_strided_slice %129 {offsets = [18, 0], sizes = [18, 128], strides = [1, 1]} : vector<36x128xf32> to vector<18x128xf32>
      %132 = arith.maximumf %130, %131 : vector<18x128xf32>
      %133 = vector.extract_strided_slice %132 {offsets = [0, 0], sizes = [16, 128], strides = [1, 1]} : vector<18x128xf32> to vector<16x128xf32>
      %134 = vector.shape_cast %133 : vector<16x128xf32> to vector<8x2x128xf32>
      %cst_112 = arith.constant dense<0xFF800000> : vector<8x128xf32>
      %135 = vector.multi_reduction <maximumf>, %134, %cst_112 [1] : vector<8x2x128xf32> to vector<8x128xf32>
      %c1_i32_113 = arith.constant 1 : i32
      %136 = arith.addi %23, %c1_i32_113 : i32
      %c10_i32 = arith.constant 10 : i32
      %137 = arith.muli %136, %c10_i32 : i32
      %c1_i32_114 = arith.constant 1 : i32
      %138 = arith.addi %137, %c1_i32_114 : i32
      %139 = arith.index_cast %138 : i32 to index
      %c0_115 = arith.constant 0 : index
      %140 = vector.load %arg10[%139, %c0_115] : memref<110x128xf32, #tpu.memory_space<vmem>>, vector<8x128xf32>
      tpu.vector_store %arg10[%139, %c0_115], %135 {strides = array<i32>} : memref<110x128xf32, #tpu.memory_space<vmem>>, vector<8x128xf32>,
    }
    %c8_i32_23 = arith.constant 8 : i32
    %c9 = arith.constant 9 : index
    %c0_24 = arith.constant 0 : index
    %18 = vector.load %arg6[%c9, %c0_24] : memref<12x128xf32, #tpu.memory_space<vmem>>, vector<1x128xf32>
    %c10 = arith.constant 10 : index
    %c0_25 = arith.constant 0 : index
    %19 = vector.load %arg6[%c10, %c0_25] : memref<12x128xf32, #tpu.memory_space<vmem>>, vector<1x128xf32>
    %c11 = arith.constant 11 : index
    %c0_26 = arith.constant 0 : index
    %20 = vector.load %arg6[%c11, %c0_26] : memref<12x128xf32, #tpu.memory_space<vmem>>, vector<1x128xf32>
    %c0_i32_27 = arith.constant 0 : i32
    %c4_i32 = arith.constant 4 : i32
    %21 = arith.addi %c0_i32_27, %c4_i32 : i32
    %c1_i32_28 = arith.constant 1 : i32
    scf.for %arg11 = %c0_i32_27 to %21 step %c1_i32_28  : i32 {
      %c1_i32_30 = arith.constant 1 : i32
      %22 = arith.muli %arg11, %c1_i32_30 : i32
      %c0_i32_31 = arith.constant 0 : i32
      %23 = arith.addi %c0_i32_31, %22 : i32
      %c2_i32 = arith.constant 2 : i32
      %24 = arith.muli %c2_i32, %23 : i32
      %c0_i32_32 = arith.constant 0 : i32
      %25 = arith.addi %24, %c0_i32_32 : i32
      %c10_i32 = arith.constant 10 : i32
      %26 = arith.muli %25, %c10_i32 : i32
      %c0_i32_33 = arith.constant 0 : i32
      %27 = arith.addi %26, %c0_i32_33 : i32
      %28 = arith.index_cast %27 : i32 to index
      %c0_34 = arith.constant 0 : index
      %29 = vector.load %arg10[%28, %c0_34] : memref<110x128xf32, #tpu.memory_space<vmem>>, vector<20x128xf32>
      %c0_35 = arith.constant 0 : index
      %c0_36 = arith.constant 0 : index
      %c0_37 = arith.constant 0 : index
      %30 = vector.load %arg5[%c0_35, %c0_36, %c0_37] : memref<9x128x128xbf16, #tpu.memory_space<vmem>>, vector<1x128x128xbf16>
      %31 = vector.shape_cast %30 : vector<1x128x128xbf16> to vector<128x128xbf16>
      %32 = arith.truncf %29 : vector<20x128xf32> to vector<20x128xbf16>
      %cst_38 = arith.constant dense<0.000000e+00> : vector<20x128xf32>
      %33 = tpu.matmul %32, %31, %cst_38 {dimension_numbers = #tpu.dot_dimension_numbers<[1], [0], [0], [1], [0, 0, 1, 1], [], []>} : vector<20x128xbf16>, vector<128x128xbf16>, vector<20x128xf32> -> vector<20x128xf32>
      %c2_i32_39 = arith.constant 2 : i32
      %34 = arith.muli %c2_i32_39, %23 : i32
      %c0_i32_40 = arith.constant 0 : i32
      %35 = arith.addi %34, %c0_i32_40 : i32
      %c10_i32_41 = arith.constant 10 : i32
      %36 = arith.muli %35, %c10_i32_41 : i32
      %c1_i32_42 = arith.constant 1 : i32
      %37 = arith.addi %36, %c1_i32_42 : i32
      %38 = arith.index_cast %37 : i32 to index
      %c0_43 = arith.constant 0 : index
      %39 = vector.load %arg10[%38, %c0_43] : memref<110x128xf32, #tpu.memory_space<vmem>>, vector<20x128xf32>
      %c1_44 = arith.constant 1 : index
      %c0_45 = arith.constant 0 : index
      %c0_46 = arith.constant 0 : index
      %40 = vector.load %arg5[%c1_44, %c0_45, %c0_46] : memref<9x128x128xbf16, #tpu.memory_space<vmem>>, vector<1x128x128xbf16>
      %41 = vector.shape_cast %40 : vector<1x128x128xbf16> to vector<128x128xbf16>
      %42 = arith.truncf %39 : vector<20x128xf32> to vector<20x128xbf16>
      %cst_47 = arith.constant dense<0.000000e+00> : vector<20x128xf32>
      %43 = tpu.matmul %42, %41, %cst_47 {dimension_numbers = #tpu.dot_dimension_numbers<[1], [0], [0], [1], [0, 0, 1, 1], [], []>} : vector<20x128xbf16>, vector<128x128xbf16>, vector<20x128xf32> -> vector<20x128xf32>
      %44 = arith.addf %33, %43 : vector<20x128xf32>
      %c2_i32_48 = arith.constant 2 : i32
      %45 = arith.muli %c2_i32_48, %23 : i32
      %c0_i32_49 = arith.constant 0 : i32
      %46 = arith.addi %45, %c0_i32_49 : i32
      %c10_i32_50 = arith.constant 10 : i32
      %47 = arith.muli %46, %c10_i32_50 : i32
      %c2_i32_51 = arith.constant 2 : i32
      %48 = arith.addi %47, %c2_i32_51 : i32
      %49 = arith.index_cast %48 : i32 to index
      %c0_52 = arith.constant 0 : index
      %50 = vector.load %arg10[%49, %c0_52] : memref<110x128xf32, #tpu.memory_space<vmem>>, vector<20x128xf32>
      %c2_53 = arith.constant 2 : index
      %c0_54 = arith.constant 0 : index
      %c0_55 = arith.constant 0 : index
      %51 = vector.load %arg5[%c2_53, %c0_54, %c0_55] : memref<9x128x128xbf16, #tpu.memory_space<vmem>>, vector<1x128x128xbf16>
      %52 = vector.shape_cast %51 : vector<1x128x128xbf16> to vector<128x128xbf16>
      %53 = arith.truncf %50 : vector<20x128xf32> to vector<20x128xbf16>
      %cst_56 = arith.constant dense<0.000000e+00> : vector<20x128xf32>
      %54 = tpu.matmul %53, %52, %cst_56 {dimension_numbers = #tpu.dot_dimension_numbers<[1], [0], [0], [1], [0, 0, 1, 1], [], []>} : vector<20x128xbf16>, vector<128x128xbf16>, vector<20x128xf32> -> vector<20x128xf32>
      %55 = arith.addf %44, %54 : vector<20x128xf32>
      %c2_i32_57 = arith.constant 2 : i32
      %56 = arith.muli %c2_i32_57, %23 : i32
      %c1_i32_58 = arith.constant 1 : i32
      %57 = arith.addi %56, %c1_i32_58 : i32
      %c10_i32_59 = arith.constant 10 : i32
      %58 = arith.muli %57, %c10_i32_59 : i32
      %c0_i32_60 = arith.constant 0 : i32
      %59 = arith.addi %58, %c0_i32_60 : i32
      %60 = arith.index_cast %59 : i32 to index
      %c0_61 = arith.constant 0 : index
      %61 = vector.load %arg10[%60, %c0_61] : memref<110x128xf32, #tpu.memory_space<vmem>>, vector<20x128xf32>
      %c3_62 = arith.constant 3 : index
      %c0_63 = arith.constant 0 : index
      %c0_64 = arith.constant 0 : index
      %62 = vector.load %arg5[%c3_62, %c0_63, %c0_64] : memref<9x128x128xbf16, #tpu.memory_space<vmem>>, vector<1x128x128xbf16>
      %63 = vector.shape_cast %62 : vector<1x128x128xbf16> to vector<128x128xbf16>
      %64 = arith.truncf %61 : vector<20x128xf32> to vector<20x128xbf16>
      %cst_65 = arith.constant dense<0.000000e+00> : vector<20x128xf32>
      %65 = tpu.matmul %64, %63, %cst_65 {dimension_numbers = #tpu.dot_dimension_numbers<[1], [0], [0], [1], [0, 0, 1, 1], [], []>} : vector<20x128xbf16>, vector<128x128xbf16>, vector<20x128xf32> -> vector<20x128xf32>
      %66 = arith.addf %55, %65 : vector<20x128xf32>
      %c2_i32_66 = arith.constant 2 : i32
      %67 = arith.muli %c2_i32_66, %23 : i32
      %c1_i32_67 = arith.constant 1 : i32
      %68 = arith.addi %67, %c1_i32_67 : i32
      %c10_i32_68 = arith.constant 10 : i32
      %69 = arith.muli %68, %c10_i32_68 : i32
      %c1_i32_69 = arith.constant 1 : i32
      %70 = arith.addi %69, %c1_i32_69 : i32
      %71 = arith.index_cast %70 : i32 to index
      %c0_70 = arith.constant 0 : index
      %72 = vector.load %arg10[%71, %c0_70] : memref<110x128xf32, #tpu.memory_space<vmem>>, vector<20x128xf32>
      %c4_71 = arith.constant 4 : index
      %c0_72 = arith.constant 0 : index
      %c0_73 = arith.constant 0 : index
      %73 = vector.load %arg5[%c4_71, %c0_72, %c0_73] : memref<9x128x128xbf16, #tpu.memory_space<vmem>>, vector<1x128x128xbf16>
      %74 = vector.shape_cast %73 : vector<1x128x128xbf16> to vector<128x128xbf16>
      %75 = arith.truncf %72 : vector<20x128xf32> to vector<20x128xbf16>
      %cst_74 = arith.constant dense<0.000000e+00> : vector<20x128xf32>
      %76 = tpu.matmul %75, %74, %cst_74 {dimension_numbers = #tpu.dot_dimension_numbers<[1], [0], [0], [1], [0, 0, 1, 1], [], []>} : vector<20x128xbf16>, vector<128x128xbf16>, vector<20x128xf32> -> vector<20x128xf32>
      %77 = arith.addf %66, %76 : vector<20x128xf32>
      %c2_i32_75 = arith.constant 2 : i32
      %78 = arith.muli %c2_i32_75, %23 : i32
      %c1_i32_76 = arith.constant 1 : i32
      %79 = arith.addi %78, %c1_i32_76 : i32
      %c10_i32_77 = arith.constant 10 : i32
      %80 = arith.muli %79, %c10_i32_77 : i32
      %c2_i32_78 = arith.constant 2 : i32
      %81 = arith.addi %80, %c2_i32_78 : i32
      %82 = arith.index_cast %81 : i32 to index
      %c0_79 = arith.constant 0 : index
      %83 = vector.load %arg10[%82, %c0_79] : memref<110x128xf32, #tpu.memory_space<vmem>>, vector<20x128xf32>
      %c5_80 = arith.constant 5 : index
      %c0_81 = arith.constant 0 : index
      %c0_82 = arith.constant 0 : index
      %84 = vector.load %arg5[%c5_80, %c0_81, %c0_82] : memref<9x128x128xbf16, #tpu.memory_space<vmem>>, vector<1x128x128xbf16>
      %85 = vector.shape_cast %84 : vector<1x128x128xbf16> to vector<128x128xbf16>
      %86 = arith.truncf %83 : vector<20x128xf32> to vector<20x128xbf16>
      %cst_83 = arith.constant dense<0.000000e+00> : vector<20x128xf32>
      %87 = tpu.matmul %86, %85, %cst_83 {dimension_numbers = #tpu.dot_dimension_numbers<[1], [0], [0], [1], [0, 0, 1, 1], [], []>} : vector<20x128xbf16>, vector<128x128xbf16>, vector<20x128xf32> -> vector<20x128xf32>
      %88 = arith.addf %77, %87 : vector<20x128xf32>
      %c2_i32_84 = arith.constant 2 : i32
      %89 = arith.muli %c2_i32_84, %23 : i32
      %c2_i32_85 = arith.constant 2 : i32
      %90 = arith.addi %89, %c2_i32_85 : i32
      %c10_i32_86 = arith.constant 10 : i32
      %91 = arith.muli %90, %c10_i32_86 : i32
      %c0_i32_87 = arith.constant 0 : i32
      %92 = arith.addi %91, %c0_i32_87 : i32
      %93 = arith.index_cast %92 : i32 to index
      %c0_88 = arith.constant 0 : index
      %94 = vector.load %arg10[%93, %c0_88] : memref<110x128xf32, #tpu.memory_space<vmem>>, vector<20x128xf32>
      %c6_89 = arith.constant 6 : index
      %c0_90 = arith.constant 0 : index
      %c0_91 = arith.constant 0 : index
      %95 = vector.load %arg5[%c6_89, %c0_90, %c0_91] : memref<9x128x128xbf16, #tpu.memory_space<vmem>>, vector<1x128x128xbf16>
      %96 = vector.shape_cast %95 : vector<1x128x128xbf16> to vector<128x128xbf16>
      %97 = arith.truncf %94 : vector<20x128xf32> to vector<20x128xbf16>
      %cst_92 = arith.constant dense<0.000000e+00> : vector<20x128xf32>
      %98 = tpu.matmul %97, %96, %cst_92 {dimension_numbers = #tpu.dot_dimension_numbers<[1], [0], [0], [1], [0, 0, 1, 1], [], []>} : vector<20x128xbf16>, vector<128x128xbf16>, vector<20x128xf32> -> vector<20x128xf32>
      %99 = arith.addf %88, %98 : vector<20x128xf32>
      %c2_i32_93 = arith.constant 2 : i32
      %100 = arith.muli %c2_i32_93, %23 : i32
      %c2_i32_94 = arith.constant 2 : i32
      %101 = arith.addi %100, %c2_i32_94 : i32
      %c10_i32_95 = arith.constant 10 : i32
      %102 = arith.muli %101, %c10_i32_95 : i32
      %c1_i32_96 = arith.constant 1 : i32
      %103 = arith.addi %102, %c1_i32_96 : i32
      %104 = arith.index_cast %103 : i32 to index
      %c0_97 = arith.constant 0 : index
      %105 = vector.load %arg10[%104, %c0_97] : memref<110x128xf32, #tpu.memory_space<vmem>>, vector<20x128xf32>
      %c7_98 = arith.constant 7 : index
      %c0_99 = arith.constant 0 : index
      %c0_100 = arith.constant 0 : index
      %106 = vector.load %arg5[%c7_98, %c0_99, %c0_100] : memref<9x128x128xbf16, #tpu.memory_space<vmem>>, vector<1x128x128xbf16>
      %107 = vector.shape_cast %106 : vector<1x128x128xbf16> to vector<128x128xbf16>
      %108 = arith.truncf %105 : vector<20x128xf32> to vector<20x128xbf16>
      %cst_101 = arith.constant dense<0.000000e+00> : vector<20x128xf32>
      %109 = tpu.matmul %108, %107, %cst_101 {dimension_numbers = #tpu.dot_dimension_numbers<[1], [0], [0], [1], [0, 0, 1, 1], [], []>} : vector<20x128xbf16>, vector<128x128xbf16>, vector<20x128xf32> -> vector<20x128xf32>
      %110 = arith.addf %99, %109 : vector<20x128xf32>
      %c2_i32_102 = arith.constant 2 : i32
      %111 = arith.muli %c2_i32_102, %23 : i32
      %c2_i32_103 = arith.constant 2 : i32
      %112 = arith.addi %111, %c2_i32_103 : i32
      %c10_i32_104 = arith.constant 10 : i32
      %113 = arith.muli %112, %c10_i32_104 : i32
      %c2_i32_105 = arith.constant 2 : i32
      %114 = arith.addi %113, %c2_i32_105 : i32
      %115 = arith.index_cast %114 : i32 to index
      %c0_106 = arith.constant 0 : index
      %116 = vector.load %arg10[%115, %c0_106] : memref<110x128xf32, #tpu.memory_space<vmem>>, vector<20x128xf32>
      %c8_107 = arith.constant 8 : index
      %c0_108 = arith.constant 0 : index
      %c0_109 = arith.constant 0 : index
      %117 = vector.load %arg5[%c8_107, %c0_108, %c0_109] : memref<9x128x128xbf16, #tpu.memory_space<vmem>>, vector<1x128x128xbf16>
      %118 = vector.shape_cast %117 : vector<1x128x128xbf16> to vector<128x128xbf16>
      %119 = arith.truncf %116 : vector<20x128xf32> to vector<20x128xbf16>
      %cst_110 = arith.constant dense<0.000000e+00> : vector<20x128xf32>
      %120 = tpu.matmul %119, %118, %cst_110 {dimension_numbers = #tpu.dot_dimension_numbers<[1], [0], [0], [1], [0, 0, 1, 1], [], []>} : vector<20x128xbf16>, vector<128x128xbf16>, vector<20x128xf32> -> vector<20x128xf32>
      %121 = arith.addf %110, %120 : vector<20x128xf32>
      %122 = vector.broadcast %18 : vector<1x128xf32> to vector<20x128xf32>
      %123 = arith.addf %121, %122 : vector<20x128xf32>
      %cst_111 = arith.constant 0.000000e+00 : f32
      %124 = vector.broadcast %cst_111 : f32 to vector<20x128xf32>
      %125 = arith.maximumf %123, %124 : vector<20x128xf32>
      %126 = vector.broadcast %19 : vector<1x128xf32> to vector<20x128xf32>
      %127 = arith.mulf %125, %126 : vector<20x128xf32>
      %128 = vector.broadcast %20 : vector<1x128xf32> to vector<20x128xf32>
      %129 = arith.addf %127, %128 : vector<20x128xf32>
      %130 = vector.extract_strided_slice %129 {offsets = [0, 0], sizes = [10, 128], strides = [1, 1]} : vector<20x128xf32> to vector<10x128xf32>
      %131 = vector.extract_strided_slice %129 {offsets = [10, 0], sizes = [10, 128], strides = [1, 1]} : vector<20x128xf32> to vector<10x128xf32>
      %132 = arith.maximumf %130, %131 : vector<10x128xf32>
      %133 = vector.extract_strided_slice %132 {offsets = [0, 0], sizes = [8, 128], strides = [1, 1]} : vector<10x128xf32> to vector<8x128xf32>
      %134 = vector.shape_cast %133 : vector<8x128xf32> to vector<4x2x128xf32>
      %cst_112 = arith.constant dense<0xFF800000> : vector<4x128xf32>
      %135 = vector.multi_reduction <maximumf>, %134, %cst_112 [1] : vector<4x2x128xf32> to vector<4x128xf32>
      %c4_i32_113 = arith.constant 4 : i32
      %136 = arith.muli %23, %c4_i32_113 : i32
      %c0_114 = arith.constant 0 : index
      %137 = arith.index_cast %136 : i32 to index
      %c0_115 = arith.constant 0 : index
      %138 = vector.load %arg7[%c0_114, %137, %c0_115] : memref<1x16x128xf32, #tpu.memory_space<vmem>>, vector<1x4x128xf32>
      %139 = vector.shape_cast %138 : vector<1x4x128xf32> to vector<4x128xf32>
      %140 = vector.shape_cast %135 : vector<4x128xf32> to vector<1x4x128xf32>
      tpu.vector_store %arg7[%c0_114, %137, %c0_115], %140 {strides = array<i32>} : memref<1x16x128xf32, #tpu.memory_space<vmem>>, vector<1x4x128xf32>,
    }
    %c4_i32_29 = arith.constant 4 : i32
    return
  }
  func.func @transform_0(%arg0: i32) -> (i32, i32, i32) {
    %c0_i32 = arith.constant 0 : i32
    %c0_i32_0 = arith.constant 0 : i32
    %c0_i32_1 = arith.constant 0 : i32
    return %arg0, %c0_i32, %c0_i32_0 : i32, i32, i32
  }
  func.func @transform_1(%arg0: i32) -> (i32, i32, i32) {
    %c0_i32 = arith.constant 0 : i32
    %c0_i32_0 = arith.constant 0 : i32
    %c0_i32_1 = arith.constant 0 : i32
    %c0_i32_2 = arith.constant 0 : i32
    return %c0_i32, %c0_i32_0, %c0_i32_1 : i32, i32, i32
  }
  func.func @transform_2(%arg0: i32) -> (i32, i32, i32) {
    %c0_i32 = arith.constant 0 : i32
    %c0_i32_0 = arith.constant 0 : i32
    %c0_i32_1 = arith.constant 0 : i32
    %c0_i32_2 = arith.constant 0 : i32
    return %c0_i32, %c0_i32_0, %c0_i32_1 : i32, i32, i32
  }
  func.func @transform_3(%arg0: i32) -> (i32, i32, i32) {
    %c0_i32 = arith.constant 0 : i32
    %c0_i32_0 = arith.constant 0 : i32
    %c0_i32_1 = arith.constant 0 : i32
    %c0_i32_2 = arith.constant 0 : i32
    return %c0_i32, %c0_i32_0, %c0_i32_1 : i32, i32, i32
  }
  func.func @transform_4(%arg0: i32) -> (i32, i32, i32) {
    %c0_i32 = arith.constant 0 : i32
    %c0_i32_0 = arith.constant 0 : i32
    %c0_i32_1 = arith.constant 0 : i32
    %c0_i32_2 = arith.constant 0 : i32
    return %c0_i32, %c0_i32_0, %c0_i32_1 : i32, i32, i32
  }
  func.func @transform_5(%arg0: i32) -> (i32, i32) {
    %c0_i32 = arith.constant 0 : i32
    %c0_i32_0 = arith.constant 0 : i32
    %c0_i32_1 = arith.constant 0 : i32
    return %c0_i32, %c0_i32_0 : i32, i32
  }
  func.func @transform_6(%arg0: i32) -> (i32, i32, i32) {
    %c0_i32 = arith.constant 0 : i32
    %c0_i32_0 = arith.constant 0 : i32
    %c0_i32_1 = arith.constant 0 : i32
    return %arg0, %c0_i32, %c0_i32_0 : i32, i32, i32
  }
}

module attributes {stable_mosaic.version = 11 : i64} {
  func.func @_dense_head_kernel(%arg0: memref<8x1024xbf16, #tpu.memory_space<vmem>>, %arg1: memref<1024x512xbf16, #tpu.memory_space<vmem>>, %arg2: memref<3x512xf32, #tpu.memory_space<vmem>>, %arg3: memref<512x128xbf16, #tpu.memory_space<vmem>>, %arg4: memref<3x128xf32, #tpu.memory_space<vmem>>, %arg5: memref<128x32xbf16, #tpu.memory_space<vmem>>, %arg6: memref<3x32xf32, #tpu.memory_space<vmem>>, %arg7: memref<32x7xf32, #tpu.memory_space<vmem>>, %arg8: memref<1x7xf32, #tpu.memory_space<vmem>>, %arg9: memref<8x7xf32, #tpu.memory_space<vmem>>) attributes {dimension_semantics = [], scalar_prefetch = 0 : i64, scratch_operands = 0 : i64, tpu.core_type = #tpu.core_type<tc>} {
    %c0 = arith.constant 0 : index
    %c0_0 = arith.constant 0 : index
    %0 = vector.load %arg0[%c0, %c0_0] : memref<8x1024xbf16, #tpu.memory_space<vmem>>, vector<8x1024xbf16>
    %c0_1 = arith.constant 0 : index
    %c0_2 = arith.constant 0 : index
    %1 = vector.load %arg1[%c0_1, %c0_2] : memref<1024x512xbf16, #tpu.memory_space<vmem>>, vector<1024x512xbf16>
    %cst = arith.constant dense<0.000000e+00> : vector<8x512xf32>
    %2 = tpu.matmul %0, %1, %cst {dimension_numbers = #tpu.dot_dimension_numbers<[1], [0], [0], [1], [0, 0, 1, 1], [], []>} : vector<8x1024xbf16>, vector<1024x512xbf16>, vector<8x512xf32> -> vector<8x512xf32>
    %c0_3 = arith.constant 0 : index
    %c0_4 = arith.constant 0 : index
    %3 = vector.load %arg2[%c0_3, %c0_4] : memref<3x512xf32, #tpu.memory_space<vmem>>, vector<1x512xf32>
    %c1 = arith.constant 1 : index
    %c0_5 = arith.constant 0 : index
    %4 = vector.load %arg2[%c1, %c0_5] : memref<3x512xf32, #tpu.memory_space<vmem>>, vector<1x512xf32>
    %c2 = arith.constant 2 : index
    %c0_6 = arith.constant 0 : index
    %5 = vector.load %arg2[%c2, %c0_6] : memref<3x512xf32, #tpu.memory_space<vmem>>, vector<1x512xf32>
    %6 = vector.broadcast %3 : vector<1x512xf32> to vector<8x512xf32>
    %7 = arith.addf %2, %6 : vector<8x512xf32>
    %cst_7 = arith.constant 0.000000e+00 : f32
    %8 = vector.broadcast %cst_7 : f32 to vector<8x512xf32>
    %9 = arith.maximumf %7, %8 : vector<8x512xf32>
    %10 = vector.broadcast %4 : vector<1x512xf32> to vector<8x512xf32>
    %11 = arith.mulf %9, %10 : vector<8x512xf32>
    %12 = vector.broadcast %5 : vector<1x512xf32> to vector<8x512xf32>
    %13 = arith.addf %11, %12 : vector<8x512xf32>
    %14 = arith.truncf %13 : vector<8x512xf32> to vector<8x512xbf16>
    %c0_8 = arith.constant 0 : index
    %c0_9 = arith.constant 0 : index
    %15 = vector.load %arg3[%c0_8, %c0_9] : memref<512x128xbf16, #tpu.memory_space<vmem>>, vector<512x128xbf16>
    %cst_10 = arith.constant dense<0.000000e+00> : vector<8x128xf32>
    %16 = tpu.matmul %14, %15, %cst_10 {dimension_numbers = #tpu.dot_dimension_numbers<[1], [0], [0], [1], [0, 0, 1, 1], [], []>} : vector<8x512xbf16>, vector<512x128xbf16>, vector<8x128xf32> -> vector<8x128xf32>
    %c0_11 = arith.constant 0 : index
    %c0_12 = arith.constant 0 : index
    %17 = vector.load %arg4[%c0_11, %c0_12] : memref<3x128xf32, #tpu.memory_space<vmem>>, vector<1x128xf32>
    %c1_13 = arith.constant 1 : index
    %c0_14 = arith.constant 0 : index
    %18 = vector.load %arg4[%c1_13, %c0_14] : memref<3x128xf32, #tpu.memory_space<vmem>>, vector<1x128xf32>
    %c2_15 = arith.constant 2 : index
    %c0_16 = arith.constant 0 : index
    %19 = vector.load %arg4[%c2_15, %c0_16] : memref<3x128xf32, #tpu.memory_space<vmem>>, vector<1x128xf32>
    %20 = vector.broadcast %17 : vector<1x128xf32> to vector<8x128xf32>
    %21 = arith.addf %16, %20 : vector<8x128xf32>
    %cst_17 = arith.constant 0.000000e+00 : f32
    %22 = vector.broadcast %cst_17 : f32 to vector<8x128xf32>
    %23 = arith.maximumf %21, %22 : vector<8x128xf32>
    %24 = vector.broadcast %18 : vector<1x128xf32> to vector<8x128xf32>
    %25 = arith.mulf %23, %24 : vector<8x128xf32>
    %26 = vector.broadcast %19 : vector<1x128xf32> to vector<8x128xf32>
    %27 = arith.addf %25, %26 : vector<8x128xf32>
    %28 = arith.truncf %27 : vector<8x128xf32> to vector<8x128xbf16>
    %c0_18 = arith.constant 0 : index
    %c0_19 = arith.constant 0 : index
    %29 = vector.load %arg5[%c0_18, %c0_19] : memref<128x32xbf16, #tpu.memory_space<vmem>>, vector<128x32xbf16>
    %cst_20 = arith.constant dense<0.000000e+00> : vector<8x32xf32>
    %30 = tpu.matmul %28, %29, %cst_20 {dimension_numbers = #tpu.dot_dimension_numbers<[1], [0], [0], [1], [0, 0, 1, 1], [], []>} : vector<8x128xbf16>, vector<128x32xbf16>, vector<8x32xf32> -> vector<8x32xf32>
    %c0_21 = arith.constant 0 : index
    %c0_22 = arith.constant 0 : index
    %31 = vector.load %arg6[%c0_21, %c0_22] : memref<3x32xf32, #tpu.memory_space<vmem>>, vector<1x32xf32>
    %c1_23 = arith.constant 1 : index
    %c0_24 = arith.constant 0 : index
    %32 = vector.load %arg6[%c1_23, %c0_24] : memref<3x32xf32, #tpu.memory_space<vmem>>, vector<1x32xf32>
    %c2_25 = arith.constant 2 : index
    %c0_26 = arith.constant 0 : index
    %33 = vector.load %arg6[%c2_25, %c0_26] : memref<3x32xf32, #tpu.memory_space<vmem>>, vector<1x32xf32>
    %34 = vector.broadcast %31 : vector<1x32xf32> to vector<8x32xf32>
    %35 = arith.addf %30, %34 : vector<8x32xf32>
    %cst_27 = arith.constant 0.000000e+00 : f32
    %36 = vector.broadcast %cst_27 : f32 to vector<8x32xf32>
    %37 = arith.maximumf %35, %36 : vector<8x32xf32>
    %38 = vector.broadcast %32 : vector<1x32xf32> to vector<8x32xf32>
    %39 = arith.mulf %37, %38 : vector<8x32xf32>
    %40 = vector.broadcast %33 : vector<1x32xf32> to vector<8x32xf32>
    %41 = arith.addf %39, %40 : vector<8x32xf32>
    %c0_28 = arith.constant 0 : index
    %c0_29 = arith.constant 0 : index
    %42 = vector.load %arg7[%c0_28, %c0_29] : memref<32x7xf32, #tpu.memory_space<vmem>>, vector<32x7xf32>
    %cst_30 = arith.constant dense<0.000000e+00> : vector<8x7xf32>
    %43 = tpu.matmul %41, %42, %cst_30 {dimension_numbers = #tpu.dot_dimension_numbers<[1], [0], [0], [1], [0, 0, 1, 1], [], []>} : vector<8x32xf32>, vector<32x7xf32>, vector<8x7xf32> -> vector<8x7xf32>
    %c0_31 = arith.constant 0 : index
    %c0_32 = arith.constant 0 : index
    %44 = vector.load %arg8[%c0_31, %c0_32] : memref<1x7xf32, #tpu.memory_space<vmem>>, vector<1x7xf32>
    %45 = vector.broadcast %44 : vector<1x7xf32> to vector<8x7xf32>
    %46 = arith.addf %43, %45 : vector<8x7xf32>
    %cst_33 = arith.constant dense<0xFF800000> : vector<8xf32>
    %47 = vector.multi_reduction <maximumf>, %46, %cst_33 [1] : vector<8x7xf32> to vector<8xf32>
    %48 = vector.shape_cast %47 : vector<8xf32> to vector<8x1xf32>
    %49 = vector.broadcast %48 : vector<8x1xf32> to vector<8x7xf32>
    %50 = arith.subf %46, %49 : vector<8x7xf32>
    %51 = math.exp %50 : vector<8x7xf32>
    %cst_34 = arith.constant dense<0.000000e+00> : vector<8xf32>
    %52 = vector.multi_reduction <add>, %51, %cst_34 [1] : vector<8x7xf32> to vector<8xf32>
    %53 = vector.shape_cast %52 : vector<8xf32> to vector<8x1xf32>
    %54 = vector.broadcast %53 : vector<8x1xf32> to vector<8x7xf32>
    %55 = arith.divf %51, %54 : vector<8x7xf32>
    %c0_35 = arith.constant 0 : index
    %c0_36 = arith.constant 0 : index
    %56 = vector.load %arg9[%c0_35, %c0_36] : memref<8x7xf32, #tpu.memory_space<vmem>>, vector<8x7xf32>
    tpu.vector_store %arg9[%c0_35, %c0_36], %55 {strides = array<i32>} : memref<8x7xf32, #tpu.memory_space<vmem>>, vector<8x7xf32>,
    return
  }
}

</mosaic_0001>

<bundles_post_ra>
// kernel: cnn_model_forward.3
= control target key start
LH: loop header
LB: loop body
LE: loop exit
PB: predicated region body
PF: predicated region fallthrough
CT: control target
= control target key end

     0   :  { %vm3469_vm0 = vmmov 0   ;;  %vm2501_vm1 = vcmask 261120   ;;  %vm2575_vm2 = vcmask 56320   ;;  %s4497_s1 = inlined_call_operand.vmem [shape: bf16[1024,512], index: 1, kind: input, shape index: {}]   ;;  %s4498_s0 = inlined_call_operand.vmem [shape: bf16[8,1024], index: 0, kind: input, shape index: {}]   ;;  %s4499_s3 = inlined_call_operand.vmem [shape: bf16[512,128], index: 3, kind: input, shape index: {}]   ;;  %s4500_s5 = inlined_call_operand.vmem [shape: bf16[128,32], index: 5, kind: input, shape index: {}]   ;;  %s4501_s2 = inlined_call_operand.vmem [shape: f32[3,512], index: 2, kind: input, shape index: {}]   ;;  %s4502_s4 = inlined_call_operand.vmem [shape: f32[3,128], index: 4, kind: input, shape index: {}]   ;;  %s4503_s7 = inlined_call_operand.vmem [shape: f32[32,7], index: 7, kind: input, shape index: {}]   ;;  %s4504_s6 = inlined_call_operand.vmem [shape: f32[3,32], index: 6, kind: input, shape index: {}]   ;;  %s4505_s8 = inlined_call_operand.vmem [shape: f32[1,7], index: 8, kind: input, shape index: {}]   ;;  %s4506_s9 = inlined_call_operand.vmem [shape: f32[8,7], index: 9, kind: output, shape index: {}]  }
   0x1   :  { %v3032_v0 = vld [vmem:[%s4497_s1 + $0x4] ss:$16 sps:$4 sm:$0xff]   ;;  %v3034_v1 = vld [vmem:[%s4497_s1 + $0xc] ss:$16 sps:$4 sm:$0xff]   ;;  %v3036_v2 = vld [vmem:[%s4497_s1] ss:$16 sps:$4 sm:$0xff]  }
   0x2   :  { %1627 = vmatprep.subr.bf16.mxu0 %v3032_v0  ;;  %v3037_v3 = vld [vmem:[%s4497_s1 + $0x8] ss:$16 sps:$4 sm:$0xff]   ;;  %1791 = vmatprep.subr.bf16.mxu1 %v3034_v1  ;;  %v3038_v4 = vld [vmem:[%s4497_s1 + $0x24] ss:$16 sps:$4 sm:$0xff]   ;;  %v3040_v5 = vld [vmem:[%s4497_s1 + $0x2c] ss:$16 sps:$4 sm:$0xff]  }
   0x3   :  { %1628 = vmatpush1.bf16.msra.mxu0 %v3036_v2  ;;  %1792 = vmatpush1.bf16.msra.mxu1 %v3037_v3  ;;  %v3042_v6 = vld [vmem:[%s4497_s1 + $0x20] ss:$16 sps:$4 sm:$0xff]   ;;  %v3043_v7 = vld [vmem:[%s4497_s1 + $0x28] ss:$16 sps:$4 sm:$0xff]   ;;  %v3044_v8 = vld [vmem:[%s4497_s1 + $0x44] ss:$16 sps:$4 sm:$0xff]  }
   0x4   :  { %1629 = vmatprep.subr.bf16.mxu0 %v3038_v4  ;;  %1793 = vmatprep.subr.bf16.mxu1 %v3040_v5  ;;  %v3046_v9 = vld [vmem:[%s4497_s1 + $0x4c] ss:$16 sps:$4 sm:$0xff]   ;;  %v3048_v10 = vld [vmem:[%s4497_s1 + $0x40] ss:$16 sps:$4 sm:$0xff]   ;;  %v3049_v11 = vld [vmem:[%s4497_s1 + $0x48] ss:$16 sps:$4 sm:$0xff]  }
   0x5   :  { %v3050_v12 = vld [vmem:[%s4497_s1 + $0x64] ss:$16 sps:$4 sm:$0xff]   ;;  %v3052_v13 = vld [vmem:[%s4497_s1 + $0x6c] ss:$16 sps:$4 sm:$0xff]   ;;  %v3054_v14 = vld [vmem:[%s4497_s1 + $0x60] ss:$16 sps:$4 sm:$0xff]  }
   0x6   :  { %v3055_v15 = vld [vmem:[%s4497_s1 + $0x68] ss:$16 sps:$4 sm:$0xff]   ;;  %v3056_v16 = vld [vmem:[%s4497_s1 + $0x84] ss:$16 sps:$4 sm:$0xff]   ;;  %v3058_v17 = vld [vmem:[%s4497_s1 + $0x8c] ss:$16 sps:$4 sm:$0xff]  }
   0x7   :  { %1630 = vmatpush1.bf16.msra.mxu0 %v3042_v6  ;;  %1794 = vmatpush1.bf16.msra.mxu1 %v3043_v7  ;;  %v3060_v18 = vld [vmem:[%s4497_s1 + $0x80] ss:$16 sps:$4 sm:$0xff]   ;;  %v3061_v19 = vld [vmem:[%s4497_s1 + $0x88] ss:$16 sps:$4 sm:$0xff]   ;;  %v3062_v20 = vld [vmem:[%s4497_s1 + $0xa4] ss:$16 sps:$4 sm:$0xff]  }
   0x8   :  { %1631 = vmatprep.subr.bf16.mxu0 %v3044_v8  ;;  %1795 = vmatprep.subr.bf16.mxu1 %v3046_v9  ;;  %v3064_v21 = vld [vmem:[%s4497_s1 + $0xac] ss:$16 sps:$4 sm:$0xff]   ;;  %v3066_v22 = vld [vmem:[%s4497_s1 + $0xa0] ss:$16 sps:$4 sm:$0xff]   ;;  %v3067_v23 = vld [vmem:[%s4497_s1 + $0xa8] ss:$16 sps:$4 sm:$0xff]  }
   0x9   :  { %v3068_v24 = vld [vmem:[%s4497_s1 + $0xc4] ss:$16 sps:$4 sm:$0xff]   ;;  %v3070_v25 = vld [vmem:[%s4497_s1 + $0xcc] ss:$16 sps:$4 sm:$0xff]   ;;  %v3072_v26 = vld [vmem:[%s4497_s1 + $0xc0] ss:$16 sps:$4 sm:$0xff]  }
   0xa   :  { %v3073_v27 = vld [vmem:[%s4497_s1 + $0xc8] ss:$16 sps:$4 sm:$0xff]   ;;  %v3074_v28 = vld [vmem:[%s4497_s1 + $0xe4] ss:$16 sps:$4 sm:$0xff]   ;;  %v3076_v29 = vld [vmem:[%s4497_s1 + $0xec] ss:$16 sps:$4 sm:$0xff]  }
   0xb   :  { %1632 = vmatpush1.bf16.msra.mxu0 %v3048_v10  ;;  %1796 = vmatpush1.bf16.msra.mxu1 %v3049_v11  ;;  %v3078_v30 = vld [vmem:[%s4497_s1 + $0xe0] ss:$16 sps:$4 sm:$0xff]   ;;  %v3079_v31 = vld [vmem:[%s4497_s1 + $0xe8] ss:$16 sps:$4 sm:$0xff]   ;;  %v3080_v32 = vld [vmem:[%s4497_s1 + $0x104] ss:$16 sps:$4 sm:$0xff]  }
   0xc   :  { %1633 = vmatprep.subr.bf16.mxu0 %v3050_v12  ;;  %1797 = vmatprep.subr.bf16.mxu1 %v3052_v13  ;;  %v3082_v33 = vld [vmem:[%s4497_s1 + $0x10c] ss:$16 sps:$4 sm:$0xff]   ;;  %v3084_v34 = vld [vmem:[%s4497_s1 + $0x100] ss:$16 sps:$4 sm:$0xff]   ;;  %v3085_v35 = vld [vmem:[%s4497_s1 + $0x108] ss:$16 sps:$4 sm:$0xff]  }
   0xd   :  { %v3086_v36 = vld [vmem:[%s4497_s1 + $0x124] ss:$16 sps:$4 sm:$0xff]   ;;  %v3088_v37 = vld [vmem:[%s4497_s1 + $0x12c] ss:$16 sps:$4 sm:$0xff]   ;;  %v3090_v38 = vld [vmem:[%s4497_s1 + $0x120] ss:$16 sps:$4 sm:$0xff]  }
   0xe   :  { %v3091_v39 = vld [vmem:[%s4497_s1 + $0x128] ss:$16 sps:$4 sm:$0xff]   ;;  %v3092_v40 = vld [vmem:[%s4497_s1 + $0x144] ss:$16 sps:$4 sm:$0xff]   ;;  %v3094_v41 = vld [vmem:[%s4497_s1 + $0x14c] ss:$16 sps:$4 sm:$0xff]  }
   0xf   :  { %1634 = vmatpush1.bf16.msra.mxu0 %v3054_v14  ;;  %1798 = vmatpush1.bf16.msra.mxu1 %v3055_v15  ;;  %v3096_v42 = vld [vmem:[%s4497_s1 + $0x140] ss:$16 sps:$4 sm:$0xff]   ;;  %v3097_v43 = vld [vmem:[%s4497_s1 + $0x148] ss:$16 sps:$4 sm:$0xff]   ;;  %v3098_v44 = vld [vmem:[%s4497_s1 + $0x164] ss:$16 sps:$4 sm:$0xff]  }
  0x10   :  { %1635 = vmatprep.subr.bf16.mxu0 %v3056_v16  ;;  %1799 = vmatprep.subr.bf16.mxu1 %v3058_v17  ;;  %v3100_v45 = vld [vmem:[%s4497_s1 + $0x16c] ss:$16 sps:$4 sm:$0xff]   ;;  %v33_v46 = vld [vmem:[%s4498_s0] sm:$0xff]  ;;  %v3103_v49 = vld [vmem:[%s4497_s1 + $0x168] ss:$16 sps:$4 sm:$0xff]  }
  0x11   :  { %v3102_v47 = vld [vmem:[%s4497_s1 + $0x160] ss:$16 sps:$4 sm:$0xff]   ;;  %v2595_v48 = vcombine.high %v33_v46, %v33_v46  ;;  %v3104_v50 = vld [vmem:[%s4497_s1 + $0x184] ss:$16 sps:$4 sm:$0xff]   ;;  %v3106_v51 = vld [vmem:[%s4497_s1 + $0x18c] ss:$16 sps:$4 sm:$0xff]   ;;  %v2594_v4 = vcombine.low %v33_v46, %v33_v46 }
  0x12   :  { %v3108_v52 = vld [vmem:[%s4497_s1 + $0x180] ss:$16 sps:$4 sm:$0xff]   ;;  %v3109_v53 = vld [vmem:[%s4497_s1 + $0x188] ss:$16 sps:$4 sm:$0xff]   ;;  %v3110_v54 = vld [vmem:[%s4497_s1 + $0x1a4] ss:$16 sps:$4 sm:$0xff]  }
  0x13   :  { %1636 = vmatpush1.bf16.msra.mxu0 %v3060_v18  ;;  %1800 = vmatpush1.bf16.msra.mxu1 %v3061_v19  ;;  %v3112_v55 = vld [vmem:[%s4497_s1 + $0x1ac] ss:$16 sps:$4 sm:$0xff]   ;;  %v3114_v56 = vld [vmem:[%s4497_s1 + $0x1a0] ss:$16 sps:$4 sm:$0xff]   ;;  %v3115_v57 = vld [vmem:[%s4497_s1 + $0x1a8] ss:$16 sps:$4 sm:$0xff]  }
  0x14   :  { %1637 = vmatprep.subr.bf16.mxu0 %v3062_v20  ;;  %1801 = vmatprep.subr.bf16.mxu1 %v3064_v21  ;;  %v3116_v58 = vld [vmem:[%s4497_s1 + $0x1c4] ss:$16 sps:$4 sm:$0xff]   ;;  %v3118_v59 = vld [vmem:[%s4497_s1 + $0x1cc] ss:$16 sps:$4 sm:$0xff]   ;;  %v3120_v60 = vld [vmem:[%s4497_s1 + $0x1c0] ss:$16 sps:$4 sm:$0xff]  }
  0x15   :  { %1659 = vmatprep.mubr.bf16.mxu0 %v2595_v48  ;;  %1823 = vmatprep.mubr.bf16.mxu1 %v2595_v48  ;;  %v3121_v61 = vld [vmem:[%s4497_s1 + $0x1c8] ss:$16 sps:$4 sm:$0xff]   ;;  %v3122_v62 = vld [vmem:[%s4497_s1 + $0x1e4] ss:$16 sps:$4 sm:$0xff]   ;;  %v3124_v63 = vld [vmem:[%s4497_s1 + $0x1ec] ss:$16 sps:$4 sm:$0xff]  }
  0x16   :  { %v3126_v0 = vld [vmem:[%s4497_s1 + $0x1e0] ss:$16 sps:$4 sm:$0xff]   ;;  %v3127_v1 = vld [vmem:[%s4497_s1 + $0x1e8] ss:$16 sps:$4 sm:$0xff]   ;;  %v3132_v2 = vld [vmem:[%s4497_s1 + $0x204] ss:$16 sps:$4 sm:$0xff]  }
  0x17   :  { %1638 = vmatpush1.bf16.msra.mxu0 %v3066_v22  ;;  %1802 = vmatpush1.bf16.msra.mxu1 %v3067_v23  ;;  %v3135_v3 = vld [vmem:[%s4497_s1 + $0x20c] ss:$16 sps:$4 sm:$0xff]   ;;  %v3130_v5 = vld [vmem:[%s4497_s1 + $0x200] ss:$16 sps:$4 sm:$0xff]   ;;  %v3133_v6 = vld [vmem:[%s4497_s1 + $0x208] ss:$16 sps:$4 sm:$0xff]  }
  0x18   :  { %1639 = vmatprep.subr.bf16.mxu0 %v3068_v24  ;;  %1803 = vmatprep.subr.bf16.mxu1 %v3070_v25  ;;  %v3138_v7 = vld [vmem:[%s4497_s1 + $0x224] ss:$16 sps:$4 sm:$0xff]   ;;  %v3141_v8 = vld [vmem:[%s4497_s1 + $0x22c] ss:$16 sps:$4 sm:$0xff]   ;;  %v3136_v9 = vld [vmem:[%s4497_s1 + $0x220] ss:$16 sps:$4 sm:$0xff]  }
  0x19   :  { %v3139_v10 = vld [vmem:[%s4497_s1 + $0x228] ss:$16 sps:$4 sm:$0xff]   ;;  %v3144_v11 = vld [vmem:[%s4497_s1 + $0x244] ss:$16 sps:$4 sm:$0xff]   ;;  %v3147_v12 = vld [vmem:[%s4497_s1 + $0x24c] ss:$16 sps:$4 sm:$0xff]  }
  0x1a   :  { %v3142_v13 = vld [vmem:[%s4497_s1 + $0x240] ss:$16 sps:$4 sm:$0xff]   ;;  %v3145_v14 = vld [vmem:[%s4497_s1 + $0x248] ss:$16 sps:$4 sm:$0xff]   ;;  %v3150_v15 = vld [vmem:[%s4497_s1 + $0x264] ss:$16 sps:$4 sm:$0xff]  }
  0x1b   :  { %1640 = vmatpush1.bf16.msra.mxu0 %v3072_v26  ;;  %1804 = vmatpush1.bf16.msra.mxu1 %v3073_v27  ;;  %v3153_v16 = vld [vmem:[%s4497_s1 + $0x26c] ss:$16 sps:$4 sm:$0xff]   ;;  %v3148_v17 = vld [vmem:[%s4497_s1 + $0x260] ss:$16 sps:$4 sm:$0xff]   ;;  %v3151_v18 = vld [vmem:[%s4497_s1 + $0x268] ss:$16 sps:$4 sm:$0xff]  }
  0x1c   :  { %1641 = vmatprep.subr.bf16.mxu0 %v3074_v28  ;;  %1805 = vmatprep.subr.bf16.mxu1 %v3076_v29  ;;  %v3156_v19 = vld [vmem:[%s4497_s1 + $0x284] ss:$16 sps:$4 sm:$0xff]   ;;  %v3159_v20 = vld [vmem:[%s4497_s1 + $0x28c] ss:$16 sps:$4 sm:$0xff]   ;;  %v3154_v21 = vld [vmem:[%s4497_s1 + $0x280] ss:$16 sps:$4 sm:$0xff]  }
  0x1d   :  { %v3157_v22 = vld [vmem:[%s4497_s1 + $0x288] ss:$16 sps:$4 sm:$0xff]   ;;  %v3162_v23 = vld [vmem:[%s4497_s1 + $0x2a4] ss:$16 sps:$4 sm:$0xff]   ;;  %v3165_v24 = vld [vmem:[%s4497_s1 + $0x2ac] ss:$16 sps:$4 sm:$0xff]  }
  0x1e   :  { %v3160_v25 = vld [vmem:[%s4497_s1 + $0x2a0] ss:$16 sps:$4 sm:$0xff]   ;;  %v3163_v26 = vld [vmem:[%s4497_s1 + $0x2a8] ss:$16 sps:$4 sm:$0xff]   ;;  %v3168_v27 = vld [vmem:[%s4497_s1 + $0x2c4] ss:$16 sps:$4 sm:$0xff]  }
  0x1f   :  { %1642 = vmatpush1.bf16.msra.mxu0 %v3078_v30  ;;  %1806 = vmatpush1.bf16.msra.mxu1 %v3079_v31  ;;  %v3171_v28 = vld [vmem:[%s4497_s1 + $0x2cc] ss:$16 sps:$4 sm:$0xff]   ;;  %v3166_v31 = vld [vmem:[%s4497_s1 + $0x2c0] ss:$16 sps:$4 sm:$0xff]   ;;  %v3193_v48 = vld [vmem:[%s4497_s1 + $0x348] ss:$16 sps:$4 sm:$0xff]  }
  0x20   :  { %1643 = vmatprep.subr.bf16.mxu0 %v3080_v32  ;;  %1807 = vmatprep.subr.bf16.mxu1 %v3082_v33  ;;  %v3797_v29 = vld [vmem:[%s4498_s0 + $0x8] sm:$0xff]  ;;  %v3174_v33 = vld [vmem:[%s4497_s1 + $0x2e4] ss:$16 sps:$4 sm:$0xff]  }
  0x21   :  { %v2597_v30 = vcombine.high %v3797_v29, %v3797_v29  ;;  %v3169_v32 = vld [vmem:[%s4497_s1 + $0x2c8] ss:$16 sps:$4 sm:$0xff]   ;;  %v3195_v46 = vld [vmem:[%s4497_s1 + $0x34c] ss:$16 sps:$4 sm:$0xff]  }
  0x23   :  { %1644 = vmatpush1.bf16.msra.mxu0 %v3084_v34  ;;  %1808 = vmatpush1.bf16.msra.mxu1 %v3085_v35  ;;  %v3177_v34 = vld [vmem:[%s4497_s1 + $0x2ec] ss:$16 sps:$4 sm:$0xff]   ;;  %v3172_v35 = vld [vmem:[%s4497_s1 + $0x2e0] ss:$16 sps:$4 sm:$0xff]  }
  0x24   :  { %1645 = vmatprep.subr.bf16.mxu0 %v3086_v36  ;;  %1809 = vmatprep.subr.bf16.mxu1 %v3088_v37  ;;  %v3175_v36 = vld [vmem:[%s4497_s1 + $0x2e8] ss:$16 sps:$4 sm:$0xff]   ;;  %v3180_v37 = vld [vmem:[%s4497_s1 + $0x304] ss:$16 sps:$4 sm:$0xff]  }
  0x27   :  { %1646 = vmatpush1.bf16.msra.mxu0 %v3090_v38  ;;  %1810 = vmatpush1.bf16.msra.mxu1 %v3091_v39  ;;  %v3183_v38 = vld [vmem:[%s4497_s1 + $0x30c] ss:$16 sps:$4 sm:$0xff]   ;;  %v3178_v39 = vld [vmem:[%s4497_s1 + $0x300] ss:$16 sps:$4 sm:$0xff]  }
  0x28   :  { %1647 = vmatprep.subr.bf16.mxu0 %v3092_v40  ;;  %1811 = vmatprep.subr.bf16.mxu1 %v3094_v41  ;;  %v3181_v40 = vld [vmem:[%s4497_s1 + $0x308] ss:$16 sps:$4 sm:$0xff]   ;;  %v3186_v41 = vld [vmem:[%s4497_s1 + $0x324] ss:$16 sps:$4 sm:$0xff]  }
  0x2b   :  { %1648 = vmatpush1.bf16.msra.mxu0 %v3096_v42  ;;  %1812 = vmatpush1.bf16.msra.mxu1 %v3097_v43  ;;  %v3189_v42 = vld [vmem:[%s4497_s1 + $0x32c] ss:$16 sps:$4 sm:$0xff]   ;;  %v3184_v43 = vld [vmem:[%s4497_s1 + $0x320] ss:$16 sps:$4 sm:$0xff]  }
  0x2c   :  { %1649 = vmatprep.subr.bf16.mxu0 %v3098_v44  ;;  %1813 = vmatprep.subr.bf16.mxu1 %v3100_v45  ;;  %v3187_v44 = vld [vmem:[%s4497_s1 + $0x328] ss:$16 sps:$4 sm:$0xff]   ;;  %v3192_v45 = vld [vmem:[%s4497_s1 + $0x344] ss:$16 sps:$4 sm:$0xff]  }
  0x2f   :  { %1650 = vmatpush1.bf16.msra.mxu0 %v3102_v47  ;;  %1814 = vmatpush1.bf16.msra.mxu1 %v3103_v49  ;;  %v3190_v47 = vld [vmem:[%s4497_s1 + $0x340] ss:$16 sps:$4 sm:$0xff]   ;;  %v3198_v49 = vld [vmem:[%s4497_s1 + $0x364] ss:$16 sps:$4 sm:$0xff]  }
  0x30   :  { %1651 = vmatprep.subr.bf16.mxu0 %v3104_v50  ;;  %1815 = vmatprep.subr.bf16.mxu1 %v3106_v51  ;;  %v3201_v50 = vld [vmem:[%s4497_s1 + $0x36c] ss:$16 sps:$4 sm:$0xff]   ;;  %v3196_v51 = vld [vmem:[%s4497_s1 + $0x360] ss:$16 sps:$4 sm:$0xff]  }
  0x33   :  { %1652 = vmatpush1.bf16.msra.mxu0 %v3108_v52  ;;  %1816 = vmatpush1.bf16.msra.mxu1 %v3109_v53  ;;  %v3199_v52 = vld [vmem:[%s4497_s1 + $0x368] ss:$16 sps:$4 sm:$0xff]   ;;  %v3204_v53 = vld [vmem:[%s4497_s1 + $0x384] ss:$16 sps:$4 sm:$0xff]  }
  0x34   :  { %1653 = vmatprep.subr.bf16.mxu0 %v3110_v54  ;;  %1817 = vmatprep.subr.bf16.mxu1 %v3112_v55  ;;  %v3207_v54 = vld [vmem:[%s4497_s1 + $0x38c] ss:$16 sps:$4 sm:$0xff]   ;;  %v3202_v55 = vld [vmem:[%s4497_s1 + $0x380] ss:$16 sps:$4 sm:$0xff]  }
  0x37   :  { %1654 = vmatpush1.bf16.msra.mxu0 %v3114_v56  ;;  %1818 = vmatpush1.bf16.msra.mxu1 %v3115_v57  ;;  %v3205_v56 = vld [vmem:[%s4497_s1 + $0x388] ss:$16 sps:$4 sm:$0xff]   ;;  %v3210_v57 = vld [vmem:[%s4497_s1 + $0x3a4] ss:$16 sps:$4 sm:$0xff]  }
  0x38   :  { %1655 = vmatprep.subr.bf16.mxu0 %v3116_v58  ;;  %1819 = vmatprep.subr.bf16.mxu1 %v3118_v59  ;;  %v3213_v58 = vld [vmem:[%s4497_s1 + $0x3ac] ss:$16 sps:$4 sm:$0xff]   ;;  %v3208_v59 = vld [vmem:[%s4497_s1 + $0x3a0] ss:$16 sps:$4 sm:$0xff]  }
  0x3b   :  { %1656 = vmatpush1.bf16.msra.mxu0 %v3120_v60  ;;  %1820 = vmatpush1.bf16.msra.mxu1 %v3121_v61  ;;  %v3211_v60 = vld [vmem:[%s4497_s1 + $0x3a8] ss:$16 sps:$4 sm:$0xff]   ;;  %v3216_v61 = vld [vmem:[%s4497_s1 + $0x3c4] ss:$16 sps:$4 sm:$0xff]  }
  0x3c   :  { %1657 = vmatprep.subr.bf16.mxu0 %v3122_v62  ;;  %1821 = vmatprep.subr.bf16.mxu1 %v3124_v63  ;;  %v3219_v62 = vld [vmem:[%s4497_s1 + $0x3cc] ss:$16 sps:$4 sm:$0xff]   ;;  %v3214_v63 = vld [vmem:[%s4497_s1 + $0x3c0] ss:$16 sps:$4 sm:$0xff]  }
  0x3f   :  { %1658 = vmatpush1.bf16.msra.mxu0 %v3126_v0  ;;  %1822 = vmatpush1.bf16.msra.mxu1 %v3127_v1  ;;  %v3217_v0 = vld [vmem:[%s4497_s1 + $0x3c8] ss:$16 sps:$4 sm:$0xff]   ;;  %v3222_v1 = vld [vmem:[%s4497_s1 + $0x3e4] ss:$16 sps:$4 sm:$0xff]  }
  0x40   :  { %1668 = vmatprep.subr.bf16.mxu0 %v3132_v2  ;;  %1832 = vmatprep.subr.bf16.mxu1 %v3135_v3  ;;  %v3225_v2 = vld [vmem:[%s4497_s1 + $0x3ec] ss:$16 sps:$4 sm:$0xff]   ;;  %v3220_v3 = vld [vmem:[%s4497_s1 + $0x3e0] ss:$16 sps:$4 sm:$0xff]  }
  0x42   :  { %1660 = vmatmul.mubr.bf16.vlgmr.msra.gmra.mrb[0].mxu0 %v2594_v4  ;;  %1824 = vmatmul.mubr.bf16.vlgmr.msra.gmra.mrb[0].mxu1 %v2594_v4  ;;  %v3223_v4 = vld [vmem:[%s4497_s1 + $0x3e8] ss:$16 sps:$4 sm:$0xff]  }
  0x43   :  { %1669 = vmatpush1.bf16.msra.mxu0 %v3130_v5  ;;  %1833 = vmatpush1.bf16.msra.mxu1 %v3133_v6  ;;  %v3230_v5 = vld [vmem:[%s4497_s1 + $0x404] ss:$16 sps:$4 sm:$0xff]   ;;  %v3233_v6 = vld [vmem:[%s4497_s1 + $0x40c] ss:$16 sps:$4 sm:$0xff]  }
  0x44   :  { %1670 = vmatprep.subr.bf16.mxu0 %v3138_v7  ;;  %1834 = vmatprep.subr.bf16.mxu1 %v3141_v8  ;;  %v2596_v7 = vcombine.low %v3797_v29, %v3797_v29  ;;  %v3228_v8 = vld [vmem:[%s4497_s1 + $0x400] ss:$16 sps:$4 sm:$0xff]   ;;  %v3263_v29 = vld [vmem:[%s4497_s1 + $0x4ac] ss:$16 sps:$4 sm:$0xff]  }
  0x45   :  { %1700 = vmatprep.mubr.bf16.mxu0 %v2597_v30  ;;  %1864 = vmatprep.mubr.bf16.mxu1 %v2597_v30  ;;  %v3258_v30 = vld [vmem:[%s4497_s1 + $0x4a0] ss:$16 sps:$4 sm:$0xff]  }
  0x47   :  { %1671 = vmatpush1.bf16.msra.mxu0 %v3136_v9  ;;  %1835 = vmatpush1.bf16.msra.mxu1 %v3139_v10  ;;  %v3231_v9 = vld [vmem:[%s4497_s1 + $0x408] ss:$16 sps:$4 sm:$0xff]   ;;  %v3236_v10 = vld [vmem:[%s4497_s1 + $0x424] ss:$16 sps:$4 sm:$0xff]  }
  0x48   :  { %1672 = vmatprep.subr.bf16.mxu0 %v3144_v11  ;;  %1836 = vmatprep.subr.bf16.mxu1 %v3147_v12  ;;  %v3935_v11 = vld [vmem:[%s4498_s0 + $0x10] sm:$0xff]  ;;  %v3239_v12 = vld [vmem:[%s4497_s1 + $0x42c] ss:$16 sps:$4 sm:$0xff]  }
  0x4b   :  { %1673 = vmatpush1.bf16.msra.mxu0 %v3142_v13  ;;  %1837 = vmatpush1.bf16.msra.mxu1 %v3145_v14  ;;  %v2599_v13 = vcombine.high %v3935_v11, %v3935_v11  ;;  %v3234_v14 = vld [vmem:[%s4497_s1 + $0x420] ss:$16 sps:$4 sm:$0xff]  }
  0x4c   :  { %1674 = vmatprep.subr.bf16.mxu0 %v3150_v15  ;;  %1838 = vmatprep.subr.bf16.mxu1 %v3153_v16  ;;  %v3237_v15 = vld [vmem:[%s4497_s1 + $0x428] ss:$16 sps:$4 sm:$0xff]   ;;  %v3242_v16 = vld [vmem:[%s4497_s1 + $0x444] ss:$16 sps:$4 sm:$0xff]  }
  0x4f   :  { %1675 = vmatpush1.bf16.msra.mxu0 %v3148_v17  ;;  %1839 = vmatpush1.bf16.msra.mxu1 %v3151_v18  ;;  %v3245_v17 = vld [vmem:[%s4497_s1 + $0x44c] ss:$16 sps:$4 sm:$0xff]   ;;  %v3240_v18 = vld [vmem:[%s4497_s1 + $0x440] ss:$16 sps:$4 sm:$0xff]  }
  0x50   :  { %1676 = vmatprep.subr.bf16.mxu0 %v3156_v19  ;;  %1840 = vmatprep.subr.bf16.mxu1 %v3159_v20  ;;  %v3243_v19 = vld [vmem:[%s4497_s1 + $0x448] ss:$16 sps:$4 sm:$0xff]   ;;  %v3248_v20 = vld [vmem:[%s4497_s1 + $0x464] ss:$16 sps:$4 sm:$0xff]  }
  0x53   :  { %1677 = vmatpush1.bf16.msra.mxu0 %v3154_v21  ;;  %1841 = vmatpush1.bf16.msra.mxu1 %v3157_v22  ;;  %v3251_v21 = vld [vmem:[%s4497_s1 + $0x46c] ss:$16 sps:$4 sm:$0xff]   ;;  %v3246_v22 = vld [vmem:[%s4497_s1 + $0x460] ss:$16 sps:$4 sm:$0xff]  }
  0x54   :  { %1678 = vmatprep.subr.bf16.mxu0 %v3162_v23  ;;  %1842 = vmatprep.subr.bf16.mxu1 %v3165_v24  ;;  %v3249_v23 = vld [vmem:[%s4497_s1 + $0x468] ss:$16 sps:$4 sm:$0xff]   ;;  %v3254_v24 = vld [vmem:[%s4497_s1 + $0x484] ss:$16 sps:$4 sm:$0xff]  }
  0x57   :  { %1679 = vmatpush1.bf16.msra.mxu0 %v3160_v25  ;;  %1843 = vmatpush1.bf16.msra.mxu1 %v3163_v26  ;;  %v3257_v25 = vld [vmem:[%s4497_s1 + $0x48c] ss:$16 sps:$4 sm:$0xff]   ;;  %v3252_v26 = vld [vmem:[%s4497_s1 + $0x480] ss:$16 sps:$4 sm:$0xff]  }
  0x58   :  { %1680 = vmatprep.subr.bf16.mxu0 %v3168_v27  ;;  %1844 = vmatprep.subr.bf16.mxu1 %v3171_v28  ;;  %v3255_v27 = vld [vmem:[%s4497_s1 + $0x488] ss:$16 sps:$4 sm:$0xff]   ;;  %v3260_v28 = vld [vmem:[%s4497_s1 + $0x4a4] ss:$16 sps:$4 sm:$0xff]  }
  0x5b   :  { %1681 = vmatpush1.bf16.msra.mxu0 %v3166_v31  ;;  %1845 = vmatpush1.bf16.msra.mxu1 %v3169_v32  ;;  %v3261_v31 = vld [vmem:[%s4497_s1 + $0x4a8] ss:$16 sps:$4 sm:$0xff]   ;;  %v3266_v32 = vld [vmem:[%s4497_s1 + $0x4c4] ss:$16 sps:$4 sm:$0xff]  }
  0x5c   :  { %1682 = vmatprep.subr.bf16.mxu0 %v3174_v33  ;;  %1846 = vmatprep.subr.bf16.mxu1 %v3177_v34  ;;  %v3269_v33 = vld [vmem:[%s4497_s1 + $0x4cc] ss:$16 sps:$4 sm:$0xff]   ;;  %v3264_v34 = vld [vmem:[%s4497_s1 + $0x4c0] ss:$16 sps:$4 sm:$0xff]  }
  0x5f   :  { %1683 = vmatpush1.bf16.msra.mxu0 %v3172_v35  ;;  %1847 = vmatpush1.bf16.msra.mxu1 %v3175_v36  ;;  %v3267_v35 = vld [vmem:[%s4497_s1 + $0x4c8] ss:$16 sps:$4 sm:$0xff]   ;;  %v3272_v36 = vld [vmem:[%s4497_s1 + $0x4e4] ss:$16 sps:$4 sm:$0xff]  }
  0x60   :  { %1684 = vmatprep.subr.bf16.mxu0 %v3180_v37  ;;  %1848 = vmatprep.subr.bf16.mxu1 %v3183_v38  ;;  %v3275_v37 = vld [vmem:[%s4497_s1 + $0x4ec] ss:$16 sps:$4 sm:$0xff]   ;;  %v3270_v38 = vld [vmem:[%s4497_s1 + $0x4e0] ss:$16 sps:$4 sm:$0xff]  }
  0x63   :  { %1685 = vmatpush1.bf16.msra.mxu0 %v3178_v39  ;;  %1849 = vmatpush1.bf16.msra.mxu1 %v3181_v40  ;;  %v3273_v39 = vld [vmem:[%s4497_s1 + $0x4e8] ss:$16 sps:$4 sm:$0xff]   ;;  %v3278_v40 = vld [vmem:[%s4497_s1 + $0x504] ss:$16 sps:$4 sm:$0xff]  }
  0x64   :  { %1686 = vmatprep.subr.bf16.mxu0 %v3186_v41  ;;  %1850 = vmatprep.subr.bf16.mxu1 %v3189_v42  ;;  %v3281_v41 = vld [vmem:[%s4497_s1 + $0x50c] ss:$16 sps:$4 sm:$0xff]   ;;  %v3276_v42 = vld [vmem:[%s4497_s1 + $0x500] ss:$16 sps:$4 sm:$0xff]  }
  0x67   :  { %1687 = vmatpush1.bf16.msra.mxu0 %v3184_v43  ;;  %1851 = vmatpush1.bf16.msra.mxu1 %v3187_v44  ;;  %v3279_v43 = vld [vmem:[%s4497_s1 + $0x508] ss:$16 sps:$4 sm:$0xff]   ;;  %v3284_v44 = vld [vmem:[%s4497_s1 + $0x524] ss:$16 sps:$4 sm:$0xff]  }
  0x68   :  { %1688 = vmatprep.subr.bf16.mxu0 %v3192_v45  ;;  %1852 = vmatprep.subr.bf16.mxu1 %v3195_v46  ;;  %v3287_v45 = vld [vmem:[%s4497_s1 + $0x52c] ss:$16 sps:$4 sm:$0xff]   ;;  %v3282_v46 = vld [vmem:[%s4497_s1 + $0x520] ss:$16 sps:$4 sm:$0xff]  }
  0x6b   :  { %1689 = vmatpush1.bf16.msra.mxu0 %v3190_v47  ;;  %1853 = vmatpush1.bf16.msra.mxu1 %v3193_v48  ;;  %v3285_v47 = vld [vmem:[%s4497_s1 + $0x528] ss:$16 sps:$4 sm:$0xff]   ;;  %v3290_v48 = vld [vmem:[%s4497_s1 + $0x544] ss:$16 sps:$4 sm:$0xff]  }
  0x6c   :  { %1690 = vmatprep.subr.bf16.mxu0 %v3198_v49  ;;  %1854 = vmatprep.subr.bf16.mxu1 %v3201_v50  ;;  %v3293_v49 = vld [vmem:[%s4497_s1 + $0x54c] ss:$16 sps:$4 sm:$0xff]   ;;  %v3288_v50 = vld [vmem:[%s4497_s1 + $0x540] ss:$16 sps:$4 sm:$0xff]  }
  0x6f   :  { %1691 = vmatpush1.bf16.msra.mxu0 %v3196_v51  ;;  %1855 = vmatpush1.bf16.msra.mxu1 %v3199_v52  ;;  %v3291_v51 = vld [vmem:[%s4497_s1 + $0x548] ss:$16 sps:$4 sm:$0xff]   ;;  %v3296_v52 = vld [vmem:[%s4497_s1 + $0x564] ss:$16 sps:$4 sm:$0xff]  }
  0x70   :  { %1692 = vmatprep.subr.bf16.mxu0 %v3204_v53  ;;  %1856 = vmatprep.subr.bf16.mxu1 %v3207_v54  ;;  %v3299_v53 = vld [vmem:[%s4497_s1 + $0x56c] ss:$16 sps:$4 sm:$0xff]   ;;  %v3294_v54 = vld [vmem:[%s4497_s1 + $0x560] ss:$16 sps:$4 sm:$0xff]  }
  0x73   :  { %1693 = vmatpush1.bf16.msra.mxu0 %v3202_v55  ;;  %1857 = vmatpush1.bf16.msra.mxu1 %v3205_v56  ;;  %v3297_v55 = vld [vmem:[%s4497_s1 + $0x568] ss:$16 sps:$4 sm:$0xff]   ;;  %v3302_v56 = vld [vmem:[%s4497_s1 + $0x584] ss:$16 sps:$4 sm:$0xff]  }
  0x74   :  { %1694 = vmatprep.subr.bf16.mxu0 %v3210_v57  ;;  %1858 = vmatprep.subr.bf16.mxu1 %v3213_v58  ;;  %v3305_v57 = vld [vmem:[%s4497_s1 + $0x58c] ss:$16 sps:$4 sm:$0xff]   ;;  %v3300_v58 = vld [vmem:[%s4497_s1 + $0x580] ss:$16 sps:$4 sm:$0xff]  }
  0x77   :  { %1695 = vmatpush1.bf16.msra.mxu0 %v3208_v59  ;;  %1859 = vmatpush1.bf16.msra.mxu1 %v3211_v60  ;;  %v3303_v59 = vld [vmem:[%s4497_s1 + $0x588] ss:$16 sps:$4 sm:$0xff]   ;;  %v3308_v60 = vld [vmem:[%s4497_s1 + $0x5a4] ss:$16 sps:$4 sm:$0xff]  }
  0x78   :  { %1696 = vmatprep.subr.bf16.mxu0 %v3216_v61  ;;  %1860 = vmatprep.subr.bf16.mxu1 %v3219_v62  ;;  %v3311_v61 = vld [vmem:[%s4497_s1 + $0x5ac] ss:$16 sps:$4 sm:$0xff]   ;;  %v3306_v62 = vld [vmem:[%s4497_s1 + $0x5a0] ss:$16 sps:$4 sm:$0xff]  }
  0x7b   :  { %1697 = vmatpush1.bf16.msra.mxu0 %v3214_v63  ;;  %1861 = vmatpush1.bf16.msra.mxu1 %v3217_v0  ;;  %v3309_v63 = vld [vmem:[%s4497_s1 + $0x5a8] ss:$16 sps:$4 sm:$0xff]   ;;  %v3314_v0 = vld [vmem:[%s4497_s1 + $0x5c4] ss:$16 sps:$4 sm:$0xff]  }
  0x7c   :  { %1698 = vmatprep.subr.bf16.mxu0 %v3222_v1  ;;  %1862 = vmatprep.subr.bf16.mxu1 %v3225_v2  ;;  %v3317_v1 = vld [vmem:[%s4497_s1 + $0x5cc] ss:$16 sps:$4 sm:$0xff]   ;;  %v3312_v2 = vld [vmem:[%s4497_s1 + $0x5c0] ss:$16 sps:$4 sm:$0xff]  }
  0x7f   :  { %1699 = vmatpush1.bf16.msra.mxu0 %v3220_v3  ;;  %1863 = vmatpush1.bf16.msra.mxu1 %v3223_v4  ;;  %v3315_v3 = vld [vmem:[%s4497_s1 + $0x5c8] ss:$16 sps:$4 sm:$0xff]   ;;  %v3320_v4 = vld [vmem:[%s4497_s1 + $0x5e4] ss:$16 sps:$4 sm:$0xff]  }
  0x80   :  { %1709 = vmatprep.subr.bf16.mxu0 %v3230_v5  ;;  %1873 = vmatprep.subr.bf16.mxu1 %v3233_v6  ;;  %v3323_v5 = vld [vmem:[%s4497_s1 + $0x5ec] ss:$16 sps:$4 sm:$0xff]   ;;  %v3318_v6 = vld [vmem:[%s4497_s1 + $0x5e0] ss:$16 sps:$4 sm:$0xff]  }
  0x82   :  { %1701 = vmatmul.mubr.bf16.vlgmr.msra.gmra.mrb[0].mxu0 %v2596_v7  ;;  %1865 = vmatmul.mubr.bf16.vlgmr.msra.gmra.mrb[0].mxu1 %v2596_v7  ;;  %v3321_v7 = vld [vmem:[%s4497_s1 + $0x5e8] ss:$16 sps:$4 sm:$0xff]  }
  0x83   :  { %1710 = vmatpush1.bf16.msra.mxu0 %v3228_v8  ;;  %1874 = vmatpush1.bf16.msra.mxu1 %v3231_v9  ;;  %v3328_v8 = vld [vmem:[%s4497_s1 + $0x604] ss:$16 sps:$4 sm:$0xff]   ;;  %v3331_v9 = vld [vmem:[%s4497_s1 + $0x60c] ss:$16 sps:$4 sm:$0xff]  }
  0x84   :  { %1711 = vmatprep.subr.bf16.mxu0 %v3236_v10  ;;  %1875 = vmatprep.subr.bf16.mxu1 %v3239_v12  ;;  %v2598_v10 = vcombine.low %v3935_v11, %v3935_v11  ;;  %v4127_v12 = vld [vmem:[%s4498_s0 + $0x18] sm:$0xff]  ;;  %v3334_v11 = vld [vmem:[%s4497_s1 + $0x624] ss:$16 sps:$4 sm:$0xff]  }
  0x85   :  { %1741 = vmatprep.mubr.bf16.mxu0 %v2599_v13  ;;  %1905 = vmatprep.mubr.bf16.mxu1 %v2599_v13  ;;  %v3326_v13 = vld [vmem:[%s4497_s1 + $0x600] ss:$16 sps:$4 sm:$0xff]  }
  0x87   :  { %1712 = vmatpush1.bf16.msra.mxu0 %v3234_v14  ;;  %1876 = vmatpush1.bf16.msra.mxu1 %v3237_v15  ;;  %v3329_v14 = vld [vmem:[%s4497_s1 + $0x608] ss:$16 sps:$4 sm:$0xff]   ;;  %v3337_v15 = vld [vmem:[%s4497_s1 + $0x62c] ss:$16 sps:$4 sm:$0xff]  }
  0x88   :  { %1713 = vmatprep.subr.bf16.mxu0 %v3242_v16  ;;  %1877 = vmatprep.subr.bf16.mxu1 %v3245_v17  ;;  %v3332_v16 = vld [vmem:[%s4497_s1 + $0x620] ss:$16 sps:$4 sm:$0xff]   ;;  %v3335_v17 = vld [vmem:[%s4497_s1 + $0x628] ss:$16 sps:$4 sm:$0xff]  }
  0x8b   :  { %1714 = vmatpush1.bf16.msra.mxu0 %v3240_v18  ;;  %1878 = vmatpush1.bf16.msra.mxu1 %v3243_v19  ;;  %v2601_v18 = vcombine.high %v4127_v12, %v4127_v12  ;;  %v3340_v19 = vld [vmem:[%s4497_s1 + $0x644] ss:$16 sps:$4 sm:$0xff]  }
  0x8c   :  { %1715 = vmatprep.subr.bf16.mxu0 %v3248_v20  ;;  %1879 = vmatprep.subr.bf16.mxu1 %v3251_v21  ;;  %v3343_v20 = vld [vmem:[%s4497_s1 + $0x64c] ss:$16 sps:$4 sm:$0xff]   ;;  %v3338_v21 = vld [vmem:[%s4497_s1 + $0x640] ss:$16 sps:$4 sm:$0xff]  }
  0x8f   :  { %1716 = vmatpush1.bf16.msra.mxu0 %v3246_v22  ;;  %1880 = vmatpush1.bf16.msra.mxu1 %v3249_v23  ;;  %v3341_v22 = vld [vmem:[%s4497_s1 + $0x648] ss:$16 sps:$4 sm:$0xff]   ;;  %v3346_v23 = vld [vmem:[%s4497_s1 + $0x664] ss:$16 sps:$4 sm:$0xff]  }
  0x90   :  { %1717 = vmatprep.subr.bf16.mxu0 %v3254_v24  ;;  %1881 = vmatprep.subr.bf16.mxu1 %v3257_v25  ;;  %v3349_v24 = vld [vmem:[%s4497_s1 + $0x66c] ss:$16 sps:$4 sm:$0xff]   ;;  %v3344_v25 = vld [vmem:[%s4497_s1 + $0x660] ss:$16 sps:$4 sm:$0xff]  }
  0x93   :  { %1718 = vmatpush1.bf16.msra.mxu0 %v3252_v26  ;;  %1882 = vmatpush1.bf16.msra.mxu1 %v3255_v27  ;;  %v3347_v26 = vld [vmem:[%s4497_s1 + $0x668] ss:$16 sps:$4 sm:$0xff]   ;;  %v3352_v27 = vld [vmem:[%s4497_s1 + $0x684] ss:$16 sps:$4 sm:$0xff]  }
  0x94   :  { %1719 = vmatprep.subr.bf16.mxu0 %v3260_v28  ;;  %1883 = vmatprep.subr.bf16.mxu1 %v3263_v29  ;;  %v3355_v28 = vld [vmem:[%s4497_s1 + $0x68c] ss:$16 sps:$4 sm:$0xff]   ;;  %v3350_v29 = vld [vmem:[%s4497_s1 + $0x680] ss:$16 sps:$4 sm:$0xff]  }
  0x97   :  { %1720 = vmatpush1.bf16.msra.mxu0 %v3258_v30  ;;  %1884 = vmatpush1.bf16.msra.mxu1 %v3261_v31  ;;  %v3353_v30 = vld [vmem:[%s4497_s1 + $0x688] ss:$16 sps:$4 sm:$0xff]   ;;  %v3358_v31 = vld [vmem:[%s4497_s1 + $0x6a4] ss:$16 sps:$4 sm:$0xff]  }
  0x98   :  { %1721 = vmatprep.subr.bf16.mxu0 %v3266_v32  ;;  %1885 = vmatprep.subr.bf16.mxu1 %v3269_v33  ;;  %v3361_v32 = vld [vmem:[%s4497_s1 + $0x6ac] ss:$16 sps:$4 sm:$0xff]   ;;  %v3356_v33 = vld [vmem:[%s4497_s1 + $0x6a0] ss:$16 sps:$4 sm:$0xff]  }
  0x9b   :  { %1722 = vmatpush1.bf16.msra.mxu0 %v3264_v34  ;;  %1886 = vmatpush1.bf16.msra.mxu1 %v3267_v35  ;;  %v3359_v34 = vld [vmem:[%s4497_s1 + $0x6a8] ss:$16 sps:$4 sm:$0xff]   ;;  %v3364_v35 = vld [vmem:[%s4497_s1 + $0x6c4] ss:$16 sps:$4 sm:$0xff]  }
  0x9c   :  { %1723 = vmatprep.subr.bf16.mxu0 %v3272_v36  ;;  %1887 = vmatprep.subr.bf16.mxu1 %v3275_v37  ;;  %v3367_v36 = vld [vmem:[%s4497_s1 + $0x6cc] ss:$16 sps:$4 sm:$0xff]   ;;  %v3362_v37 = vld [vmem:[%s4497_s1 + $0x6c0] ss:$16 sps:$4 sm:$0xff]  }
  0x9f   :  { %1724 = vmatpush1.bf16.msra.mxu0 %v3270_v38  ;;  %1888 = vmatpush1.bf16.msra.mxu1 %v3273_v39  ;;  %v3365_v38 = vld [vmem:[%s4497_s1 + $0x6c8] ss:$16 sps:$4 sm:$0xff]   ;;  %v3370_v39 = vld [vmem:[%s4497_s1 + $0x6e4] ss:$16 sps:$4 sm:$0xff]  }
  0xa0   :  { %1725 = vmatprep.subr.bf16.mxu0 %v3278_v40  ;;  %1889 = vmatprep.subr.bf16.mxu1 %v3281_v41  ;;  %v3373_v40 = vld [vmem:[%s4497_s1 + $0x6ec] ss:$16 sps:$4 sm:$0xff]   ;;  %v3368_v41 = vld [vmem:[%s4497_s1 + $0x6e0] ss:$16 sps:$4 sm:$0xff]  }
  0xa3   :  { %1726 = vmatpush1.bf16.msra.mxu0 %v3276_v42  ;;  %1890 = vmatpush1.bf16.msra.mxu1 %v3279_v43  ;;  %v3371_v42 = vld [vmem:[%s4497_s1 + $0x6e8] ss:$16 sps:$4 sm:$0xff]   ;;  %v3376_v43 = vld [vmem:[%s4497_s1 + $0x704] ss:$16 sps:$4 sm:$0xff]  }
  0xa4   :  { %1727 = vmatprep.subr.bf16.mxu0 %v3284_v44  ;;  %1891 = vmatprep.subr.bf16.mxu1 %v3287_v45  ;;  %v3379_v44 = vld [vmem:[%s4497_s1 + $0x70c] ss:$16 sps:$4 sm:$0xff]   ;;  %v3374_v45 = vld [vmem:[%s4497_s1 + $0x700] ss:$16 sps:$4 sm:$0xff]  }
  0xa7   :  { %1728 = vmatpush1.bf16.msra.mxu0 %v3282_v46  ;;  %1892 = vmatpush1.bf16.msra.mxu1 %v3285_v47  ;;  %v3377_v46 = vld [vmem:[%s4497_s1 + $0x708] ss:$16 sps:$4 sm:$0xff]   ;;  %v3382_v47 = vld [vmem:[%s4497_s1 + $0x724] ss:$16 sps:$4 sm:$0xff]  }
  0xa8   :  { %1729 = vmatprep.subr.bf16.mxu0 %v3290_v48  ;;  %1893 = vmatprep.subr.bf16.mxu1 %v3293_v49  ;;  %v3385_v48 = vld [vmem:[%s4497_s1 + $0x72c] ss:$16 sps:$4 sm:$0xff]   ;;  %v3380_v49 = vld [vmem:[%s4497_s1 + $0x720] ss:$16 sps:$4 sm:$0xff]  }
  0xab   :  { %1730 = vmatpush1.bf16.msra.mxu0 %v3288_v50  ;;  %1894 = vmatpush1.bf16.msra.mxu1 %v3291_v51  ;;  %v3383_v50 = vld [vmem:[%s4497_s1 + $0x728] ss:$16 sps:$4 sm:$0xff]   ;;  %v3388_v51 = vld [vmem:[%s4497_s1 + $0x744] ss:$16 sps:$4 sm:$0xff]  }
  0xac   :  { %1731 = vmatprep.subr.bf16.mxu0 %v3296_v52  ;;  %1895 = vmatprep.subr.bf16.mxu1 %v3299_v53  ;;  %v3391_v52 = vld [vmem:[%s4497_s1 + $0x74c] ss:$16 sps:$4 sm:$0xff]   ;;  %v3386_v53 = vld [vmem:[%s4497_s1 + $0x740] ss:$16 sps:$4 sm:$0xff]  }
  0xaf   :  { %1732 = vmatpush1.bf16.msra.mxu0 %v3294_v54  ;;  %1896 = vmatpush1.bf16.msra.mxu1 %v3297_v55  ;;  %v3389_v54 = vld [vmem:[%s4497_s1 + $0x748] ss:$16 sps:$4 sm:$0xff]   ;;  %v3394_v55 = vld [vmem:[%s4497_s1 + $0x764] ss:$16 sps:$4 sm:$0xff]  }
  0xb0   :  { %1733 = vmatprep.subr.bf16.mxu0 %v3302_v56  ;;  %1897 = vmatprep.subr.bf16.mxu1 %v3305_v57  ;;  %v3397_v56 = vld [vmem:[%s4497_s1 + $0x76c] ss:$16 sps:$4 sm:$0xff]   ;;  %v3392_v57 = vld [vmem:[%s4497_s1 + $0x760] ss:$16 sps:$4 sm:$0xff]  }
  0xb3   :  { %1734 = vmatpush1.bf16.msra.mxu0 %v3300_v58  ;;  %1898 = vmatpush1.bf16.msra.mxu1 %v3303_v59  ;;  %v3395_v58 = vld [vmem:[%s4497_s1 + $0x768] ss:$16 sps:$4 sm:$0xff]   ;;  %v3400_v59 = vld [vmem:[%s4497_s1 + $0x784] ss:$16 sps:$4 sm:$0xff]  }
  0xb4   :  { %1735 = vmatprep.subr.bf16.mxu0 %v3308_v60  ;;  %1899 = vmatprep.subr.bf16.mxu1 %v3311_v61  ;;  %v3403_v60 = vld [vmem:[%s4497_s1 + $0x78c] ss:$16 sps:$4 sm:$0xff]   ;;  %v3398_v61 = vld [vmem:[%s4497_s1 + $0x780] ss:$16 sps:$4 sm:$0xff]  }
  0xb7   :  { %1736 = vmatpush1.bf16.msra.mxu0 %v3306_v62  ;;  %1900 = vmatpush1.bf16.msra.mxu1 %v3309_v63  ;;  %v3401_v62 = vld [vmem:[%s4497_s1 + $0x788] ss:$16 sps:$4 sm:$0xff]   ;;  %v3406_v63 = vld [vmem:[%s4497_s1 + $0x7a4] ss:$16 sps:$4 sm:$0xff]  }
  0xb8   :  { %1737 = vmatprep.subr.bf16.mxu0 %v3314_v0  ;;  %1901 = vmatprep.subr.bf16.mxu1 %v3317_v1  ;;  %v3409_v0 = vld [vmem:[%s4497_s1 + $0x7ac] ss:$16 sps:$4 sm:$0xff]   ;;  %v3404_v1 = vld [vmem:[%s4497_s1 + $0x7a0] ss:$16 sps:$4 sm:$0xff]  }
  0xbb   :  { %1738 = vmatpush1.bf16.msra.mxu0 %v3312_v2  ;;  %1902 = vmatpush1.bf16.msra.mxu1 %v3315_v3  ;;  %v3407_v2 = vld [vmem:[%s4497_s1 + $0x7a8] ss:$16 sps:$4 sm:$0xff]   ;;  %v3412_v3 = vld [vmem:[%s4497_s1 + $0x7c4] ss:$16 sps:$4 sm:$0xff]  }
  0xbc   :  { %1739 = vmatprep.subr.bf16.mxu0 %v3320_v4  ;;  %1903 = vmatprep.subr.bf16.mxu1 %v3323_v5  ;;  %v3415_v4 = vld [vmem:[%s4497_s1 + $0x7cc] ss:$16 sps:$4 sm:$0xff]   ;;  %v3410_v5 = vld [vmem:[%s4497_s1 + $0x7c0] ss:$16 sps:$4 sm:$0xff]  }
  0xbf   :  { %1740 = vmatpush1.bf16.msra.mxu0 %v3318_v6  ;;  %1904 = vmatpush1.bf16.msra.mxu1 %v3321_v7  ;;  %v3413_v6 = vld [vmem:[%s4497_s1 + $0x7c8] ss:$16 sps:$4 sm:$0xff]   ;;  %v3418_v7 = vld [vmem:[%s4497_s1 + $0x7e4] ss:$16 sps:$4 sm:$0xff]  }
  0xc0   :  { %1750 = vmatprep.subr.bf16.mxu0 %v3328_v8  ;;  %1914 = vmatprep.subr.bf16.mxu1 %v3331_v9  ;;  %v3421_v8 = vld [vmem:[%s4497_s1 + $0x7ec] ss:$16 sps:$4 sm:$0xff]   ;;  %v3416_v9 = vld [vmem:[%s4497_s1 + $0x7e0] ss:$16 sps:$4 sm:$0xff]  }
  0xc2   :  { %1742 = vmatmul.mubr.bf16.vlgmr.msra.gmra.mrb[0].mxu0 %v2598_v10  ;;  %1906 = vmatmul.mubr.bf16.vlgmr.msra.gmra.mrb[0].mxu1 %v2598_v10  ;;  %v3419_v10 = vld [vmem:[%s4497_s1 + $0x7e8] ss:$16 sps:$4 sm:$0xff]  }
  0xc3   :  { %1751 = vmatpush1.bf16.msra.mxu0 %v3326_v13  ;;  %1915 = vmatpush1.bf16.msra.mxu1 %v3329_v14  ;;  %v3424_v13 = vld [vmem:[%s4499_s3 + $0x40] sm:$0xff]  }
  0xc4   :  { %1752 = vmatprep.subr.bf16.mxu0 %v3334_v11  ;;  %1916 = vmatprep.subr.bf16.mxu1 %v3337_v15  ;;  %v3425_v14 = vld [vmem:[%s4499_s3 + $0xc0] sm:$0xff]   ;;  %v2600_v11 = vcombine.low %v4127_v12, %v4127_v12  ;;  %v3429_v12 = vld [vmem:[%s4499_s3 + $0xc8] sm:$0xff]  }
  0xc5   :  { %1782 = vmatprep.mubr.bf16.mxu0 %v2601_v18  ;;  %1946 = vmatprep.mubr.bf16.mxu1 %v2601_v18  ;;  %v3426_v15 = vld [vmem:[%s4499_s3] sm:$0xff]   ;;  %v3430_v18 = vld [vmem:[%s4499_s3 + $0x8] sm:$0xff]  }
  0xc7   :  { %1753 = vmatpush1.bf16.msra.mxu0 %v3332_v16  ;;  %1917 = vmatpush1.bf16.msra.mxu1 %v3335_v17  ;;  %v3427_v16 = vld [vmem:[%s4499_s3 + $0x80] sm:$0xff]   ;;  %v3428_v17 = vld [vmem:[%s4499_s3 + $0x48] sm:$0xff]  }
  0xc8   :  { %1754 = vmatprep.subr.bf16.mxu0 %v3340_v19  ;;  %1918 = vmatprep.subr.bf16.mxu1 %v3343_v20  ;;  %v3431_v19 = vld [vmem:[%s4499_s3 + $0x88] sm:$0xff]   ;;  %v3432_v20 = vld [vmem:[%s4499_s3 + $0x50] sm:$0xff]  }
  0xcb   :  { %1755 = vmatpush1.bf16.msra.mxu0 %v3338_v21  ;;  %1919 = vmatpush1.bf16.msra.mxu1 %v3341_v22  ;;  %v3433_v21 = vld [vmem:[%s4499_s3 + $0xd0] sm:$0xff]  }
  0xcc   :  { %1756 = vmatprep.subr.bf16.mxu0 %v3346_v23  ;;  %1920 = vmatprep.subr.bf16.mxu1 %v3349_v24  ;;  %v3434_v22 = vld [vmem:[%s4499_s3 + $0x10] sm:$0xff]   ;;  %v3436_v24 = vld [vmem:[%s4499_s3 + $0x58] sm:$0xff]  }
  0xcd   :  { %v3435_v23 = vld [vmem:[%s4499_s3 + $0x90] sm:$0xff]  }
  0xcf   :  { %1757 = vmatpush1.bf16.msra.mxu0 %v3344_v25  ;;  %1921 = vmatpush1.bf16.msra.mxu1 %v3347_v26  ;;  %v3437_v25 = vld [vmem:[%s4499_s3 + $0xd8] sm:$0xff]  }
  0xd0   :  { %1758 = vmatprep.subr.bf16.mxu0 %v3352_v27  ;;  %1922 = vmatprep.subr.bf16.mxu1 %v3355_v28  ;;  %v3438_v26 = vld [vmem:[%s4499_s3 + $0x18] sm:$0xff]   ;;  %v3440_v28 = vld [vmem:[%s4499_s3 + $0x60] sm:$0xff]  }
  0xd1   :  { %v3439_v27 = vld [vmem:[%s4499_s3 + $0x98] sm:$0xff]  }
  0xd3   :  { %1759 = vmatpush1.bf16.msra.mxu0 %v3350_v29  ;;  %1923 = vmatpush1.bf16.msra.mxu1 %v3353_v30  ;;  %v3441_v29 = vld [vmem:[%s4499_s3 + $0xe0] sm:$0xff]  }
  0xd4   :  { %1760 = vmatprep.subr.bf16.mxu0 %v3358_v31  ;;  %1924 = vmatprep.subr.bf16.mxu1 %v3361_v32  ;;  %v3442_v30 = vld [vmem:[%s4499_s3 + $0x20] sm:$0xff]   ;;  %v3444_v32 = vld [vmem:[%s4499_s3 + $0x68] sm:$0xff]  }
  0xd5   :  { %v3443_v31 = vld [vmem:[%s4499_s3 + $0xa0] sm:$0xff]  }
  0xd7   :  { %1761 = vmatpush1.bf16.msra.mxu0 %v3356_v33  ;;  %1925 = vmatpush1.bf16.msra.mxu1 %v3359_v34  ;;  %v3445_v33 = vld [vmem:[%s4499_s3 + $0xe8] sm:$0xff]  }
  0xd8   :  { %1762 = vmatprep.subr.bf16.mxu0 %v3364_v35  ;;  %1926 = vmatprep.subr.bf16.mxu1 %v3367_v36  ;;  %v3446_v34 = vld [vmem:[%s4499_s3 + $0x28] sm:$0xff]   ;;  %v3448_v36 = vld [vmem:[%s4499_s3 + $0x70] sm:$0xff]  }
  0xd9   :  { %v3447_v35 = vld [vmem:[%s4499_s3 + $0xa8] sm:$0xff]  }
  0xdb   :  { %1763 = vmatpush1.bf16.msra.mxu0 %v3362_v37  ;;  %1927 = vmatpush1.bf16.msra.mxu1 %v3365_v38  ;;  %v3449_v37 = vld [vmem:[%s4499_s3 + $0xf0] sm:$0xff]  }
  0xdc   :  { %1764 = vmatprep.subr.bf16.mxu0 %v3370_v39  ;;  %1928 = vmatprep.subr.bf16.mxu1 %v3373_v40  ;;  %v3450_v38 = vld [vmem:[%s4499_s3 + $0x30] sm:$0xff]   ;;  %v3452_v40 = vld [vmem:[%s4499_s3 + $0x78] sm:$0xff]  }
  0xdd   :  { %v3451_v39 = vld [vmem:[%s4499_s3 + $0xb0] sm:$0xff]  }
  0xdf   :  { %1765 = vmatpush1.bf16.msra.mxu0 %v3368_v41  ;;  %1929 = vmatpush1.bf16.msra.mxu1 %v3371_v42  ;;  %v3453_v41 = vld [vmem:[%s4499_s3 + $0xf8] sm:$0xff]  }
  0xe0   :  { %1766 = vmatprep.subr.bf16.mxu0 %v3376_v43  ;;  %1930 = vmatprep.subr.bf16.mxu1 %v3379_v44  ;;  %v3454_v42 = vld [vmem:[%s4499_s3 + $0x38] sm:$0xff]   ;;  %v3468_v44 = vmov 0.0  }
  0xe1   :  { %v3455_v43 = vld [vmem:[%s4499_s3 + $0xb8] sm:$0xff]  }
  0xe3   :  { %1767 = vmatpush1.bf16.msra.mxu0 %v3374_v45  ;;  %1931 = vmatpush1.bf16.msra.mxu1 %v3377_v46  ;;  %v299_v45 = vlaneseq }
  0xe4   :  { %1768 = vmatprep.subr.bf16.mxu0 %v3382_v47  ;;  %1932 = vmatprep.subr.bf16.mxu1 %v3385_v48 }
  0xe5   :  { %v300_v46 = vshrl.u32 %v299_v45, 7 }
  0xe7   :  { %1769 = vmatpush1.bf16.msra.mxu0 %v3380_v49  ;;  %1933 = vmatpush1.bf16.msra.mxu1 %v3383_v50  ;;  %v301_v47 = vsub.s32 0, %v300_v46  ;;  %v309_v48 = vsub.s32 2, %v300_v46  ;;  %v293_v49 = vld [vmem:[%s4501_s2] ss:$4 sm:$0xf]  ;;  %v305_v50 = vsub.s32 1, %v300_v46 }
  0xe8   :  { %1770 = vmatprep.subr.bf16.mxu0 %v3388_v51  ;;  %1934 = vmatprep.subr.bf16.mxu1 %v3391_v52  ;;  %v313_v51 = vsub.s32 3, %v300_v46 }
  0xe9   :  { %v302_v52 = vrot.slane %v293_v49, %v301_v47 }
  0xeb   :  { %1771 = vmatpush1.bf16.msra.mxu0 %v3386_v53  ;;  %1935 = vmatpush1.bf16.msra.mxu1 %v3389_v54  ;;  %v310_v53 = vrot.slane %v293_v49, %v309_v48  ;;  %v2592_v54 = vld [vmem:[%s4501_s2 + $0x1] ss:$4 sm:$0xf] }
  0xec   :  { %1772 = vmatprep.subr.bf16.mxu0 %v3394_v55  ;;  %1936 = vmatprep.subr.bf16.mxu1 %v3397_v56  ;;  %v306_v55 = vrot.slane %v293_v49, %v305_v50  ;;  %v314_v56 = vrot.slane %v293_v49, %v313_v51 }
  0xef   :  { %1773 = vmatpush1.bf16.msra.mxu0 %v3392_v57  ;;  %1937 = vmatpush1.bf16.msra.mxu1 %v3395_v58  ;;  %v2593_v57 = vld [vmem:[%s4501_s2 + $0x2] ss:$4 sm:$0xf] }
  0xf0   :  { %1774 = vmatprep.subr.bf16.mxu0 %v3400_v59  ;;  %1938 = vmatprep.subr.bf16.mxu1 %v3403_v60 }
  0xf3   :  { %1775 = vmatpush1.bf16.msra.mxu0 %v3398_v61  ;;  %1939 = vmatpush1.bf16.msra.mxu1 %v3401_v62  ;;  %v1963_v61 = vrot.slane %v2592_v54, %v301_v47 }
  0xf4   :  { %1776 = vmatprep.subr.bf16.mxu0 %v3406_v63  ;;  %1940 = vmatprep.subr.bf16.mxu1 %v3409_v0  ;;  %v1971_v63 = vrot.slane %v2592_v54, %v309_v48 }
  0xf7   :  { %1777 = vmatpush1.bf16.msra.mxu0 %v3404_v1  ;;  %1941 = vmatpush1.bf16.msra.mxu1 %v3407_v2 }
  0xf8   :  { %1778 = vmatprep.subr.bf16.mxu0 %v3412_v3  ;;  %1942 = vmatprep.subr.bf16.mxu1 %v3415_v4  ;;  %v1967_v3 = vrot.slane %v2592_v54, %v305_v50 }
  0xfb   :  { %1779 = vmatpush1.bf16.msra.mxu0 %v3410_v5  ;;  %1943 = vmatpush1.bf16.msra.mxu1 %v3413_v6  ;;  %v1975_v5 = vrot.slane %v2592_v54, %v313_v51 }
  0xfc   :  { %1780 = vmatprep.subr.bf16.mxu0 %v3418_v7  ;;  %1944 = vmatprep.subr.bf16.mxu1 %v3421_v8 }
  0xff   :  { %1781 = vmatpush1.bf16.msra.mxu0 %v3416_v9  ;;  %1945 = vmatpush1.bf16.msra.mxu1 %v3419_v10  ;;  %v1988_v9 = vrot.slane %v2593_v57, %v301_v47 }
 0x100   :  { %2906 = vmatprep.subr.bf16.mxu0 %v3424_v13  ;;  %2928 = vmatprep.subr.bf16.mxu1 %v3425_v14  ;;  %v1996_v13 = vrot.slane %v2593_v57, %v309_v48 }
 0x102   :  { %1783 = vmatmul.mubr.bf16.vlgmr.msra.gmra.mrb[0].mxu0 %v2600_v11  ;;  %1947 = vmatmul.mubr.bf16.vlgmr.msra.gmra.mrb[0].mxu1 %v2600_v11 }
 0x103   :  { %2907 = vmatpush3.bf16.msra.mxu0 %v3426_v15  ;;  %2929 = vmatpush3.bf16.msra.mxu1 %v3427_v16 }
 0x104   :  { %2908 = vmatprep.subr.bf16.mxu0 %v3428_v17  ;;  %2930 = vmatprep.subr.bf16.mxu1 %v3429_v12  ;;  %v1992_v17 = vrot.slane %v2593_v57, %v305_v50  ;;  %v2000_v12 = vrot.slane %v2593_v57, %v313_v51  ;;  %v2490_v57 = vld [vmem:[%s4503_s7] sm:$0xff] }
 0x107   :  { %2909 = vmatpush3.bf16.msra.mxu0 %v3430_v18  ;;  %2931 = vmatpush3.bf16.msra.mxu1 %v3431_v19 }
 0x108   :  { %2910 = vmatprep.subr.bf16.mxu0 %v3432_v20  ;;  %2932 = vmatprep.subr.bf16.mxu1 %v3433_v21 }
 0x10b   :  { %2911 = vmatpush3.bf16.msra.mxu0 %v3434_v22  ;;  %2933 = vmatpush3.bf16.msra.mxu1 %v3435_v23 }
 0x10c   :  { %2912 = vmatprep.subr.bf16.mxu0 %v3436_v24  ;;  %2934 = vmatprep.subr.bf16.mxu1 %v3437_v25 }
 0x10f   :  { %2913 = vmatpush3.bf16.msra.mxu0 %v3438_v26  ;;  %2935 = vmatpush3.bf16.msra.mxu1 %v3439_v27 }
 0x110   :  { %2914 = vmatprep.subr.bf16.mxu0 %v3440_v28  ;;  %2936 = vmatprep.subr.bf16.mxu1 %v3441_v29  ;;  %v3456_v28 = vld [vmem:[%s4500_s5] sm:$0xff]  }
 0x113   :  { %2915 = vmatpush3.bf16.msra.mxu0 %v3442_v30  ;;  %2937 = vmatpush3.bf16.msra.mxu1 %v3443_v31  ;;  %v3457_v31 = vld [vmem:[%s4500_s5 + $0x8] sm:$0xff]  }
 0x114   :  { %2916 = vmatprep.subr.bf16.mxu0 %v3444_v32  ;;  %2938 = vmatprep.subr.bf16.mxu1 %v3445_v33  ;;  %v3458_v32 = vld [vmem:[%s4500_s5 + $0x10] sm:$0xff]   ;;  %v3459_v33 = vld [vmem:[%s4500_s5 + $0x18] sm:$0xff]  }
 0x117   :  { %2917 = vmatpush3.bf16.msra.mxu0 %v3446_v34  ;;  %2939 = vmatpush3.bf16.msra.mxu1 %v3447_v35  ;;  %v3460_v34 = vld [vmem:[%s4500_s5 + $0x20] sm:$0xff]   ;;  %v3461_v35 = vld [vmem:[%s4500_s5 + $0x28] sm:$0xff]  }
 0x118   :  { %2918 = vmatprep.subr.bf16.mxu0 %v3448_v36  ;;  %2940 = vmatprep.subr.bf16.mxu1 %v3449_v37  ;;  %v3462_v36 = vld [vmem:[%s4500_s5 + $0x30] sm:$0xff]   ;;  %v3463_v37 = vld [vmem:[%s4500_s5 + $0x38] sm:$0xff]  }
 0x11b   :  { %2919 = vmatpush3.bf16.msra.mxu0 %v3450_v38  ;;  %2941 = vmatpush3.bf16.msra.mxu1 %v3451_v39 }
 0x11c   :  { %2920 = vmatprep.subr.bf16.mxu0 %v3452_v40  ;;  %2942 = vmatprep.subr.bf16.mxu1 %v3453_v41  ;;  %v2858_v40 = vld [vmem:[%s4502_s4] ss:$0 sm:$0xff] }
 0x11f   :  { %2921 = vmatpush3.bf16.msra.mxu0 %v3454_v42  ;;  %2943 = vmatpush3.bf16.msra.mxu1 %v3455_v43 }
 0x120   :  { %2964 = vmatprep.subr.bf16.mxu0 %v3468_v44 }
 0x1d5   :  { %v1784_v58 = vpop.f32.mrb[0].mxu0  ;;  %v1948_v59 = vpop.f32.mrb[0].mxu1 }
 0x1d6   :  { %v3001_v60 = vadd.f32 %v1784_v58, %v302_v52  ;;  %v3003_v62 = vadd.f32 %v1948_v59, %v310_v53  ;;  %v1786_v0 = vpop.f32.mrb[1].mxu0  ;;  %v1950_v1 = vpop.f32.mrb[1].mxu1  ;;  %v2892_v53 = vld [vmem:[%s4502_s4 + $0x2] ss:$0 sm:$0xff]  ;;  %v2491_v58 = vld [vmem:[%s4503_s7 + $0x8] sm:$0xff] }
 0x1d7   :  { %v3002_v2 = vadd.f32 %v1786_v0, %v306_v55  ;;  %v3004_v4 = vadd.f32 %v1950_v1, %v314_v56  ;;  %v1788_v6 = vpop.f32.mrb[2].mxu0  ;;  %v1952_v7 = vpop.f32.mrb[2].mxu1  ;;  %v2996_v59 = vpack.c.bf16 %v2491_v58, %v2490_v57  ;;  %v2893_v0 = vld [vmem:[%s4504_s6] ss:$0 sm:$0xff] }
 0x1d8   :  { %v1955_v8 = vmax.f32 %v3001_v60, 0.0  ;;  %v1957_v10 = vmax.f32 %v3003_v62, 0.0  ;;  %v1789_v14 = vpop.f32.mrb[3].mxu0  ;;  %v1953_v11 = vpop.f32.mrb[3].mxu1  ;;  %v3470_v60 = vmov 0.0|0.0   ;;  %v2493_v62 = vld [vmem:[%s4503_s7 + $0x18] sm:$0xff] }
 0x1d9   :  { %v1956_v15 = vmax.f32 %v3002_v2, 0.0  ;;  %v1958_v16 = vmax.f32 %v3004_v4, 0.0  ;;  %2995 = vmatprep.subr.bf16.mxu1 %v3470_v60  ;;  %v2902_v4 = vld [vmem:[%s4504_s6 + $0x1] ss:$0 sm:$0xff] }
 0x1da   :  { %v1980_v18 = vmul.f32 %v1963_v61, %v1955_v8  ;;  %v1982_v19 = vmul.f32 %v1971_v63, %v1957_v10  ;;  %v2492_v61 = vld [vmem:[%s4503_s7 + $0x10] sm:$0xff]  ;;  %v2903_v8 = vld [vmem:[%s4504_s6 + $0x2] ss:$0 sm:$0xff] }
 0x1db   :  { %v1981_v20 = vmul.f32 %v1967_v3, %v1956_v15  ;;  %v1983_v21 = vmul.f32 %v1975_v5, %v1958_v16  ;;  %v2999_v63 = vpack.c.bf16 %v2493_v62, %v2492_v61 }
 0x1dc   :  { %v2005_v22 = vadd.f32 %v1988_v9, %v1980_v18  ;;  %v2007_v23 = vadd.f32 %v1996_v13, %v1982_v19  ;;  %v2904_v13 = vld [vmem:[%s4505_s8] ss:$0 sm:$0xff] }
 0x1dd   :  { %v2006_v24 = vadd.f32 %v1992_v17, %v1981_v20  ;;  %v2008_v25 = vadd.f32 %v2000_v12, %v1983_v21 }
 0x1de   :  { %v2009_v29 = vpack.c.bf16 %v2005_v22, %v2005_v22  ;;  %v2011_v30 = vpack.c.bf16 %v2007_v23, %v2007_v23 }
 0x1df   :  { %v2010_v26 = vpack.c.bf16 %v2006_v24, %v2006_v24  ;;  %v2012_v27 = vpack.c.bf16 %v2008_v25, %v2008_v25 }
 0x1e1   :  { %2308 = vmatprep.mubr.bf16.mxu0 %v2010_v26  ;;  %2348 = vmatprep.mubr.bf16.mxu1 %v2012_v27 }
 0x1e2   :  { %2309 = vmatmul.mubr.bf16.vlgmr.msra.gmra.mrb[4].mxu0 %v2009_v29  ;;  %2349 = vmatmul.mubr.bf16.vlgmr.msra.gmra.mrb[4].mxu1 %v2011_v30 }
 0x1e3   :  { %2965 = vmatpush3.bf16.msra.mxu0 %v3456_v28  ;;  %2980 = vmatprep.mubr.msk.bf16.mxu0 %vm3469_vm0, %v3468_v44 }
 0x1e4   :  { %2966 = vmatprep.subr.bf16.mxu0 %v3468_v44  ;;  %2992 = vmatprep.mubr.msk.f32.mxu1 %vm3469_vm0, %v3468_v44 }
 0x1e5   :  { %2997 = vmatpush3.bf16.msra.mxu1 %v2996_v59 }
 0x1e6   :  { %2998 = vmatprep.subr.bf16.mxu1 %v3470_v60 }
 0x1e7   :  { %2967 = vmatpush3.bf16.msra.mxu0 %v3457_v31 }
 0x1e8   :  { %2968 = vmatprep.subr.bf16.mxu0 %v3468_v44 }
 0x1e9   :  { %3000 = vmatpush3.bf16.msra.mxu1 %v2999_v63 }
 0x1eb   :  { %2969 = vmatpush3.bf16.msra.mxu0 %v3458_v32 }
 0x1ec   :  { %2970 = vmatprep.subr.bf16.mxu0 %v3468_v44 }
 0x1ef   :  { %2971 = vmatpush3.bf16.msra.mxu0 %v3459_v33 }
 0x1f0   :  { %2972 = vmatprep.subr.bf16.mxu0 %v3468_v44 }
 0x1f3   :  { %2973 = vmatpush3.bf16.msra.mxu0 %v3460_v34 }
 0x1f4   :  { %2974 = vmatprep.subr.bf16.mxu0 %v3468_v44 }
 0x1f7   :  { %2975 = vmatpush3.bf16.msra.mxu0 %v3461_v35 }
 0x1f8   :  { %2976 = vmatprep.subr.bf16.mxu0 %v3468_v44 }
 0x1fb   :  { %2977 = vmatpush3.bf16.msra.mxu0 %v3462_v36 }
 0x1fc   :  { %2978 = vmatprep.subr.bf16.mxu0 %v3468_v44  ;;  %v2891_v44 = vld [vmem:[%s4502_s4 + $0x1] ss:$0 sm:$0xff] }
 0x1ff   :  { %2979 = vmatpush3.bf16.msra.mxu0 %v3463_v37 }
 0x2b5   :  { %v2922_v38 = vpop.f32.mrb[4].mxu0  ;;  %v2944_v39 = vpop.f32.mrb[4].mxu1 }
 0x2b6   :  { %v2923_v41 = vpop.f32.mrb[5].mxu0  ;;  %v2945_v42 = vpop.f32.mrb[5].mxu1 }
 0x2b7   :  { %v2924_v43 = vadd.f32 %v2923_v41, %v2922_v38  ;;  %v2946_v45 = vadd.f32 %v2945_v42, %v2944_v39  ;;  %v2925_v46 = vpop.f32.mrb[6].mxu0  ;;  %v2947_v47 = vpop.f32.mrb[6].mxu1 }
 0x2b8   :  { %v2926_v48 = vpop.f32.mrb[7].mxu0  ;;  %v2948_v49 = vpop.f32.mrb[7].mxu1 }
 0x2b9   :  { %v2311_v50 = vadd.f32 %v2924_v43, %v2858_v40 }
 0x2bb   :  { %v2351_v51 = vadd.f32 %v2946_v45, %v2311_v50 }
 0x2bd   :  { %v2356_v52 = vmax.f32 %v2351_v51, 0.0 }
 0x2bf   :  { %v2361_v54 = vmul.f32 %v2891_v44, %v2356_v52 }
 0x2c1   :  { %v2366_v55 = vadd.f32 %v2892_v53, %v2361_v54 }
 0x2c3   :  { %v2367_v56 = vpack.c.bf16 %v2366_v55, %v2366_v55 }
 0x2c5   :  { %2981 = vmatmul.mubr.bf16.vlgmr.msra.gmra.mrb[8].mxu0 %v2367_v56 }
 0x398   :  { %v2473_v1 = vpop.f32.mrb[8].mxu0 }
 0x399   :  { %v2474_v2 = vadd.f32 %v2893_v0, %v2473_v1  ;;  %v2982_v3 = vpop.f32.mrb[9].mxu0 }
 0x39a   :  { %v2476_v5 = vpop.f32.mrb[10].mxu0 }
 0x39b   :  { %v2479_v6 = vmax.f32 %v2474_v2, 0.0  ;;  %v2983_v7 = vpop.f32.mrb[11].mxu0 }
 0x39d   :  { %v2484_v9 = vmul.f32 %v2902_v4, %v2479_v6 }
 0x39f   :  { %v2489_v10 = vadd.f32 %v2903_v8, %v2484_v9 }
 0x3a1   :  { %2993 = vmatmul.mubr.msk.f32.vlgmr.msra.gmra.mrb[8].mxu1 %vm2501_vm1, %v2489_v10 }
 0x474   :  { %v2571_v14 = vpop.f32.mrb[8].mxu1 }
 0x475   :  { %v2572_v11 = vadd.f32 %v2904_v13, %v2571_v14  ;;  %v2994_v15 = vpop.f32.mrb[9].mxu1 }
 0x477   :  { %v2576_v16 = vsel %vm2575_vm2, %v2572_v11, -inf }
 0x478   :  { %2577 = vmax.xlane.f32.xlu0 %v2576_v16 }
 0x505   :  { %v2578_v17 = vpop.xlane.xlu0 %2577 }
 0x506   :  { %v2579_v12 = vsub.f32 %v2572_v11, %v2578_v17 }
 0x508   :  { %v2580_v18 = vmul.f32 1.442695, %v2579_v12 }
 0x50a   :  { %3464 = vpow2.f32 %v2580_v18 }
 0x514   :  { %v3465_v19 = vpop.eup %3464 }
 0x515   :  { %v2582_v20 = vsel %vm2575_vm2, %v3465_v19, 0.0 }
 0x516   :  { %2583 = vadd.xlane.f32.xlu0 %v2582_v20 }
 0x5a3   :  { %v2584_v21 = vpop.xlane.xlu0 %2583 }
 0x5a4   :  { %3466 = vrcp.f32 %v2584_v21 }
 0x5ae   :  { %v3467_v22 = vpop.eup %3466 }
 0x5af   :  { %v2586_v23 = vmul.f32 %v3467_v22, %v3465_v19 }
 0x5b1   :  { %2587 = vst.msk [vmem:[%s4506_s9] sm:$0xff] %vm2575_vm2, %v2586_v23 }

// kernel: cnn_model_forward.2
= control target key start
LH: loop header
LB: loop body
LE: loop exit
PB: predicated region body
PF: predicated region fallthrough
CT: control target
= control target key end

     0   :  { %s9370_s21 = smov 0   ;;  %s11843_s0 = inlined_call_operand.vmem [shape: f32[2,4422,1], index: 0, kind: input, shape index: {}]   ;;  %s11844_s1 = inlined_call_operand.vmem [shape: f32[9,1,128], index: 1, kind: input, shape index: {}]   ;;  %s11845_s2 = inlined_call_operand.vmem [shape: bf16[9,128,128], index: 2, kind: input, shape index: {}]   ;;  %s11846_s3 = inlined_call_operand.vmem [shape: bf16[9,128,128], index: 3, kind: input, shape index: {}]   ;;  %s11847_s4 = inlined_call_operand.vmem [shape: bf16[9,128,128], index: 4, kind: input, shape index: {}]   ;;  %s11848_s5 = inlined_call_operand.vmem [shape: f32[12,128], index: 5, kind: input, shape index: {}]   ;;  %s11849_s6 = inlined_call_operand.vmem [shape: f32[2,16,128], index: 6, kind: output, shape index: {}]  }
   0x1 LB: > { %s6960_s22 = sadd.s32 4294967295, %s9310_s21   ;;  %p6964_p0 = scmp.ge.s32.totalorder %s9310_s21, 1  ;;  %s9310_s21 = sphi %s9370_s21, %s16_s21  }
   0x2   : > { %p212_p1 = scmp.lt.s32.totalorder %s9310_s21, 3 }
   0x4   : > { %p213_p2 = pnand %p6964_p0, %p212_p1 }
   0x6   : > { %216 = sbr.rel (%p213_p2) target bundleno = 1943 (0x797), region = 44 }
   0xd   : > { %p9380_p3 = scmp.lt.s32.totalorder %s6960_s22, 1  ;;  %v9387_v0 = vld [vmem:[%s11848_s5] ss:$0 sm:$0xff]  ;;  %v9392_v1 = vld [vmem:[%s11848_s5 + $0x1] ss:$0 sm:$0xff]  ;;  %v9328_v2 = vmov 0.0  }
   0xe   : > { %11854 = vst [vmem:[#allocation5_spill] sm:$0xff] %v9387_v0  ;;  %11855 = vst [vmem:[#allocation6_spill] sm:$0xff] %v9392_v1  ;;  %v9603_v3 = vld [vmem:[%s11848_s5 + $0x2] ss:$0 sm:$0xff]  ;;  %s9619_s14 = smov 0  }
   0xf   : > { %253 = vst [vmem:[#allocation2] sm:$0xff] %v9328_v2  ;;  %254 = vst [vmem:[#allocation2 + $0x8] sm:$0xff] %v9328_v2  ;;  %s11901_s22 = smov (!%p9380_p3, %s6960_s22), 1 }
  0x10   : > { %255 = vst [vmem:[#allocation2 + $0x10] sm:$0xff] %v9328_v2  ;;  %256 = vst [vmem:[#allocation2 + $0x18] sm:$0xff] %v9328_v2  ;;  %s9022_s30 = smul.u32 4424, %s11901_s22  ;;  %s7927_s7 = sshll.u32 %s11901_s22, 4 }
  0x11   : > { %257 = vst [vmem:[#allocation2 + $0x20] sm:$0xff] %v9328_v2  ;;  %258 = vst [vmem:[#allocation2 + $0x28] sm:$0xff] %v9328_v2  ;;  %s9612_s10 = scalar_lea.vmem %s11849_s6, %s7927_s7 }
  0x12   : > { %259 = vst [vmem:[#allocation2 + $0x30] sm:$0xff] %v9328_v2  ;;  %260 = vst [vmem:[#allocation2 + $0x38] sm:$0xff] %v9328_v2  ;;  %s9617_s13 = scalar_lea.vmem %s11843_s0, %s9022_s30 }
  0x13   : > { %261 = vst [vmem:[#allocation2 + $0x40] sm:$0xff] %v9328_v2  ;;  %262 = vst [vmem:[#allocation2 + $0x48] sm:$0xff] %v9328_v2 }
  0x14   : > { %263 = vst [vmem:[#allocation2 + $0x50] sm:$0xff] %v9328_v2  ;;  %264 = vst [vmem:[#allocation2 + $0x58] sm:$0xff] %v9328_v2 }
  0x15   : > { %265 = vst [vmem:[#allocation2 + $0x60] sm:$0xff] %v9328_v2  ;;  %266 = vst [vmem:[#allocation2 + $0x68] sm:$0xff] %v9328_v2 }
  0x16   : > { %267 = vst [vmem:[#allocation2 + $0x70] sm:$0xff] %v9328_v2  ;;  %268 = vst [vmem:[#allocation2 + $0x78] sm:$0xff] %v9328_v2 }
  0x17   : > { %269 = vst [vmem:[#allocation2 + $0x80] sm:$0xff] %v9328_v2  ;;  %270 = vst [vmem:[#allocation2 + $0x88] sm:$0xff] %v9328_v2 }
  0x18   : > { %271 = vst [vmem:[#allocation2 + $0x90] sm:$0xff] %v9328_v2  ;;  %272 = vst [vmem:[#allocation2 + $0x98] sm:$0xff] %v9328_v2 }
  0x19   : > { %273 = vst [vmem:[#allocation2 + $0xa0] sm:$0xff] %v9328_v2  ;;  %274 = vst [vmem:[#allocation2 + $0xa8] sm:$0xff] %v9328_v2 }
  0x1a   : > { %275 = vst [vmem:[#allocation2 + $0xb0] sm:$0xff] %v9328_v2  ;;  %276 = vst [vmem:[#allocation2 + $0xb8] sm:$0xff] %v9328_v2 }
  0x1b   : > { %277 = vst [vmem:[#allocation2 + $0xc0] sm:$0xff] %v9328_v2  ;;  %278 = vst [vmem:[#allocation2 + $0xc8] sm:$0xff] %v9328_v2 }
  0x1c   : > { %279 = vst [vmem:[#allocation2 + $0xd0] sm:$0xff] %v9328_v2  ;;  %280 = vst [vmem:[#allocation2 + $0xd8] sm:$0xff] %v9328_v2 }
  0x1d   : > { %281 = vst [vmem:[#allocation2 + $0xe0] sm:$0xff] %v9328_v2  ;;  %282 = vst [vmem:[#allocation2 + $0xe8] sm:$0xff] %v9328_v2 }
  0x1e   : > { %283 = vst [vmem:[#allocation2 + $0xf0] sm:$0xff] %v9328_v2  ;;  %284 = vst [vmem:[#allocation2 + $0xf8] sm:$0xff] %v9328_v2 }
  0x1f   : > { %285 = vst [vmem:[#allocation2 + $0x100] sm:$0xff] %v9328_v2  ;;  %286 = vst [vmem:[#allocation2 + $0x108] sm:$0xff] %v9328_v2 }
  0x20   : > { %287 = vst [vmem:[#allocation2 + $0x110] sm:$0xff] %v9328_v2  ;;  %288 = vst [vmem:[#allocation2 + $0x118] sm:$0xff] %v9328_v2 }
  0x21   : > { %289 = vst [vmem:[#allocation2 + $0x120] sm:$0xff] %v9328_v2  ;;  %290 = vst [vmem:[#allocation2 + $0x128] sm:$0xff] %v9328_v2 }
  0x22   : > { %291 = vst [vmem:[#allocation2 + $0x130] sm:$0xff] %v9328_v2  ;;  %292 = vst [vmem:[#allocation2 + $0x138] sm:$0xff] %v9328_v2 }
  0x23   : > { %293 = vst [vmem:[#allocation2 + $0x140] sm:$0xff] %v9328_v2  ;;  %294 = vst [vmem:[#allocation2 + $0x148] sm:$0xff] %v9328_v2 }
  0x24   : > { %295 = vst [vmem:[#allocation2 + $0x150] sm:$0xff] %v9328_v2  ;;  %296 = vst [vmem:[#allocation2 + $0x158] sm:$0xff] %v9328_v2 }
  0x25   : > { %297 = vst [vmem:[#allocation2 + $0x160] sm:$0xff] %v9328_v2  ;;  %298 = vst [vmem:[#allocation2 + $0x168] sm:$0xff] %v9328_v2 }
  0x26   : > { %299 = vst [vmem:[#allocation2 + $0x170] sm:$0xff] %v9328_v2  ;;  %300 = vst [vmem:[#allocation2 + $0x178] sm:$0xff] %v9328_v2 }
  0x27   : > { %301 = vst [vmem:[#allocation2 + $0x180] sm:$0xff] %v9328_v2  ;;  %302 = vst [vmem:[#allocation2 + $0x188] sm:$0xff] %v9328_v2 }
  0x28   : > { %303 = vst [vmem:[#allocation2 + $0x190] sm:$0xff] %v9328_v2  ;;  %304 = vst [vmem:[#allocation2 + $0x198] sm:$0xff] %v9328_v2 }
  0x29   : > { %305 = vst [vmem:[#allocation2 + $0x1a0] sm:$0xff] %v9328_v2  ;;  %306 = vst [vmem:[#allocation2 + $0x1a8] sm:$0xff] %v9328_v2 }
  0x2a   : > { %307 = vst [vmem:[#allocation2 + $0x1b0] sm:$0xff] %v9328_v2  ;;  %308 = vst [vmem:[#allocation2 + $0x1b8] sm:$0xff] %v9328_v2 }
  0x2b   : > { %309 = vst [vmem:[#allocation2 + $0x1c0] sm:$0xff] %v9328_v2  ;;  %310 = vst [vmem:[#allocation2 + $0x1c8] sm:$0xff] %v9328_v2 }
  0x2c   : > { %311 = vst [vmem:[#allocation2 + $0x1d0] sm:$0xff] %v9328_v2  ;;  %312 = vst [vmem:[#allocation2 + $0x1d8] sm:$0xff] %v9328_v2 }
  0x2d   : > { %313 = vst [vmem:[#allocation2 + $0x1e0] sm:$0xff] %v9328_v2  ;;  %314 = vst [vmem:[#allocation2 + $0x1e8] sm:$0xff] %v9328_v2 }
  0x2e   : > { %315 = vst [vmem:[#allocation2 + $0x1f0] sm:$0xff] %v9328_v2  ;;  %316 = vst [vmem:[#allocation2 + $0x1f8] sm:$0xff] %v9328_v2 }
  0x2f   : > { %317 = vst [vmem:[#allocation2 + $0x200] sm:$0xff] %v9328_v2  ;;  %318 = vst [vmem:[#allocation2 + $0x208] sm:$0xff] %v9328_v2 }
  0x30   : > { %319 = vst [vmem:[#allocation2 + $0x210] sm:$0xff] %v9328_v2  ;;  %320 = vst [vmem:[#allocation2 + $0x218] sm:$0xff] %v9328_v2 }
  0x31   : > { %321 = vst [vmem:[#allocation2 + $0x220] sm:$0xff] %v9328_v2  ;;  %322 = vst [vmem:[#allocation2 + $0x228] sm:$0xff] %v9328_v2 }
  0x32   : > { %323 = vst [vmem:[#allocation2 + $0x230] sm:$0xff] %v9328_v2  ;;  %324 = vst [vmem:[#allocation2 + $0x238] sm:$0xff] %v9328_v2 }
  0x33   : > { %325 = vst [vmem:[#allocation2 + $0x240] sm:$0xff] %v9328_v2  ;;  %326 = vst [vmem:[#allocation2 + $0x248] sm:$0xff] %v9328_v2 }
  0x34   : > { %327 = vst [vmem:[#allocation2 + $0x250] sm:$0xff] %v9328_v2  ;;  %328 = vst [vmem:[#allocation2 + $0x258] sm:$0xff] %v9328_v2 }
  0x35   : > { %329 = vst [vmem:[#allocation2 + $0x260] sm:$0xff] %v9328_v2  ;;  %330 = vst [vmem:[#allocation2 + $0x268] sm:$0xff] %v9328_v2 }
  0x36   : > { %331 = vst [vmem:[#allocation2 + $0x270] sm:$0xff] %v9328_v2  ;;  %332 = vst [vmem:[#allocation2 + $0x278] sm:$0xff] %v9328_v2 }
  0x37   : > { %333 = vst [vmem:[#allocation2 + $0x280] sm:$0xff] %v9328_v2  ;;  %334 = vst [vmem:[#allocation2 + $0x288] sm:$0xff] %v9328_v2 }
  0x38   : > { %335 = vst [vmem:[#allocation2 + $0x290] sm:$0xff] %v9328_v2  ;;  %336 = vst [vmem:[#allocation2 + $0x298] sm:$0xff] %v9328_v2 }
  0x39   : > { %337 = vst [vmem:[#allocation2 + $0x2a0] sm:$0xff] %v9328_v2  ;;  %338 = vst [vmem:[#allocation2 + $0x2a8] sm:$0xff] %v9328_v2 }
  0x3a   : > { %339 = vst [vmem:[#allocation2 + $0x2b0] sm:$0xff] %v9328_v2  ;;  %340 = vst [vmem:[#allocation2 + $0x2b8] sm:$0xff] %v9328_v2 }
  0x3b   : > { %341 = vst [vmem:[#allocation2 + $0x2c0] sm:$0xff] %v9328_v2  ;;  %342 = vst [vmem:[#allocation2 + $0x2c8] sm:$0xff] %v9328_v2 }
  0x3c   : > { %343 = vst [vmem:[#allocation2 + $0x2d0] sm:$0xff] %v9328_v2  ;;  %344 = vst [vmem:[#allocation2 + $0x2d8] sm:$0xff] %v9328_v2 }
  0x3d   : > { %345 = vst [vmem:[#allocation2 + $0x2e0] sm:$0xff] %v9328_v2  ;;  %346 = vst [vmem:[#allocation2 + $0x2e8] sm:$0xff] %v9328_v2 }
  0x3e   : > { %347 = vst [vmem:[#allocation2 + $0x2f0] sm:$0xff] %v9328_v2  ;;  %348 = vst [vmem:[#allocation2 + $0x2f8] sm:$0xff] %v9328_v2 }
  0x3f   : > { %349 = vst [vmem:[#allocation2 + $0x300] sm:$0xff] %v9328_v2  ;;  %350 = vst [vmem:[#allocation2 + $0x308] sm:$0xff] %v9328_v2 }
  0x40   : > { %351 = vst [vmem:[#allocation2 + $0x310] sm:$0xff] %v9328_v2  ;;  %352 = vst [vmem:[#allocation2 + $0x318] sm:$0xff] %v9328_v2 }
  0x41   : > { %353 = vst [vmem:[#allocation2 + $0x320] sm:$0xff] %v9328_v2  ;;  %354 = vst [vmem:[#allocation2 + $0x328] sm:$0xff] %v9328_v2 }
  0x42   : > { %355 = vst [vmem:[#allocation2 + $0x330] sm:$0xff] %v9328_v2  ;;  %356 = vst [vmem:[#allocation2 + $0x338] sm:$0xff] %v9328_v2 }
  0x43   : > { %357 = vst [vmem:[#allocation2 + $0x340] sm:$0xff] %v9328_v2  ;;  %358 = vst [vmem:[#allocation2 + $0x348] sm:$0xff] %v9328_v2 }
  0x44   : > { %359 = vst [vmem:[#allocation2 + $0x350] sm:$0xff] %v9328_v2  ;;  %360 = vst [vmem:[#allocation2 + $0x358] sm:$0xff] %v9328_v2 }
  0x45   : > { %361 = vst [vmem:[#allocation2 + $0x360] sm:$0xff] %v9328_v2  ;;  %362 = vst [vmem:[#allocation2 + $0x368] sm:$0xff] %v9328_v2 }
  0x46   : > { %363 = vst [vmem:[#allocation2 + $0x370] sm:$0xff] %v9328_v2  ;;  %364 = vst [vmem:[#allocation2 + $0x378] sm:$0xff] %v9328_v2 }
  0x47   : > { %365 = vst [vmem:[#allocation2 + $0x380] sm:$0xff] %v9328_v2  ;;  %366 = vst [vmem:[#allocation2 + $0x388] sm:$0xff] %v9328_v2 }
  0x48   : > { %367 = vst [vmem:[#allocation2 + $0x390] sm:$0xff] %v9328_v2  ;;  %368 = vst [vmem:[#allocation2 + $0x398] sm:$0xff] %v9328_v2 }
  0x49   : > { %369 = vst [vmem:[#allocation2 + $0x3a0] sm:$0xff] %v9328_v2  ;;  %370 = vst [vmem:[#allocation2 + $0x3a8] sm:$0xff] %v9328_v2 }
  0x4a   : > { %371 = vst [vmem:[#allocation2 + $0x3b0] sm:$0xff] %v9328_v2  ;;  %372 = vst [vmem:[#allocation2 + $0x3b8] sm:$0xff] %v9328_v2 }
  0x4b   : > { %373 = vst [vmem:[#allocation2 + $0x3c0] sm:$0xff] %v9328_v2  ;;  %374 = vst [vmem:[#allocation2 + $0x3c8] sm:$0xff] %v9328_v2 }
  0x4c   : > { %375 = vst [vmem:[#allocation2 + $0x3d0] sm:$0xff] %v9328_v2  ;;  %376 = vst [vmem:[#allocation2 + $0x3d8] sm:$0xff] %v9328_v2 }
  0x4d   : > { %377 = vst [vmem:[#allocation2 + $0x3e0] sm:$0xff] %v9328_v2  ;;  %378 = vst [vmem:[#allocation2 + $0x3e8] sm:$0xff] %v9328_v2 }
  0x4e   : > { %379 = vst [vmem:[#allocation2 + $0x3f0] sm:$0xff] %v9328_v2  ;;  %380 = vst [vmem:[#allocation2 + $0x3f8] sm:$0xff] %v9328_v2 }
  0x4f   : > { %381 = vst [vmem:[#allocation2 + $0x400] sm:$0xff] %v9328_v2  ;;  %382 = vst [vmem:[#allocation2 + $0x408] sm:$0xff] %v9328_v2 }
  0x50   : > { %383 = vst [vmem:[#allocation2 + $0x410] sm:$0xff] %v9328_v2  ;;  %384 = vst [vmem:[#allocation2 + $0x418] sm:$0xff] %v9328_v2 }
  0x51   : > { %385 = vst [vmem:[#allocation2 + $0x420] sm:$0xff] %v9328_v2  ;;  %386 = vst [vmem:[#allocation2 + $0x428] sm:$0xff] %v9328_v2 }
  0x52   : > { %387 = vst [vmem:[#allocation2 + $0x430] sm:$0xff] %v9328_v2  ;;  %388 = vst [vmem:[#allocation2 + $0x438] sm:$0xff] %v9328_v2 }
  0x53   : > { %389 = vst [vmem:[#allocation2 + $0x440] sm:$0xff] %v9328_v2  ;;  %390 = vst [vmem:[#allocation2 + $0x448] sm:$0xff] %v9328_v2 }
  0x54   : > { %391 = vst [vmem:[#allocation2 + $0x450] sm:$0xff] %v9328_v2  ;;  %392 = vst [vmem:[#allocation2 + $0x458] sm:$0xff] %v9328_v2 }
  0x55   : > { %393 = vst [vmem:[#allocation2 + $0x460] sm:$0xff] %v9328_v2  ;;  %394 = vst [vmem:[#allocation2 + $0x468] sm:$0xff] %v9328_v2 }
  0x56   : > { %395 = vst [vmem:[#allocation2 + $0x470] sm:$0xff] %v9328_v2  ;;  %396 = vst [vmem:[#allocation2 + $0x478] sm:$0xff] %v9328_v2 }
  0x57   : > { %397 = vst [vmem:[#allocation2 + $0x480] sm:$0xff] %v9328_v2  ;;  %398 = vst [vmem:[#allocation2 + $0x488] sm:$0xff] %v9328_v2 }
  0x58   : > { %399 = vst [vmem:[#allocation2 + $0x490] sm:$0xff] %v9328_v2  ;;  %400 = vst [vmem:[#allocation2 + $0x498] sm:$0xff] %v9328_v2 }
  0x59   : > { %401 = vst [vmem:[#allocation2 + $0x4a0] sm:$0x3f] %v9328_v2  ;;  %402 = vst [vmem:[#allocation3] sm:$0xff] %v9328_v2 }
  0x5a   : > { %403 = vst [vmem:[#allocation3 + $0x8] sm:$0xff] %v9328_v2  ;;  %404 = vst [vmem:[#allocation3 + $0x10] sm:$0xff] %v9328_v2 }
  0x5b   : > { %405 = vst [vmem:[#allocation3 + $0x18] sm:$0xff] %v9328_v2  ;;  %406 = vst [vmem:[#allocation3 + $0x20] sm:$0xff] %v9328_v2 }
  0x5c   : > { %407 = vst [vmem:[#allocation3 + $0x28] sm:$0xff] %v9328_v2  ;;  %408 = vst [vmem:[#allocation3 + $0x30] sm:$0xff] %v9328_v2 }
  0x5d   : > { %409 = vst [vmem:[#allocation3 + $0x38] sm:$0xff] %v9328_v2  ;;  %410 = vst [vmem:[#allocation3 + $0x40] sm:$0xff] %v9328_v2 }
  0x5e   : > { %411 = vst [vmem:[#allocation3 + $0x48] sm:$0xff] %v9328_v2  ;;  %412 = vst [vmem:[#allocation3 + $0x50] sm:$0xff] %v9328_v2 }
  0x5f   : > { %413 = vst [vmem:[#allocation3 + $0x58] sm:$0xff] %v9328_v2  ;;  %414 = vst [vmem:[#allocation3 + $0x60] sm:$0xff] %v9328_v2 }
  0x60   : > { %415 = vst [vmem:[#allocation3 + $0x68] sm:$0xff] %v9328_v2  ;;  %416 = vst [vmem:[#allocation3 + $0x70] sm:$0xff] %v9328_v2 }
  0x61   : > { %417 = vst [vmem:[#allocation3 + $0x78] sm:$0xff] %v9328_v2  ;;  %418 = vst [vmem:[#allocation3 + $0x80] sm:$0xff] %v9328_v2 }
  0x62   : > { %419 = vst [vmem:[#allocation3 + $0x88] sm:$0xff] %v9328_v2  ;;  %420 = vst [vmem:[#allocation3 + $0x90] sm:$0xff] %v9328_v2 }
  0x63   : > { %421 = vst [vmem:[#allocation3 + $0x98] sm:$0xff] %v9328_v2  ;;  %422 = vst [vmem:[#allocation3 + $0xa0] sm:$0xff] %v9328_v2 }
  0x64   : > { %423 = vst [vmem:[#allocation3 + $0xa8] sm:$0xff] %v9328_v2  ;;  %424 = vst [vmem:[#allocation3 + $0xb0] sm:$0xff] %v9328_v2 }
  0x65   : > { %425 = vst [vmem:[#allocation3 + $0xb8] sm:$0xff] %v9328_v2  ;;  %426 = vst [vmem:[#allocation3 + $0xc0] sm:$0xff] %v9328_v2 }
  0x66   : > { %427 = vst [vmem:[#allocation3 + $0xc8] sm:$0xff] %v9328_v2  ;;  %428 = vst [vmem:[#allocation3 + $0xd0] sm:$0xff] %v9328_v2 }
  0x67   : > { %429 = vst [vmem:[#allocation3 + $0xd8] sm:$0xff] %v9328_v2  ;;  %430 = vst [vmem:[#allocation3 + $0xe0] sm:$0xff] %v9328_v2 }
  0x68   : > { %431 = vst [vmem:[#allocation3 + $0xe8] sm:$0xff] %v9328_v2  ;;  %432 = vst [vmem:[#allocation3 + $0xf0] sm:$0xff] %v9328_v2 }
  0x69   : > { %433 = vst [vmem:[#allocation3 + $0xf8] sm:$0xff] %v9328_v2  ;;  %434 = vst [vmem:[#allocation3 + $0x100] sm:$0xff] %v9328_v2 }
  0x6a   : > { %435 = vst [vmem:[#allocation3 + $0x108] sm:$0xff] %v9328_v2  ;;  %436 = vst [vmem:[#allocation3 + $0x110] sm:$0xff] %v9328_v2 }
  0x6b   : > { %437 = vst [vmem:[#allocation3 + $0x118] sm:$0xff] %v9328_v2  ;;  %438 = vst [vmem:[#allocation3 + $0x120] sm:$0xff] %v9328_v2 }
  0x6c   : > { %439 = vst [vmem:[#allocation3 + $0x128] sm:$0xff] %v9328_v2  ;;  %440 = vst [vmem:[#allocation3 + $0x130] sm:$0xff] %v9328_v2 }
  0x6d   : > { %441 = vst [vmem:[#allocation3 + $0x138] sm:$0xff] %v9328_v2  ;;  %442 = vst [vmem:[#allocation3 + $0x140] sm:$0xff] %v9328_v2 }
  0x6e   : > { %443 = vst [vmem:[#allocation3 + $0x148] sm:$0xff] %v9328_v2  ;;  %444 = vst [vmem:[#allocation3 + $0x150] sm:$0x3f] %v9328_v2 }
  0x6f   : > { %445 = vst [vmem:[#allocation4] sm:$0xff] %v9328_v2  ;;  %446 = vst [vmem:[#allocation4 + $0x8] sm:$0xff] %v9328_v2 }
  0x70   : > { %447 = vst [vmem:[#allocation4 + $0x10] sm:$0xff] %v9328_v2  ;;  %448 = vst [vmem:[#allocation4 + $0x18] sm:$0xff] %v9328_v2 }
  0x71   : > { %449 = vst [vmem:[#allocation4 + $0x20] sm:$0xff] %v9328_v2  ;;  %450 = vst [vmem:[#allocation4 + $0x28] sm:$0xff] %v9328_v2 }
  0x72   : > { %451 = vst [vmem:[#allocation4 + $0x30] sm:$0xff] %v9328_v2  ;;  %452 = vst [vmem:[#allocation4 + $0x38] sm:$0xff] %v9328_v2 }
  0x73   : > { %453 = vst [vmem:[#allocation4 + $0x40] sm:$0xff] %v9328_v2  ;;  %454 = vst [vmem:[#allocation4 + $0x48] sm:$0xff] %v9328_v2 }
  0x74   : > { %455 = vst [vmem:[#allocation4 + $0x50] sm:$0xff] %v9328_v2  ;;  %456 = vst [vmem:[#allocation4 + $0x58] sm:$0xff] %v9328_v2 }
  0x75   : > { %457 = vst [vmem:[#allocation4 + $0x60] sm:$0xff] %v9328_v2  ;;  %458 = vst [vmem:[#allocation4 + $0x68] sm:$0x3f] %v9328_v2 }
  0x76   : > { %11856 = vst [vmem:[#allocation7_spill] sm:$0xff] %v9603_v3 }
  0x77 LB: >> { %v9329_v4 = vmov 0   ;;  %s468_s15 = smul.u32 132, %s9314_s14  ;;  %vm1856_vm0 = vcmask 1045504   ;;  %vm2066_vm1 = vcmask 1041408   ;;  %vm2326_vm2 = vcmask 1041409   ;;  %s9314_s14 = sphi %s9619_s14, %s467_s14  }
  0x78   : >> { %9071 = vset.pattern.permute.xlu1 %v9329_v4  ;;  %9070 = vset.pattern.permute.xlu0 %v9329_v4  ;;  %vm2328_vm3 = vcmask 1042434   ;;  %vm2330_vm4 = vcmask 1043459   ;;  %vm2332_vm5 = vcmask 1044484   ;;  %vm2334_vm6 = vcmask 1045509  }
  0x79   : >> { %s9626_s16 = scalar_lea.vmem %s9617_s13, %s468_s15  ;;  %vm2336_vm7 = vcmask 1046534   ;;  %vm2338_vm8 = vcmask 1047559   ;;  %s6809_s15 = smul.u32 34, %s9314_s14 }
  0x7a   : >> { %v472_v5 = vld [vmem:[%s9626_s16 + $0x10] sm:$0xff]  ;;  %v470_v6 = vld [vmem:[%s9626_s16] sm:$0xff]  ;;  %v473_v7 = vld [vmem:[%s9626_s16 + $0x18] sm:$0xff]  ;;  %s467_s14 = sadd.s32 1, %s9314_s14  }
  0x7b   : >> { %500 = vperm.xlu1 %9071, %v472_v5   ;;  %490 = vperm.xlu0 %9070, %v470_v6   ;;  %v471_v8 = vld [vmem:[%s9626_s16 + $0x8] sm:$0xff]  ;;  %v474_v10 = vld [vmem:[%s9626_s16 + $0x20] sm:$0xff]  ;;  %v477_v11 = vld [vmem:[%s9626_s16 + $0x38] sm:$0xff]  ;;  %p464_p4 = scmp.ge.s32.totalorder %s467_s14, 32  }
  0x7c   : >> { %v475_v9 = vld [vmem:[%s9626_s16 + $0x28] sm:$0xff]  ;;  %v476_v12 = vld [vmem:[%s9626_s16 + $0x30] sm:$0xff]  ;;  %v478_v14 = vld [vmem:[%s9626_s16 + $0x40] sm:$0xff]  ;;  %s10531_s24 = smov (%p464_p4), 0  }
  0x7d   : >> { %v479_v13 = vld [vmem:[%s9626_s16 + $0x48] sm:$0xff]  ;;  %v481_v15 = vld [vmem:[%s9626_s16 + $0x58] sm:$0xff]  ;;  %v480_v16 = vld [vmem:[%s9626_s16 + $0x50] sm:$0xff] }
  0x7e   : >> { %v483_v17 = vld [vmem:[%s9626_s16 + $0x68] sm:$0xff]  ;;  %v482_v18 = vld [vmem:[%s9626_s16 + $0x60] sm:$0xff]  ;;  %v485_v19 = vld [vmem:[%s9626_s16 + $0x78] sm:$0xff] }
  0x7f   : >> { %505 = vperm.xlu1 %9071, %v473_v7   ;;  %495 = vperm.xlu0 %9070, %v471_v8   ;;  %v484_v20 = vld [vmem:[%s9626_s16 + $0x70] sm:$0xff]  ;;  %v6969_v21 = vld [vmem:[%s9626_s16 + $0x1] sm:$0xff]  ;;  %v6972_v26 = vld [vmem:[%s9626_s16 + $0x19] sm:$0xff] }
  0x80   : >> { %v486_v22 = vld [vmem:[%s9626_s16 + $0x80] sm:$0xf]  ;;  %v6971_v23 = vld [vmem:[%s9626_s16 + $0x11] sm:$0xff]  ;;  %v6970_v24 = vld [vmem:[%s9626_s16 + $0x9] sm:$0xff] }
  0x81   : >> { %v6973_v25 = vld [vmem:[%s9626_s16 + $0x21] sm:$0xff]  ;;  %v6975_v27 = vld [vmem:[%s9626_s16 + $0x31] sm:$0xff]  ;;  %v6974_v28 = vld [vmem:[%s9626_s16 + $0x29] sm:$0xff] }
  0x82   : >> { %v6977_v29 = vld [vmem:[%s9626_s16 + $0x41] sm:$0xff]  ;;  %v6976_v30 = vld [vmem:[%s9626_s16 + $0x39] sm:$0xff]  ;;  %v6979_v31 = vld [vmem:[%s9626_s16 + $0x51] sm:$0xff] }
  0x83   : >> { %515 = vperm.xlu1 %9071, %v475_v9   ;;  %510 = vperm.xlu0 %9070, %v474_v10   ;;  %v6978_v32 = vld [vmem:[%s9626_s16 + $0x49] sm:$0xff]  ;;  %v6981_v33 = vld [vmem:[%s9626_s16 + $0x61] sm:$0xff]  ;;  %v6980_v34 = vld [vmem:[%s9626_s16 + $0x59] sm:$0xff] }
  0x84   : >> { %v6983_v35 = vld [vmem:[%s9626_s16 + $0x71] sm:$0xff]  ;;  %v6982_v36 = vld [vmem:[%s9626_s16 + $0x69] sm:$0xff]  ;;  %v6985_v37 = vld [vmem:[%s9626_s16 + $0x81] sm:$0xf] }
  0x85   : >> { %v6984_v38 = vld [vmem:[%s9626_s16 + $0x79] sm:$0xff]  ;;  %v6989_v39 = vld [vmem:[%s9626_s16 + $0xa] sm:$0xff]  ;;  %v6988_v40 = vld [vmem:[%s9626_s16 + $0x2] sm:$0xff] }
  0x86   : >> { %v6991_v41 = vld [vmem:[%s9626_s16 + $0x1a] sm:$0xff]  ;;  %v6990_v42 = vld [vmem:[%s9626_s16 + $0x12] sm:$0xff]  ;;  %v6993_v43 = vld [vmem:[%s9626_s16 + $0x2a] sm:$0xff] }
  0x87   : >> { %525 = vperm.xlu1 %9071, %v477_v11   ;;  %520 = vperm.xlu0 %9070, %v476_v12   ;;  %v6992_v44 = vld [vmem:[%s9626_s16 + $0x22] sm:$0xff]  ;;  %v6995_v45 = vld [vmem:[%s9626_s16 + $0x3a] sm:$0xff]  ;;  %v6994_v46 = vld [vmem:[%s9626_s16 + $0x32] sm:$0xff] }
  0x88   : >> { %v6997_v47 = vld [vmem:[%s9626_s16 + $0x4a] sm:$0xff]  ;;  %v6996_v48 = vld [vmem:[%s9626_s16 + $0x42] sm:$0xff]  ;;  %v6999_v49 = vld [vmem:[%s9626_s16 + $0x5a] sm:$0xff] }
  0x89   : >> { %v6998_v50 = vld [vmem:[%s9626_s16 + $0x52] sm:$0xff]  ;;  %v7001_v51 = vld [vmem:[%s9626_s16 + $0x6a] sm:$0xff]  ;;  %v7000_v52 = vld [vmem:[%s9626_s16 + $0x62] sm:$0xff] }
  0x8a   : >> { %v7003_v53 = vld [vmem:[%s9626_s16 + $0x7a] sm:$0xff]  ;;  %v7002_v54 = vld [vmem:[%s9626_s16 + $0x72] sm:$0xff]  ;;  %v7004_v55 = vld [vmem:[%s9626_s16 + $0x82] sm:$0xf] }
  0x8b   : >> { %535 = vperm.xlu1 %9071, %v479_v13   ;;  %530 = vperm.xlu0 %9070, %v478_v14   ;;  %v7017_v56 = vld [vmem:[%s9626_s16 + $0x82] sm:$0xff]  ;;  %v7019_v57 = vld [vmem:[%s9626_s16 + $0x92] sm:$0xff]  ;;  %v7018_v58 = vld [vmem:[%s9626_s16 + $0x8a] sm:$0xff] }
  0x8c   : >> { %v7021_v59 = vld [vmem:[%s9626_s16 + $0xa2] sm:$0xff]  ;;  %v7020_v60 = vld [vmem:[%s9626_s16 + $0x9a] sm:$0xff]  ;;  %v7023_v61 = vld [vmem:[%s9626_s16 + $0xb2] sm:$0xff] }
  0x8d   : >> { %v7022_v62 = vld [vmem:[%s9626_s16 + $0xaa] sm:$0xff]  ;;  %v7025_v4 = vld [vmem:[%s9626_s16 + $0xc2] sm:$0xf]  ;;  %v7024_v5 = vld [vmem:[%s9626_s16 + $0xba] sm:$0xff] }
  0x8e   : >> { %v7031_v8 = vld [vmem:[%s9626_s16 + $0x4b] sm:$0xff]  ;;  %v7030_v9 = vld [vmem:[%s9626_s16 + $0x43] sm:$0xff]  ;;  %v7033_v12 = vld [vmem:[%s9626_s16 + $0x5b] sm:$0xff] }
  0x8f   : >> { %545 = vperm.xlu1 %9071, %v481_v15   ;;  %540 = vperm.xlu0 %9070, %v480_v16   ;;  %v7032_v13 = vld [vmem:[%s9626_s16 + $0x53] sm:$0xff]  ;;  %v7035_v16 = vld [vmem:[%s9626_s16 + $0x6b] sm:$0xff] }
  0x93   : >> { %555 = vperm.xlu1 %9071, %v483_v17   ;;  %550 = vperm.xlu0 %9070, %v482_v18   ;;  %v7034_v17 = vld [vmem:[%s9626_s16 + $0x63] sm:$0xff] }
  0x97   : >> { %565 = vperm.xlu1 %9071, %v485_v19   ;;  %560 = vperm.xlu0 %9070, %v484_v20   ;;  %v7037_v20 = vld [vmem:[%s9626_s16 + $0x7b] sm:$0xff] }
  0x9b   : >> { %619 = vperm.xlu1 %9071, %v6969_v21   ;;  %570 = vperm.xlu0 %9070, %v486_v22   ;;  %v7036_v21 = vld [vmem:[%s9626_s16 + $0x73] sm:$0xff] }
  0x9f   : >> { %629 = vperm.xlu1 %9071, %v6971_v23   ;;  %624 = vperm.xlu0 %9070, %v6970_v24   ;;  %v7039_v24 = vld [vmem:[%s9626_s16 + $0x8b] sm:$0xff] }
  0xa3   : >> { %639 = vperm.xlu1 %9071, %v6973_v25   ;;  %634 = vperm.xlu0 %9070, %v6972_v26   ;;  %v7038_v25 = vld [vmem:[%s9626_s16 + $0x83] sm:$0xff] }
  0xa7   : >> { %649 = vperm.xlu1 %9071, %v6975_v27   ;;  %644 = vperm.xlu0 %9070, %v6974_v28   ;;  %v7041_v28 = vld [vmem:[%s9626_s16 + $0x9b] sm:$0xff] }
  0xab   : >> { %659 = vperm.xlu1 %9071, %v6977_v29   ;;  %654 = vperm.xlu0 %9070, %v6976_v30   ;;  %v7040_v29 = vld [vmem:[%s9626_s16 + $0x93] sm:$0xff] }
  0xaf   : >> { %669 = vperm.xlu1 %9071, %v6979_v31   ;;  %664 = vperm.xlu0 %9070, %v6978_v32   ;;  %v7043_v32 = vld [vmem:[%s9626_s16 + $0xab] sm:$0xff] }
  0xb3   : >> { %679 = vperm.xlu1 %9071, %v6981_v33   ;;  %674 = vperm.xlu0 %9070, %v6980_v34   ;;  %v7042_v33 = vld [vmem:[%s9626_s16 + $0xa3] sm:$0xff] }
  0xb7   : >> { %689 = vperm.xlu1 %9071, %v6983_v35   ;;  %684 = vperm.xlu0 %9070, %v6982_v36   ;;  %v7045_v36 = vld [vmem:[%s9626_s16 + $0xbb] sm:$0xff] }
  0xbb   : >> { %699 = vperm.xlu1 %9071, %v6985_v37   ;;  %694 = vperm.xlu0 %9070, %v6984_v38   ;;  %v7044_v37 = vld [vmem:[%s9626_s16 + $0xb3] sm:$0xff] }
  0xbf   : >> { %770 = vperm.xlu1 %9071, %v6989_v39   ;;  %765 = vperm.xlu0 %9070, %v6988_v40   ;;  %v7051_v40 = vld [vmem:[%s9626_s16 + $0x44] sm:$0xff] }
  0xc3   : >> { %780 = vperm.xlu1 %9071, %v6991_v41   ;;  %775 = vperm.xlu0 %9070, %v6990_v42   ;;  %v7046_v41 = vld [vmem:[%s9626_s16 + $0xc3] sm:$0xf] }
  0xc7   : >> { %790 = vperm.xlu1 %9071, %v6993_v43   ;;  %785 = vperm.xlu0 %9070, %v6992_v44   ;;  %v7053_v44 = vld [vmem:[%s9626_s16 + $0x54] sm:$0xff] }
  0xcb   : >> { %800 = vperm.xlu1 %9071, %v6995_v45   ;;  %795 = vperm.xlu0 %9070, %v6994_v46   ;;  %v7052_v45 = vld [vmem:[%s9626_s16 + $0x4c] sm:$0xff] }
  0xcf   : >> { %810 = vperm.xlu1 %9071, %v6997_v47   ;;  %805 = vperm.xlu0 %9070, %v6996_v48  }
  0xd3   : >> { %820 = vperm.xlu1 %9071, %v6999_v49   ;;  %815 = vperm.xlu0 %9070, %v6998_v50  }
  0xd7   : >> { %830 = vperm.xlu1 %9071, %v7001_v51   ;;  %825 = vperm.xlu0 %9070, %v7000_v52  }
  0xdb   : >> { %840 = vperm.xlu1 %9071, %v7003_v53   ;;  %835 = vperm.xlu0 %9070, %v7002_v54  }
  0xdf   : >> { %913 = vperm.xlu1 %9071, %v6996_v48   ;;  %845 = vperm.xlu0 %9070, %v7004_v55   ;;  %v7055_v48 = vld [vmem:[%s9626_s16 + $0x64] sm:$0xff] }
  0xe3   : >> { %923 = vperm.xlu1 %9071, %v6998_v50   ;;  %918 = vperm.xlu0 %9070, %v6997_v47  }
  0xe7   : >> { %933 = vperm.xlu1 %9071, %v7000_v52   ;;  %928 = vperm.xlu0 %9070, %v6999_v49   ;;  %v7054_v49 = vld [vmem:[%s9626_s16 + $0x5c] sm:$0xff]  ;;  %v7057_v52 = vld [vmem:[%s9626_s16 + $0x74] sm:$0xff] }
  0xeb   : >> { %943 = vperm.xlu1 %9071, %v7002_v54   ;;  %938 = vperm.xlu0 %9070, %v7001_v51  }
  0xef   : >> { %953 = vperm.xlu1 %9071, %v7017_v56   ;;  %948 = vperm.xlu0 %9070, %v7003_v53   ;;  %v7056_v53 = vld [vmem:[%s9626_s16 + $0x6c] sm:$0xff]  ;;  %v7059_v56 = vld [vmem:[%s9626_s16 + $0x84] sm:$0xff] }
  0xf3   : >> { %963 = vperm.xlu1 %9071, %v7019_v57   ;;  %958 = vperm.xlu0 %9070, %v7018_v58   ;;  %v7058_v57 = vld [vmem:[%s9626_s16 + $0x7c] sm:$0xff] }
  0xf7   : >> { %973 = vperm.xlu1 %9071, %v7021_v59   ;;  %968 = vperm.xlu0 %9070, %v7020_v60   ;;  %v7061_v60 = vld [vmem:[%s9626_s16 + $0x94] sm:$0xff] }
  0xfa   : >> { %v9686_v63 = vpop.permute.xlu1 %500  ;;  %v9688_v2 = vpop.permute.xlu0 %490 }
  0xfb   : >> { %983 = vperm.xlu1 %9071, %v7023_v61   ;;  %978 = vperm.xlu0 %9070, %v7022_v62   ;;  %v7060_v61 = vld [vmem:[%s9626_s16 + $0x8c] sm:$0xff] }
  0xfe   : >> { %v9692_v6 = vpop.permute.xlu1 %505  ;;  %v9694_v7 = vpop.permute.xlu0 %495 }
  0xff   : >> { %993 = vperm.xlu1 %9071, %v7025_v4   ;;  %988 = vperm.xlu0 %9070, %v7024_v5   ;;  %v7063_v5 = vld [vmem:[%s9626_s16 + $0xa4] sm:$0xff] }
 0x102   : >> { %v9698_v10 = vpop.permute.xlu1 %515  ;;  %v9700_v11 = vpop.permute.xlu0 %510 }
 0x103   : >> { %1064 = vperm.xlu1 %9071, %v7031_v8   ;;  %1059 = vperm.xlu0 %9070, %v7030_v9   ;;  %v7062_v8 = vld [vmem:[%s9626_s16 + $0x9c] sm:$0xff] }
 0x106   : >> { %v9704_v14 = vpop.permute.xlu1 %525  ;;  %v9706_v15 = vpop.permute.xlu0 %520 }
 0x107   : >> { %1074 = vperm.xlu1 %9071, %v7033_v12   ;;  %1069 = vperm.xlu0 %9070, %v7032_v13   ;;  %v7065_v13 = vld [vmem:[%s9626_s16 + $0xb4] sm:$0xff] }
 0x10a   : >> { %v9710_v18 = vpop.permute.xlu1 %535  ;;  %v9712_v19 = vpop.permute.xlu0 %530 }
 0x10b   : >> { %1084 = vperm.xlu1 %9071, %v7035_v16   ;;  %1079 = vperm.xlu0 %9070, %v7034_v17   ;;  %v7064_v16 = vld [vmem:[%s9626_s16 + $0xac] sm:$0xff] }
 0x10e   : >> { %v9716_v22 = vpop.permute.xlu1 %545  ;;  %v9718_v23 = vpop.permute.xlu0 %540 }
 0x10f   : >> { %1094 = vperm.xlu1 %9071, %v7037_v20   ;;  %1089 = vperm.xlu0 %9070, %v7036_v21   ;;  %v7067_v21 = vld [vmem:[%s9626_s16 + $0xc4] sm:$0xf] }
 0x112   : >> { %v9722_v26 = vpop.permute.xlu1 %555  ;;  %v9724_v27 = vpop.permute.xlu0 %550 }
 0x113   : >> { %1104 = vperm.xlu1 %9071, %v7039_v24   ;;  %1099 = vperm.xlu0 %9070, %v7038_v25   ;;  %v7066_v24 = vld [vmem:[%s9626_s16 + $0xbc] sm:$0xff] }
 0x116   : >> { %v9728_v30 = vpop.permute.xlu1 %565  ;;  %v9730_v31 = vpop.permute.xlu0 %560 }
 0x117   : >> { %1114 = vperm.xlu1 %9071, %v7041_v28   ;;  %1109 = vperm.xlu0 %9070, %v7040_v29  }
 0x11a   : >> { %v9734_v34 = vpop.permute.xlu1 %619  ;;  %v9736_v35 = vpop.permute.xlu0 %570 }
 0x11b   : >> { %1124 = vperm.xlu1 %9071, %v7043_v32   ;;  %1119 = vperm.xlu0 %9070, %v7042_v33  }
 0x11e   : >> { %v9740_v38 = vpop.permute.xlu1 %629  ;;  %v9742_v39 = vpop.permute.xlu0 %624 }
 0x11f   : >> { %1134 = vperm.xlu1 %9071, %v7045_v36   ;;  %1129 = vperm.xlu0 %9070, %v7044_v37  }
 0x122   : >> { %v9746_v42 = vpop.permute.xlu1 %639  ;;  %v9748_v43 = vpop.permute.xlu0 %634 }
 0x123   : >> { %1205 = vperm.xlu1 %9071, %v7051_v40   ;;  %1139 = vperm.xlu0 %9070, %v7046_v41  }
 0x126   : >> { %v9752_v46 = vpop.permute.xlu1 %649  ;;  %v9754_v47 = vpop.permute.xlu0 %644 }
 0x127   : >> { %1215 = vperm.xlu1 %9071, %v7053_v44   ;;  %1210 = vperm.xlu0 %9070, %v7052_v45   ;;  %v7081_v45 = vld [vmem:[%s9626_s16 + $0xcc] sm:$0xff] }
 0x12a   : >> { %v9758_v50 = vpop.permute.xlu1 %659  ;;  %v9760_v51 = vpop.permute.xlu0 %654 }
 0x12b   : >> { %1225 = vperm.xlu1 %9071, %v7055_v48   ;;  %1220 = vperm.xlu0 %9070, %v7054_v49   ;;  %v7080_v48 = vld [vmem:[%s9626_s16 + $0xc4] sm:$0xff] }
 0x12e   : >> { %v9764_v54 = vpop.permute.xlu1 %669  ;;  %v9766_v55 = vpop.permute.xlu0 %664 }
 0x12f   : >> { %1235 = vperm.xlu1 %9071, %v7057_v52   ;;  %1230 = vperm.xlu0 %9070, %v7056_v53   ;;  %v7083_v53 = vld [vmem:[%s9626_s16 + $0xdc] sm:$0xff] }
 0x132   : >> { %v9770_v58 = vpop.permute.xlu1 %679  ;;  %v9772_v59 = vpop.permute.xlu0 %674 }
 0x133   : >> { %1245 = vperm.xlu1 %9071, %v7059_v56   ;;  %1240 = vperm.xlu0 %9070, %v7058_v57  }
 0x136   : >> { %v9776_v62 = vpop.permute.xlu1 %689  ;;  %v9778_v4 = vpop.permute.xlu0 %684 }
 0x137   : >> { %1255 = vperm.xlu1 %9071, %v7061_v60   ;;  %1250 = vperm.xlu0 %9070, %v7060_v61  }
 0x13a   : >> { %v9782_v9 = vpop.permute.xlu1 %699  ;;  %v9784_v12 = vpop.permute.xlu0 %694 }
 0x13b   : >> { %11857 = vst [vmem:[#allocation8_spill] sm:$0xff] %v9784_v12  ;;  %1265 = vperm.xlu1 %9071, %v7063_v5   ;;  %1260 = vperm.xlu0 %9070, %v7062_v8  }
 0x13e   : >> { %v9788_v17 = vpop.permute.xlu1 %770  ;;  %v9790_v20 = vpop.permute.xlu0 %765 }
 0x13f   : >> { %11858 = vst [vmem:[#allocation9_spill] sm:$0xff] %v9788_v17  ;;  %11859 = vst [vmem:[#allocation10_spill] sm:$0xff] %v9790_v20  ;;  %1275 = vperm.xlu1 %9071, %v7065_v13   ;;  %1270 = vperm.xlu0 %9070, %v7064_v16  }
 0x142   : >> { %v9794_v25 = vpop.permute.xlu1 %780  ;;  %v9796_v28 = vpop.permute.xlu0 %775 }
 0x143   : >> { %11860 = vst [vmem:[#allocation11_spill] sm:$0xff] %v9794_v25  ;;  %11861 = vst [vmem:[#allocation12_spill] sm:$0xff] %v9796_v28  ;;  %1285 = vperm.xlu1 %9071, %v7067_v21   ;;  %1280 = vperm.xlu0 %9070, %v7066_v24   ;;  %v7086_v21 = vld [vmem:[%s9626_s16 + $0xf4] sm:$0xff] }
 0x146   : >> { %v9798_v29 = vpop.permute.xlu1 %790  ;;  %v9800_v32 = vpop.permute.xlu0 %785 }
 0x147   : >> { %1357 = vperm.xlu1 %9071, %v7060_v61   ;;  %1352 = vperm.xlu0 %9070, %v7059_v56   ;;  %v7082_v56 = vld [vmem:[%s9626_s16 + $0xd4] sm:$0xff]  ;;  %v7085_v61 = vld [vmem:[%s9626_s16 + $0xec] sm:$0xff] }
 0x14a   : >> { %v9802_v33 = vpop.permute.xlu1 %800  ;;  %v9804_v36 = vpop.permute.xlu0 %795 }
 0x14b   : >> { %1367 = vperm.xlu1 %9071, %v7062_v8   ;;  %1362 = vperm.xlu0 %9070, %v7061_v60  }
 0x14e   : >> { %v9806_v37 = vpop.permute.xlu1 %810  ;;  %v9808_v40 = vpop.permute.xlu0 %805 }
 0x14f   : >> { %1377 = vperm.xlu1 %9071, %v7064_v16   ;;  %1372 = vperm.xlu0 %9070, %v7063_v5   ;;  %v7084_v5 = vld [vmem:[%s9626_s16 + $0xe4] sm:$0xff]  ;;  %v7087_v16 = vld [vmem:[%s9626_s16 + $0xfc] sm:$0xff] }
 0x152   : >> { %v9810_v41 = vpop.permute.xlu1 %820  ;;  %v9812_v44 = vpop.permute.xlu0 %815 }
 0x153   : >> { %1387 = vperm.xlu1 %9071, %v7066_v24   ;;  %1382 = vperm.xlu0 %9070, %v7065_v13  }
 0x156   : >> { %v9816_v49 = vpop.permute.xlu1 %830  ;;  %v9818_v52 = vpop.permute.xlu0 %825 }
 0x157   : >> { %1397 = vperm.xlu1 %9071, %v7081_v45   ;;  %1392 = vperm.xlu0 %9070, %v7080_v48   ;;  %v7093_v48 = vld [vmem:[%s9626_s16 + $0x85] sm:$0xff] }
 0x15a   : >> { %v9822_v57 = vpop.permute.xlu1 %840  ;;  %v9824_v60 = vpop.permute.xlu0 %835 }
 0x15b   : >> { %11862 = vst [vmem:[#allocation13_spill] sm:$0xff] %v9822_v57  ;;  %11863 = vst [vmem:[#allocation14_spill] sm:$0xff] %v9824_v60  ;;  %1407 = vperm.xlu1 %9071, %v7083_v53   ;;  %1402 = vperm.xlu0 %9070, %v7082_v56   ;;  %v7088_v53 = vld [vmem:[%s9626_s16 + $0x104] sm:$0xf] }
 0x15c   : >> { %v7105_v57 = vld [vmem:[%s9626_s16 + $0xe5] sm:$0xff] }
 0x15e   : >> { %v9828_v8 = vpop.permute.xlu1 %913  ;;  %v9830_v13 = vpop.permute.xlu0 %845 }
 0x15f   : >> { %11864 = vst [vmem:[#allocation15_spill] sm:$0xff] %v9828_v8  ;;  %11865 = vst [vmem:[#allocation16_spill] sm:$0xff] %v9830_v13  ;;  %1417 = vperm.xlu1 %9071, %v7085_v61   ;;  %1412 = vperm.xlu0 %9070, %v7084_v5   ;;  %v7095_v61 = vld [vmem:[%s9626_s16 + $0x95] sm:$0xff]  ;;  %v7094_v5 = vld [vmem:[%s9626_s16 + $0x8d] sm:$0xff] }
 0x162   : >> { %v9834_v24 = vpop.permute.xlu1 %923  ;;  %v9836_v45 = vpop.permute.xlu0 %918 }
 0x163   : >> { %11866 = vst [vmem:[#allocation17_spill] sm:$0xff] %v9834_v24  ;;  %11867 = vst [vmem:[#allocation18_spill] sm:$0xff] %v9836_v45  ;;  %1427 = vperm.xlu1 %9071, %v7087_v16   ;;  %1422 = vperm.xlu0 %9070, %v7086_v21   ;;  %v7097_v16 = vld [vmem:[%s9626_s16 + $0xa5] sm:$0xff]  ;;  %v7096_v21 = vld [vmem:[%s9626_s16 + $0x9d] sm:$0xff] }
 0x166   : >> { %v9840_v56 = vpop.permute.xlu1 %933  ;;  %v9842_v3 = vpop.permute.xlu0 %928 }
 0x167   : >> { %11868 = vst [vmem:[#allocation19_spill] sm:$0xff] %v9842_v3  ;;  %1498 = vperm.xlu1 %9071, %v7093_v48   ;;  %1432 = vperm.xlu0 %9070, %v7088_v53   ;;  %v7099_v48 = vld [vmem:[%s9626_s16 + $0xb5] sm:$0xff]  ;;  %v7098_v53 = vld [vmem:[%s9626_s16 + $0xad] sm:$0xff] }
 0x16a   : >> { %v9846_v1 = vpop.permute.xlu1 %943  ;;  %v9848_v0 = vpop.permute.xlu0 %938 }
 0x16b   : >> { %1508 = vperm.xlu1 %9071, %v7095_v61   ;;  %1503 = vperm.xlu0 %9070, %v7094_v5   ;;  %v7102_v61 = vld [vmem:[%s9626_s16 + $0xcd] sm:$0xff]  ;;  %v7101_v5 = vld [vmem:[%s9626_s16 + $0xc5] sm:$0xff] }
 0x16e   : >> { %v9852_v24 = vpop.permute.xlu1 %953  ;;  %v9854_v25 = vpop.permute.xlu0 %948 }
 0x16f   : >> { %1518 = vperm.xlu1 %9071, %v7097_v16   ;;  %1513 = vperm.xlu0 %9070, %v7096_v21   ;;  %v7104_v16 = vld [vmem:[%s9626_s16 + $0xdd] sm:$0xff]  ;;  %v7103_v21 = vld [vmem:[%s9626_s16 + $0xd5] sm:$0xff] }
 0x172   : >> { %v9858_v3 = vpop.permute.xlu1 %963  ;;  %v9860_v45 = vpop.permute.xlu0 %958 }
 0x173   : >> { %1528 = vperm.xlu1 %9071, %v7099_v48   ;;  %1523 = vperm.xlu0 %9070, %v7098_v53   ;;  %v6968_v48 = vld [vmem:[%s11844_s1] ss:$0 sm:$0xff]  ;;  %v7106_v53 = vld [vmem:[%s9626_s16 + $0xed] sm:$0xff] }
 0x174   : >> { %v581_v20 = vmul.f32 %v6968_v48, %v9686_v63  ;;  %v580_v60 = vmul.f32 %v6968_v48, %v9694_v7  ;;  %v583_v63 = vmul.f32 %v6968_v48, %v9700_v11  ;;  %v585_v12 = vmul.f32 %v6968_v48, %v9706_v15 }
 0x175   : >> { %v9901_v7 = vmul.f32 %v6968_v48, %v9716_v22  ;;  %v589_v11 = vmul.f32 %v6968_v48, %v9718_v23  ;;  %v9917_v22 = vmul.f32 %v6968_v48, %v9728_v30 }
 0x176   : >> { %v9864_v28 = vpop.permute.xlu1 %973  ;;  %v9866_v13 = vpop.permute.xlu0 %968 }
 0x177   : >> { %11869 = vst [vmem:[#allocation20_spill] sm:$0xff] %v9864_v28  ;;  %1543 = vperm.xlu1 %9071, %v7102_v61   ;;  %1538 = vperm.xlu0 %9070, %v7101_v5   ;;  %v9883_v61 = vld [vmem:[%s11844_s1 + $0x1] ss:$0 sm:$0xff]  ;;  %v579_v5 = vmul.f32 %v6968_v48, %v9688_v2  ;;  %v586_v28 = vmul.f32 %v6968_v48, %v9704_v14 }
 0x178   : >> { %v588_v2 = vmul.f32 %v6968_v48, %v9710_v18  ;;  %v9909_v14 = vmul.f32 %v6968_v48, %v9722_v26  ;;  %v710_v15 = vmul.f32 %v9883_v61, %v9740_v38  ;;  %v712_v18 = vmul.f32 %v9883_v61, %v9746_v42 }
 0x179   : >> { %v713_v23 = vmul.f32 %v9883_v61, %v9754_v47  ;;  %v9929_v38 = vmul.f32 %v6968_v48, %v9736_v35  ;;  %v714_v30 = vmul.f32 %v9883_v61, %v9752_v46  ;;  %v716_v47 = vmul.f32 %v9883_v61, %v9758_v50  ;;  %v7122_v46 = vld [vmem:[%s9626_s16 + $0xc6] sm:$0xff]  ;;  %v9959_v50 = vld [vmem:[%s11844_s1 + $0x3] ss:$0 sm:$0xff] }
 0x17a   : >> { %v9870_v8 = vpop.permute.xlu1 %983  ;;  %v9872_v17 = vpop.permute.xlu0 %978 }
 0x17b   : >> { %11870 = vst [vmem:[#allocation21_spill] sm:$0xff] %v9870_v8  ;;  %11871 = vst [vmem:[#allocation22_spill] sm:$0xff] %v9872_v17  ;;  %1553 = vperm.xlu1 %9071, %v7104_v16   ;;  %1548 = vperm.xlu0 %9070, %v7103_v21   ;;  %v9887_v8 = vmul.f32 %v6968_v48, %v9692_v6  ;;  %v584_v16 = vmul.f32 %v6968_v48, %v9698_v10 }
 0x17c   : >> { %v587_v6 = vmul.f32 %v6968_v48, %v9712_v19  ;;  %v708_v10 = vmul.f32 %v9883_v61, %v9734_v34  ;;  %v591_v19 = vmul.f32 %v6968_v48, %v9724_v27  ;;  %v9920_v34 = vmul.f32 %v6968_v48, %v9730_v31  ;;  %v9938_v31 = vld [vmem:[%s11844_s1 + $0x2] ss:$0 sm:$0xff]  ;;  %v7123_v48 = vld [vmem:[%s9626_s16 + $0xce] sm:$0xff] }
 0x17d   : >> { %11872 = vst [vmem:[#allocation23_spill] sm:$0xff] %v9887_v8  ;;  %v7108_v8 = vld [vmem:[%s9626_s16 + $0xfd] sm:$0xff]  ;;  %v709_v27 = vmul.f32 %v9883_v61, %v9742_v39  ;;  %v859_v35 = vmul.f32 %v9938_v31, %v9798_v29  ;;  %v858_v39 = vmul.f32 %v9938_v31, %v9800_v32  ;;  %v730_v29 = vadd.f32 %v713_v23, %v584_v16 }
 0x17e   : >> { %v9891_v21 = vpop.permute.xlu1 %993  ;;  %v9893_v17 = vpop.permute.xlu0 %988  ;;  %v9940_v42 = vadd.f32 %v708_v10, %v579_v5  ;;  %v718_v5 = vmul.f32 %v9883_v61, %v9764_v54  ;;  %v717_v32 = vmul.f32 %v9883_v61, %v9766_v55  ;;  %v9975_v10 = vmul.f32 %v9883_v61, %v9748_v43  ;;  %v7124_v23 = vld [vmem:[%s9626_s16 + $0xd6] sm:$0xff] }
 0x17f   : >> { %11873 = vst [vmem:[#allocation24_spill] sm:$0xff] %v9891_v21  ;;  %1563 = vperm.xlu1 %9071, %v7106_v53   ;;  %1558 = vperm.xlu0 %9070, %v7105_v57   ;;  %v7107_v21 = vld [vmem:[%s9626_s16 + $0xf5] sm:$0xff]  ;;  %v9950_v53 = vadd.f32 %v710_v15, %v581_v20  ;;  %v1006_v20 = vmul.f32 %v9959_v50, %v9840_v56 }
 0x180   : >> { %v731_v16 = vadd.f32 %v714_v30, %v585_v12  ;;  %v733_v55 = vadd.f32 %v716_v47, %v587_v6  ;;  %v876_v15 = vadd.f32 %v859_v35, %v730_v29  ;;  %v860_v56 = vmul.f32 %v9938_v31, %v9804_v36  ;;  %v9990_v36 = vld [vmem:[%s11844_s1 + $0x4] ss:$0 sm:$0xff] }
 0x181   : >> { %11875 = vst [vmem:[#allocation26_spill] sm:$0xff] %v9950_v53  ;;  %v735_v53 = vadd.f32 %v718_v5, %v589_v11  ;;  %v861_v43 = vmul.f32 %v9938_v31, %v9802_v33  ;;  %v1008_v6 = vmul.f32 %v9959_v50, %v9846_v1  ;;  %v719_v1 = vmul.f32 %v9883_v61, %v9772_v59 }
 0x182   : >> { %v9924_v26 = vpop.permute.xlu1 %1064  ;;  %v9926_v57 = vpop.permute.xlu0 %1059  ;;  %v877_v30 = vadd.f32 %v860_v56, %v731_v16  ;;  %v863_v47 = vmul.f32 %v9938_v31, %v9806_v37  ;;  %v862_v35 = vmul.f32 %v9938_v31, %v9808_v40  ;;  %v722_v29 = vmul.f32 %v9883_v61, %v9776_v62  ;;  %v7128_v56 = vld [vmem:[%s9626_s16 + $0xf6] sm:$0xff] }
 0x183   : >> { %11874 = vst [vmem:[#allocation25_spill] sm:$0xff] %v9924_v26  ;;  %1573 = vperm.xlu1 %9071, %v7108_v8   ;;  %1568 = vperm.xlu0 %9070, %v7107_v21   ;;  %v729_v26 = vadd.f32 %v712_v18, %v583_v63  ;;  %v715_v8 = vmul.f32 %v9883_v61, %v9760_v51 }
 0x184   : >> { %v1007_v51 = vmul.f32 %v9959_v50, %v9848_v0  ;;  %v9971_v63 = vadd.f32 %v709_v27, %v580_v60  ;;  %v7125_v0 = vld [vmem:[%s9626_s16 + $0xde] sm:$0xff]  ;;  %v720_v60 = vmul.f32 %v9883_v61, %v9770_v58  ;;  %v734_v27 = vadd.f32 %v717_v32, %v588_v2 }
 0x185   : >> { %v875_v18 = vadd.f32 %v858_v39, %v729_v26  ;;  %v1009_v58 = vmul.f32 %v9959_v50, %v9854_v25  ;;  %v7127_v39 = vld [vmem:[%s9626_s16 + $0xee] sm:$0xff]  ;;  %v1025_v59 = vadd.f32 %v1008_v6, %v877_v30  ;;  %v1010_v37 = vmul.f32 %v9959_v50, %v9852_v24  ;;  %v7129_v24 = vld [vmem:[%s9626_s16 + $0xfe] sm:$0xff] }
 0x186   : >> { %v9967_v21 = vpop.permute.xlu1 %1074  ;;  %v9969_v54 = vpop.permute.xlu0 %1069  ;;  %v1024_v26 = vadd.f32 %v1007_v51, %v876_v15  ;;  %v1011_v40 = vmul.f32 %v9959_v50, %v9860_v45  ;;  %v736_v16 = vadd.f32 %v719_v1, %v9901_v7  ;;  %v880_v62 = vadd.f32 %v863_v47, %v734_v27  ;;  %v11877_v30 = vld [vmem:[#allocation8_spill] sm:$0xff] }
 0x187   : >> { %11876 = vst [vmem:[#allocation27_spill] sm:$0xff] %v9967_v21  ;;  %1689 = vperm.xlu1 %9071, %v7123_v48   ;;  %1684 = vperm.xlu0 %9070, %v7122_v46   ;;  %v732_v21 = vadd.f32 %v715_v8, %v586_v28  ;;  %v1023_v12 = vadd.f32 %v1006_v20, %v875_v18  ;;  %v7126_v48 = vld [vmem:[%s9626_s16 + $0xe6] sm:$0xff] }
 0x188   : >> { %v737_v46 = vadd.f32 %v720_v60, %v591_v19  ;;  %v879_v15 = vadd.f32 %v862_v35, %v733_v55  ;;  %v864_v18 = vmul.f32 %v9938_v31, %v9812_v44  ;;  %v721_v45 = vmul.f32 %v9883_v61, %v9778_v4  ;;  %v11878_v47 = vld [vmem:[#allocation20_spill] sm:$0xff]  ;;  %v11879_v35 = vld [vmem:[#allocation22_spill] sm:$0xff] }
 0x189   : >> { %v878_v25 = vadd.f32 %v861_v43, %v732_v21  ;;  %v739_v7 = vadd.f32 %v722_v29, %v9920_v34  ;;  %v1012_v44 = vmul.f32 %v9959_v50, %v9858_v3  ;;  %v1028_v43 = vadd.f32 %v1011_v40, %v880_v62  ;;  %v11880_v40 = vld [vmem:[#allocation14_spill] sm:$0xff] }
 0x18a   : >> { %v1085_v28 = vpop.permute.xlu1 %1084  ;;  %v1080_v11 = vpop.permute.xlu0 %1079  ;;  %v1027_v55 = vadd.f32 %v1010_v37, %v879_v15  ;;  %v1013_v4 = vmul.f32 %v9959_v50, %v9866_v13  ;;  %v724_v34 = vmul.f32 %v9883_v61, %v9782_v9  ;;  %v866_v3 = vmul.f32 %v9938_v31, %v9818_v52 }
 0x18b   : >> { %v1153_v33 = vmul.f32 %v9990_v36, %v1085_v28  ;;  %v1152_v2 = vmul.f32 %v9990_v36, %v1080_v11  ;;  %1699 = vperm.xlu1 %9071, %v7125_v0   ;;  %1694 = vperm.xlu0 %9070, %v7124_v23   ;;  %v1026_v19 = vadd.f32 %v1009_v58, %v878_v25  ;;  %v7114_v11 = vld [vmem:[%s9626_s16 + $0x86] sm:$0xff] }
 0x18c   : >> { %v865_v0 = vmul.f32 %v9938_v31, %v9810_v41  ;;  %v867_v28 = vmul.f32 %v9938_v31, %v9816_v49  ;;  %v7109_v58 = vld [vmem:[%s9626_s16 + $0x105] sm:$0xf]  ;;  %v738_v13 = vadd.f32 %v721_v45, %v9909_v14  ;;  %v723_v9 = vmul.f32 %v9883_v61, %v11877_v30 }
 0x18d   : >> { %v10004_v8 = vadd.f32 %v1153_v33, %v1024_v26  ;;  %v10006_v5 = vadd.f32 %v1152_v2, %v1023_v12  ;;  %v881_v26 = vadd.f32 %v864_v18, %v735_v53  ;;  %v1014_v49 = vmul.f32 %v9959_v50, %v11878_v47 }
 0x18e   : >> { %v1095_v32 = vpop.permute.xlu1 %1094  ;;  %v1090_v20 = vpop.permute.xlu0 %1089  ;;  %v882_v33 = vadd.f32 %v865_v0, %v736_v16  ;;  %v1015_v52 = vmul.f32 %v9959_v50, %v11879_v35  ;;  %v884_v61 = vadd.f32 %v867_v28, %v738_v13  ;;  %v883_v37 = vadd.f32 %v866_v3, %v737_v46  ;;  %v11882_v16 = vld [vmem:[#allocation13_spill] sm:$0xff]  ;;  %v7130_v28 = vld [vmem:[%s9626_s16 + $0x106] sm:$0xf] }
 0x18f   : >> { %v1155_v51 = vmul.f32 %v9990_v36, %v1095_v32  ;;  %v1154_v21 = vmul.f32 %v9990_v36, %v1090_v20  ;;  %1709 = vperm.xlu1 %9071, %v7127_v39   ;;  %1704 = vperm.xlu0 %9070, %v7126_v48   ;;  %v1029_v53 = vadd.f32 %v1012_v44, %v881_v26  ;;  %v7118_v20 = vld [vmem:[%s9626_s16 + $0xa6] sm:$0xff]  ;;  %v7120_v3 = vld [vmem:[%s9626_s16 + $0xb6] sm:$0xff] }
 0x190   : >> { %v1030_v14 = vadd.f32 %v1013_v4, %v882_v33  ;;  %v868_v32 = vmul.f32 %v9938_v31, %v11880_v40  ;;  %v869_v62 = vmul.f32 %v9938_v31, %v11882_v16  ;;  %v1031_v46 = vadd.f32 %v1014_v49, %v883_v37  ;;  %v11887_v33 = vld [vmem:[#allocation12_spill] sm:$0xff]  ;;  %v7100_v40 = vld [vmem:[%s9626_s16 + $0xbd] sm:$0xff] }
 0x191   : >> { %v10025_v23 = vadd.f32 %v1155_v51, %v1026_v19  ;;  %v10027_v60 = vadd.f32 %v1154_v21, %v1025_v59  ;;  %v741_v59 = vadd.f32 %v724_v34, %v9929_v38  ;;  %v7116_v19 = vld [vmem:[%s9626_s16 + $0x96] sm:$0xff]  ;;  %v740_v38 = vadd.f32 %v723_v9, %v9917_v22  ;;  %v11886_v34 = vld [vmem:[#allocation16_spill] sm:$0xff] }
 0x192   : >> { %v1105_v27 = vpop.permute.xlu1 %1104  ;;  %v1100_v12 = vpop.permute.xlu0 %1099  ;;  %v11881_v51 = vld [vmem:[#allocation10_spill] sm:$0xff]  ;;  %v1032_v45 = vadd.f32 %v1015_v52, %v884_v61  ;;  %v1017_v44 = vmul.f32 %v9959_v50, %v9893_v17  ;;  %v885_v4 = vadd.f32 %v868_v32, %v739_v7  ;;  %v870_v26 = vmul.f32 %v9938_v31, %v11886_v34  ;;  %v11888_v9 = vld [vmem:[#allocation24_spill] sm:$0xff]  ;;  %v11890_v32 = vld [vmem:[#allocation11_spill] sm:$0xff] }
 0x193   : >> { %v1157_v41 = vmul.f32 %v9990_v36, %v1105_v27  ;;  %v1156_v6 = vmul.f32 %v9990_v36, %v1100_v12  ;;  %1719 = vperm.xlu1 %9071, %v7129_v24   ;;  %1714 = vperm.xlu0 %9070, %v7128_v56   ;;  %v854_v21 = vmul.f32 %v9938_v31, %v11881_v51  ;;  %v11883_v24 = vld [vmem:[#allocation21_spill] sm:$0xff] }
 0x194   : >> { %v1016_v56 = vmul.f32 %v9959_v50, %v11883_v24  ;;  %v11884_v12 = vld [vmem:[#allocation9_spill] sm:$0xff]  ;;  %v856_v30 = vmul.f32 %v9938_v31, %v11887_v33  ;;  %v1148_v47 = vmul.f32 %v9990_v36, %v9926_v57  ;;  %v10104_v57 = vld [vmem:[%s11844_s1 + $0x5] ss:$0 sm:$0xff] }
 0x195   : >> { %v10045_v2 = vadd.f32 %v1157_v41, %v1028_v43  ;;  %v10047_v1 = vadd.f32 %v1156_v6, %v1027_v55  ;;  %v855_v22 = vmul.f32 %v9938_v31, %v11884_v12  ;;  %v11885_v41 = vld [vmem:[#allocation15_spill] sm:$0xff]  ;;  %v871_v17 = vadd.f32 %v854_v21, %v9940_v42  ;;  %v7115_v37 = vld [vmem:[%s9626_s16 + $0x8e] sm:$0xff]  ;;  %v11892_v21 = vld [vmem:[#allocation26_spill] sm:$0xff] }
 0x196   : >> { %v1115_v39 = vpop.permute.xlu1 %1114  ;;  %v1110_v48 = vpop.permute.xlu0 %1109  ;;  %v1002_v6 = vmul.f32 %v9959_v50, %v11885_v41  ;;  %v1033_v7 = vadd.f32 %v1016_v56, %v885_v4  ;;  %v873_v16 = vadd.f32 %v856_v30, %v11892_v21  ;;  %v7119_v12 = vld [vmem:[%s9626_s16 + $0xae] sm:$0xff]  ;;  %v11895_v41 = vld [vmem:[#allocation19_spill] sm:$0xff] }
 0x197   : >> { %v1159_v25 = vmul.f32 %v9990_v36, %v1115_v39  ;;  %v1158_v29 = vmul.f32 %v9990_v36, %v1110_v48  ;;  %1644 = vperm.xlu1 %9071, %v7114_v11   ;;  %1578 = vperm.xlu0 %9070, %v7109_v58   ;;  %v886_v11 = vadd.f32 %v869_v62, %v740_v38  ;;  %v11893_v38 = vld [vmem:[#allocation25_spill] sm:$0xff] }
 0x198   : >> { %v872_v48 = vadd.f32 %v855_v22, %v9971_v63  ;;  %v7117_v22 = vld [vmem:[%s9626_s16 + $0x9e] sm:$0xff] }
 0x199   : >> { %v10066_v15 = vadd.f32 %v1159_v25, %v1030_v14  ;;  %v10068_v18 = vadd.f32 %v1158_v29, %v1029_v53  ;;  %v1018_v53 = vmul.f32 %v9959_v50, %v11888_v9  ;;  %v1034_v42 = vadd.f32 %v1017_v44, %v886_v11  ;;  %v11889_v29 = vld [vmem:[#allocation18_spill] sm:$0xff]  ;;  %v11894_v44 = vld [vmem:[#allocation23_spill] sm:$0xff] }
 0x19a   : >> { %v1125_v0 = vpop.permute.xlu1 %1124  ;;  %v1120_v55 = vpop.permute.xlu0 %1119  ;;  %v1019_v14 = vadd.f32 %v1002_v6, %v871_v17  ;;  %v887_v25 = vadd.f32 %v870_v26, %v741_v59  ;;  %v1003_v61 = vmul.f32 %v9959_v50, %v11889_v29  ;;  %v1005_v6 = vmul.f32 %v9959_v50, %v11895_v41  ;;  %v7121_v9 = vld [vmem:[%s9626_s16 + $0xbe] sm:$0xff]  ;;  %s10455_s16 = scalar_lea.vmem [#allocation2], %s6809_s15 }
 0x19b   : >> { %v1161_v43 = vmul.f32 %v9990_v36, %v1125_v0  ;;  %v1160_v27 = vmul.f32 %v9990_v36, %v1120_v55  ;;  %1664 = vperm.xlu1 %9071, %v7118_v20   ;;  %1654 = vperm.xlu0 %9070, %v7116_v19   ;;  %v857_v20 = vmul.f32 %v9938_v31, %v11890_v32  ;;  %v11891_v19 = vld [vmem:[#allocation17_spill] sm:$0xff] }
 0x19c   : >> { %v1004_v51 = vmul.f32 %v9959_v50, %v11891_v19  ;;  %v1035_v62 = vadd.f32 %v1018_v53, %v887_v25  ;;  %v1165_v24 = vadd.f32 %v1148_v47, %v1019_v14  ;;  %v1150_v31 = vmul.f32 %v9990_v36, %v9969_v54 }
 0x19d   : >> { %v10086_v58 = vadd.f32 %v1161_v43, %v1032_v45  ;;  %v10088_v13 = vadd.f32 %v1160_v27, %v1031_v46  ;;  %v1149_v46 = vmul.f32 %v9990_v36, %v11893_v38  ;;  %v728_v43 = vadd.f32 %v9975_v10, %v11894_v44 }
 0x19e   : >> { %v1135_v49 = vpop.permute.xlu1 %1134  ;;  %v1130_v35 = vpop.permute.xlu0 %1129  ;;  %v1020_v27 = vadd.f32 %v1003_v61, %v872_v48  ;;  %v1021_v4 = vadd.f32 %v1004_v51, %v873_v16 }
 0x19f   : >> { %v1163_v52 = vmul.f32 %v9990_v36, %v1135_v49  ;;  %v1162_v39 = vmul.f32 %v9990_v36, %v1130_v35  ;;  %1724 = vperm.xlu1 %9071, %v7130_v28   ;;  %1674 = vperm.xlu0 %9070, %v7120_v3   ;;  %v874_v26 = vadd.f32 %v857_v20, %v728_v43  ;;  %v11896_v3 = vld [vmem:[#allocation27_spill] sm:$0xff] }
 0x1a0   : >> { %v1166_v28 = vadd.f32 %v1149_v46, %v1020_v27  ;;  %v1151_v17 = vmul.f32 %v9990_v36, %v11896_v3  ;;  %v1167_v30 = vadd.f32 %v1150_v31, %v1021_v4 }
 0x1a1   : >> { %v10112_v63 = vadd.f32 %v1163_v52, %v1034_v42  ;;  %v10114_v59 = vadd.f32 %v1162_v39, %v1033_v7  ;;  %v1022_v53 = vadd.f32 %v1005_v6, %v874_v26 }
 0x1a2   : >> { %v1206_v56 = vpop.permute.xlu1 %1205  ;;  %v1140_v45 = vpop.permute.xlu0 %1139 }
 0x1a3   : >> { %v1294_v0 = vmul.f32 %v10104_v57, %v1206_v56  ;;  %v1164_v55 = vmul.f32 %v9990_v36, %v1140_v45  ;;  %1649 = vperm.xlu1 %9071, %v7115_v37   ;;  %1533 = vperm.xlu0 %9070, %v7100_v40   ;;  %v1168_v42 = vadd.f32 %v1151_v17, %v1022_v53 }
 0x1a5   : >> { %v10129_v34 = vadd.f32 %v1294_v0, %v1165_v24  ;;  %v1181_v54 = vadd.f32 %v1164_v55, %v1035_v62 }
 0x1a6   : >> { %v1216_v11 = vpop.permute.xlu1 %1215  ;;  %v1211_v33 = vpop.permute.xlu0 %1210 }
 0x1a7   : >> { %v1296_v10 = vmul.f32 %v10104_v57, %v1216_v11  ;;  %v1295_v7 = vmul.f32 %v10104_v57, %v1211_v33  ;;  %1669 = vperm.xlu1 %9071, %v7119_v12   ;;  %1659 = vperm.xlu0 %9070, %v7117_v22  }
 0x1a9   : >> { %v1313_v50 = vadd.f32 %v1296_v10, %v1167_v30  ;;  %v1312_v47 = vadd.f32 %v1295_v7, %v1166_v28 }
 0x1aa   : >> { %v1226_v49 = vpop.permute.xlu1 %1225  ;;  %v1221_v35 = vpop.permute.xlu0 %1220 }
 0x1ab   : >> { %v1298_v52 = vmul.f32 %v10104_v57, %v1226_v49  ;;  %v1297_v36 = vmul.f32 %v10104_v57, %v1221_v35  ;;  %1679 = vperm.xlu0 %9070, %v7121_v9  }
 0x1ad   : >> { %v1315_v39 = vadd.f32 %v1298_v52, %v10006_v5  ;;  %v1314_v48 = vadd.f32 %v1297_v36, %v1168_v42 }
 0x1ae   : >> { %v1236_v14 = vpop.permute.xlu1 %1235  ;;  %v1231_v25 = vpop.permute.xlu0 %1230 }
 0x1af   : >> { %v1300_v29 = vmul.f32 %v10104_v57, %v1236_v14  ;;  %v1299_v61 = vmul.f32 %v10104_v57, %v1231_v25 }
 0x1b1   : >> { %v1317_v37 = vadd.f32 %v1300_v29, %v10027_v60  ;;  %v1316_v40 = vadd.f32 %v1299_v61, %v10004_v8 }
 0x1b2   : >> { %v1246_v32 = vpop.permute.xlu1 %1245  ;;  %v1241_v20 = vpop.permute.xlu0 %1240 }
 0x1b3   : >> { %v1302_v19 = vmul.f32 %v10104_v57, %v1246_v32  ;;  %v1301_v51 = vmul.f32 %v10104_v57, %v1241_v20 }
 0x1b5   : >> { %v10146_v21 = vadd.f32 %v1302_v19, %v10047_v1  ;;  %v1318_v5 = vadd.f32 %v1301_v51, %v10025_v23 }
 0x1b6   : >> { %v1256_v16 = vpop.permute.xlu1 %1255  ;;  %v1251_v62 = vpop.permute.xlu0 %1250 }
 0x1b7   : >> { %v1304_v38 = vmul.f32 %v10104_v57, %v1256_v16  ;;  %v1303_v46 = vmul.f32 %v10104_v57, %v1251_v62 }
 0x1b9   : >> { %v10152_v60 = vadd.f32 %v1304_v38, %v10068_v18  ;;  %v1320_v8 = vadd.f32 %v1303_v46, %v10045_v2 }
 0x1ba   : >> { %v1266_v24 = vpop.permute.xlu1 %1265  ;;  %v1261_v56 = vpop.permute.xlu0 %1260 }
 0x1bb   : >> { %v1306_v45 = vmul.f32 %v10104_v57, %v1266_v24  ;;  %v1305_v1 = vmul.f32 %v10104_v57, %v1261_v56  ;;  %v10210_v24 = vld [vmem:[%s11844_s1 + $0x7] ss:$0 sm:$0xff] }
 0x1bd   : >> { %v10158_v31 = vadd.f32 %v1306_v45, %v10088_v13  ;;  %v1322_v23 = vadd.f32 %v1305_v1, %v10066_v15  ;;  %v10172_v15 = vld [vmem:[%s11844_s1 + $0x6] ss:$0 sm:$0xff] }
 0x1be   : >> { %v1276_v0 = vpop.permute.xlu1 %1275  ;;  %v1271_v55 = vpop.permute.xlu0 %1270 }
 0x1bf   : >> { %v1308_v44 = vmul.f32 %v10104_v57, %v1276_v0  ;;  %v1307_v18 = vmul.f32 %v10104_v57, %v1271_v55 }
 0x1c1   : >> { %v10164_v43 = vadd.f32 %v1308_v44, %v10114_v59  ;;  %v1324_v2 = vadd.f32 %v1307_v18, %v10086_v58 }
 0x1c2   : >> { %v1286_v27 = vpop.permute.xlu1 %1285  ;;  %v1281_v12 = vpop.permute.xlu0 %1280 }
 0x1c3   : >> { %v1310_v22 = vmul.f32 %v10104_v57, %v1286_v27  ;;  %v1309_v13 = vmul.f32 %v10104_v57, %v1281_v12 }
 0x1c5   : >> { %v1327_v4 = vadd.f32 %v1310_v22, %v1181_v54  ;;  %v1326_v41 = vadd.f32 %v1309_v13, %v10112_v63 }
 0x1c6   : >> { %v1358_v6 = vpop.permute.xlu1 %1357  ;;  %v10175_v26 = vpop.permute.xlu0 %1352 }
 0x1c7   : >> { %v1442_v59 = vmul.f32 %v10172_v15, %v1358_v6 }
 0x1c9   : >> { %v10178_v58 = vadd.f32 %v1442_v59, %v1312_v47 }
 0x1ca   : >> { %v1368_v28 = vpop.permute.xlu1 %1367  ;;  %v1363_v3 = vpop.permute.xlu0 %1362 }
 0x1cb   : >> { %v1444_v17 = vmul.f32 %v10172_v15, %v1368_v28  ;;  %v1443_v57 = vmul.f32 %v10172_v15, %v1363_v3 }
 0x1cd   : >> { %v10182_v11 = vadd.f32 %v1444_v17, %v1314_v48  ;;  %v1460_v33 = vadd.f32 %v1443_v57, %v1313_v50 }
 0x1ce   : >> { %v1378_v30 = vpop.permute.xlu1 %1377  ;;  %v1373_v54 = vpop.permute.xlu0 %1372 }
 0x1cf   : >> { %v1446_v63 = vmul.f32 %v10172_v15, %v1378_v30  ;;  %v1445_v10 = vmul.f32 %v10172_v15, %v1373_v54  ;;  %v10233_v30 = vld [vmem:[%s11844_s1 + $0x8] ss:$0 sm:$0xff] }
 0x1d1   : >> { %v10186_v7 = vadd.f32 %v1446_v63, %v1316_v40  ;;  %v10188_v9 = vadd.f32 %v1445_v10, %v1315_v39 }
 0x1d2   : >> { %v1388_v53 = vpop.permute.xlu1 %1387  ;;  %v1383_v47 = vpop.permute.xlu0 %1382 }
 0x1d3   : >> { %v1448_v49 = vmul.f32 %v10172_v15, %v1388_v53  ;;  %v1447_v35 = vmul.f32 %v10172_v15, %v1383_v47 }
 0x1d5   : >> { %v10192_v42 = vadd.f32 %v1448_v49, %v1318_v5  ;;  %v1464_v52 = vadd.f32 %v1447_v35, %v1317_v37  ;;  %v9330_v49 = vmov 1983009808  }
 0x1d6   : >> { %v1398_v50 = vpop.permute.xlu1 %1397  ;;  %v1393_v36 = vpop.permute.xlu0 %1392  ;;  %v10238_v35 = vunpack.c.l.s4 %v9330_v49 }
 0x1d7   : >> { %v1450_v48 = vmul.f32 %v10172_v15, %v1398_v50  ;;  %v1449_v59 = vmul.f32 %v10172_v15, %v1393_v36 }
 0x1d9   : >> { %v1467_v14 = vadd.f32 %v1450_v48, %v1320_v8  ;;  %v1466_v54 = vadd.f32 %v1449_v59, %v10146_v21 }
 0x1da   : >> { %v1408_v25 = vpop.permute.xlu1 %1407  ;;  %v1403_v29 = vpop.permute.xlu0 %1402 }
 0x1db   : >> { %v1452_v61 = vmul.f32 %v10172_v15, %v1408_v25  ;;  %v1441_v25 = vmul.f32 %v10172_v15, %v10175_v26 }
 0x1dd   : >> { %v1469_v39 = vadd.f32 %v1452_v61, %v1322_v23 }
 0x1de   : >> { %v1418_v40 = vpop.permute.xlu1 %1417  ;;  %v1413_v32 = vpop.permute.xlu0 %1412 }
 0x1df   : >> { %v1454_v20 = vmul.f32 %v10172_v15, %v1418_v40 }
 0x1e1   : >> { %v10197_v19 = vadd.f32 %v1454_v20, %v1324_v2  ;;  %v1902_v20 = vlaneseq }
 0x1e2   : >> { %v1428_v51 = vpop.permute.xlu1 %1427  ;;  %v1423_v5 = vpop.permute.xlu0 %1422 }
 0x1e3   : >> { %v1456_v37 = vmul.f32 %v10172_v15, %v1428_v51  ;;  %v1455_v51 = vmul.f32 %v10172_v15, %v1423_v5 }
 0x1e5   : >> { %v10200_v16 = vadd.f32 %v1456_v37, %v1326_v41  ;;  %v1472_v59 = vadd.f32 %v1455_v51, %v10164_v43 }
 0x1e6   : >> { %v10202_v62 = vpop.permute.xlu1 %1498  ;;  %v1433_v38 = vpop.permute.xlu0 %1432 }
 0x1e7   : >> { %v1457_v46 = vmul.f32 %v10172_v15, %v1433_v38 }
 0x1e9   : >> { %v10205_v8 = vadd.f32 %v1457_v46, %v1327_v4 }
 0x1ea   : >> { %v1509_v56 = vpop.permute.xlu1 %1508  ;;  %v10212_v45 = vpop.permute.xlu0 %1503 }
 0x1eb   : >> { %v1589_v1 = vmul.f32 %v10210_v24, %v1509_v56  ;;  %v1901_v56 = vunpack.c.0.s8 %v10238_v35 }
 0x1ed   : >> { %v10215_v23 = vadd.f32 %v1589_v1, %v1460_v33  ;;  %v1451_v33 = vmul.f32 %v10172_v15, %v1403_v29  ;;  %v1453_v29 = vmul.f32 %v10172_v15, %v1413_v32  ;;  %v11897_v1 = vld [vmem:[#allocation5_spill] sm:$0xff] }
 0x1ee   : >> { %v10217_v0 = vpop.permute.xlu1 %1518  ;;  %v10219_v55 = vpop.permute.xlu0 %1513 }
 0x1ef   : >> { %v1468_v21 = vadd.f32 %v1451_v33, %v10152_v60  ;;  %v1590_v35 = vmul.f32 %v10210_v24, %v10219_v55 }
 0x1f2   : >> { %v1529_v44 = vpop.permute.xlu1 %1528  ;;  %v10221_v18 = vpop.permute.xlu0 %1523 }
 0x1f3   : >> { %v1593_v2 = vmul.f32 %v10210_v24, %v1529_v44 }
 0x1f5   : >> { %v10224_v27 = vadd.f32 %v1593_v2, %v1464_v52  ;;  %v1458_v2 = vadd.f32 %v1441_v25, %v10129_v34 }
 0x1f6   : >> { %v1544_v12 = vpop.permute.xlu1 %1543  ;;  %v1539_v22 = vpop.permute.xlu0 %1538 }
 0x1f7   : >> { %v1596_v17 = vmul.f32 %v10210_v24, %v1544_v12  ;;  %v1595_v57 = vmul.f32 %v10210_v24, %v1539_v22  ;;  %v1470_v12 = vadd.f32 %v1453_v29, %v10158_v31  ;;  %v11898_v31 = vld [vmem:[#allocation6_spill] sm:$0xff] }
 0x1f9   : >> { %v1613_v52 = vadd.f32 %v1596_v17, %v1467_v14  ;;  %v1612_v50 = vadd.f32 %v1595_v57, %v1466_v54  ;;  %v1587_v17 = vmul.f32 %v10210_v24, %v10202_v62 }
 0x1fa   : >> { %v1554_v13 = vpop.permute.xlu1 %1553  ;;  %v1549_v4 = vpop.permute.xlu0 %1548 }
 0x1fb   : >> { %v1598_v63 = vmul.f32 %v10210_v24, %v1554_v13  ;;  %v1597_v10 = vmul.f32 %v10210_v24, %v1549_v4 }
 0x1fd   : >> { %v1615_v37 = vadd.f32 %v1598_v63, %v1469_v39  ;;  %v1614_v38 = vadd.f32 %v1597_v10, %v1468_v21 }
 0x1fe   : >> { %v1564_v41 = vpop.permute.xlu1 %1563  ;;  %v1559_v6 = vpop.permute.xlu0 %1558 }
 0x1ff   : >> { %v1600_v15 = vmul.f32 %v10210_v24, %v1564_v41  ;;  %v1599_v39 = vmul.f32 %v10210_v24, %v1559_v6 }
 0x201   : >> { %v1616_v43 = vadd.f32 %v1599_v39, %v1470_v12 }
 0x202   : >> { %v1574_v28 = vpop.permute.xlu1 %1573  ;;  %v1569_v3 = vpop.permute.xlu0 %1568 }
 0x203   : >> { %v1602_v57 = vmul.f32 %v10210_v24, %v1574_v28  ;;  %v1601_v33 = vmul.f32 %v10210_v24, %v1569_v3  ;;  %v11899_v28 = vld [vmem:[#allocation7_spill] sm:$0xff] }
 0x206   : >> { %v1690_v53 = vpop.permute.xlu1 %1689  ;;  %v1685_v47 = vpop.permute.xlu0 %1684 }
 0x207   : >> { %v1742_v36 = vmul.f32 %v10233_v30, %v1690_v53  ;;  %v1741_v48 = vmul.f32 %v10233_v30, %v1685_v47  ;;  %v1617_v53 = vadd.f32 %v1600_v15, %v10197_v19 }
 0x209   : >> { %v1759_v61 = vadd.f32 %v1742_v36, %v1613_v52  ;;  %v1758_v40 = vadd.f32 %v1741_v48, %v1612_v50  ;;  %v1619_v36 = vadd.f32 %v1602_v57, %v10200_v16  ;;  %v1618_v48 = vadd.f32 %v1601_v33, %v1472_v59 }
 0x20a   : >> { %v1700_v14 = vpop.permute.xlu1 %1699  ;;  %v1695_v46 = vpop.permute.xlu0 %1694  ;;  %v1604_v16 = vadd.f32 %v1587_v17, %v1458_v2 }
 0x20b   : >> { %v1780_v44 = vadd.f32 %v11897_v1, %v1759_v61  ;;  %v1779_v26 = vadd.f32 %v11897_v1, %v1758_v40  ;;  %v1744_v60 = vmul.f32 %v10233_v30, %v1700_v14  ;;  %v1743_v32 = vmul.f32 %v10233_v30, %v1695_v46 }
 0x20d   : >> { %v1797_v5 = vmax.f32 %v1780_v44, 0.0  ;;  %v1796_v22 = vmax.f32 %v1779_v26, 0.0  ;;  %v1761_v13 = vadd.f32 %v1744_v60, %v1615_v37  ;;  %v1760_v4 = vadd.f32 %v1743_v32, %v1614_v38 }
 0x20e   : >> { %v1710_v34 = vpop.permute.xlu1 %1709  ;;  %v1705_v54 = vpop.permute.xlu0 %1704 }
 0x20f   : >> { %v1818_v63 = vmul.f32 %v11898_v31, %v1797_v5  ;;  %v1817_v41 = vmul.f32 %v11898_v31, %v1796_v22  ;;  %v1782_v6 = vadd.f32 %v11897_v1, %v1761_v13  ;;  %v1781_v10 = vadd.f32 %v11897_v1, %v1760_v4 }
 0x210   : >> { %v1746_v47 = vmul.f32 %v10233_v30, %v1710_v34  ;;  %v1745_v62 = vmul.f32 %v10233_v30, %v1705_v54  ;;  %v1591_v4 = vmul.f32 %v10210_v24, %v10217_v0 }
 0x211   : >> { %v1839_v49 = vadd.f32 %v11899_v28, %v1818_v63  ;;  %v1838_v3 = vadd.f32 %v11899_v28, %v1817_v41  ;;  %v1799_v52 = vmax.f32 %v1782_v6, 0.0  ;;  %v1798_v50 = vmax.f32 %v1781_v10, 0.0 }
 0x212   : >> { %v1763_v25 = vadd.f32 %v1746_v47, %v1617_v53  ;;  %v1762_v21 = vadd.f32 %v1745_v62, %v1616_v43  ;;  %v1720_v29 = vpop.permute.xlu1 %1719  ;;  %v1715_v61 = vpop.permute.xlu0 %1714  ;;  %v1903_v63 = vshrl.u32 %v1902_v20, 7 }
 0x213   : >> { %v1858_v40 = vrot.slane %v1839_v49, 2  ;;  %v1857_v19 = vrot.slane %v1838_v3, 2  ;;  %v1820_v51 = vmul.f32 %v11898_v31, %v1799_v52  ;;  %v1819_v37 = vmul.f32 %v11898_v31, %v1798_v50 }
 0x214   : >> { %v1784_v38 = vadd.f32 %v11897_v1, %v1763_v25  ;;  %v1783_v14 = vadd.f32 %v11897_v1, %v1762_v21  ;;  %v1748_v46 = vmul.f32 %v10233_v30, %v1720_v29  ;;  %v1747_v44 = vmul.f32 %v10233_v30, %v1715_v61 }
 0x215   : >> { %v1841_v26 = vadd.f32 %v11899_v28, %v1820_v51  ;;  %v1840_v60 = vadd.f32 %v11899_v28, %v1819_v37  ;;  %v1859_v32 = vsel %vm1856_vm0, %v1857_v19, %v1858_v40  ;;  %v1608_v3 = vadd.f32 %v1591_v4, %v10188_v9 }
 0x216   : >> { %v1801_v12 = vmax.f32 %v1784_v38, 0.0  ;;  %v1800_v15 = vmax.f32 %v1783_v14, 0.0  ;;  %v1765_v39 = vadd.f32 %v1748_v46, %v1619_v36  ;;  %v1764_v5 = vadd.f32 %v1747_v44, %v1618_v48  ;;  %v1645_v22 = vpop.permute.xlu1 %1644  ;;  %v1579_v13 = vpop.permute.xlu0 %1578 }
 0x217   : >> { %v1862_v59 = vrot.slane %v1841_v26, 2  ;;  %v1860_v57 = vrot.slane %v1840_v60, 2  ;;  %v1733_v33 = vmul.f32 %v10233_v30, %v1645_v22  ;;  %v1603_v61 = vmul.f32 %v10210_v24, %v1579_v13 }
 0x218   : >> { %v1822_v2 = vmul.f32 %v11898_v31, %v1801_v12  ;;  %v1821_v17 = vmul.f32 %v11898_v31, %v1800_v15  ;;  %v1786_v34 = vadd.f32 %v11897_v1, %v1765_v39  ;;  %v1785_v54 = vadd.f32 %v11897_v1, %v1764_v5 }
 0x219   : >> { %v1750_v41 = vadd.f32 %v1733_v33, %v1604_v16  ;;  %v1863_v6 = vsel %vm1856_vm0, %v1860_v57, %v1862_v59  ;;  %v10290_v10 = vsel %vm1856_vm0, %v1858_v40, %v1860_v57  ;;  %v10312_v46 = vsub.s32 %v1901_v56, %v1903_v63 }
 0x21a   : >> { %v1843_v0 = vadd.f32 %v11899_v28, %v1822_v2  ;;  %v1842_v53 = vadd.f32 %v11899_v28, %v1821_v17  ;;  %v1803_v43 = vmax.f32 %v1786_v34, 0.0  ;;  %v1802_v47 = vmax.f32 %v1785_v54, 0.0  ;;  %v1665_v62 = vpop.permute.xlu1 %1664  ;;  %v1655_v49 = vpop.permute.xlu0 %1654 }
 0x21b   : >> { %v1771_v52 = vadd.f32 %v11897_v1, %v1750_v41  ;;  %v1737_v20 = vmul.f32 %v10233_v30, %v1665_v62  ;;  %v1735_v50 = vmul.f32 %v10233_v30, %v1655_v49  ;;  %v1588_v60 = vmul.f32 %v10210_v24, %v10212_v45 }
 0x21c   : >> { %v1866_v36 = vrot.slane %v1843_v0, 2  ;;  %v1864_v48 = vrot.slane %v1842_v53, 2  ;;  %v1824_v25 = vmul.f32 %v11898_v31, %v1803_v43  ;;  %v1823_v21 = vmul.f32 %v11898_v31, %v1802_v47 }
 0x21d   : >> { %v1788_v29 = vmax.f32 %v1771_v52, 0.0  ;;  %v1754_v40 = vadd.f32 %v1737_v20, %v1608_v3  ;;  %v1752_v19 = vadd.f32 %v1735_v50, %v10215_v23  ;;  %v1620_v13 = vadd.f32 %v1603_v61, %v10205_v8 }
 0x21e   : >> { %v10303_v9 = vadd.f32 %v11899_v28, %v1824_v25  ;;  %v1844_v51 = vadd.f32 %v11899_v28, %v1823_v21  ;;  %v1867_v37 = vsel %vm1856_vm0, %v1864_v48, %v1866_v36  ;;  %v1725_v38 = vpop.permute.xlu1 %1724  ;;  %v10308_v14 = vsel %vm1856_vm0, %v1862_v59, %v1864_v48  ;;  %v1675_v26 = vpop.permute.xlu0 %1674 }
 0x21f   : >> { %v1809_v44 = vmul.f32 %v11898_v31, %v1788_v29  ;;  %v1775_v16 = vadd.f32 %v11897_v1, %v1754_v40  ;;  %v1773_v23 = vadd.f32 %v11897_v1, %v1752_v19  ;;  %v1749_v39 = vmul.f32 %v10233_v30, %v1725_v38 }
 0x220   : >> { %v1870_v12 = vrot.slane %v10303_v9, 2  ;;  %v1868_v15 = vrot.slane %v1844_v51, 2  ;;  %v1739_v45 = vmul.f32 %v10233_v30, %v1675_v26  ;;  %v1592_v2 = vmul.f32 %v10210_v24, %v10221_v18 }
 0x221   : >> { %v1830_v56 = vadd.f32 %v11899_v28, %v1809_v44  ;;  %v1792_v5 = vmax.f32 %v1775_v16, 0.0  ;;  %v1790_v22 = vmax.f32 %v1773_v23, 0.0  ;;  %v1766_v8 = vadd.f32 %v1749_v39, %v1620_v13 }
 0x222   : >> { %v10328_v4 = vsel %vm1856_vm0, %v1868_v15, %v1870_v12  ;;  %v10332_v59 = vsel %vm1856_vm0, %v1866_v36, %v1868_v15  ;;  %v1605_v41 = vadd.f32 %v1588_v60, %v10178_v58  ;;  %v1756_v0 = vadd.f32 %v1739_v45, %v10224_v27  ;;  %v1650_v20 = vpop.permute.xlu1 %1649  ;;  %v1534_v26 = vpop.permute.xlu0 %1533 }
 0x223   : >> { %v1882_v57 = vmax.f32 %v1830_v56, %v1859_v32  ;;  %v1813_v33 = vmul.f32 %v11898_v31, %v1792_v5  ;;  %v1811_v55 = vmul.f32 %v11898_v31, %v1790_v22  ;;  %v10343_v32 = vadd.f32 %v1590_v35, %v10182_v11 }
 0x224   : >> { %v10349_v62 = vadd.f32 %v1592_v2, %v10186_v7  ;;  %v1787_v52 = vadd.f32 %v11897_v1, %v1766_v8  ;;  %v1734_v61 = vmul.f32 %v10233_v30, %v1650_v20 }
 0x225   : >> { %v1898_v17 = vcombine.high %v1882_v57, %v1882_v57  ;;  %v1905_v34 = vrot.slane %v1882_v57, %v10312_v46  ;;  %v1834_v54 = vadd.f32 %v11899_v28, %v1813_v33  ;;  %v1832_v63 = vadd.f32 %v11899_v28, %v1811_v55 }
 0x226   : >> { %v1594_v55 = vmul.f32 %v10210_v24, %v1534_v26 }
 0x227   : >> { %v1912_v53 = vrot.slane %v1898_v17, %v10312_v46  ;;  %v1913_v43 = vcombine.high %v1905_v34, %v1905_v34  ;;  %v2067_v18 = vsel %vm2066_vm1, %v1905_v34, -inf  ;;  %v1886_v47 = vmax.f32 %v1834_v54, %v1867_v37 }
 0x228   : >> { %v2068_v49 = vrot.slane %v2067_v18, 4  ;;  %v1884_v3 = vmax.f32 %v1832_v63, %v1863_v6  ;;  %v1777_v6 = vadd.f32 %v11897_v1, %v1756_v0  ;;  %v1804_v0 = vmax.f32 %v1787_v52, 0.0 }
 0x229   : >> { %v1914_v58 = vcombine.high %v1912_v53, %v1912_v53  ;;  %v2074_v11 = vsel %vm2066_vm1, %v1913_v43, -inf  ;;  %v2081_v50 = vsel %vm2066_vm1, %v1912_v53, -inf  ;;  %v1966_v27 = vcombine.high %v1886_v47, %v1886_v47 }
 0x22a   : >> { %v2069_v36 = vmax.f32 %v2067_v18, %v2068_v49  ;;  %v2075_v48 = vrot.slane %v2074_v11, 4  ;;  %v2082_v25 = vrot.slane %v2081_v50, 4  ;;  %v1973_v21 = vrot.slane %v1886_v47, %v10312_v46 }
 0x22b   : >> { %v2088_v29 = vsel %vm2066_vm1, %v1914_v58, -inf  ;;  %v1980_v7 = vrot.slane %v1966_v27, %v10312_v46  ;;  %v1932_v33 = vcombine.high %v1884_v3, %v1884_v3  ;;  %v1939_v63 = vrot.slane %v1884_v3, %v10312_v46 }
 0x22c   : >> { %v2070_v40 = vrot.slane %v2069_v36, 2  ;;  %v2076_v19 = vmax.f32 %v2074_v11, %v2075_v48  ;;  %v2083_v51 = vmax.f32 %v2081_v50, %v2082_v25  ;;  %v2089_v37 = vrot.slane %v2088_v29, 4 }
 0x22d   : >> { %v1981_v38 = vcombine.high %v1973_v21, %v1973_v21  ;;  %v1982_v44 = vcombine.high %v1980_v7, %v1980_v7  ;;  %v2179_v16 = vsel %vm2066_vm1, %v1973_v21, -inf  ;;  %v2193_v23 = vsel %vm2066_vm1, %v1980_v7, -inf }
 0x22e   : >> { %v2071_v60 = vmax.f32 %v2069_v36, %v2070_v40  ;;  %v2077_v15 = vrot.slane %v2076_v19, 2  ;;  %v2084_v39 = vrot.slane %v2083_v51, 2  ;;  %v2090_v35 = vmax.f32 %v2088_v29, %v2089_v37 }
 0x22f   : >> { %v2180_v56 = vrot.slane %v2179_v16, 4  ;;  %v2186_v5 = vsel %vm2066_vm1, %v1981_v38, -inf  ;;  %v2194_v22 = vrot.slane %v2193_v23, 4  ;;  %v2200_v13 = vsel %vm2066_vm1, %v1982_v44, -inf }
 0x230   : >> { %v2078_v45 = vmax.f32 %v2076_v19, %v2077_v15  ;;  %v2091_v57 = vrot.slane %v2090_v35, 2  ;;  %v2187_v8 = vrot.slane %v2186_v5, 4  ;;  %v2201_v34 = vrot.slane %v2200_v13, 4 }
 0x231   : >> { %v2181_v2 = vmax.f32 %v2179_v16, %v2180_v56  ;;  %v2195_v17 = vmax.f32 %v2193_v23, %v2194_v22  ;;  %v2072_v54 = vrot.slane %v2071_v60, 1  ;;  %v1794_v53 = vmax.f32 %v1777_v6, 0.0 }
 0x232   : >> { %v2085_v43 = vmax.f32 %v2083_v51, %v2084_v39  ;;  %v2188_v47 = vmax.f32 %v2186_v5, %v2187_v8  ;;  %v2202_v49 = vmax.f32 %v2200_v13, %v2201_v34  ;;  %v2079_v20 = vrot.slane %v2078_v45, 1 }
 0x233   : >> { %v2182_v18 = vrot.slane %v2181_v2, 2  ;;  %v1946_v58 = vrot.slane %v1932_v33, %v10312_v46  ;;  %v1751_v11 = vadd.f32 %v1734_v61, %v1605_v41  ;;  %v10367_v24 = vadd.f32 %v1594_v55, %v10192_v42 }
 0x234   : >> { %v2092_v50 = vmax.f32 %v2090_v35, %v2091_v57  ;;  %v2189_v27 = vrot.slane %v2188_v47, 2  ;;  %v2196_v36 = vrot.slane %v2195_v17, 2  ;;  %v2203_v48 = vrot.slane %v2202_v49, 2 }
 0x235   : >> { %v1947_v25 = vcombine.high %v1939_v63, %v1939_v63  ;;  %v1948_v3 = vcombine.high %v1946_v58, %v1946_v58  ;;  %v1825_v52 = vmul.f32 %v11898_v31, %v1804_v0  ;;  %v1815_v21 = vmul.f32 %v11898_v31, %v1794_v53 }
 0x236   : >> { %v2073_v29 = vmax.f32 %v2071_v60, %v2072_v54  ;;  %v2086_v7 = vrot.slane %v2085_v43, 1  ;;  %v2183_v6 = vmax.f32 %v2181_v2, %v2182_v18  ;;  %v2190_v40 = vmax.f32 %v2188_v47, %v2189_v27 }
 0x237   : >> { %v2080_v19 = vmax.f32 %v2078_v45, %v2079_v20  ;;  %v2123_v41 = vsel %vm2066_vm1, %v1939_v63, -inf  ;;  %v2130_v42 = vsel %vm2066_vm1, %v1947_v25, -inf  ;;  %v2137_v61 = vsel %vm2066_vm1, %v1946_v58, -inf  ;;  %v1670_v58 = vpop.permute.xlu1 %1669 }
 0x238   : >> { %v2093_v51 = vrot.slane %v2092_v50, 1  ;;  %v2197_v37 = vmax.f32 %v2195_v17, %v2196_v36  ;;  %v2204_v38 = vmax.f32 %v2202_v49, %v2203_v48  ;;  %v2124_v44 = vrot.slane %v2123_v41, 4 }
 0x239   : >> { %v2191_v16 = vrot.slane %v2190_v40, 1  ;;  %v2131_v23 = vrot.slane %v2130_v42, 4  ;;  %v2138_v26 = vrot.slane %v2137_v61, 4  ;;  %v2144_v15 = vsel %vm2066_vm1, %v1948_v3, -inf }
 0x23a   : >> { %v2087_v60 = vmax.f32 %v2085_v43, %v2086_v7  ;;  %v2184_v39 = vrot.slane %v2183_v6, 1  ;;  %v2125_v35 = vmax.f32 %v2123_v41, %v2124_v44  ;;  %v2145_v56 = vrot.slane %v2144_v15, 4 }
 0x23b   : >> { %v2327_v5 = vsel %vm2326_vm2, %v2080_v19, %v2073_v29  ;;  %v2132_v22 = vmax.f32 %v2130_v42, %v2131_v23  ;;  %v2139_v13 = vmax.f32 %v2137_v61, %v2138_v26  ;;  %v1836_v45 = vadd.f32 %v11899_v28, %v1815_v21 }
 0x23c   : >> { %v10377_v57 = vmax.f32 %v2092_v50, %v2093_v51  ;;  %v2198_v33 = vrot.slane %v2197_v37, 1  ;;  %v2205_v55 = vrot.slane %v2204_v38, 1  ;;  %v2126_v2 = vrot.slane %v2125_v35, 2 }
 0x23d   : >> { %v2192_v8 = vmax.f32 %v2190_v40, %v2191_v16  ;;  %v2133_v17 = vrot.slane %v2132_v22, 2  ;;  %v2146_v34 = vmax.f32 %v2144_v15, %v2145_v56  ;;  %v1888_v54 = vmax.f32 %v1836_v45, %v10328_v4 }
 0x23e   : >> { %v10381_v63 = vsel %vm2328_vm3, %v2087_v60, %v2327_v5  ;;  %v2185_v0 = vmax.f32 %v2183_v6, %v2184_v39  ;;  %v2140_v53 = vrot.slane %v2139_v13, 2  ;;  %v1772_v43 = vadd.f32 %v11897_v1, %v1751_v11 }
 0x23f   : >> { %v2134_v18 = vmax.f32 %v2132_v22, %v2133_v17  ;;  %v10385_v47 = vadd.f32 %v11899_v28, %v1825_v52  ;;  %v2000_v49 = vcombine.high %v1888_v54, %v1888_v54  ;;  %v2007_v20 = vrot.slane %v1888_v54, %v10312_v46 }
 0x240   : >> { %v2199_v50 = vmax.f32 %v2197_v37, %v2198_v33  ;;  %v10388_v27 = vmax.f32 %v2204_v38, %v2205_v55  ;;  %v2127_v36 = vmax.f32 %v2125_v35, %v2126_v2  ;;  %v1789_v4 = vmax.f32 %v1772_v43, 0.0 }
 0x241   : >> { %v2347_v48 = vsel %vm2326_vm2, %v2192_v8, %v2185_v0  ;;  %v2147_v25 = vrot.slane %v2146_v34, 2  ;;  %v2014_v3 = vrot.slane %v2000_v49, %v10312_v46  ;;  %v2015_v21 = vcombine.high %v2007_v20, %v2007_v20 }
 0x242   : >> { %v2141_v11 = vmax.f32 %v2139_v13, %v2140_v53  ;;  %v2235_v29 = vsel %vm2066_vm1, %v2007_v20, -inf  ;;  %v1810_v52 = vmul.f32 %v11898_v31, %v1789_v4  ;;  %v1738_v7 = vmul.f32 %v10233_v30, %v1670_v58  ;;  %v1660_v4 = vpop.permute.xlu0 %1659 }
 0x243   : >> { %v2135_v6 = vrot.slane %v2134_v18, 1  ;;  %v1872_v40 = vrot.slane %v10385_v47, 2  ;;  %v2016_v19 = vcombine.high %v2014_v3, %v2014_v3  ;;  %v2236_v41 = vrot.slane %v2235_v29, 4 }
 0x244   : >> { %v2128_v42 = vrot.slane %v2127_v36, 1  ;;  %v2242_v61 = vsel %vm2066_vm1, %v2015_v21, -inf  ;;  %v2249_v51 = vsel %vm2066_vm1, %v2014_v3, -inf  ;;  %v1831_v37 = vadd.f32 %v11899_v28, %v1810_v52 }
 0x245   : >> { %v2148_v38 = vmax.f32 %v2146_v34, %v2147_v25  ;;  %v2237_v44 = vmax.f32 %v2235_v29, %v2236_v41  ;;  %v2243_v16 = vrot.slane %v2242_v61, 4  ;;  %v2250_v23 = vrot.slane %v2249_v51, 4 }
 0x246   : >> { %v2142_v26 = vrot.slane %v2141_v11, 1  ;;  %v2256_v15 = vsel %vm2066_vm1, %v2016_v19, -inf  ;;  %v1883_v60 = vmax.f32 %v1831_v37, %v10290_v10  ;;  %v1755_v39 = vadd.f32 %v1738_v7, %v10349_v62 }
 0x247   : >> { %v2136_v35 = vmax.f32 %v2134_v18, %v2135_v6  ;;  %v2244_v56 = vmax.f32 %v2242_v61, %v2243_v16  ;;  %v2251_v5 = vmax.f32 %v2249_v51, %v2250_v23  ;;  %v2257_v22 = vrot.slane %v2256_v15, 4 }
 0x248   : >> { %v2348_v13 = vsel %vm2328_vm3, %v2199_v50, %v2347_v48  ;;  %v1915_v45 = vcombine.high %v1883_v60, %v1883_v60  ;;  %v1922_v33 = vrot.slane %v1883_v60, %v10312_v46  ;;  %v1776_v55 = vadd.f32 %v11897_v1, %v1755_v39  ;;  %v1680_v39 = vpop.permute.xlu0 %1679 }
 0x249   : >> { %v2129_v2 = vmax.f32 %v2127_v36, %v2128_v42  ;;  %v2238_v8 = vrot.slane %v2237_v44, 2  ;;  %v2245_v17 = vrot.slane %v2244_v56, 2  ;;  %v2252_v34 = vrot.slane %v2251_v5, 2 }
 0x24a   : >> { %v2149_v54 = vrot.slane %v2148_v38, 1  ;;  %v1929_v10 = vrot.slane %v1915_v45, %v10312_v46  ;;  %v1930_v0 = vcombine.high %v1922_v33, %v1922_v33  ;;  %v2095_v62 = vsel %vm2066_vm1, %v1922_v33, -inf }
 0x24b   : >> { %v2143_v53 = vmax.f32 %v2141_v11, %v2142_v26  ;;  %v2340_v43 = vsel %vm2326_vm2, %v2136_v35, %v2129_v2  ;;  %v2258_v18 = vmax.f32 %v2256_v15, %v2257_v22  ;;  %v1793_v49 = vmax.f32 %v1776_v55, 0.0 }
 0x24c   : >> { %v1931_v20 = vcombine.high %v1929_v10, %v1929_v10  ;;  %v2096_v58 = vrot.slane %v2095_v62, 4  ;;  %v2102_v50 = vsel %vm2066_vm1, %v1930_v0, -inf  ;;  %v2109_v36 = vsel %vm2066_vm1, %v1929_v10, -inf }
 0x24d   : >> { %v10410_v48 = vmax.f32 %v2237_v44, %v2238_v8  ;;  %v2246_v25 = vmax.f32 %v2244_v56, %v2245_v17  ;;  %v10412_v3 = vmax.f32 %v2251_v5, %v2252_v34  ;;  %v2331_v21 = vsel %vm2330_vm4, %v10377_v57, %v10381_v63 }
 0x24e   : >> { %v2097_v11 = vmax.f32 %v2095_v62, %v2096_v58  ;;  %v2103_v29 = vrot.slane %v2102_v50, 4  ;;  %v2110_v52 = vrot.slane %v2109_v36, 4  ;;  %v2116_v7 = vsel %vm2066_vm1, %v1931_v20, -inf }
 0x24f   : >> { %v10418_v6 = vmax.f32 %v2148_v38, %v2149_v54  ;;  %v10421_v19 = vsel %vm2328_vm3, %v2143_v53, %v2340_v43  ;;  %v2259_v41 = vrot.slane %v2258_v18, 2  ;;  %v2117_v42 = vrot.slane %v2116_v7, 4 }
 0x250   : >> { %v2098_v61 = vrot.slane %v2097_v11, 2  ;;  %v2104_v51 = vmax.f32 %v2102_v50, %v2103_v29  ;;  %v2111_v37 = vmax.f32 %v2109_v36, %v2110_v52  ;;  %v1814_v44 = vmul.f32 %v11898_v31, %v1793_v49 }
 0x251   : >> { %v2240_v57 = vrot.slane %v10410_v48, 1  ;;  %v2247_v63 = vrot.slane %v2246_v25, 1  ;;  %v2118_v16 = vmax.f32 %v2116_v7, %v2117_v42  ;;  %v10427_v38 = vsel %vm2330_vm4, %v10388_v27, %v2348_v13 }
 0x252   : >> { %v2254_v23 = vrot.slane %v10412_v3, 1  ;;  %v2099_v26 = vmax.f32 %v2097_v11, %v2098_v61  ;;  %v2105_v15 = vrot.slane %v2104_v51, 2  ;;  %v2112_v60 = vrot.slane %v2111_v37, 2 }
 0x253   : >> { %v2119_v35 = vrot.slane %v2118_v16, 2  ;;  %v1835_v56 = vadd.f32 %v11899_v28, %v1814_v44  ;;  %v1736_v5 = vmul.f32 %v10233_v30, %v1660_v4  ;;  %v10437_v22 = vsel %vm1856_vm0, %v1870_v12, %v1872_v40 }
 0x254   : >> { %v2260_v27 = vmax.f32 %v2258_v18, %v2259_v41  ;;  %v2100_v13 = vrot.slane %v2099_v26, 1  ;;  %v2106_v45 = vmax.f32 %v2104_v51, %v2105_v15  ;;  %v2113_v33 = vmax.f32 %v2111_v37, %v2112_v60 }
 0x255   : >> { %v2120_v55 = vmax.f32 %v2118_v16, %v2119_v35  ;;  %v1887_v2 = vmax.f32 %v1835_v56, %v10332_v59  ;;  %v1753_v8 = vadd.f32 %v1736_v5, %v10343_v32  ;;  %v1740_v17 = vmul.f32 %v10233_v30, %v1680_v39 }
 0x256   : >> { %v2248_v34 = vmax.f32 %v2246_v25, %v2247_v63  ;;  %v2101_v54 = vmax.f32 %v2099_v26, %v2100_v13  ;;  %v2107_v47 = vrot.slane %v2106_v45, 1  ;;  %v2114_v10 = vrot.slane %v2113_v33, 1 }
 0x257   : >> { %v2121_v9 = vrot.slane %v2120_v55, 1  ;;  %v1983_v0 = vcombine.high %v1887_v2, %v1887_v2  ;;  %v1990_v12 = vrot.slane %v1887_v2, %v10312_v46  ;;  %v1774_v40 = vadd.f32 %v11897_v1, %v1753_v8 }
 0x258   : >> { %v2108_v62 = vmax.f32 %v2106_v45, %v2107_v47  ;;  %v2115_v53 = vmax.f32 %v2113_v33, %v2114_v10  ;;  %v2333_v43 = vsel %vm2332_vm5, %v2101_v54, %v2331_v21  ;;  %v1757_v59 = vadd.f32 %v1740_v17, %v10367_v24 }
 0x259   : >> { %v2122_v32 = vmax.f32 %v2120_v55, %v2121_v9  ;;  %v1997_v30 = vrot.slane %v1983_v0, %v10312_v46  ;;  %v1998_v18 = vcombine.high %v1990_v12, %v1990_v12  ;;  %v2207_v49 = vsel %vm2066_vm1, %v1990_v12, -inf }
 0x25a   : >> { %v2335_v20 = vsel %vm2334_vm6, %v2108_v62, %v2333_v43  ;;  %v2208_v58 = vrot.slane %v2207_v49, 4  ;;  %v1791_v50 = vmax.f32 %v1774_v40, 0.0  ;;  %v1778_v36 = vadd.f32 %v11897_v1, %v1757_v59 }
 0x25b   : >> { %v2337_v4 = vsel %vm2336_vm7, %v2115_v53, %v2335_v20  ;;  %v1999_v25 = vcombine.high %v1997_v30, %v1997_v30  ;;  %v2214_v11 = vsel %vm2066_vm1, %v1998_v18, -inf  ;;  %v2221_v21 = vsel %vm2066_vm1, %v1997_v30, -inf }
 0x25c   : >> { %v2339_v24 = vsel %vm2338_vm8, %v2122_v32, %v2337_v4  ;;  %v2209_v29 = vmax.f32 %v2207_v49, %v2208_v58  ;;  %v2215_v52 = vrot.slane %v2214_v11, 4  ;;  %v2222_v7 = vrot.slane %v2221_v21, 4 }
 0x25d   : >> { %v2261_v41 = vrot.slane %v2260_v27, 1  ;;  %7136 = vst [vmem:[%s10455_s16 + $0x23] sm:$0xff] %v2339_v24  ;;  %v2228_v42 = vsel %vm2066_vm1, %v1999_v25, -inf  ;;  %v1812_v61 = vmul.f32 %v11898_v31, %v1791_v50  ;;  %v1795_v51 = vmax.f32 %v1778_v36, 0.0 }
 0x25e   : >> { %v2210_v37 = vrot.slane %v2209_v29, 2  ;;  %v2216_v44 = vmax.f32 %v2214_v11, %v2215_v52  ;;  %v2223_v63 = vmax.f32 %v2221_v21, %v2222_v7  ;;  %v2229_v16 = vrot.slane %v2228_v42, 4 }
 0x25f   : >> { %v2241_v26 = vmax.f32 %v10410_v48, %v2240_v57  ;;  %v10462_v15 = vmax.f32 %v10412_v3, %v2254_v23  ;;  %v1833_v60 = vadd.f32 %v11899_v28, %v1812_v61  ;;  %v1816_v39 = vmul.f32 %v11898_v31, %v1795_v51 }
 0x260   : >> { %v2211_v35 = vmax.f32 %v2209_v29, %v2210_v37  ;;  %v2217_v56 = vrot.slane %v2216_v44, 2  ;;  %v2224_v5 = vrot.slane %v2223_v63, 2  ;;  %v2230_v13 = vmax.f32 %v2228_v42, %v2229_v16 }
 0x261   : >> { %v10466_v45 = vmax.f32 %v2260_v27, %v2261_v41  ;;  %v10469_v33 = vsel %vm2326_vm2, %v2248_v34, %v2241_v26  ;;  %v1885_v55 = vmax.f32 %v1833_v60, %v10308_v14  ;;  %v1837_v48 = vadd.f32 %v11899_v28, %v1816_v39 }
 0x262   : >> { %v2212_v57 = vrot.slane %v2211_v35, 1  ;;  %v2218_v3 = vmax.f32 %v2216_v44, %v2217_v56  ;;  %v2225_v23 = vmax.f32 %v2223_v63, %v2224_v5  ;;  %v2231_v2 = vrot.slane %v2230_v13, 2 }
 0x263   : >> { %v10476_v8 = vsel %vm2330_vm4, %v10418_v6, %v10421_v19  ;;  %v1949_v17 = vcombine.high %v1885_v55, %v1885_v55  ;;  %v1956_v27 = vrot.slane %v1885_v55, %v10312_v46  ;;  %v1889_v54 = vmax.f32 %v1837_v48, %v10437_v22 }
 0x264   : >> { %v2213_v34 = vmax.f32 %v2211_v35, %v2212_v57  ;;  %v2219_v47 = vrot.slane %v2218_v3, 1  ;;  %v2226_v10 = vrot.slane %v2225_v23, 1  ;;  %v2232_v14 = vmax.f32 %v2230_v13, %v2231_v2 }
 0x265   : >> { %v1963_v9 = vrot.slane %v1949_v17, %v10312_v46  ;;  %v1964_v0 = vcombine.high %v1956_v27, %v1956_v27  ;;  %v2151_v12 = vsel %vm2066_vm1, %v1956_v27, -inf  ;;  %v2017_v40 = vcombine.high %v1889_v54, %v1889_v54 }
 0x266   : >> { %v2220_v62 = vmax.f32 %v2218_v3, %v2219_v47  ;;  %v2227_v53 = vmax.f32 %v2225_v23, %v2226_v10  ;;  %v2233_v43 = vrot.slane %v2232_v14, 1  ;;  %v2350_v6 = vsel %vm2332_vm5, %v2213_v34, %v10427_v38 }
 0x267   : >> { %v1965_v19 = vcombine.high %v1963_v9, %v1963_v9  ;;  %v2152_v59 = vrot.slane %v2151_v12, 4  ;;  %v2158_v22 = vsel %vm2066_vm1, %v1964_v0, -inf  ;;  %v2165_v32 = vsel %vm2066_vm1, %v1963_v9, -inf }
 0x268   : >> { %v2234_v30 = vmax.f32 %v2232_v14, %v2233_v43  ;;  %v2351_v18 = vsel %vm2334_vm6, %v2220_v62, %v2350_v6  ;;  %v2159_v49 = vrot.slane %v2158_v22, 4  ;;  %v2166_v20 = vrot.slane %v2165_v32, 4 }
 0x269   : >> { %v2352_v58 = vsel %vm2336_vm7, %v2227_v53, %v2351_v18  ;;  %v2153_v50 = vmax.f32 %v2151_v12, %v2152_v59  ;;  %v2172_v36 = vsel %vm2066_vm1, %v1965_v19, -inf  ;;  %v2024_v4 = vrot.slane %v1889_v54, %v10312_v46 }
 0x26a   : >> { %v2353_v38 = vsel %vm2338_vm8, %v2234_v30, %v2352_v58  ;;  %v2160_v25 = vmax.f32 %v2158_v22, %v2159_v49  ;;  %v2167_v11 = vmax.f32 %v2165_v32, %v2166_v20  ;;  %v2173_v21 = vrot.slane %v2172_v36, 4 }
 0x26b   : >> { %7138 = vst [vmem:[%s10455_s16 + $0x33] sm:$0xff] %v2353_v38  ;;  %v2154_v24 = vrot.slane %v2153_v50, 2  ;;  %v2031_v29 = vrot.slane %v2017_v40, %v10312_v46  ;;  %v2032_v52 = vcombine.high %v2024_v4, %v2024_v4  ;;  %v2263_v7 = vsel %vm2066_vm1, %v2024_v4, -inf }
 0x26c   : >> { %v2161_v41 = vrot.slane %v2160_v25, 2  ;;  %v2168_v42 = vrot.slane %v2167_v11, 2  ;;  %v2174_v61 = vmax.f32 %v2172_v36, %v2173_v21  ;;  %v2264_v51 = vrot.slane %v2263_v7, 4  ;;  %v10524_v21 = vld [vmem:[%s11848_s5 + $0x4] ss:$0 sm:$0xff] (%p464_p4) }
 0x26d   : >> { %v2155_v37 = vmax.f32 %v2153_v50, %v2154_v24  ;;  %v2033_v44 = vcombine.high %v2031_v29, %v2031_v29  ;;  %v2270_v63 = vsel %vm2066_vm1, %v2032_v52, -inf  ;;  %v2277_v16 = vsel %vm2066_vm1, %v2031_v29, -inf  ;;  %v10529_v24 = vld [vmem:[%s11848_s5 + $0x5] ss:$0 sm:$0xff] (%p464_p4) }
 0x26e   : >> { %v2162_v26 = vmax.f32 %v2160_v25, %v2161_v41  ;;  %v2169_v60 = vmax.f32 %v2167_v11, %v2168_v42  ;;  %v2175_v39 = vrot.slane %v2174_v61, 2  ;;  %v2265_v35 = vmax.f32 %v2263_v7, %v2264_v51 }
 0x26f   : >> { %v2156_v56 = vrot.slane %v2155_v37, 1  ;;  %v2271_v5 = vrot.slane %v2270_v63, 4  ;;  %v2278_v13 = vrot.slane %v2277_v16, 4  ;;  %v2284_v55 = vsel %vm2066_vm1, %v2033_v44, -inf }
 0x270   : >> { %v2163_v48 = vrot.slane %v2162_v26, 1  ;;  %v2170_v57 = vrot.slane %v2169_v60, 1  ;;  %v2176_v3 = vmax.f32 %v2174_v61, %v2175_v39  ;;  %v2266_v23 = vrot.slane %v2265_v35, 2 }
 0x271   : >> { %v2157_v2 = vmax.f32 %v2155_v37, %v2156_v56  ;;  %v2272_v17 = vmax.f32 %v2270_v63, %v2271_v5  ;;  %v2279_v27 = vmax.f32 %v2277_v16, %v2278_v13  ;;  %v2285_v54 = vrot.slane %v2284_v55, 4 }
 0x272   : >> { %v2164_v34 = vmax.f32 %v2162_v26, %v2163_v48  ;;  %v2171_v47 = vmax.f32 %v2169_v60, %v2170_v57  ;;  %v2177_v10 = vrot.slane %v2176_v3, 1  ;;  %v2267_v14 = vmax.f32 %v2265_v35, %v2266_v23 }
 0x273   : >> { %v2343_v9 = vsel %vm2332_vm5, %v2157_v2, %v10476_v8  ;;  %v2273_v0 = vrot.slane %v2272_v17, 2  ;;  %v2280_v12 = vrot.slane %v2279_v27, 2  ;;  %v2286_v40 = vmax.f32 %v2284_v55, %v2285_v54 }
 0x274   : >> { %v2355_v62 = vsel %vm2328_vm3, %v10462_v15, %v10469_v33  ;;  %v2178_v53 = vmax.f32 %v2176_v3, %v2177_v10  ;;  %v2344_v43 = vsel %vm2334_vm6, %v2164_v34, %v2343_v9  ;;  %v2268_v6 = vrot.slane %v2267_v14, 1 }
 0x275   : >> { %v2345_v19 = vsel %vm2336_vm7, %v2171_v47, %v2344_v43  ;;  %v2274_v59 = vmax.f32 %v2272_v17, %v2273_v0  ;;  %v2281_v22 = vmax.f32 %v2279_v27, %v2280_v12  ;;  %v2287_v32 = vrot.slane %v2286_v40, 2 }
 0x276   : >> { %v2346_v30 = vsel %vm2338_vm8, %v2178_v53, %v2345_v19  ;;  %v2269_v8 = vmax.f32 %v2267_v14, %v2268_v6  ;;  %v2356_v18 = vsel %vm2330_vm4, %v10466_v45, %v2355_v62  ;;  %v10519_v45 = vld [vmem:[%s11848_s5 + $0x3] ss:$0 sm:$0xff] (%p464_p4) }
 0x277   : >> { %7137 = vst [vmem:[%s10455_s16 + $0x2b] sm:$0xff] %v2346_v30  ;;  %v2275_v49 = vrot.slane %v2274_v59, 1  ;;  %v2282_v20 = vrot.slane %v2281_v22, 1  ;;  %v2288_v15 = vmax.f32 %v2286_v40, %v2287_v32 }
 0x278   : >> { %v2357_v33 = vsel %vm2332_vm5, %v2269_v8, %v2356_v18  ;;  %466 = sbr.rel (!%p464_p4) target bundleno = 119 (0x77), region = 174 }
 0x279   : >> { %v2276_v58 = vmax.f32 %v2274_v59, %v2275_v49  ;;  %v2283_v50 = vmax.f32 %v2281_v22, %v2282_v20  ;;  %v2289_v36 = vrot.slane %v2288_v15, 1 }
 0x27b   : >> { %v2290_v4 = vmax.f32 %v2288_v15, %v2289_v36  ;;  %v2358_v38 = vsel %vm2334_vm6, %v2276_v58, %v2357_v33 }
 0x27c   : >> { %v2359_v25 = vsel %vm2336_vm7, %v2283_v50, %v2358_v38 }
 0x27d   : >> { %v2360_v11 = vsel %vm2338_vm8, %v2290_v4, %v2359_v25 }
 0x27e   : >> { %7139 = vst [vmem:[%s10455_s16 + $0x3b] sm:$0xff] %v2360_v11 }
 0x27f LB: >> { %v9072_v1 = vld [vmem:[%s11845_s2 + $0x40] sm:$0xff]   ;;  %v9331_v31 = vmov 0.0   ;;  %v9074_v29 = vld [vmem:[%s11845_s2 + $0x48] sm:$0xff]   ;;  %vm9332_vm9 = vmmov 0   ;;  %v9076_v7 = vld [vmem:[%s11845_s2 + $0x50] sm:$0xff]   ;;  %s2379_s23 = smul.u32 68, %s9318_s24  ;;  %s9318_s24 = sphi %s10531_s24, %s2378_s24  }
 0x280   : >> { %8234 = vmatprep.subr.bf16.mxu0 %v9331_v31  ;;  %8270 = vmatprep.subr.bf16.mxu1 %v9331_v31  ;;  %v9073_v28 = vld [vmem:[%s11845_s2] sm:$0xff]   ;;  %v9075_v52 = vld [vmem:[%s11845_s2 + $0x8] sm:$0xff]   ;;  %v9077_v41 = vld [vmem:[%s11845_s2 + $0x10] sm:$0xff]  }
 0x281   : >> { %8235 = vmatpush3.bf16.msra.mxu0 %v9072_v1  ;;  %8250 = vmatprep.mubr.msk.bf16.mxu0 %vm9332_vm9, %v9331_v31  ;;  %v9078_v42 = vld [vmem:[%s11845_s2 + $0x58] sm:$0xff]   ;;  %v9080_v51 = vld [vmem:[%s11845_s2 + $0x60] sm:$0xff]   ;;  %v9082_v44 = vld [vmem:[%s11845_s2 + $0x68] sm:$0xff]   ;;  %s10600_s9 = scalar_lea.vmem [#allocation2], %s2379_s23 }
 0x282   : >> { %8271 = vmatpush3.bf16.msra.mxu1 %v9073_v28  ;;  %8236 = vmatprep.subr.bf16.mxu0 %v9331_v31  ;;  %v9079_v61 = vld [vmem:[%s11845_s2 + $0x18] sm:$0xff]   ;;  %v9081_v37 = vld [vmem:[%s11845_s2 + $0x20] sm:$0xff]   ;;  %v9083_v63 = vld [vmem:[%s11845_s2 + $0x28] sm:$0xff]  }
 0x283   : >> { %8272 = vmatprep.subr.bf16.mxu1 %v9331_v31  ;;  %8286 = vmatprep.mubr.msk.bf16.mxu1 %vm9332_vm9, %v9331_v31  ;;  %v9084_v16 = vld [vmem:[%s11845_s2 + $0x70] sm:$0xff]   ;;  %v9086_v60 = vld [vmem:[%s11845_s2 + $0x78] sm:$0xff]   ;;  %v9088_v57 = vld [vmem:[%s11845_s2 + $0x80] sm:$0xff]  }
 0x284   : >> { %v9085_v26 = vld [vmem:[%s11845_s2 + $0x30] sm:$0xff]   ;;  %v9087_v35 = vld [vmem:[%s11845_s2 + $0x38] sm:$0xff]   ;;  %v9090_v3 = vld [vmem:[%s11845_s2 + $0xc0] sm:$0xff]  }
 0x285   : >> { %8237 = vmatpush3.bf16.msra.mxu0 %v9074_v29  ;;  %v7140_v39 = vld [vmem:[%s10600_s9 + $0x1] sm:$0xff]  ;;  %v7141_v56 = vld [vmem:[%s10600_s9 + $0x9] sm:$0xff]  ;;  %v7142_v2 = vld [vmem:[%s10600_s9 + $0x11] sm:$0xff] }
 0x286   : >> { %8273 = vmatpush3.bf16.msra.mxu1 %v9075_v52  ;;  %8238 = vmatprep.subr.bf16.mxu0 %v9331_v31  ;;  %v2381_v5 = vld [vmem:[%s10600_s9] sm:$0xff]  ;;  %v2382_v13 = vld [vmem:[%s10600_s9 + $0x8] sm:$0xff]  ;;  %v2439_v55 = vpack.c.bf16 %v7141_v56, %v7140_v39  ;;  %v2383_v27 = vld [vmem:[%s10600_s9 + $0x10] sm:$0xff] }
 0x287   : >> { %8274 = vmatprep.subr.bf16.mxu1 %v9331_v31  ;;  %v2406_v48 = vpack.c.bf16 %v2382_v13, %v2381_v5  ;;  %v9089_v23 = vld [vmem:[%s11845_s2 + $0x88] sm:$0xff]   ;;  %v7143_v17 = vld [vmem:[%s10600_s9 + $0x19] sm:$0xff]  ;;  %v9091_v14 = vld [vmem:[%s11845_s2 + $0x90] sm:$0xff]  }
 0x288   : >> { %v2384_v54 = vld [vmem:[%s10600_s9 + $0x18] sm:$0xff]  ;;  %v9092_v34 = vld [vmem:[%s11845_s2 + $0xc8] sm:$0xff]   ;;  %v2440_v47 = vpack.c.bf16 %v7143_v17, %v7142_v2  ;;  %v9094_v9 = vld [vmem:[%s11845_s2 + $0xd0] sm:$0xff]  }
 0x289   : >> { %8239 = vmatpush3.bf16.msra.mxu0 %v9076_v7  ;;  %v2407_v10 = vpack.c.bf16 %v2384_v54, %v2383_v27  ;;  %v7144_v0 = vld [vmem:[%s10600_s9 + $0x21] sm:$0xff]  ;;  %v7145_v12 = vld [vmem:[%s10600_s9 + $0x29] sm:$0xff]  ;;  %v9093_v62 = vld [vmem:[%s11845_s2 + $0x98] sm:$0xff]  }
 0x28a   : >> { %8275 = vmatpush3.bf16.msra.mxu1 %v9077_v41  ;;  %8240 = vmatprep.subr.bf16.mxu0 %v9331_v31  ;;  %v2385_v40 = vld [vmem:[%s10600_s9 + $0x20] sm:$0xff]  ;;  %v2386_v53 = vld [vmem:[%s10600_s9 + $0x28] sm:$0xff]  ;;  %v9096_v43 = vld [vmem:[%s11845_s2 + $0xd8] sm:$0xff]   ;;  %v2441_v6 = vpack.c.bf16 %v7145_v12, %v7144_v0 }
 0x28b   : >> { %8276 = vmatprep.subr.bf16.mxu1 %v9331_v31  ;;  %v2408_v19 = vpack.c.bf16 %v2386_v53, %v2385_v40  ;;  %v9095_v59 = vld [vmem:[%s11845_s2 + $0xa0] sm:$0xff]   ;;  %v7146_v32 = vld [vmem:[%s10600_s9 + $0x31] sm:$0xff]  ;;  %v9098_v18 = vld [vmem:[%s11845_s2 + $0xa8] sm:$0xff]  }
 0x28c   : >> { %v9097_v22 = vld [vmem:[%s11845_s2 + $0xe0] sm:$0xff]   ;;  %v2387_v8 = vld [vmem:[%s10600_s9 + $0x30] sm:$0xff]  ;;  %v2388_v49 = vld [vmem:[%s10600_s9 + $0x38] sm:$0xff] }
 0x28d   : >> { %8241 = vmatpush3.bf16.msra.mxu0 %v9078_v42  ;;  %v7147_v30 = vld [vmem:[%s10600_s9 + $0x39] sm:$0xff]  ;;  %v9099_v20 = vld [vmem:[%s11845_s2 + $0xe8] sm:$0xff]   ;;  %v2409_v33 = vpack.c.bf16 %v2388_v49, %v2387_v8  ;;  %v9100_v58 = vld [vmem:[%s11845_s2 + $0xb0] sm:$0xff]  }
 0x28e   : >> { %8277 = vmatpush3.bf16.msra.mxu1 %v9079_v61  ;;  %8242 = vmatprep.subr.bf16.mxu0 %v9331_v31  ;;  %v2442_v15 = vpack.c.bf16 %v7147_v30, %v7146_v32  ;;  %v9101_v50 = vld [vmem:[%s11845_s2 + $0xf0] sm:$0xff]   ;;  %v7148_v36 = vld [vmem:[%s10600_s9 + $0x41] sm:$0xf]  ;;  %v9102_v38 = vld [vmem:[%s11845_s2 + $0xb8] sm:$0xff]  }
 0x28f   : >> { %8278 = vmatprep.subr.bf16.mxu1 %v9331_v31  ;;  %v2389_v4 = vld [vmem:[%s10600_s9 + $0x40] sm:$0xf]  ;;  %v9103_v25 = vld [vmem:[%s11845_s2 + $0xf8] sm:$0xff]   ;;  %v2443_v11 = vpack.c.bf16 %v7148_v36, %v7148_v36  ;;  %v7182_v29 = vld [vmem:[%s10600_s9 + $0xa] sm:$0xff] }
 0x290   : >> { %v2410_v1 = vpack.c.bf16 %v2389_v4, %v2389_v4  ;;  %v7181_v28 = vld [vmem:[%s10600_s9 + $0x2] sm:$0xff]  ;;  %v7217_v7 = vld [vmem:[%s10600_s9 + $0x2a] sm:$0xff]  ;;  %v9109_v13 = vld [vmem:[%s11845_s2 + $0x118] sm:$0xff]  }
 0x291   : >> { %8243 = vmatpush3.bf16.msra.mxu0 %v9080_v51  ;;  %v7216_v52 = vld [vmem:[%s10600_s9 + $0x22] sm:$0xff]  ;;  %v2712_v41 = vpack.c.bf16 %v7182_v29, %v7181_v28  ;;  %v9107_v56 = vld [vmem:[%s11845_s2 + $0x110] sm:$0xff]   ;;  %v7223_v54 = vld [vmem:[%s10600_s9 + $0x5a] sm:$0xff] }
 0x292   : >> { %8279 = vmatpush3.bf16.msra.mxu1 %v9081_v37  ;;  %8244 = vmatprep.subr.bf16.mxu0 %v9331_v31  ;;  %v2876_v42 = vpack.c.bf16 %v7217_v7, %v7216_v52  ;;  %v9104_v61 = vld [vmem:[%s11845_s2 + $0x100] sm:$0xff]   ;;  %v9105_v51 = vld [vmem:[%s11845_s2 + $0x108] sm:$0xff]   ;;  %v7183_v37 = vld [vmem:[%s10600_s9 + $0x12] sm:$0xff] }
 0x293   : >> { %8280 = vmatprep.subr.bf16.mxu1 %v9331_v31  ;;  %v9110_v5 = vld [vmem:[%s11845_s2 + $0x150] sm:$0xff]   ;;  %v9113_v2 = vld [vmem:[%s11845_s2 + $0x160] sm:$0xff]   ;;  %v9114_v17 = vld [vmem:[%s11845_s2 + $0x128] sm:$0xff]  }
 0x294   : >> { %v7222_v27 = vld [vmem:[%s10600_s9 + $0x52] sm:$0xff]  ;;  %v7224_v0 = vld [vmem:[%s10600_s9 + $0x62] sm:$0xf] }
 0x295   : >> { %8245 = vmatpush3.bf16.msra.mxu0 %v9082_v44  ;;  %v9106_v44 = vld [vmem:[%s11845_s2 + $0x140] sm:$0xff]   ;;  %v9118_v12 = vld [vmem:[%s11845_s2 + $0x138] sm:$0xff]   ;;  %v2880_v53 = vpack.c.bf16 %v7224_v0, %v7224_v0  ;;  %v9123_v4 = vld [vmem:[%s11845_s2 + $0x190] sm:$0xff]  }
 0x296   : >> { %8281 = vmatpush3.bf16.msra.mxu1 %v9083_v63  ;;  %8246 = vmatprep.subr.bf16.mxu0 %v9331_v31  ;;  %v7184_v63 = vld [vmem:[%s10600_s9 + $0x1a] sm:$0xff]  ;;  %v7290_v28 = vld [vmem:[%s10600_s9 + $0x44] sm:$0xff]  ;;  %v7291_v29 = vld [vmem:[%s10600_s9 + $0x4c] sm:$0xff] }
 0x297   : >> { %8282 = vmatprep.subr.bf16.mxu1 %v9331_v31  ;;  %v2713_v39 = vpack.c.bf16 %v7184_v63, %v7183_v37  ;;  %v9119_v40 = vld [vmem:[%s11845_s2 + $0x178] sm:$0xff]   ;;  %v9120_v30 = vld [vmem:[%s11845_s2 + $0x180] sm:$0xff]   ;;  %v7326_v0 = vld [vmem:[%s10600_s9 + $0x6c] sm:$0xff] }
 0x298   : >> { %v9122_v8 = vld [vmem:[%s11845_s2 + $0x1c0] sm:$0xff]   ;;  %v7253_v49 = vld [vmem:[%s10600_s9 + $0x33] sm:$0xff] }
 0x299   : >> { %8247 = vmatpush3.bf16.msra.mxu0 %v9084_v16  ;;  %v7218_v16 = vld [vmem:[%s10600_s9 + $0x32] sm:$0xff]  ;;  %v7258_v37 = vld [vmem:[%s10600_s9 + $0x5b] sm:$0xff] }
 0x29a   : >> { %8283 = vmatpush3.bf16.msra.mxu1 %v9085_v26  ;;  %8248 = vmatprep.subr.bf16.mxu0 %v9331_v31  ;;  %v7219_v26 = vld [vmem:[%s10600_s9 + $0x3a] sm:$0xff] }
 0x29b   : >> { %8284 = vmatprep.subr.bf16.mxu1 %v9331_v31  ;;  %v9128_v52 = vld [vmem:[%s11845_s2 + $0x1d8] sm:$0xff]  }
 0x29c   : >> { %v7292_v63 = vld [vmem:[%s10600_s9 + $0x54] sm:$0xff] }
 0x29d   : >> { %8249 = vmatpush3.bf16.msra.mxu0 %v9086_v60  ;;  %v9108_v60 = vld [vmem:[%s11845_s2 + $0x148] sm:$0xff]  }
 0x29e   : >> { %8285 = vmatpush3.bf16.msra.mxu1 %v9087_v35  ;;  %8306 = vmatprep.subr.bf16.mxu0 %v9331_v31  ;;  %v2877_v35 = vpack.c.bf16 %v7219_v26, %v7218_v16  ;;  %v7293_v16 = vld [vmem:[%s10600_s9 + $0x5c] sm:$0xff]  ;;  %v9131_v26 = vld [vmem:[%s11845_s2 + $0x1e8] sm:$0xff]  }
 0x29f   : >> { %8342 = vmatprep.subr.bf16.mxu1 %v9331_v31 }
 0x2a0   : >> { %8251 = vmatmul.mubr.bf16.vlgmr.msra.gmra.mrb[0].mxu0 %v2439_v55  ;;  %v7220_v55 = vld [vmem:[%s10600_s9 + $0x42] sm:$0xff] }
 0x2a1   : >> { %8287 = vmatmul.mubr.bf16.vlgmr.msra.gmra.mrb[0].mxu1 %v2406_v48  ;;  %8307 = vmatpush3.bf16.msra.mxu0 %v9088_v57  ;;  %v7221_v48 = vld [vmem:[%s10600_s9 + $0x4a] sm:$0xff]  ;;  %v9112_v57 = vld [vmem:[%s11845_s2 + $0x158] sm:$0xff]  }
 0x2a2   : >> { %8308 = vmatprep.subr.bf16.mxu0 %v9331_v31  ;;  %8254 = vmatprep.mubr.msk.bf16.mxu0 %vm9332_vm9, %v9331_v31 }
 0x2a3   : >> { %8290 = vmatprep.mubr.msk.bf16.mxu1 %vm9332_vm9, %v9331_v31  ;;  %8343 = vmatpush3.bf16.msra.mxu1 %v9090_v3  ;;  %v2878_v3 = vpack.c.bf16 %v7221_v48, %v7220_v55  ;;  %v9134_v55 = vld [vmem:[%s11845_s2 + $0x1b8] sm:$0xff]  }
 0x2a4   : >> { %8344 = vmatprep.subr.bf16.mxu1 %v9331_v31  ;;  %v9135_v48 = vld [vmem:[%s11845_s2 + $0x1f8] sm:$0xff]  }
 0x2a5   : >> { %8309 = vmatpush3.bf16.msra.mxu0 %v9089_v23  ;;  %v9111_v23 = vld [vmem:[%s11845_s2 + $0x120] sm:$0xff]  }
 0x2a6   : >> { %8310 = vmatprep.subr.bf16.mxu0 %v9331_v31 }
 0x2a7   : >> { %8345 = vmatpush3.bf16.msra.mxu1 %v9092_v34  ;;  %v9115_v34 = vld [vmem:[%s11845_s2 + $0x168] sm:$0xff]  }
 0x2a8   : >> { %8255 = vmatmul.mubr.bf16.gmra.mrb[4].mxu0 %v2440_v47  ;;  %8346 = vmatprep.subr.bf16.mxu1 %v9331_v31  ;;  %v2879_v47 = vpack.c.bf16 %v7223_v54, %v7222_v27  ;;  %v9136_v27 = vld [vmem:[%s11845_s2 + $0x200] sm:$0xff]   ;;  %v9137_v54 = vld [vmem:[%s11845_s2 + $0x208] sm:$0xff]  }
 0x2a9   : >> { %8291 = vmatmul.mubr.bf16.gmra.mrb[4].mxu1 %v2407_v10  ;;  %8311 = vmatpush3.bf16.msra.mxu0 %v9091_v14  ;;  %v9116_v10 = vld [vmem:[%s11845_s2 + $0x130] sm:$0xff]  }
 0x2aa   : >> { %8258 = vmatprep.mubr.msk.bf16.mxu0 %vm9332_vm9, %v9331_v31  ;;  %8294 = vmatprep.mubr.msk.bf16.mxu1 %vm9332_vm9, %v9331_v31  ;;  %v9117_v14 = vld [vmem:[%s11845_s2 + $0x170] sm:$0xff]  }
 0x2ab   : >> { %8312 = vmatprep.subr.bf16.mxu0 %v9331_v31  ;;  %8347 = vmatpush3.bf16.msra.mxu1 %v9094_v9  ;;  %v7189_v9 = vld [vmem:[%s10600_s9 + $0x42] sm:$0xf] }
 0x2ac   : >> { %8348 = vmatprep.subr.bf16.mxu1 %v9331_v31 }
 0x2ad   : >> { %8313 = vmatpush3.bf16.msra.mxu0 %v9093_v62  ;;  %v2716_v62 = vpack.c.bf16 %v7189_v9, %v7189_v9  ;;  %v7325_v9 = vld [vmem:[%s10600_s9 + $0x64] sm:$0xff] }
 0x2ae   : >> { %8314 = vmatprep.subr.bf16.mxu0 %v9331_v31 }
 0x2af   : >> { %8349 = vmatpush3.bf16.msra.mxu1 %v9096_v43  ;;  %v7251_v43 = vld [vmem:[%s10600_s9 + $0x23] sm:$0xff] }
 0x2b0   : >> { %8259 = vmatmul.mubr.bf16.gmra.mrb[8].mxu0 %v2441_v6  ;;  %8350 = vmatprep.subr.bf16.mxu1 %v9331_v31  ;;  %v7252_v6 = vld [vmem:[%s10600_s9 + $0x2b] sm:$0xff] }
 0x2b1   : >> { %8295 = vmatmul.mubr.bf16.gmra.mrb[8].mxu1 %v2408_v19  ;;  %8315 = vmatpush3.bf16.msra.mxu0 %v9095_v59  ;;  %v7286_v19 = vld [vmem:[%s10600_s9 + $0x24] sm:$0xff]  ;;  %v7287_v59 = vld [vmem:[%s10600_s9 + $0x2c] sm:$0xff] }
 0x2b2   : >> { %8262 = vmatprep.mubr.msk.bf16.mxu0 %vm9332_vm9, %v9331_v31  ;;  %8298 = vmatprep.mubr.msk.bf16.mxu1 %vm9332_vm9, %v9331_v31  ;;  %v3200_v32 = vpack.c.bf16 %v7287_v59, %v7286_v19  ;;  %v7327_v19 = vld [vmem:[%s10600_s9 + $0x74] sm:$0xff]  ;;  %v7328_v59 = vld [vmem:[%s10600_s9 + $0x7c] sm:$0xff] }
 0x2b3   : >> { %8316 = vmatprep.subr.bf16.mxu0 %v9331_v31  ;;  %8351 = vmatpush3.bf16.msra.mxu1 %v9097_v22  ;;  %v3038_v22 = vpack.c.bf16 %v7252_v6, %v7251_v43  ;;  %v9140_v6 = vld [vmem:[%s11845_s2 + $0x220] sm:$0xff]  }
 0x2b4   : >> { %8352 = vmatprep.subr.bf16.mxu1 %v9331_v31 }
 0x2b5   : >> { %8317 = vmatpush3.bf16.msra.mxu0 %v9098_v18  ;;  %v9121_v18 = vld [vmem:[%s11845_s2 + $0x188] sm:$0xff]  }
 0x2b6   : >> { %8318 = vmatprep.subr.bf16.mxu0 %v9331_v31 }
 0x2b7   : >> { %8353 = vmatpush3.bf16.msra.mxu1 %v9099_v20  ;;  %v7254_v20 = vld [vmem:[%s10600_s9 + $0x3b] sm:$0xff] }
 0x2b8   : >> { %8263 = vmatmul.mubr.bf16.gmra.mrb[12].mxu0 %v2442_v15  ;;  %8354 = vmatprep.subr.bf16.mxu1 %v9331_v31  ;;  %v7288_v15 = vld [vmem:[%s10600_s9 + $0x34] sm:$0xff] }
 0x2b9   : >> { %8299 = vmatmul.mubr.bf16.gmra.mrb[12].mxu1 %v2409_v33  ;;  %8266 = vmatprep.mubr.msk.bf16.mxu0 %vm9332_vm9, %v9331_v31  ;;  %v7289_v33 = vld [vmem:[%s10600_s9 + $0x3c] sm:$0xff] }
 0x2ba   : >> { %8302 = vmatprep.mubr.msk.bf16.mxu1 %vm9332_vm9, %v9331_v31  ;;  %8319 = vmatpush3.bf16.msra.mxu0 %v9100_v58  ;;  %v9124_v58 = vld [vmem:[%s11845_s2 + $0x1c8] sm:$0xff]   ;;  %v3201_v36 = vpack.c.bf16 %v7289_v33, %v7288_v15  ;;  %v9143_v33 = vld [vmem:[%s11845_s2 + $0x238] sm:$0xff]  }
 0x2bb   : >> { %8355 = vmatpush3.bf16.msra.mxu1 %v9101_v50  ;;  %8320 = vmatprep.subr.bf16.mxu0 %v9331_v31  ;;  %v3039_v50 = vpack.c.bf16 %v7254_v20, %v7253_v49  ;;  %v9142_v49 = vld [vmem:[%s11845_s2 + $0x230] sm:$0xff]   ;;  %v7329_v20 = vld [vmem:[%s10600_s9 + $0x84] sm:$0xf] }
 0x2bc   : >> { %8356 = vmatprep.subr.bf16.mxu1 %v9331_v31  ;;  %v7364_v15 = vld [vmem:[%s10600_s9 + $0x85] sm:$0xf] }
 0x2be   : >> { %8321 = vmatpush3.bf16.msra.mxu0 %v9102_v38  ;;  %v9126_v38 = vld [vmem:[%s11845_s2 + $0x1d0] sm:$0xff]  }
 0x2bf   : >> { %8357 = vmatpush3.bf16.msra.mxu1 %v9103_v25  ;;  %8378 = vmatprep.subr.bf16.mxu0 %v9331_v31  ;;  %v7255_v25 = vld [vmem:[%s10600_s9 + $0x43] sm:$0xff] }
 0x2c0   : >> { %8267 = vmatmul.mubr.bf16.gmra.mrb[16].mxu0 %v2443_v11  ;;  %8414 = vmatprep.subr.bf16.mxu1 %v9331_v31  ;;  %v7256_v11 = vld [vmem:[%s10600_s9 + $0x4b] sm:$0xff] }
 0x2c1   : >> { %8303 = vmatmul.mubr.bf16.gmra.mrb[16].mxu1 %v2410_v1  ;;  %8322 = vmatprep.mubr.msk.bf16.mxu0 %vm9332_vm9, %v9331_v31  ;;  %v9125_v1 = vld [vmem:[%s11845_s2 + $0x198] sm:$0xff]   ;;  %v3040_v7 = vpack.c.bf16 %v7256_v11, %v7255_v25 }
 0x2c2   : >> { %8358 = vmatprep.mubr.msk.bf16.mxu1 %vm9332_vm9, %v9331_v31  ;;  %v7398_v25 = vld [vmem:[%s10600_s9 + $0x7e] sm:$0xff] }
 0x2c8   : >> { %8323 = vmatmul.mubr.bf16.vlgmr.msra.gmra.mrb[20].mxu0 %v2712_v41  ;;  %v3202_v41 = vpack.c.bf16 %v7291_v29, %v7290_v28  ;;  %v7393_v28 = vld [vmem:[%s10600_s9 + $0x56] sm:$0xff]  ;;  %v7394_v29 = vld [vmem:[%s10600_s9 + $0x5e] sm:$0xff] }
 0x2c9   : >> { %8359 = vmatmul.mubr.bf16.vlgmr.msra.gmra.mrb[20].mxu1 %v2876_v42  ;;  %8379 = vmatpush3.bf16.msra.mxu0 %v9104_v61  ;;  %v9129_v61 = vld [vmem:[%s11845_s2 + $0x1e0] sm:$0xff]  }
 0x2ca   : >> { %8380 = vmatprep.subr.bf16.mxu0 %v9331_v31  ;;  %8326 = vmatprep.mubr.msk.bf16.mxu0 %vm9332_vm9, %v9331_v31 }
 0x2cb   : >> { %8362 = vmatprep.mubr.msk.bf16.mxu1 %vm9332_vm9, %v9331_v31  ;;  %8415 = vmatpush3.bf16.msra.mxu1 %v9106_v44  ;;  %v9130_v44 = vld [vmem:[%s11845_s2 + $0x1a8] sm:$0xff]  }
 0x2cc   : >> { %8416 = vmatprep.subr.bf16.mxu1 %v9331_v31 }
 0x2cd   : >> { %8381 = vmatpush3.bf16.msra.mxu0 %v9105_v51  ;;  %v7257_v51 = vld [vmem:[%s10600_s9 + $0x53] sm:$0xff] }
 0x2ce   : >> { %8382 = vmatprep.subr.bf16.mxu0 %v9331_v31 }
 0x2cf   : >> { %8417 = vmatpush3.bf16.msra.mxu1 %v9108_v60  ;;  %v3041_v60 = vpack.c.bf16 %v7258_v37, %v7257_v51 }
 0x2d0   : >> { %8327 = vmatmul.mubr.bf16.gmra.mrb[24].mxu0 %v2713_v39  ;;  %8418 = vmatprep.subr.bf16.mxu1 %v9331_v31  ;;  %v3203_v39 = vpack.c.bf16 %v7293_v16, %v7292_v63 }
 0x2d1   : >> { %8363 = vmatmul.mubr.bf16.gmra.mrb[24].mxu1 %v2877_v35  ;;  %8383 = vmatpush3.bf16.msra.mxu0 %v9107_v56  ;;  %v9133_v56 = vld [vmem:[%s11845_s2 + $0x1f0] sm:$0xff]  }
 0x2d2   : >> { %8330 = vmatprep.mubr.msk.bf16.mxu0 %vm9332_vm9, %v9331_v31  ;;  %8366 = vmatprep.mubr.msk.bf16.mxu1 %vm9332_vm9, %v9331_v31 }
 0x2d3   : >> { %8384 = vmatprep.subr.bf16.mxu0 %v9331_v31  ;;  %8419 = vmatpush3.bf16.msra.mxu1 %v9110_v5  ;;  %v7259_v5 = vld [vmem:[%s10600_s9 + $0x63] sm:$0xf] }
 0x2d4   : >> { %8420 = vmatprep.subr.bf16.mxu1 %v9331_v31 }
 0x2d5   : >> { %8385 = vmatpush3.bf16.msra.mxu0 %v9109_v13  ;;  %v7294_v13 = vld [vmem:[%s10600_s9 + $0x64] sm:$0xf] }
 0x2d6   : >> { %8386 = vmatprep.subr.bf16.mxu0 %v9331_v31 }
 0x2d7   : >> { %8421 = vmatpush3.bf16.msra.mxu1 %v9112_v57  ;;  %v3042_v57 = vpack.c.bf16 %v7259_v5, %v7259_v5 }
 0x2d8   : >> { %8331 = vmatmul.mubr.bf16.gmra.mrb[28].mxu0 %v2876_v42  ;;  %8422 = vmatprep.subr.bf16.mxu1 %v9331_v31  ;;  %v9127_v42 = vld [vmem:[%s11845_s2 + $0x1a0] sm:$0xff]  }
 0x2d9   : >> { %8367 = vmatmul.mubr.bf16.gmra.mrb[28].mxu1 %v2878_v3  ;;  %8387 = vmatpush3.bf16.msra.mxu0 %v9111_v23  ;;  %v3204_v3 = vpack.c.bf16 %v7294_v13, %v7294_v13  ;;  %v7356_v23 = vld [vmem:[%s10600_s9 + $0x45] sm:$0xff] }
 0x2da   : >> { %8334 = vmatprep.mubr.msk.bf16.mxu0 %vm9332_vm9, %v9331_v31  ;;  %8370 = vmatprep.mubr.msk.bf16.mxu1 %vm9332_vm9, %v9331_v31 }
 0x2db   : >> { %8388 = vmatprep.subr.bf16.mxu0 %v9331_v31  ;;  %8423 = vmatpush3.bf16.msra.mxu1 %v9113_v2  ;;  %v7357_v2 = vld [vmem:[%s10600_s9 + $0x4d] sm:$0xff] }
 0x2dc   : >> { %8424 = vmatprep.subr.bf16.mxu1 %v9331_v31 }
 0x2dd   : >> { %8389 = vmatpush3.bf16.msra.mxu0 %v9114_v17  ;;  %v3525_v17 = vpack.c.bf16 %v7357_v2, %v7356_v23 }
 0x2de   : >> { %8390 = vmatprep.subr.bf16.mxu0 %v9331_v31 }
 0x2df   : >> { %8425 = vmatpush3.bf16.msra.mxu1 %v9115_v34  ;;  %v7358_v34 = vld [vmem:[%s10600_s9 + $0x55] sm:$0xff] }
 0x2e0   : >> { %8335 = vmatmul.mubr.bf16.gmra.mrb[32].mxu0 %v2877_v35  ;;  %8426 = vmatprep.subr.bf16.mxu1 %v9331_v31  ;;  %v9132_v35 = vld [vmem:[%s11845_s2 + $0x1b0] sm:$0xff]  }
 0x2e1   : >> { %8371 = vmatmul.mubr.bf16.gmra.mrb[32].mxu1 %v2879_v47  ;;  %8338 = vmatprep.mubr.msk.bf16.mxu0 %vm9332_vm9, %v9331_v31  ;;  %v7359_v47 = vld [vmem:[%s10600_s9 + $0x5d] sm:$0xff] }
 0x2e2   : >> { %8374 = vmatprep.mubr.msk.bf16.mxu1 %vm9332_vm9, %v9331_v31  ;;  %8391 = vmatpush3.bf16.msra.mxu0 %v9116_v10  ;;  %v3526_v10 = vpack.c.bf16 %v7359_v47, %v7358_v34 }
 0x2e3   : >> { %8427 = vmatpush3.bf16.msra.mxu1 %v9117_v14  ;;  %8392 = vmatprep.subr.bf16.mxu0 %v9331_v31  ;;  %v9138_v14 = vld [vmem:[%s11845_s2 + $0x210] sm:$0xff]  }
 0x2e4   : >> { %8428 = vmatprep.subr.bf16.mxu1 %v9331_v31 }
 0x2e6   : >> { %8393 = vmatpush3.bf16.msra.mxu0 %v9118_v12  ;;  %v9139_v12 = vld [vmem:[%s11845_s2 + $0x218] sm:$0xff]  }
 0x2e7   : >> { %8429 = vmatpush3.bf16.msra.mxu1 %v9119_v40  ;;  %8450 = vmatprep.subr.bf16.mxu0 %v9331_v31  ;;  %v7360_v40 = vld [vmem:[%s10600_s9 + $0x65] sm:$0xff] }
 0x2e8   : >> { %8339 = vmatmul.mubr.bf16.gmra.mrb[36].mxu0 %v2716_v62  ;;  %8486 = vmatprep.subr.bf16.mxu1 %v9331_v31  ;;  %v7361_v62 = vld [vmem:[%s10600_s9 + $0x6d] sm:$0xff] }
 0x2e9   : >> { %8375 = vmatmul.mubr.bf16.gmra.mrb[36].mxu1 %v2880_v53  ;;  %8394 = vmatprep.mubr.msk.bf16.mxu0 %vm9332_vm9, %v9331_v31  ;;  %v3365_v53 = vpack.c.bf16 %v7326_v0, %v7325_v9  ;;  %v3527_v43 = vpack.c.bf16 %v7361_v62, %v7360_v40 }
 0x2ea   : >> { %8430 = vmatprep.mubr.msk.bf16.mxu1 %vm9332_vm9, %v9331_v31 }
 0x2f0   : >> { %8395 = vmatmul.mubr.bf16.vlgmr.msra.gmra.mrb[40].mxu0 %v3038_v22  ;;  %v9141_v22 = vld [vmem:[%s11845_s2 + $0x228] sm:$0xff]  }
 0x2f1   : >> { %8431 = vmatmul.mubr.bf16.vlgmr.msra.gmra.mrb[40].mxu1 %v3200_v32  ;;  %8451 = vmatpush3.bf16.msra.mxu0 %v9120_v30  ;;  %v7362_v32 = vld [vmem:[%s10600_s9 + $0x75] sm:$0xff]  ;;  %v7363_v30 = vld [vmem:[%s10600_s9 + $0x7d] sm:$0xff] }
 0x2f2   : >> { %8452 = vmatprep.subr.bf16.mxu0 %v9331_v31  ;;  %8398 = vmatprep.mubr.msk.bf16.mxu0 %vm9332_vm9, %v9331_v31 }
 0x2f3   : >> { %8434 = vmatprep.mubr.msk.bf16.mxu1 %vm9332_vm9, %v9331_v31  ;;  %8487 = vmatpush3.bf16.msra.mxu1 %v9122_v8  ;;  %v3366_v8 = vpack.c.bf16 %v7328_v59, %v7327_v19 }
 0x2f4   : >> { %8488 = vmatprep.subr.bf16.mxu1 %v9331_v31 }
 0x2f5   : >> { %8453 = vmatpush3.bf16.msra.mxu0 %v9121_v18  ;;  %v3528_v18 = vpack.c.bf16 %v7363_v30, %v7362_v32 }
 0x2f6   : >> { %8454 = vmatprep.subr.bf16.mxu0 %v9331_v31 }
 0x2f7   : >> { %8489 = vmatpush3.bf16.msra.mxu1 %v9124_v58  ;;  %v3367_v58 = vpack.c.bf16 %v7329_v20, %v7329_v20 }
 0x2f8   : >> { %8399 = vmatmul.mubr.bf16.gmra.mrb[44].mxu0 %v3039_v50  ;;  %8490 = vmatprep.subr.bf16.mxu1 %v9331_v31  ;;  %v3529_v50 = vpack.c.bf16 %v7364_v15, %v7364_v15 }
 0x2f9   : >> { %8435 = vmatmul.mubr.bf16.gmra.mrb[44].mxu1 %v3201_v36  ;;  %8455 = vmatpush3.bf16.msra.mxu0 %v9123_v4  ;;  %v7391_v36 = vld [vmem:[%s10600_s9 + $0x46] sm:$0xff]  ;;  %v7392_v4 = vld [vmem:[%s10600_s9 + $0x4e] sm:$0xff] }
 0x2fa   : >> { %8402 = vmatprep.mubr.msk.bf16.mxu0 %vm9332_vm9, %v9331_v31  ;;  %8438 = vmatprep.mubr.msk.bf16.mxu1 %vm9332_vm9, %v9331_v31  ;;  %v3687_v11 = vpack.c.bf16 %v7392_v4, %v7391_v36 }
 0x2fb   : >> { %8456 = vmatprep.subr.bf16.mxu0 %v9331_v31  ;;  %8491 = vmatpush3.bf16.msra.mxu1 %v9126_v38  ;;  %v7397_v38 = vld [vmem:[%s10600_s9 + $0x76] sm:$0xff] }
 0x2fc   : >> { %8492 = vmatprep.subr.bf16.mxu1 %v9331_v31 }
 0x2fd   : >> { %8457 = vmatpush3.bf16.msra.mxu0 %v9125_v1  ;;  %v3690_v1 = vpack.c.bf16 %v7398_v25, %v7397_v38 }
 0x2fe   : >> { %8458 = vmatprep.subr.bf16.mxu0 %v9331_v31 }
 0x2ff   : >> { %8493 = vmatpush3.bf16.msra.mxu1 %v9128_v52  ;;  %v7399_v52 = vld [vmem:[%s10600_s9 + $0x86] sm:$0xf] }
 0x300   : >> { %8403 = vmatmul.mubr.bf16.gmra.mrb[48].mxu0 %v3040_v7  ;;  %8494 = vmatprep.subr.bf16.mxu1 %v9331_v31  ;;  %v3688_v7 = vpack.c.bf16 %v7394_v29, %v7393_v28 }
 0x301   : >> { %8439 = vmatmul.mubr.bf16.gmra.mrb[48].mxu1 %v3202_v41  ;;  %8459 = vmatpush3.bf16.msra.mxu0 %v9127_v42  ;;  %v7395_v42 = vld [vmem:[%s10600_s9 + $0x66] sm:$0xff] }
 0x302   : >> { %8406 = vmatprep.mubr.msk.bf16.mxu0 %vm9332_vm9, %v9331_v31  ;;  %8442 = vmatprep.mubr.msk.bf16.mxu1 %vm9332_vm9, %v9331_v31 }
 0x303   : >> { %8460 = vmatprep.subr.bf16.mxu0 %v9331_v31  ;;  %8495 = vmatpush3.bf16.msra.mxu1 %v9129_v61  ;;  %v7396_v61 = vld [vmem:[%s10600_s9 + $0x6e] sm:$0xff]  ;;  %s6844_s9 = smul.u32 18, %s9318_s24  ;;  %s2378_s24 = sadd.s32 1, %s9318_s24  }
 0x304   : >> { %8496 = vmatprep.subr.bf16.mxu1 %v9331_v31  ;;  %v3689_v51 = vpack.c.bf16 %v7396_v61, %v7395_v42  ;;  %p2375_p5 = scmp.ge.s32.totalorder %s2378_s24, 16  }
 0x305   : >> { %8461 = vmatpush3.bf16.msra.mxu0 %v9130_v44  ;;  %s11072_s27 = scalar_lea.vmem [#allocation3], %s6844_s9  ;;  %s11109_s12 = smov (%p2375_p5), 0  }
 0x306   : >> { %8462 = vmatprep.subr.bf16.mxu0 %v9331_v31 }
 0x307   : >> { %8497 = vmatpush3.bf16.msra.mxu1 %v9131_v26 }
 0x308   : >> { %8407 = vmatmul.mubr.bf16.gmra.mrb[52].mxu0 %v3041_v60  ;;  %8498 = vmatprep.subr.bf16.mxu1 %v9331_v31 }
 0x309   : >> { %8443 = vmatmul.mubr.bf16.gmra.mrb[52].mxu1 %v3203_v39  ;;  %8410 = vmatprep.mubr.msk.bf16.mxu0 %vm9332_vm9, %v9331_v31 }
 0x30a   : >> { %8446 = vmatprep.mubr.msk.bf16.mxu1 %vm9332_vm9, %v9331_v31  ;;  %8463 = vmatpush3.bf16.msra.mxu0 %v9132_v35 }
 0x30b   : >> { %8499 = vmatpush3.bf16.msra.mxu1 %v9133_v56  ;;  %8464 = vmatprep.subr.bf16.mxu0 %v9331_v31 }
 0x30c   : >> { %8500 = vmatprep.subr.bf16.mxu1 %v9331_v31 }
 0x30e   : >> { %8465 = vmatpush3.bf16.msra.mxu0 %v9134_v55 }
 0x30f   : >> { %8501 = vmatpush3.bf16.msra.mxu1 %v9135_v48  ;;  %8522 = vmatprep.subr.bf16.mxu0 %v9331_v31 }
 0x310   : >> { %8411 = vmatmul.mubr.bf16.gmra.mrb[56].mxu0 %v3042_v57  ;;  %8990 = vmatprep.subr.bf16.mxu1 %v9331_v31 }
 0x311   : >> { %8447 = vmatmul.mubr.bf16.gmra.mrb[56].mxu1 %v3204_v3  ;;  %8466 = vmatprep.mubr.msk.bf16.mxu0 %vm9332_vm9, %v9331_v31 }
 0x312   : >> { %8502 = vmatprep.mubr.msk.bf16.mxu1 %vm9332_vm9, %v9331_v31 }
 0x318   : >> { %8467 = vmatmul.mubr.bf16.vlgmr.msra.gmra.mrb[60].mxu0 %v3202_v41  ;;  %v3691_v41 = vpack.c.bf16 %v7399_v52, %v7399_v52 }
 0x319   : >> { %8503 = vmatmul.mubr.bf16.vlgmr.msra.gmra.mrb[60].mxu1 %v3525_v17  ;;  %8523 = vmatpush3.bf16.msra.mxu0 %v9136_v27 }
 0x31a   : >> { %8524 = vmatprep.subr.bf16.mxu0 %v9331_v31  ;;  %8470 = vmatprep.mubr.msk.bf16.mxu0 %vm9332_vm9, %v9331_v31 }
 0x31b   : >> { %8506 = vmatprep.mubr.msk.bf16.mxu1 %vm9332_vm9, %v9331_v31  ;;  %8998 = vmatpush3.bf16.msra.mxu1 %v9136_v27 }
 0x31c   : >> { %8991 = vmatprep.subr.bf16.mxu1 %v9331_v31 }
 0x31d   : >> { %8525 = vmatpush3.bf16.msra.mxu0 %v9137_v54 }
 0x31e   : >> { %8526 = vmatprep.subr.bf16.mxu0 %v9331_v31 }
 0x31f   : >> { %8999 = vmatpush3.bf16.msra.mxu1 %v9137_v54 }
 0x320   : >> { %8471 = vmatmul.mubr.bf16.gmra.mrb[64].mxu0 %v3203_v39  ;;  %8992 = vmatprep.subr.bf16.mxu1 %v9331_v31 }
 0x321   : >> { %8507 = vmatmul.mubr.bf16.gmra.mrb[64].mxu1 %v3526_v10  ;;  %8527 = vmatpush3.bf16.msra.mxu0 %v9138_v14 }
 0x322   : >> { %8474 = vmatprep.mubr.msk.bf16.mxu0 %vm9332_vm9, %v9331_v31  ;;  %8510 = vmatprep.mubr.msk.bf16.mxu1 %vm9332_vm9, %v9331_v31 }
 0x323   : >> { %8528 = vmatprep.subr.bf16.mxu0 %v9331_v31  ;;  %9000 = vmatpush3.bf16.msra.mxu1 %v9138_v14 }
 0x324   : >> { %8993 = vmatprep.subr.bf16.mxu1 %v9331_v31 }
 0x325   : >> { %8529 = vmatpush3.bf16.msra.mxu0 %v9139_v12 }
 0x326   : >> { %8530 = vmatprep.subr.bf16.mxu0 %v9331_v31 }
 0x327   : >> { %9001 = vmatpush3.bf16.msra.mxu1 %v9139_v12 }
 0x328   : >> { %8475 = vmatmul.mubr.bf16.gmra.mrb[68].mxu0 %v3365_v53  ;;  %8994 = vmatprep.subr.bf16.mxu1 %v9331_v31 }
 0x329   : >> { %8511 = vmatmul.mubr.bf16.gmra.mrb[68].mxu1 %v3527_v43  ;;  %8531 = vmatpush3.bf16.msra.mxu0 %v9140_v6 }
 0x32a   : >> { %8478 = vmatprep.mubr.msk.bf16.mxu0 %vm9332_vm9, %v9331_v31  ;;  %8514 = vmatprep.mubr.msk.bf16.mxu1 %vm9332_vm9, %v9331_v31 }
 0x32b   : >> { %9002 = vmatpush3.bf16.msra.mxu1 %v9140_v6  ;;  %8532 = vmatprep.subr.bf16.mxu0 %v9331_v31 }
 0x32c   : >> { %8995 = vmatprep.subr.bf16.mxu1 %v9331_v31 }
 0x32d   : >> { %8533 = vmatpush3.bf16.msra.mxu0 %v9141_v22 }
 0x32e   : >> { %8534 = vmatprep.subr.bf16.mxu0 %v9331_v31 }
 0x32f   : >> { %9003 = vmatpush3.bf16.msra.mxu1 %v9141_v22 }
 0x330   : >> { %8479 = vmatmul.mubr.bf16.gmra.mrb[72].mxu0 %v3366_v8  ;;  %8996 = vmatprep.subr.bf16.mxu1 %v9331_v31 }
 0x331   : >> { %8515 = vmatmul.mubr.bf16.gmra.mrb[72].mxu1 %v3528_v18  ;;  %8482 = vmatprep.mubr.msk.bf16.mxu0 %vm9332_vm9, %v9331_v31 }
 0x332   : >> { %8518 = vmatprep.mubr.msk.bf16.mxu1 %vm9332_vm9, %v9331_v31  ;;  %8535 = vmatpush3.bf16.msra.mxu0 %v9142_v49 }
 0x333   : >> { %9004 = vmatpush3.bf16.msra.mxu1 %v9142_v49  ;;  %8536 = vmatprep.subr.bf16.mxu0 %v9331_v31 }
 0x334   : >> { %8997 = vmatprep.subr.bf16.mxu1 %v9331_v31 }
 0x336   : >> { %8537 = vmatpush3.bf16.msra.mxu0 %v9143_v33 }
 0x337   : >> { %9005 = vmatpush3.bf16.msra.mxu1 %v9143_v33 }
 0x338   : >> { %8483 = vmatmul.mubr.bf16.gmra.mrb[76].mxu0 %v3367_v58 }
 0x339   : >> { %8519 = vmatmul.mubr.bf16.gmra.mrb[76].mxu1 %v3529_v50  ;;  %8538 = vmatprep.mubr.msk.bf16.mxu0 %vm9332_vm9, %v9331_v31 }
 0x33a   : >> { %8550 = vmatprep.mubr.msk.bf16.mxu1 %vm9332_vm9, %v9331_v31 }
 0x340   : >> { %8539 = vmatmul.mubr.bf16.vlgmr.msra.gmra.mrb[80].mxu0 %v3687_v11 }
 0x341   : >> { %8551 = vmatmul.mubr.bf16.vlgmr.msra.gmra.mrb[80].mxu1 %v3690_v1  ;;  %8542 = vmatprep.mubr.msk.bf16.mxu0 %vm9332_vm9, %v9331_v31 }
 0x342   : >> { %8554 = vmatprep.mubr.msk.bf16.mxu1 %vm9332_vm9, %v9331_v31 }
 0x348   : >> { %8543 = vmatmul.mubr.bf16.gmra.mrb[84].mxu0 %v3688_v7 }
 0x349   : >> { %8555 = vmatmul.mubr.bf16.gmra.mrb[84].mxu1 %v3691_v41  ;;  %8546 = vmatprep.mubr.msk.bf16.mxu0 %vm9332_vm9, %v9331_v31 }
 0x350   : >> { %8547 = vmatmul.mubr.bf16.gmra.mrb[88].mxu0 %v3689_v51 }
 0x373   : >> { %v2526_v37 = vpop.f32.mrb[0].mxu0 }
 0x374   : >> { %v2646_v44 = vpop.f32.mrb[0].mxu1  ;;  %v8252_v63 = vpop.f32.mrb[1].mxu0 }
 0x375   : >> { %v2647_v16 = vadd.f32 %v2646_v44, %v2526_v37  ;;  %v8288_v26 = vpop.f32.mrb[1].mxu1  ;;  %v2529_v60 = vpop.f32.mrb[2].mxu0 }
 0x376   : >> { %v2649_v39 = vpop.f32.mrb[2].mxu1  ;;  %v8253_v35 = vpop.f32.mrb[3].mxu0 }
 0x377   : >> { %v2650_v56 = vadd.f32 %v2649_v39, %v2529_v60  ;;  %v8289_v5 = vpop.f32.mrb[3].mxu1 }
 0x37b   : >> { %v2534_v13 = vpop.f32.mrb[4].mxu0 }
 0x37c   : >> { %v2654_v55 = vpop.f32.mrb[4].mxu1  ;;  %v8256_v48 = vpop.f32.mrb[5].mxu0 }
 0x37d   : >> { %v2655_v57 = vadd.f32 %v2654_v55, %v2534_v13  ;;  %v8292_v3 = vpop.f32.mrb[5].mxu1  ;;  %v2537_v31 = vpop.f32.mrb[6].mxu0 }
 0x37e   : >> { %v2657_v23 = vpop.f32.mrb[6].mxu1  ;;  %v8257_v2 = vpop.f32.mrb[7].mxu0 }
 0x37f   : >> { %v2658_v17 = vadd.f32 %v2657_v23, %v2537_v31  ;;  %v8293_v27 = vpop.f32.mrb[7].mxu1 }
 0x383   : >> { %v2542_v54 = vpop.f32.mrb[8].mxu0 }
 0x384   : >> { %v2662_v34 = vpop.f32.mrb[8].mxu1  ;;  %v8260_v47 = vpop.f32.mrb[9].mxu0 }
 0x385   : >> { %v2663_v10 = vadd.f32 %v2662_v34, %v2542_v54  ;;  %v8296_v14 = vpop.f32.mrb[9].mxu1  ;;  %v2545_v9 = vpop.f32.mrb[10].mxu0 }
 0x386   : >> { %v2665_v0 = vpop.f32.mrb[10].mxu1  ;;  %v8261_v12 = vpop.f32.mrb[11].mxu0 }
 0x387   : >> { %v2666_v40 = vadd.f32 %v2665_v0, %v2545_v9  ;;  %v8297_v62 = vpop.f32.mrb[11].mxu1 }
 0x38b   : >> { %v2550_v53 = vpop.f32.mrb[12].mxu0 }
 0x38c   : >> { %v2670_v43 = vpop.f32.mrb[12].mxu1  ;;  %v8264_v6 = vpop.f32.mrb[13].mxu0 }
 0x38d   : >> { %v2671_v19 = vadd.f32 %v2670_v43, %v2550_v53  ;;  %v8300_v59 = vpop.f32.mrb[13].mxu1  ;;  %v2553_v22 = vpop.f32.mrb[14].mxu0 }
 0x38e   : >> { %v2673_v32 = vpop.f32.mrb[14].mxu1  ;;  %v8265_v30 = vpop.f32.mrb[15].mxu0 }
 0x38f   : >> { %v2674_v8 = vadd.f32 %v2673_v32, %v2553_v22  ;;  %v8301_v18 = vpop.f32.mrb[15].mxu1 }
 0x393   : >> { %v2558_v49 = vpop.f32.mrb[16].mxu0 }
 0x394   : >> { %v8268_v20 = vpop.f32.mrb[17].mxu0  ;;  %v2678_v15 = vpop.f32.mrb[16].mxu1 }
 0x395   : >> { %v2679_v33 = vadd.f32 %v2678_v15, %v2558_v49  ;;  %v2561_v58 = vpop.f32.mrb[18].mxu0  ;;  %v8304_v50 = vpop.f32.mrb[17].mxu1 }
 0x396   : >> { %v8269_v36 = vpop.f32.mrb[19].mxu0  ;;  %v2681_v4 = vpop.f32.mrb[18].mxu1 }
 0x397   : >> { %v8305_v38 = vpop.f32.mrb[19].mxu1 }
 0x39b   : >> { %v2799_v25 = vpop.f32.mrb[20].mxu0 }
 0x39c   : >> { %v2837_v11 = vadd.f32 %v2799_v25, %v2647_v16  ;;  %v8324_v1 = vpop.f32.mrb[21].mxu0  ;;  %v2963_v28 = vpop.f32.mrb[20].mxu1 }
 0x39d   : >> { %v2802_v29 = vpop.f32.mrb[22].mxu0  ;;  %v8360_v52 = vpop.f32.mrb[21].mxu1 }
 0x39e   : >> { %v2838_v7 = vadd.f32 %v2802_v29, %v2650_v56  ;;  %v3001_v41 = vadd.f32 %v2963_v28, %v2837_v11  ;;  %v8325_v42 = vpop.f32.mrb[23].mxu0  ;;  %v2966_v61 = vpop.f32.mrb[22].mxu1 }
 0x39f   : >> { %v8361_v51 = vpop.f32.mrb[23].mxu1 }
 0x3a0   : >> { %v3002_v37 = vadd.f32 %v2966_v61, %v2838_v7 }
 0x3a3   : >> { %v2807_v44 = vpop.f32.mrb[24].mxu0 }
 0x3a4   : >> { %v2839_v63 = vadd.f32 %v2807_v44, %v2655_v57  ;;  %v8328_v26 = vpop.f32.mrb[25].mxu0  ;;  %v2971_v60 = vpop.f32.mrb[24].mxu1 }
 0x3a5   : >> { %v2810_v39 = vpop.f32.mrb[26].mxu0  ;;  %v8364_v35 = vpop.f32.mrb[25].mxu1 }
 0x3a6   : >> { %v2840_v5 = vadd.f32 %v2810_v39, %v2658_v17  ;;  %v3003_v13 = vadd.f32 %v2971_v60, %v2839_v63  ;;  %v8329_v55 = vpop.f32.mrb[27].mxu0  ;;  %v2974_v16 = vpop.f32.mrb[26].mxu1 }
 0x3a7   : >> { %v8365_v48 = vpop.f32.mrb[27].mxu1 }
 0x3a8   : >> { %v3004_v3 = vadd.f32 %v2974_v16, %v2840_v5 }
 0x3ab   : >> { %v2815_v31 = vpop.f32.mrb[28].mxu0 }
 0x3ac   : >> { %v2841_v23 = vadd.f32 %v2815_v31, %v2663_v10  ;;  %v8332_v56 = vpop.f32.mrb[29].mxu0  ;;  %v2979_v2 = vpop.f32.mrb[28].mxu1 }
 0x3ad   : >> { %v2818_v27 = vpop.f32.mrb[30].mxu0  ;;  %v8368_v54 = vpop.f32.mrb[29].mxu1 }
 0x3ae   : >> { %v2842_v34 = vadd.f32 %v2818_v27, %v2666_v40  ;;  %v3005_v47 = vadd.f32 %v2979_v2, %v2841_v23  ;;  %v8333_v14 = vpop.f32.mrb[31].mxu0  ;;  %v2982_v57 = vpop.f32.mrb[30].mxu1 }
 0x3af   : >> { %v8369_v9 = vpop.f32.mrb[31].mxu1 }
 0x3b0   : >> { %v3006_v0 = vadd.f32 %v2982_v57, %v2842_v34 }
 0x3b3   : >> { %v2823_v12 = vpop.f32.mrb[32].mxu0 }
 0x3b4   : >> { %v2843_v62 = vadd.f32 %v2823_v12, %v2671_v19  ;;  %v8336_v17 = vpop.f32.mrb[33].mxu0  ;;  %v2987_v53 = vpop.f32.mrb[32].mxu1 }
 0x3b5   : >> { %v2826_v43 = vpop.f32.mrb[34].mxu0  ;;  %v8372_v6 = vpop.f32.mrb[33].mxu1 }
 0x3b6   : >> { %v2844_v59 = vadd.f32 %v2826_v43, %v2674_v8  ;;  %v3007_v22 = vadd.f32 %v2987_v53, %v2843_v62  ;;  %v8337_v32 = vpop.f32.mrb[35].mxu0  ;;  %v2990_v10 = vpop.f32.mrb[34].mxu1 }
 0x3b7   : >> { %v8373_v30 = vpop.f32.mrb[35].mxu1 }
 0x3b8   : >> { %v3008_v18 = vadd.f32 %v2990_v10, %v2844_v59 }
 0x3bb   : >> { %v2831_v49 = vpop.f32.mrb[36].mxu0 }
 0x3bc   : >> { %v2845_v20 = vadd.f32 %v2831_v49, %v2679_v33  ;;  %v8340_v40 = vpop.f32.mrb[37].mxu0  ;;  %v2995_v15 = vpop.f32.mrb[36].mxu1 }
 0x3bd   : >> { %v2834_v58 = vpop.f32.mrb[38].mxu0  ;;  %v8376_v50 = vpop.f32.mrb[37].mxu1 }
 0x3be   : >> { %v3009_v36 = vadd.f32 %v2995_v15, %v2845_v20  ;;  %v8341_v4 = vpop.f32.mrb[39].mxu0  ;;  %v2998_v38 = vpop.f32.mrb[38].mxu1 }
 0x3bf   : >> { %v8377_v19 = vpop.f32.mrb[39].mxu1 }
 0x3c3   : >> { %v3125_v25 = vpop.f32.mrb[40].mxu0 }
 0x3c4   : >> { %v3163_v11 = vadd.f32 %v3125_v25, %v3001_v41  ;;  %v8396_v1 = vpop.f32.mrb[41].mxu0  ;;  %v3287_v28 = vpop.f32.mrb[40].mxu1 }
 0x3c5   : >> { %v3128_v8 = vpop.f32.mrb[42].mxu0  ;;  %v8432_v29 = vpop.f32.mrb[41].mxu1 }
 0x3c6   : >> { %v3164_v52 = vadd.f32 %v3128_v8, %v3002_v37  ;;  %v3325_v7 = vadd.f32 %v3287_v28, %v3163_v11  ;;  %v8397_v42 = vpop.f32.mrb[43].mxu0  ;;  %v3290_v61 = vpop.f32.mrb[42].mxu1 }
 0x3c7   : >> { %v8433_v51 = vpop.f32.mrb[43].mxu1 }
 0x3c8   : >> { %v3326_v33 = vadd.f32 %v3290_v61, %v3164_v52 }
 0x3cb   : >> { %v3133_v44 = vpop.f32.mrb[44].mxu0 }
 0x3cc   : >> { %v3165_v63 = vadd.f32 %v3133_v44, %v3003_v13  ;;  %v8400_v26 = vpop.f32.mrb[45].mxu0  ;;  %v3295_v60 = vpop.f32.mrb[44].mxu1 }
 0x3cd   : >> { %v3136_v39 = vpop.f32.mrb[46].mxu0  ;;  %v8436_v35 = vpop.f32.mrb[45].mxu1 }
 0x3ce   : >> { %v3166_v5 = vadd.f32 %v3136_v39, %v3004_v3  ;;  %v3327_v55 = vadd.f32 %v3295_v60, %v3165_v63  ;;  %v8401_v16 = vpop.f32.mrb[47].mxu0  ;;  %v3298_v41 = vpop.f32.mrb[46].mxu1 }
 0x3cf   : >> { %v8437_v48 = vpop.f32.mrb[47].mxu1 }
 0x3d0   : >> { %v3328_v31 = vadd.f32 %v3298_v41, %v3166_v5 }
 0x3d3   : >> { %v3141_v23 = vpop.f32.mrb[48].mxu0 }
 0x3d4   : >> { %v3167_v56 = vadd.f32 %v3141_v23, %v3005_v47  ;;  %v8404_v37 = vpop.f32.mrb[49].mxu0  ;;  %v3303_v2 = vpop.f32.mrb[48].mxu1 }
 0x3d5   : >> { %v3144_v27 = vpop.f32.mrb[50].mxu0  ;;  %v8440_v54 = vpop.f32.mrb[49].mxu1 }
 0x3d6   : >> { %v3168_v34 = vadd.f32 %v3144_v27, %v3006_v0  ;;  %v3329_v14 = vadd.f32 %v3303_v2, %v3167_v56  ;;  %v8405_v57 = vpop.f32.mrb[51].mxu0  ;;  %v3306_v13 = vpop.f32.mrb[50].mxu1 }
 0x3d7   : >> { %v8441_v9 = vpop.f32.mrb[51].mxu1 }
 0x3d8   : >> { %v3330_v12 = vadd.f32 %v3306_v13, %v3168_v34 }
 0x3db   : >> { %v3149_v62 = vpop.f32.mrb[52].mxu0 }
 0x3dc   : >> { %v3169_v17 = vadd.f32 %v3149_v62, %v3007_v22  ;;  %v8408_v3 = vpop.f32.mrb[53].mxu0  ;;  %v3311_v53 = vpop.f32.mrb[52].mxu1 }
 0x3dd   : >> { %v3152_v43 = vpop.f32.mrb[54].mxu0  ;;  %v8444_v6 = vpop.f32.mrb[53].mxu1 }
 0x3de   : >> { %v3170_v59 = vadd.f32 %v3152_v43, %v3008_v18  ;;  %v3331_v32 = vadd.f32 %v3311_v53, %v3169_v17  ;;  %v8409_v10 = vpop.f32.mrb[55].mxu0  ;;  %v3314_v47 = vpop.f32.mrb[54].mxu1 }
 0x3df   : >> { %v8445_v30 = vpop.f32.mrb[55].mxu1 }
 0x3e0   : >> { %v3332_v49 = vadd.f32 %v3314_v47, %v3170_v59 }
 0x3e3   : >> { %v3157_v20 = vpop.f32.mrb[56].mxu0 }
 0x3e4   : >> { %v3171_v40 = vadd.f32 %v3157_v20, %v3009_v36  ;;  %v8412_v0 = vpop.f32.mrb[57].mxu0  ;;  %v3319_v15 = vpop.f32.mrb[56].mxu1 }
 0x3e5   : >> { %v3160_v58 = vpop.f32.mrb[58].mxu0  ;;  %v8448_v50 = vpop.f32.mrb[57].mxu1 }
 0x3e6   : >> { %v3333_v4 = vadd.f32 %v3319_v15, %v3171_v40  ;;  %v8413_v38 = vpop.f32.mrb[59].mxu0  ;;  %v3322_v19 = vpop.f32.mrb[58].mxu1 }
 0x3e7   : >> { %v8449_v22 = vpop.f32.mrb[59].mxu1 }
 0x3eb   : >> { %v3450_v25 = vpop.f32.mrb[60].mxu0 }
 0x3ec   : >> { %v3488_v11 = vadd.f32 %v3450_v25, %v3325_v7  ;;  %v8468_v1 = vpop.f32.mrb[61].mxu0  ;;  %v3612_v28 = vpop.f32.mrb[60].mxu1 }
 0x3ed   : >> { %v3453_v18 = vpop.f32.mrb[62].mxu0  ;;  %v8504_v8 = vpop.f32.mrb[61].mxu1 }
 0x3ee   : >> { %v3489_v29 = vadd.f32 %v3453_v18, %v3326_v33  ;;  %v3650_v52 = vadd.f32 %v3612_v28, %v3488_v11  ;;  %v8469_v42 = vpop.f32.mrb[63].mxu0  ;;  %v3615_v61 = vpop.f32.mrb[62].mxu1 }
 0x3ef   : >> { %v8505_v51 = vpop.f32.mrb[63].mxu1 }
 0x3f0   : >> { %v3651_v36 = vadd.f32 %v3615_v61, %v3489_v29 }
 0x3f3   : >> { %v3458_v44 = vpop.f32.mrb[64].mxu0 }
 0x3f4   : >> { %v3490_v63 = vadd.f32 %v3458_v44, %v3327_v55  ;;  %v8472_v26 = vpop.f32.mrb[65].mxu0  ;;  %v3620_v60 = vpop.f32.mrb[64].mxu1 }
 0x3f5   : >> { %v3461_v39 = vpop.f32.mrb[66].mxu0  ;;  %v8508_v35 = vpop.f32.mrb[65].mxu1 }
 0x3f6   : >> { %v3491_v5 = vadd.f32 %v3461_v39, %v3328_v31  ;;  %v3652_v16 = vadd.f32 %v3620_v60, %v3490_v63  ;;  %v8473_v41 = vpop.f32.mrb[67].mxu0  ;;  %v3623_v7 = vpop.f32.mrb[66].mxu1 }
 0x3f7   : >> { %v8509_v48 = vpop.f32.mrb[67].mxu1 }
 0x3f8   : >> { %v3653_v23 = vadd.f32 %v3623_v7, %v3491_v5 }
 0x3fb   : >> { %v3466_v56 = vpop.f32.mrb[68].mxu0 }
 0x3fc   : >> { %v3492_v37 = vadd.f32 %v3466_v56, %v3329_v14  ;;  %v8476_v33 = vpop.f32.mrb[69].mxu0  ;;  %v3628_v2 = vpop.f32.mrb[68].mxu1 }
 0x3fd   : >> { %v3469_v27 = vpop.f32.mrb[70].mxu0  ;;  %v8512_v54 = vpop.f32.mrb[69].mxu1 }
 0x3fe   : >> { %v3493_v34 = vadd.f32 %v3469_v27, %v3330_v12  ;;  %v10998_v57 = vadd.f32 %v3628_v2, %v3492_v37  ;;  %v8477_v55 = vpop.f32.mrb[71].mxu0  ;;  %v3631_v13 = vpop.f32.mrb[70].mxu1 }
 0x3ff   : >> { %v8513_v9 = vpop.f32.mrb[71].mxu1 }
 0x400   : >> { %v11000_v62 = vadd.f32 %v3631_v13, %v3493_v34 }
 0x403   : >> { %v3474_v31 = vpop.f32.mrb[72].mxu0 }
 0x404   : >> { %v3494_v17 = vadd.f32 %v3474_v31, %v3331_v32  ;;  %v8480_v3 = vpop.f32.mrb[73].mxu0  ;;  %v3636_v53 = vpop.f32.mrb[72].mxu1 }
 0x405   : >> { %v3477_v43 = vpop.f32.mrb[74].mxu0  ;;  %v8516_v6 = vpop.f32.mrb[73].mxu1 }
 0x406   : >> { %v3495_v59 = vadd.f32 %v3477_v43, %v3332_v49  ;;  %v3656_v14 = vadd.f32 %v3636_v53, %v3494_v17  ;;  %v8481_v10 = vpop.f32.mrb[75].mxu0  ;;  %v3639_v47 = vpop.f32.mrb[74].mxu1 }
 0x407   : >> { %v8517_v30 = vpop.f32.mrb[75].mxu1 }
 0x408   : >> { %v3657_v20 = vadd.f32 %v3639_v47, %v3495_v59 }
 0x40b   : >> { %v3482_v12 = vpop.f32.mrb[76].mxu0 }
 0x40c   : >> { %v3496_v40 = vadd.f32 %v3482_v12, %v3333_v4  ;;  %v8484_v0 = vpop.f32.mrb[77].mxu0  ;;  %v3644_v15 = vpop.f32.mrb[76].mxu1 }
 0x40d   : >> { %v3485_v58 = vpop.f32.mrb[78].mxu0  ;;  %v8520_v50 = vpop.f32.mrb[77].mxu1 }
 0x40e   : >> { %v3658_v38 = vadd.f32 %v3644_v15, %v3496_v40  ;;  %v8485_v19 = vpop.f32.mrb[79].mxu0  ;;  %v3647_v22 = vpop.f32.mrb[78].mxu1 }
 0x40f   : >> { %v8521_v32 = vpop.f32.mrb[79].mxu1 }
 0x413   : >> { %v3774_v25 = vpop.f32.mrb[80].mxu0 }
 0x414   : >> { %v3812_v11 = vadd.f32 %v3774_v25, %v3650_v52  ;;  %v3798_v1 = vpop.f32.mrb[80].mxu1  ;;  %v8540_v28 = vpop.f32.mrb[81].mxu0 }
 0x415   : >> { %v3818_v49 = vadd.f32 %v3798_v1, %v3656_v14  ;;  %v8552_v18 = vpop.f32.mrb[81].mxu1  ;;  %v3777_v8 = vpop.f32.mrb[82].mxu0 }
 0x416   : >> { %v3813_v29 = vadd.f32 %v3777_v8, %v3651_v36  ;;  %v3801_v42 = vpop.f32.mrb[82].mxu1  ;;  %v8541_v61 = vpop.f32.mrb[83].mxu0  ;;  %v3825_v6 = vadd.f32 %v10519_v45, %v3812_v11 }
 0x417   : >> { %v3831_v4 = vadd.f32 %v10519_v45, %v3818_v49  ;;  %v3819_v51 = vadd.f32 %v3801_v42, %v3657_v20  ;;  %v8553_v44 = vpop.f32.mrb[83].mxu1 }
 0x418   : >> { %v3834_v22 = vmax.f32 %v3825_v6, 0.0 }
 0x419   : >> { %v3840_v63 = vmax.f32 %v3831_v4, 0.0  ;;  %v3832_v26 = vadd.f32 %v10519_v45, %v3819_v51 }
 0x41b   : >> { %v3853_v60 = vmul.f32 %v10524_v21, %v3840_v63  ;;  %v3841_v39 = vmax.f32 %v3832_v26, 0.0  ;;  %v3782_v35 = vpop.f32.mrb[84].mxu0 }
 0x41c   : >> { %v3814_v52 = vadd.f32 %v3782_v35, %v3652_v16  ;;  %v3806_v5 = vpop.f32.mrb[84].mxu1  ;;  %v8544_v41 = vpop.f32.mrb[85].mxu0 }
 0x41d   : >> { %v11006_v7 = vadd.f32 %v10529_v24, %v3853_v60  ;;  %v3854_v36 = vmul.f32 %v10524_v21, %v3841_v39  ;;  %v3820_v48 = vadd.f32 %v3806_v5, %v3658_v38  ;;  %v3785_v56 = vpop.f32.mrb[86].mxu0  ;;  %v8556_v37 = vpop.f32.mrb[85].mxu1 }
 0x41e   : >> { %v3827_v33 = vadd.f32 %v10519_v45, %v3814_v52  ;;  %v3815_v2 = vadd.f32 %v3785_v56, %v3653_v23  ;;  %v8545_v27 = vpop.f32.mrb[87].mxu0  ;;  %v3809_v54 = vpop.f32.mrb[86].mxu1  ;;  %v3826_v23 = vadd.f32 %v10519_v45, %v3813_v29 }
 0x41f   : >> { %v3867_v34 = vadd.f32 %v10529_v24, %v3854_v36  ;;  %v3833_v55 = vadd.f32 %v10519_v45, %v3820_v48  ;;  %v8557_v16 = vpop.f32.mrb[87].mxu1  ;;  %v3878_v31 = vrot.slane %v11006_v7, 2 }
 0x420   : >> { %v3836_v13 = vmax.f32 %v3827_v33, 0.0  ;;  %v3828_v9 = vadd.f32 %v10519_v45, %v3815_v2  ;;  %v3835_v32 = vmax.f32 %v3826_v23, 0.0 }
 0x421   : >> { %v3880_v17 = vrot.slane %v3867_v34, 2  ;;  %v3842_v3 = vmax.f32 %v3833_v55, 0.0 }
 0x422   : >> { %v3849_v53 = vmul.f32 %v10524_v21, %v3836_v13  ;;  %v3837_v43 = vmax.f32 %v3828_v9, 0.0  ;;  %v11037_v61 = vmul.f32 %v10524_v21, %v3835_v32 }
 0x423   : >> { %v3881_v59 = vsel %vm1856_vm0, %v3878_v31, %v3880_v17  ;;  %v3855_v14 = vmul.f32 %v10524_v21, %v3842_v3  ;;  %v3790_v10 = vpop.f32.mrb[88].mxu0 }
 0x424   : >> { %v3862_v47 = vadd.f32 %v10529_v24, %v3849_v53  ;;  %v3850_v30 = vmul.f32 %v10524_v21, %v3837_v43  ;;  %v3816_v20 = vadd.f32 %v3790_v10, %v10998_v57  ;;  %v8548_v12 = vpop.f32.mrb[89].mxu0 }
 0x425   : >> { %v3868_v40 = vadd.f32 %v10529_v24, %v3855_v14  ;;  %v3793_v0 = vpop.f32.mrb[90].mxu0 }
 0x426   : >> { %v3890_v15 = vmax.f32 %v3862_v47, %v3881_v59  ;;  %v3863_v58 = vadd.f32 %v10529_v24, %v3850_v30  ;;  %v3829_v50 = vadd.f32 %v10519_v45, %v3816_v20  ;;  %v3817_v38 = vadd.f32 %v3793_v0, %v11000_v62  ;;  %v8549_v19 = vpop.f32.mrb[91].mxu0 }
 0x427   : >> { %v3882_v25 = vrot.slane %v3868_v40, 2  ;;  %v11034_v62 = vmul.f32 %v10524_v21, %v3834_v22 }
 0x428   : >> { %v3930_v11 = vcombine.high %v3890_v15, %v3890_v15  ;;  %v3937_v1 = vrot.slane %v3890_v15, %v10312_v46  ;;  %v3838_v28 = vmax.f32 %v3829_v50, 0.0  ;;  %v3830_v49 = vadd.f32 %v10519_v45, %v3817_v38 }
 0x429   : >> { %v3883_v57 = vsel %vm1856_vm0, %v3880_v17, %v3882_v25 }
 0x42a   : >> { %v3944_v18 = vrot.slane %v3930_v11, %v10312_v46  ;;  %v3945_v8 = vcombine.high %v3937_v1, %v3937_v1  ;;  %v4037_v29 = vsel %vm2066_vm1, %v3937_v1, -inf  ;;  %v3891_v42 = vmax.f32 %v3863_v58, %v3883_v57 }
 0x42b   : >> { %v4038_v4 = vrot.slane %v4037_v29, 4  ;;  %v3851_v51 = vmul.f32 %v10524_v21, %v3838_v28  ;;  %v3839_v56 = vmax.f32 %v3830_v49, 0.0 }
 0x42c   : >> { %v3946_v44 = vcombine.high %v3944_v18, %v3944_v18  ;;  %v4044_v63 = vsel %vm2066_vm1, %v3945_v8, -inf  ;;  %v4051_v26 = vsel %vm2066_vm1, %v3944_v18, -inf  ;;  %v3947_v60 = vcombine.high %v3891_v42, %v3891_v42 }
 0x42d   : >> { %v4039_v39 = vmax.f32 %v4037_v29, %v4038_v4  ;;  %v4045_v35 = vrot.slane %v4044_v63, 4  ;;  %v4052_v52 = vrot.slane %v4051_v26, 4  ;;  %v3954_v5 = vrot.slane %v3891_v42, %v10312_v46 }
 0x42e   : >> { %v4058_v41 = vsel %vm2066_vm1, %v3946_v44, -inf  ;;  %v3961_v36 = vrot.slane %v3947_v60, %v10312_v46  ;;  %v3864_v48 = vadd.f32 %v10529_v24, %v3851_v51  ;;  %v3852_v50 = vmul.f32 %v10524_v21, %v3839_v56 }
 0x42f   : >> { %v4040_v37 = vrot.slane %v4039_v39, 2  ;;  %v4046_v33 = vmax.f32 %v4044_v63, %v4045_v35  ;;  %v4053_v2 = vmax.f32 %v4051_v26, %v4052_v52  ;;  %v4059_v27 = vrot.slane %v4058_v41, 4 }
 0x430   : >> { %v3962_v54 = vcombine.high %v3954_v5, %v3954_v5  ;;  %v3963_v34 = vcombine.high %v3961_v36, %v3961_v36  ;;  %v4065_v55 = vsel %vm2066_vm1, %v3954_v5, -inf  ;;  %v4079_v16 = vsel %vm2066_vm1, %v3961_v36, -inf }
 0x431   : >> { %v4041_v13 = vmax.f32 %v4039_v39, %v4040_v37  ;;  %v4047_v9 = vrot.slane %v4046_v33, 2  ;;  %v4054_v17 = vrot.slane %v4053_v2, 2  ;;  %v4060_v3 = vmax.f32 %v4058_v41, %v4059_v27 }
 0x432   : >> { %v4066_v53 = vrot.slane %v4065_v55, 4  ;;  %v4072_v43 = vsel %vm2066_vm1, %v3962_v54, -inf  ;;  %v4080_v6 = vrot.slane %v4079_v16, 4  ;;  %v4086_v23 = vsel %vm2066_vm1, %v3963_v34, -inf }
 0x433   : >> { %v4042_v59 = vrot.slane %v4041_v13, 1  ;;  %v4048_v14 = vmax.f32 %v4046_v33, %v4047_v9  ;;  %v4055_v10 = vmax.f32 %v4053_v2, %v4054_v17  ;;  %v4061_v47 = vrot.slane %v4060_v3, 2 }
 0x434   : >> { %v4067_v30 = vmax.f32 %v4065_v55, %v4066_v53  ;;  %v4073_v20 = vrot.slane %v4072_v43, 4  ;;  %v4081_v12 = vmax.f32 %v4079_v16, %v4080_v6  ;;  %v4087_v40 = vrot.slane %v4086_v23, 4 }
 0x435   : >> { %v4049_v0 = vrot.slane %v4048_v14, 1  ;;  %v4056_v15 = vrot.slane %v4055_v10, 1  ;;  %v4062_v58 = vmax.f32 %v4060_v3, %v4061_v47  ;;  %v4043_v25 = vmax.f32 %v4041_v13, %v4042_v59 }
 0x436   : >> { %v4068_v38 = vrot.slane %v4067_v30, 2  ;;  %v4074_v19 = vmax.f32 %v4072_v43, %v4073_v20  ;;  %v4082_v22 = vrot.slane %v4081_v12, 2  ;;  %v4088_v32 = vmax.f32 %v4086_v23, %v4087_v40 }
 0x437   : >> { %v4050_v11 = vmax.f32 %v4048_v14, %v4049_v0  ;;  %v4057_v1 = vmax.f32 %v4055_v10, %v4056_v15  ;;  %v4063_v28 = vrot.slane %v4062_v58, 1  ;;  %v3865_v4 = vadd.f32 %v10529_v24, %v3852_v50 }
 0x438   : >> { %v4069_v57 = vmax.f32 %v4067_v30, %v4068_v38  ;;  %v4075_v49 = vrot.slane %v4074_v19, 2  ;;  %v4083_v18 = vmax.f32 %v4081_v12, %v4082_v22  ;;  %v4089_v8 = vrot.slane %v4088_v32, 2 }
 0x439   : >> { %v4064_v29 = vmax.f32 %v4062_v58, %v4063_v28  ;;  %v4126_v42 = vsel %vm2326_vm2, %v4050_v11, %v4043_v25  ;;  %v3875_v26 = vrot.slane %v3864_v48, 2  ;;  %v3876_v52 = vrot.slane %v3865_v4, 2 }
 0x43a   : >> { %v4127_v51 = vsel %vm2328_vm3, %v4057_v1, %v4126_v42  ;;  %v4070_v44 = vrot.slane %v4069_v57, 1  ;;  %v4076_v63 = vmax.f32 %v4074_v19, %v4075_v49  ;;  %v4084_v60 = vrot.slane %v4083_v18, 1 }
 0x43b   : >> { %v4090_v39 = vmax.f32 %v4088_v32, %v4089_v8  ;;  %v4128_v35 = vsel %vm2330_vm4, %v4064_v29, %v4127_v51  ;;  %v3860_v5 = vadd.f32 %v10529_v24, %v11034_v62  ;;  %v3861_v41 = vadd.f32 %v10529_v24, %v11037_v61 }
 0x43c   : >> { %v4071_v36 = vmax.f32 %v4069_v57, %v4070_v44  ;;  %v4077_v56 = vrot.slane %v4076_v63, 1  ;;  %v3877_v33 = vsel %vm1856_vm0, %v3875_v26, %v3876_v52  ;;  %v3879_v48 = vsel %vm1856_vm0, %v3876_v52, %v3878_v31 }
 0x43d   : >> { %v4091_v37 = vrot.slane %v4090_v39, 1  ;;  %v3888_v54 = vmax.f32 %v3860_v5, %v3877_v33  ;;  %v3889_v34 = vmax.f32 %v3861_v41, %v3879_v48  ;;  %v4085_v55 = vmax.f32 %v4083_v18, %v4084_v60 }
 0x43e   : >> { %v4078_v2 = vmax.f32 %v4076_v63, %v4077_v56  ;;  %v4129_v27 = vsel %vm2332_vm5, %v4071_v36, %v4128_v35 }
 0x43f   : >> { %v4092_v62 = vmax.f32 %v4090_v39, %v4091_v37  ;;  %v3896_v61 = vcombine.high %v3888_v54, %v3888_v54  ;;  %v3903_v13 = vrot.slane %v3888_v54, %v10312_v46  ;;  %v3913_v9 = vcombine.high %v3889_v34, %v3889_v34 }
 0x440   : >> { %v4130_v16 = vsel %vm2334_vm6, %v4078_v2, %v4129_v27  ;;  %v3920_v3 = vrot.slane %v3889_v34, %v10312_v46 }
 0x441   : >> { %v4131_v17 = vsel %vm2336_vm7, %v4085_v55, %v4130_v16  ;;  %v3910_v31 = vrot.slane %v3896_v61, %v10312_v46  ;;  %v3911_v53 = vcombine.high %v3903_v13, %v3903_v13  ;;  %v3927_v43 = vrot.slane %v3913_v9, %v10312_v46 }
 0x442   : >> { %v4132_v7 = vsel %vm2338_vm8, %v4092_v62, %v4131_v17  ;;  %v3928_v6 = vcombine.high %v3920_v3, %v3920_v3  ;;  %v3981_v23 = vsel %vm2066_vm1, %v3903_v13, -inf  ;;  %v4009_v59 = vsel %vm2066_vm1, %v3920_v3, -inf }
 0x443   : >> { %7428 = vst [vmem:[%s11072_s27 + $0x1b] sm:$0xff] %v4132_v7  ;;  %v3912_v14 = vcombine.high %v3910_v31, %v3910_v31  ;;  %v3929_v10 = vcombine.high %v3927_v43, %v3927_v43  ;;  %v3982_v47 = vrot.slane %v3981_v23, 4  ;;  %v3988_v30 = vsel %vm2066_vm1, %v3911_v53, -inf }
 0x444   : >> { %v3989_v20 = vrot.slane %v3988_v30, 4  ;;  %v3995_v12 = vsel %vm2066_vm1, %v3910_v31, -inf  ;;  %v4010_v40 = vrot.slane %v4009_v59, 4  ;;  %v4016_v0 = vsel %vm2066_vm1, %v3928_v6, -inf }
 0x445   : >> { %v3983_v15 = vmax.f32 %v3981_v23, %v3982_v47  ;;  %v3996_v58 = vrot.slane %v3995_v12, 4  ;;  %v4002_v50 = vsel %vm2066_vm1, %v3912_v14, -inf  ;;  %v4017_v38 = vrot.slane %v4016_v0, 4 }
 0x446   : >> { %v3990_v19 = vmax.f32 %v3988_v30, %v3989_v20  ;;  %v4003_v22 = vrot.slane %v4002_v50, 4  ;;  %v4011_v32 = vmax.f32 %v4009_v59, %v4010_v40  ;;  %v4023_v25 = vsel %vm2066_vm1, %v3927_v43, -inf  ;;  %v11097_v30 = vld [vmem:[%s11848_s5 + $0x6] ss:$0 sm:$0xff] (%p2375_p5)  ;;  %v11102_v20 = vld [vmem:[%s11848_s5 + $0x7] ss:$0 sm:$0xff] (%p2375_p5) }
 0x447   : >> { %v3984_v11 = vrot.slane %v3983_v15, 2  ;;  %v3997_v1 = vmax.f32 %v3995_v12, %v3996_v58  ;;  %v4018_v28 = vmax.f32 %v4016_v0, %v4017_v38  ;;  %v4024_v57 = vrot.slane %v4023_v25, 4  ;;  %v11107_v12 = vld [vmem:[%s11848_s5 + $0x8] ss:$0 sm:$0xff] (%p2375_p5) }
 0x448   : >> { %v3991_v49 = vrot.slane %v3990_v19, 2  ;;  %v4004_v18 = vmax.f32 %v4002_v50, %v4003_v22  ;;  %v4012_v8 = vrot.slane %v4011_v32, 2  ;;  %v4030_v29 = vsel %vm2066_vm1, %v3929_v10, -inf }
 0x449   : >> { %v3985_v42 = vmax.f32 %v3983_v15, %v3984_v11  ;;  %v3998_v4 = vrot.slane %v3997_v1, 2  ;;  %v4019_v51 = vrot.slane %v4018_v28, 2  ;;  %v4025_v44 = vmax.f32 %v4023_v25, %v4024_v57 }
 0x44a   : >> { %v3992_v63 = vmax.f32 %v3990_v19, %v3991_v49  ;;  %v4005_v26 = vrot.slane %v4004_v18, 2  ;;  %v4013_v60 = vmax.f32 %v4011_v32, %v4012_v8  ;;  %v4031_v39 = vrot.slane %v4030_v29, 4 }
 0x44b   : >> { %v3986_v35 = vrot.slane %v3985_v42, 1  ;;  %v3999_v52 = vmax.f32 %v3997_v1, %v3998_v4  ;;  %v4020_v5 = vmax.f32 %v4018_v28, %v4019_v51  ;;  %v4026_v41 = vrot.slane %v4025_v44, 2 }
 0x44c   : >> { %v3993_v36 = vrot.slane %v3992_v63, 1  ;;  %v4006_v56 = vmax.f32 %v4004_v18, %v4005_v26  ;;  %v4032_v37 = vmax.f32 %v4030_v29, %v4031_v39  ;;  %v4014_v2 = vrot.slane %v4013_v60, 1 }
 0x44d   : >> { %v3987_v33 = vmax.f32 %v3985_v42, %v3986_v35  ;;  %v4000_v48 = vrot.slane %v3999_v52, 1  ;;  %v4027_v27 = vmax.f32 %v4025_v44, %v4026_v41  ;;  %v4021_v55 = vrot.slane %v4020_v5, 1 }
 0x44e   : >> { %v3994_v54 = vmax.f32 %v3992_v63, %v3993_v36  ;;  %v4007_v34 = vrot.slane %v4006_v56, 1  ;;  %v4033_v62 = vrot.slane %v4032_v37, 2  ;;  %v4015_v3 = vmax.f32 %v4013_v60, %v4014_v2 }
 0x44f   : >> { %v4001_v16 = vmax.f32 %v3999_v52, %v4000_v48  ;;  %v4028_v61 = vrot.slane %v4027_v27, 1  ;;  %v4022_v31 = vmax.f32 %v4020_v5, %v4021_v55 }
 0x450   : >> { %v4008_v13 = vmax.f32 %v4006_v56, %v4007_v34  ;;  %v4034_v9 = vmax.f32 %v4032_v37, %v4033_v62  ;;  %v4113_v17 = vsel %vm2326_vm2, %v3994_v54, %v3987_v33 }
 0x451   : >> { %v4115_v7 = vsel %vm2328_vm3, %v4001_v16, %v4113_v17  ;;  %v4029_v6 = vmax.f32 %v4027_v27, %v4028_v61  ;;  %2377 = sbr.rel (!%p2375_p5) target bundleno = 639 (0x27f), region = 185 }
 0x452   : >> { %v4035_v53 = vrot.slane %v4034_v9, 1  ;;  %v4117_v43 = vsel %vm2330_vm4, %v4008_v13, %v4115_v7 }
 0x453   : >> { %v4119_v23 = vsel %vm2332_vm5, %v4015_v3, %v4117_v43 }
 0x454   : >> { %v4036_v59 = vmax.f32 %v4034_v9, %v4035_v53  ;;  %v4121_v14 = vsel %vm2334_vm6, %v4022_v31, %v4119_v23 }
 0x455   : >> { %v4123_v10 = vsel %vm2336_vm7, %v4029_v6, %v4121_v14 }
 0x456   : >> { %v4125_v47 = vsel %vm2338_vm8, %v4036_v59, %v4123_v10 }
 0x457   : >> { %7427 = vst [vmem:[%s11072_s27 + $0x13] sm:$0xff] %v4125_v47 }
 0x458 LB: >> { %v9144_v45 = vld [vmem:[%s11846_s3 + $0x40] sm:$0xff]   ;;  %v9333_v21 = vmov 0.0   ;;  %v9146_v40 = vld [vmem:[%s11846_s3 + $0x48] sm:$0xff]   ;;  %vm9334_vm10 = vmmov 0   ;;  %v9148_v15 = vld [vmem:[%s11846_s3 + $0x50] sm:$0xff]   ;;  %s4147_s15 = smul.u32 36, %s9322_s12  ;;  %s9322_s12 = sphi %s11109_s12, %s4146_s12  }
 0x459   : >> { %8558 = vmatprep.subr.bf16.mxu0 %v9333_v21  ;;  %8586 = vmatprep.subr.bf16.mxu1 %v9333_v21  ;;  %v9145_v24 = vld [vmem:[%s11846_s3] sm:$0xff]   ;;  %v9147_v0 = vld [vmem:[%s11846_s3 + $0x8] sm:$0xff]   ;;  %v9149_v58 = vld [vmem:[%s11846_s3 + $0x10] sm:$0xff]  }
 0x45a   : >> { %8559 = vmatpush3.bf16.msra.mxu0 %v9144_v45  ;;  %8574 = vmatprep.mubr.msk.bf16.mxu0 %vm9334_vm10, %v9333_v21  ;;  %v9150_v50 = vld [vmem:[%s11846_s3 + $0x58] sm:$0xff]   ;;  %v9152_v19 = vld [vmem:[%s11846_s3 + $0x60] sm:$0xff]   ;;  %v9154_v32 = vld [vmem:[%s11846_s3 + $0x68] sm:$0xff]   ;;  %s11181_s26 = scalar_lea.vmem [#allocation3], %s4147_s15 }
 0x45b   : >> { %8587 = vmatpush3.bf16.msra.mxu1 %v9145_v24  ;;  %8560 = vmatprep.subr.bf16.mxu0 %v9333_v21  ;;  %v9151_v38 = vld [vmem:[%s11846_s3 + $0x18] sm:$0xff]   ;;  %v9153_v22 = vld [vmem:[%s11846_s3 + $0x20] sm:$0xff]   ;;  %v9155_v25 = vld [vmem:[%s11846_s3 + $0x28] sm:$0xff]  }
 0x45c   : >> { %8588 = vmatprep.subr.bf16.mxu1 %v9333_v21  ;;  %8602 = vmatprep.mubr.msk.bf16.mxu1 %vm9334_vm10, %v9333_v21  ;;  %v9156_v11 = vld [vmem:[%s11846_s3 + $0x70] sm:$0xff]   ;;  %v9158_v28 = vld [vmem:[%s11846_s3 + $0x78] sm:$0xff]   ;;  %v9160_v51 = vld [vmem:[%s11846_s3 + $0x80] sm:$0xff]  }
 0x45d   : >> { %v9157_v1 = vld [vmem:[%s11846_s3 + $0x30] sm:$0xff]   ;;  %v9159_v57 = vld [vmem:[%s11846_s3 + $0x38] sm:$0xff]   ;;  %v9161_v44 = vld [vmem:[%s11846_s3 + $0xc0] sm:$0xff]  }
 0x45e   : >> { %8561 = vmatpush3.bf16.msra.mxu0 %v9146_v40  ;;  %v7429_v49 = vld [vmem:[%s11181_s26 + $0x1] sm:$0xff]  ;;  %v7430_v18 = vld [vmem:[%s11181_s26 + $0x9] sm:$0xff]  ;;  %v7431_v26 = vld [vmem:[%s11181_s26 + $0x11] sm:$0xff] }
 0x45f   : >> { %8589 = vmatpush3.bf16.msra.mxu1 %v9147_v0  ;;  %8562 = vmatprep.subr.bf16.mxu0 %v9333_v21  ;;  %v4149_v8 = vld [vmem:[%s11181_s26] sm:$0xff]  ;;  %v4150_v29 = vld [vmem:[%s11181_s26 + $0x8] sm:$0xff]  ;;  %v4197_v42 = vpack.c.bf16 %v7430_v18, %v7429_v49  ;;  %v4151_v35 = vld [vmem:[%s11181_s26 + $0x10] sm:$0xff] }
 0x460   : >> { %8590 = vmatprep.subr.bf16.mxu1 %v9333_v21  ;;  %v4170_v4 = vpack.c.bf16 %v4150_v29, %v4149_v8  ;;  %v9162_v63 = vld [vmem:[%s11846_s3 + $0x88] sm:$0xff]   ;;  %v7432_v60 = vld [vmem:[%s11181_s26 + $0x19] sm:$0xff]  ;;  %v9164_v41 = vld [vmem:[%s11846_s3 + $0x90] sm:$0xff]  }
 0x461   : >> { %v9163_v39 = vld [vmem:[%s11846_s3 + $0xc8] sm:$0xff]   ;;  %v4152_v52 = vld [vmem:[%s11181_s26 + $0x18] sm:$0xff]  ;;  %v4198_v5 = vpack.c.bf16 %v7432_v60, %v7431_v26  ;;  %v9165_v56 = vld [vmem:[%s11846_s3 + $0xd0] sm:$0xff]  }
 0x462   : >> { %8563 = vmatpush3.bf16.msra.mxu0 %v9148_v15  ;;  %v4171_v36 = vpack.c.bf16 %v4152_v52, %v4151_v35  ;;  %v9166_v37 = vld [vmem:[%s11846_s3 + $0x98] sm:$0xff]   ;;  %v7433_v48 = vld [vmem:[%s11181_s26 + $0x21] sm:$0xf]  ;;  %v9170_v62 = vld [vmem:[%s11846_s3 + $0xa8] sm:$0xff]  }
 0x463   : >> { %8591 = vmatpush3.bf16.msra.mxu1 %v9149_v58  ;;  %8564 = vmatprep.subr.bf16.mxu0 %v9333_v21  ;;  %v9167_v33 = vld [vmem:[%s11846_s3 + $0xd8] sm:$0xff]   ;;  %v4153_v2 = vld [vmem:[%s11181_s26 + $0x20] sm:$0xf]  ;;  %v4199_v27 = vpack.c.bf16 %v7433_v48, %v7433_v48  ;;  %v9171_v16 = vld [vmem:[%s11846_s3 + $0xe8] sm:$0xff]  }
 0x464   : >> { %8592 = vmatprep.subr.bf16.mxu1 %v9333_v21  ;;  %v9168_v54 = vld [vmem:[%s11846_s3 + $0xa0] sm:$0xff]   ;;  %v4172_v34 = vpack.c.bf16 %v4153_v2, %v4153_v2  ;;  %v9172_v61 = vld [vmem:[%s11846_s3 + $0xb0] sm:$0xff]   ;;  %v9174_v9 = vld [vmem:[%s11846_s3 + $0xb8] sm:$0xff]  }
 0x465   : >> { %v9169_v55 = vld [vmem:[%s11846_s3 + $0xe0] sm:$0xff]   ;;  %v9173_v13 = vld [vmem:[%s11846_s3 + $0xf0] sm:$0xff]   ;;  %v9175_v7 = vld [vmem:[%s11846_s3 + $0xf8] sm:$0xff]  }
 0x466   : >> { %8565 = vmatpush3.bf16.msra.mxu0 %v9150_v50  ;;  %v7466_v17 = vld [vmem:[%s11181_s26 + $0x2] sm:$0xff]  ;;  %v7467_v3 = vld [vmem:[%s11181_s26 + $0xa] sm:$0xff]  ;;  %v7497_v31 = vld [vmem:[%s11181_s26 + $0x12] sm:$0xff] }
 0x467   : >> { %8593 = vmatpush3.bf16.msra.mxu1 %v9151_v38  ;;  %8566 = vmatprep.subr.bf16.mxu0 %v9333_v21  ;;  %v7498_v53 = vld [vmem:[%s11181_s26 + $0x1a] sm:$0xff]  ;;  %v4432_v43 = vpack.c.bf16 %v7467_v3, %v7466_v17  ;;  %v9178_v14 = vld [vmem:[%s11846_s3 + $0x108] sm:$0xff]   ;;  %v9180_v24 = vld [vmem:[%s11846_s3 + $0x110] sm:$0xff]  }
 0x468   : >> { %8594 = vmatprep.subr.bf16.mxu1 %v9333_v21  ;;  %v4570_v6 = vpack.c.bf16 %v7498_v53, %v7497_v31  ;;  %v9176_v23 = vld [vmem:[%s11846_s3 + $0x100] sm:$0xff]   ;;  %v9179_v10 = vld [vmem:[%s11846_s3 + $0x148] sm:$0xff]   ;;  %v9181_v0 = vld [vmem:[%s11846_s3 + $0x150] sm:$0xff]  }
 0x469   : >> { %v9177_v59 = vld [vmem:[%s11846_s3 + $0x140] sm:$0xff]   ;;  %v7500_v45 = vld [vmem:[%s11181_s26 + $0x2a] sm:$0xff]  ;;  %v9182_v15 = vld [vmem:[%s11846_s3 + $0x118] sm:$0xff]  }
 0x46a   : >> { %8567 = vmatpush3.bf16.msra.mxu0 %v9152_v19  ;;  %v7499_v47 = vld [vmem:[%s11181_s26 + $0x22] sm:$0xff]  ;;  %v9183_v58 = vld [vmem:[%s11846_s3 + $0x158] sm:$0xff]   ;;  %v7501_v38 = vld [vmem:[%s11181_s26 + $0x32] sm:$0xf] }
 0x46b   : >> { %8595 = vmatpush3.bf16.msra.mxu1 %v9153_v22  ;;  %8568 = vmatprep.subr.bf16.mxu0 %v9333_v21  ;;  %v4571_v40 = vpack.c.bf16 %v7500_v45, %v7499_v47  ;;  %v7470_v50 = vld [vmem:[%s11181_s26 + $0x22] sm:$0xf]  ;;  %v9190_v49 = vld [vmem:[%s11846_s3 + $0x138] sm:$0xff]   ;;  %v9194_v60 = vld [vmem:[%s11846_s3 + $0x188] sm:$0xff]  }
 0x46c   : >> { %8596 = vmatprep.subr.bf16.mxu1 %v9333_v21  ;;  %v4434_v19 = vpack.c.bf16 %v7470_v50, %v7470_v50  ;;  %v9184_v22 = vld [vmem:[%s11846_s3 + $0x120] sm:$0xff]   ;;  %v7528_v18 = vld [vmem:[%s11181_s26 + $0x13] sm:$0xff]  ;;  %v7531_v35 = vld [vmem:[%s11181_s26 + $0x2b] sm:$0xff] }
 0x46d   : >> { %v7529_v8 = vld [vmem:[%s11181_s26 + $0x1b] sm:$0xff]  ;;  %v9195_v52 = vld [vmem:[%s11846_s3 + $0x1c8] sm:$0xff]   ;;  %v7532_v2 = vld [vmem:[%s11181_s26 + $0x33] sm:$0xf] }
 0x46e   : >> { %8569 = vmatpush3.bf16.msra.mxu0 %v9154_v32  ;;  %v4572_v32 = vpack.c.bf16 %v7501_v38, %v7501_v38  ;;  %v9191_v29 = vld [vmem:[%s11846_s3 + $0x178] sm:$0xff]   ;;  %v9193_v26 = vld [vmem:[%s11846_s3 + $0x1c0] sm:$0xff]   ;;  %v9205_v17 = vld [vmem:[%s11846_s3 + $0x1f0] sm:$0xff]  }
 0x46f   : >> { %8597 = vmatpush3.bf16.msra.mxu1 %v9155_v25  ;;  %8570 = vmatprep.subr.bf16.mxu0 %v9333_v21  ;;  %v9185_v25 = vld [vmem:[%s11846_s3 + $0x160] sm:$0xff]   ;;  %v9198_v48 = vld [vmem:[%s11846_s3 + $0x198] sm:$0xff]   ;;  %v7622_v53 = vld [vmem:[%s11181_s26 + $0x2d] sm:$0xff] }
 0x470   : >> { %8598 = vmatprep.subr.bf16.mxu1 %v9333_v21  ;;  %v9206_v3 = vld [vmem:[%s11846_s3 + $0x1b8] sm:$0xff]   ;;  %v7621_v31 = vld [vmem:[%s11181_s26 + $0x25] sm:$0xff] }
 0x471   : >> { %v7624_v47 = vld [vmem:[%s11181_s26 + $0x3d] sm:$0xff] }
 0x472   : >> { %8571 = vmatpush3.bf16.msra.mxu0 %v9156_v11  ;;  %v9186_v11 = vld [vmem:[%s11846_s3 + $0x128] sm:$0xff]   ;;  %v9212_v38 = vld [vmem:[%s11846_s3 + $0x220] sm:$0xff]  }
 0x473   : >> { %8599 = vmatpush3.bf16.msra.mxu1 %v9157_v1  ;;  %8572 = vmatprep.subr.bf16.mxu0 %v9333_v21  ;;  %v9187_v1 = vld [vmem:[%s11846_s3 + $0x168] sm:$0xff]  }
 0x474   : >> { %8600 = vmatprep.subr.bf16.mxu1 %v9333_v21 }
 0x476   : >> { %8573 = vmatpush3.bf16.msra.mxu0 %v9158_v28  ;;  %v9188_v28 = vld [vmem:[%s11846_s3 + $0x130] sm:$0xff]  }
 0x477   : >> { %8601 = vmatpush3.bf16.msra.mxu1 %v9159_v57  ;;  %8614 = vmatprep.subr.bf16.mxu0 %v9333_v21  ;;  %v9189_v57 = vld [vmem:[%s11846_s3 + $0x170] sm:$0xff]  }
 0x478   : >> { %8642 = vmatprep.subr.bf16.mxu1 %v9333_v21 }
 0x479   : >> { %8575 = vmatmul.mubr.bf16.vlgmr.msra.gmra.mrb[0].mxu0 %v4197_v42  ;;  %v7559_v42 = vld [vmem:[%s11181_s26 + $0x14] sm:$0xff] }
 0x47a   : >> { %8603 = vmatmul.mubr.bf16.vlgmr.msra.gmra.mrb[0].mxu1 %v4170_v4  ;;  %8615 = vmatpush3.bf16.msra.mxu0 %v9160_v51  ;;  %v7560_v4 = vld [vmem:[%s11181_s26 + $0x1c] sm:$0xff]  ;;  %v4706_v51 = vpack.c.bf16 %v7529_v8, %v7528_v18  ;;  %v7656_v8 = vld [vmem:[%s11181_s26 + $0x46] sm:$0xf] }
 0x47b   : >> { %8643 = vmatpush3.bf16.msra.mxu1 %v9161_v44  ;;  %8616 = vmatprep.subr.bf16.mxu0 %v9333_v21  ;;  %v4842_v44 = vpack.c.bf16 %v7560_v4, %v7559_v42 }
 0x47c   : >> { %8644 = vmatprep.subr.bf16.mxu1 %v9333_v21  ;;  %8606 = vmatprep.mubr.msk.bf16.mxu1 %vm9334_vm10, %v9333_v21 }
 0x47d   : >> { %8578 = vmatprep.mubr.msk.bf16.mxu0 %vm9334_vm10, %v9333_v21 }
 0x47e   : >> { %8617 = vmatpush3.bf16.msra.mxu0 %v9162_v63  ;;  %v9192_v63 = vld [vmem:[%s11846_s3 + $0x180] sm:$0xff]  }
 0x47f   : >> { %8645 = vmatpush3.bf16.msra.mxu1 %v9163_v39  ;;  %8618 = vmatprep.subr.bf16.mxu0 %v9333_v21  ;;  %v7530_v39 = vld [vmem:[%s11181_s26 + $0x23] sm:$0xff] }
 0x480   : >> { %8646 = vmatprep.subr.bf16.mxu1 %v9333_v21 }
 0x481   : >> { %8579 = vmatmul.mubr.bf16.gmra.mrb[4].mxu0 %v4198_v5  ;;  %v7561_v5 = vld [vmem:[%s11181_s26 + $0x24] sm:$0xff] }
 0x482   : >> { %8619 = vmatpush3.bf16.msra.mxu0 %v9164_v41  ;;  %8607 = vmatmul.mubr.bf16.gmra.mrb[4].mxu1 %v4171_v36  ;;  %v7562_v41 = vld [vmem:[%s11181_s26 + $0x2c] sm:$0xff]  ;;  %v4707_v36 = vpack.c.bf16 %v7531_v35, %v7530_v39 }
 0x483   : >> { %8647 = vmatpush3.bf16.msra.mxu1 %v9165_v56  ;;  %8620 = vmatprep.subr.bf16.mxu0 %v9333_v21  ;;  %v9196_v56 = vld [vmem:[%s11846_s3 + $0x190] sm:$0xff]  }
 0x484   : >> { %8648 = vmatprep.subr.bf16.mxu1 %v9333_v21  ;;  %8610 = vmatprep.mubr.msk.bf16.mxu1 %vm9334_vm10, %v9333_v21 }
 0x485   : >> { %8582 = vmatprep.mubr.msk.bf16.mxu0 %vm9334_vm10, %v9333_v21 }
 0x486   : >> { %8621 = vmatpush3.bf16.msra.mxu0 %v9166_v37  ;;  %v4843_v37 = vpack.c.bf16 %v7562_v41, %v7561_v5 }
 0x487   : >> { %8649 = vmatpush3.bf16.msra.mxu1 %v9167_v33  ;;  %8622 = vmatprep.subr.bf16.mxu0 %v9333_v21  ;;  %v9197_v33 = vld [vmem:[%s11846_s3 + $0x1d0] sm:$0xff]  }
 0x488   : >> { %8650 = vmatprep.subr.bf16.mxu1 %v9333_v21 }
 0x489   : >> { %8583 = vmatmul.mubr.bf16.gmra.mrb[8].mxu0 %v4199_v27  ;;  %v9199_v27 = vld [vmem:[%s11846_s3 + $0x1d8] sm:$0xff]  }
 0x48a   : >> { %8623 = vmatpush3.bf16.msra.mxu0 %v9168_v54  ;;  %8611 = vmatmul.mubr.bf16.gmra.mrb[8].mxu1 %v4172_v34  ;;  %v7563_v54 = vld [vmem:[%s11181_s26 + $0x34] sm:$0xf]  ;;  %v4708_v34 = vpack.c.bf16 %v7532_v2, %v7532_v2 }
 0x48b   : >> { %8651 = vmatpush3.bf16.msra.mxu1 %v9169_v55  ;;  %8624 = vmatprep.subr.bf16.mxu0 %v9333_v21  ;;  %v9200_v55 = vld [vmem:[%s11846_s3 + $0x1a0] sm:$0xff]  }
 0x48c   : >> { %8652 = vmatprep.subr.bf16.mxu1 %v9333_v21  ;;  %8630 = vmatprep.mubr.msk.bf16.mxu0 %vm9334_vm10, %v9333_v21 }
 0x48d   : >> { %8658 = vmatprep.mubr.msk.bf16.mxu1 %vm9334_vm10, %v9333_v21 }
 0x48e   : >> { %8625 = vmatpush3.bf16.msra.mxu0 %v9170_v62  ;;  %v4844_v62 = vpack.c.bf16 %v7563_v54, %v7563_v54 }
 0x48f   : >> { %8653 = vmatpush3.bf16.msra.mxu1 %v9171_v16  ;;  %8626 = vmatprep.subr.bf16.mxu0 %v9333_v21  ;;  %v9201_v16 = vld [vmem:[%s11846_s3 + $0x1e0] sm:$0xff]  }
 0x490   : >> { %8654 = vmatprep.subr.bf16.mxu1 %v9333_v21 }
 0x492   : >> { %8627 = vmatpush3.bf16.msra.mxu0 %v9172_v61  ;;  %v9202_v61 = vld [vmem:[%s11846_s3 + $0x1a8] sm:$0xff]  }
 0x493   : >> { %8655 = vmatpush3.bf16.msra.mxu1 %v9173_v13  ;;  %8628 = vmatprep.subr.bf16.mxu0 %v9333_v21  ;;  %v9203_v13 = vld [vmem:[%s11846_s3 + $0x1e8] sm:$0xff]  }
 0x494   : >> { %8656 = vmatprep.subr.bf16.mxu1 %v9333_v21 }
 0x496   : >> { %8629 = vmatpush3.bf16.msra.mxu0 %v9174_v9  ;;  %v9204_v9 = vld [vmem:[%s11846_s3 + $0x1b0] sm:$0xff]  }
 0x497   : >> { %8657 = vmatpush3.bf16.msra.mxu1 %v9175_v7  ;;  %8670 = vmatprep.subr.bf16.mxu0 %v9333_v21  ;;  %v9207_v7 = vld [vmem:[%s11846_s3 + $0x1f8] sm:$0xff]  }
 0x498   : >> { %8698 = vmatprep.subr.bf16.mxu1 %v9333_v21 }
 0x499   : >> { %8631 = vmatmul.mubr.bf16.vlgmr.msra.gmra.mrb[12].mxu0 %v4432_v43  ;;  %v5115_v43 = vpack.c.bf16 %v7622_v53, %v7621_v31 }
 0x49a   : >> { %8659 = vmatmul.mubr.bf16.vlgmr.msra.gmra.mrb[12].mxu1 %v4570_v6  ;;  %8671 = vmatpush3.bf16.msra.mxu0 %v9176_v23  ;;  %v9209_v23 = vld [vmem:[%s11846_s3 + $0x208] sm:$0xff]  }
 0x49b   : >> { %8699 = vmatpush3.bf16.msra.mxu1 %v9177_v59  ;;  %8672 = vmatprep.subr.bf16.mxu0 %v9333_v21  ;;  %v7592_v59 = vld [vmem:[%s11181_s26 + $0x34] sm:$0xff] }
 0x49c   : >> { %8700 = vmatprep.subr.bf16.mxu1 %v9333_v21  ;;  %8634 = vmatprep.mubr.msk.bf16.mxu0 %vm9334_vm10, %v9333_v21 }
 0x49d   : >> { %8662 = vmatprep.mubr.msk.bf16.mxu1 %vm9334_vm10, %v9333_v21 }
 0x49e   : >> { %8673 = vmatpush3.bf16.msra.mxu0 %v9178_v14  ;;  %v7593_v14 = vld [vmem:[%s11181_s26 + $0x3c] sm:$0xff] }
 0x49f   : >> { %8701 = vmatpush3.bf16.msra.mxu1 %v9179_v10  ;;  %8674 = vmatprep.subr.bf16.mxu0 %v9333_v21  ;;  %v7623_v10 = vld [vmem:[%s11181_s26 + $0x35] sm:$0xff]  ;;  %v4980_v45 = vpack.c.bf16 %v7593_v14, %v7592_v59 }
 0x4a0   : >> { %8702 = vmatprep.subr.bf16.mxu1 %v9333_v21 }
 0x4a1   : >> { %8635 = vmatmul.mubr.bf16.gmra.mrb[16].mxu0 %v4570_v6  ;;  %v9208_v6 = vld [vmem:[%s11846_s3 + $0x200] sm:$0xff]  }
 0x4a2   : >> { %8675 = vmatpush3.bf16.msra.mxu0 %v9180_v24  ;;  %8663 = vmatmul.mubr.bf16.gmra.mrb[16].mxu1 %v4571_v40  ;;  %v9210_v24 = vld [vmem:[%s11846_s3 + $0x210] sm:$0xff]   ;;  %v5116_v40 = vpack.c.bf16 %v7624_v47, %v7623_v10 }
 0x4a3   : >> { %8703 = vmatpush3.bf16.msra.mxu1 %v9181_v0  ;;  %8676 = vmatprep.subr.bf16.mxu0 %v9333_v21  ;;  %v9211_v0 = vld [vmem:[%s11846_s3 + $0x218] sm:$0xff]  }
 0x4a4   : >> { %8704 = vmatprep.subr.bf16.mxu1 %v9333_v21  ;;  %8638 = vmatprep.mubr.msk.bf16.mxu0 %vm9334_vm10, %v9333_v21 }
 0x4a5   : >> { %8666 = vmatprep.mubr.msk.bf16.mxu1 %vm9334_vm10, %v9333_v21 }
 0x4a6   : >> { %8677 = vmatpush3.bf16.msra.mxu0 %v9182_v15  ;;  %v7594_v15 = vld [vmem:[%s11181_s26 + $0x44] sm:$0xf] }
 0x4a7   : >> { %8705 = vmatpush3.bf16.msra.mxu1 %v9183_v58  ;;  %8678 = vmatprep.subr.bf16.mxu0 %v9333_v21  ;;  %v7625_v58 = vld [vmem:[%s11181_s26 + $0x45] sm:$0xf]  ;;  %v4981_v50 = vpack.c.bf16 %v7594_v15, %v7594_v15 }
 0x4a8   : >> { %8706 = vmatprep.subr.bf16.mxu1 %v9333_v21 }
 0x4a9   : >> { %8639 = vmatmul.mubr.bf16.gmra.mrb[20].mxu0 %v4434_v19  ;;  %v5117_v19 = vpack.c.bf16 %v7625_v58, %v7625_v58 }
 0x4aa   : >> { %8679 = vmatpush3.bf16.msra.mxu0 %v9184_v22  ;;  %8667 = vmatmul.mubr.bf16.gmra.mrb[20].mxu1 %v4572_v32  ;;  %v9213_v22 = vld [vmem:[%s11846_s3 + $0x228] sm:$0xff]   ;;  %v9214_v32 = vld [vmem:[%s11846_s3 + $0x230] sm:$0xff]  }
 0x4ab   : >> { %8707 = vmatpush3.bf16.msra.mxu1 %v9185_v25  ;;  %8680 = vmatprep.subr.bf16.mxu0 %v9333_v21  ;;  %v9215_v25 = vld [vmem:[%s11846_s3 + $0x238] sm:$0xff]  }
 0x4ac   : >> { %8708 = vmatprep.subr.bf16.mxu1 %v9333_v21  ;;  %8686 = vmatprep.mubr.msk.bf16.mxu0 %vm9334_vm10, %v9333_v21 }
 0x4ad   : >> { %8714 = vmatprep.mubr.msk.bf16.mxu1 %vm9334_vm10, %v9333_v21 }
 0x4ae   : >> { %8681 = vmatpush3.bf16.msra.mxu0 %v9186_v11  ;;  %v7652_v11 = vld [vmem:[%s11181_s26 + $0x26] sm:$0xff] }
 0x4af   : >> { %8709 = vmatpush3.bf16.msra.mxu1 %v9187_v1  ;;  %8682 = vmatprep.subr.bf16.mxu0 %v9333_v21  ;;  %v7653_v1 = vld [vmem:[%s11181_s26 + $0x2e] sm:$0xff] }
 0x4b0   : >> { %8710 = vmatprep.subr.bf16.mxu1 %v9333_v21 }
 0x4b2   : >> { %8683 = vmatpush3.bf16.msra.mxu0 %v9188_v28  ;;  %v7654_v28 = vld [vmem:[%s11181_s26 + $0x36] sm:$0xff] }
 0x4b3   : >> { %8711 = vmatpush3.bf16.msra.mxu1 %v9189_v57  ;;  %8684 = vmatprep.subr.bf16.mxu0 %v9333_v21  ;;  %v7655_v57 = vld [vmem:[%s11181_s26 + $0x3e] sm:$0xff]  ;;  %s6879_s26 = smul.u32 10, %s9322_s12  ;;  %s4146_s12 = sadd.s32 1, %s9322_s12  }
 0x4b4   : >> { %8712 = vmatprep.subr.bf16.mxu1 %v9333_v21  ;;  %v5252_v18 = vpack.c.bf16 %v7655_v57, %v7654_v28  ;;  %p4143_p6 = scmp.ge.s32.totalorder %s4146_s12, 8  }
 0x4b5   : >> { %s6880_s18 = scalar_lea.vmem [#allocation4], %s6879_s26  ;;  %s11563_s25 = smov (%p4143_p6), 0  }
 0x4b6   : >> { %8685 = vmatpush3.bf16.msra.mxu0 %v9190_v49  ;;  %v5251_v49 = vpack.c.bf16 %v7653_v1, %v7652_v11 }
 0x4b7   : >> { %8713 = vmatpush3.bf16.msra.mxu1 %v9191_v29  ;;  %8726 = vmatprep.subr.bf16.mxu0 %v9333_v21  ;;  %v5253_v29 = vpack.c.bf16 %v7656_v8, %v7656_v8 }
 0x4b8   : >> { %8754 = vmatprep.subr.bf16.mxu1 %v9333_v21 }
 0x4b9   : >> { %8687 = vmatmul.mubr.bf16.vlgmr.msra.gmra.mrb[24].mxu0 %v4706_v51 }
 0x4ba   : >> { %8715 = vmatmul.mubr.bf16.vlgmr.msra.gmra.mrb[24].mxu1 %v4842_v44  ;;  %8727 = vmatpush3.bf16.msra.mxu0 %v9192_v63 }
 0x4bb   : >> { %8755 = vmatpush3.bf16.msra.mxu1 %v9193_v26  ;;  %8728 = vmatprep.subr.bf16.mxu0 %v9333_v21 }
 0x4bc   : >> { %8756 = vmatprep.subr.bf16.mxu1 %v9333_v21  ;;  %8690 = vmatprep.mubr.msk.bf16.mxu0 %vm9334_vm10, %v9333_v21 }
 0x4bd   : >> { %8718 = vmatprep.mubr.msk.bf16.mxu1 %vm9334_vm10, %v9333_v21 }
 0x4be   : >> { %8729 = vmatpush3.bf16.msra.mxu0 %v9194_v60 }
 0x4bf   : >> { %8757 = vmatpush3.bf16.msra.mxu1 %v9195_v52  ;;  %8730 = vmatprep.subr.bf16.mxu0 %v9333_v21 }
 0x4c0   : >> { %8758 = vmatprep.subr.bf16.mxu1 %v9333_v21 }
 0x4c1   : >> { %8691 = vmatmul.mubr.bf16.gmra.mrb[28].mxu0 %v4707_v36 }
 0x4c2   : >> { %8731 = vmatpush3.bf16.msra.mxu0 %v9196_v56  ;;  %8719 = vmatmul.mubr.bf16.gmra.mrb[28].mxu1 %v4843_v37 }
 0x4c3   : >> { %8759 = vmatpush3.bf16.msra.mxu1 %v9197_v33  ;;  %8732 = vmatprep.subr.bf16.mxu0 %v9333_v21 }
 0x4c4   : >> { %8760 = vmatprep.subr.bf16.mxu1 %v9333_v21  ;;  %8694 = vmatprep.mubr.msk.bf16.mxu0 %vm9334_vm10, %v9333_v21 }
 0x4c5   : >> { %8722 = vmatprep.mubr.msk.bf16.mxu1 %vm9334_vm10, %v9333_v21 }
 0x4c6   : >> { %8733 = vmatpush3.bf16.msra.mxu0 %v9198_v48 }
 0x4c7   : >> { %8761 = vmatpush3.bf16.msra.mxu1 %v9199_v27  ;;  %8734 = vmatprep.subr.bf16.mxu0 %v9333_v21 }
 0x4c8   : >> { %8762 = vmatprep.subr.bf16.mxu1 %v9333_v21 }
 0x4c9   : >> { %8695 = vmatmul.mubr.bf16.gmra.mrb[32].mxu0 %v4708_v34 }
 0x4ca   : >> { %8735 = vmatpush3.bf16.msra.mxu0 %v9200_v55  ;;  %8723 = vmatmul.mubr.bf16.gmra.mrb[32].mxu1 %v4844_v62 }
 0x4cb   : >> { %8763 = vmatpush3.bf16.msra.mxu1 %v9201_v16  ;;  %8736 = vmatprep.subr.bf16.mxu0 %v9333_v21 }
 0x4cc   : >> { %8764 = vmatprep.subr.bf16.mxu1 %v9333_v21  ;;  %8742 = vmatprep.mubr.msk.bf16.mxu0 %vm9334_vm10, %v9333_v21 }
 0x4cd   : >> { %8770 = vmatprep.mubr.msk.bf16.mxu1 %vm9334_vm10, %v9333_v21 }
 0x4ce   : >> { %8737 = vmatpush3.bf16.msra.mxu0 %v9202_v61 }
 0x4cf   : >> { %8765 = vmatpush3.bf16.msra.mxu1 %v9203_v13  ;;  %8738 = vmatprep.subr.bf16.mxu0 %v9333_v21 }
 0x4d0   : >> { %8766 = vmatprep.subr.bf16.mxu1 %v9333_v21 }
 0x4d2   : >> { %8739 = vmatpush3.bf16.msra.mxu0 %v9204_v9 }
 0x4d3   : >> { %8767 = vmatpush3.bf16.msra.mxu1 %v9205_v17  ;;  %8740 = vmatprep.subr.bf16.mxu0 %v9333_v21 }
 0x4d4   : >> { %8768 = vmatprep.subr.bf16.mxu1 %v9333_v21 }
 0x4d6   : >> { %8741 = vmatpush3.bf16.msra.mxu0 %v9206_v3 }
 0x4d7   : >> { %8769 = vmatpush3.bf16.msra.mxu1 %v9207_v7  ;;  %8782 = vmatprep.subr.bf16.mxu0 %v9333_v21 }
 0x4d8   : >> { %9006 = vmatprep.subr.bf16.mxu1 %v9333_v21 }
 0x4d9   : >> { %8743 = vmatmul.mubr.bf16.vlgmr.msra.gmra.mrb[36].mxu0 %v4843_v37 }
 0x4da   : >> { %8771 = vmatmul.mubr.bf16.vlgmr.msra.gmra.mrb[36].mxu1 %v5115_v43  ;;  %8783 = vmatpush3.bf16.msra.mxu0 %v9208_v6 }
 0x4db   : >> { %9014 = vmatpush3.bf16.msra.mxu1 %v9208_v6  ;;  %8784 = vmatprep.subr.bf16.mxu0 %v9333_v21 }
 0x4dc   : >> { %9007 = vmatprep.subr.bf16.mxu1 %v9333_v21  ;;  %8746 = vmatprep.mubr.msk.bf16.mxu0 %vm9334_vm10, %v9333_v21 }
 0x4dd   : >> { %8774 = vmatprep.mubr.msk.bf16.mxu1 %vm9334_vm10, %v9333_v21 }
 0x4de   : >> { %8785 = vmatpush3.bf16.msra.mxu0 %v9209_v23 }
 0x4df   : >> { %9015 = vmatpush3.bf16.msra.mxu1 %v9209_v23  ;;  %8786 = vmatprep.subr.bf16.mxu0 %v9333_v21 }
 0x4e0   : >> { %9008 = vmatprep.subr.bf16.mxu1 %v9333_v21 }
 0x4e1   : >> { %8747 = vmatmul.mubr.bf16.gmra.mrb[40].mxu0 %v4980_v45 }
 0x4e2   : >> { %8787 = vmatpush3.bf16.msra.mxu0 %v9210_v24  ;;  %8775 = vmatmul.mubr.bf16.gmra.mrb[40].mxu1 %v5116_v40 }
 0x4e3   : >> { %9016 = vmatpush3.bf16.msra.mxu1 %v9210_v24  ;;  %8788 = vmatprep.subr.bf16.mxu0 %v9333_v21 }
 0x4e4   : >> { %9009 = vmatprep.subr.bf16.mxu1 %v9333_v21  ;;  %8750 = vmatprep.mubr.msk.bf16.mxu0 %vm9334_vm10, %v9333_v21 }
 0x4e5   : >> { %8778 = vmatprep.mubr.msk.bf16.mxu1 %vm9334_vm10, %v9333_v21 }
 0x4e6   : >> { %8789 = vmatpush3.bf16.msra.mxu0 %v9211_v0 }
 0x4e7   : >> { %9017 = vmatpush3.bf16.msra.mxu1 %v9211_v0  ;;  %8790 = vmatprep.subr.bf16.mxu0 %v9333_v21 }
 0x4e8   : >> { %9010 = vmatprep.subr.bf16.mxu1 %v9333_v21 }
 0x4e9   : >> { %8751 = vmatmul.mubr.bf16.gmra.mrb[44].mxu0 %v4981_v50 }
 0x4ea   : >> { %8791 = vmatpush3.bf16.msra.mxu0 %v9212_v38  ;;  %8779 = vmatmul.mubr.bf16.gmra.mrb[44].mxu1 %v5117_v19 }
 0x4eb   : >> { %9018 = vmatpush3.bf16.msra.mxu1 %v9212_v38  ;;  %8792 = vmatprep.subr.bf16.mxu0 %v9333_v21 }
 0x4ec   : >> { %9011 = vmatprep.subr.bf16.mxu1 %v9333_v21  ;;  %8798 = vmatprep.mubr.msk.bf16.mxu0 %vm9334_vm10, %v9333_v21 }
 0x4ed   : >> { %8802 = vmatprep.mubr.msk.bf16.mxu1 %vm9334_vm10, %v9333_v21 }
 0x4ee   : >> { %8793 = vmatpush3.bf16.msra.mxu0 %v9213_v22 }
 0x4ef   : >> { %9019 = vmatpush3.bf16.msra.mxu1 %v9213_v22  ;;  %8794 = vmatprep.subr.bf16.mxu0 %v9333_v21 }
 0x4f0   : >> { %9012 = vmatprep.subr.bf16.mxu1 %v9333_v21 }
 0x4f2   : >> { %8795 = vmatpush3.bf16.msra.mxu0 %v9214_v32 }
 0x4f3   : >> { %9020 = vmatpush3.bf16.msra.mxu1 %v9214_v32  ;;  %8796 = vmatprep.subr.bf16.mxu0 %v9333_v21 }
 0x4f4   : >> { %9013 = vmatprep.subr.bf16.mxu1 %v9333_v21 }
 0x4f6   : >> { %8797 = vmatpush3.bf16.msra.mxu0 %v9215_v25 }
 0x4f7   : >> { %9021 = vmatpush3.bf16.msra.mxu1 %v9215_v25 }
 0x4f9   : >> { %8799 = vmatmul.mubr.bf16.vlgmr.msra.gmra.mrb[48].mxu0 %v5251_v49 }
 0x4fa   : >> { %8803 = vmatmul.mubr.bf16.vlgmr.msra.gmra.mrb[48].mxu1 %v5252_v18 }
 0x4fb   : >> { %8806 = vmatprep.mubr.msk.bf16.mxu1 %vm9334_vm10, %v9333_v21 }
 0x502   : >> { %8807 = vmatmul.mubr.bf16.gmra.mrb[52].mxu1 %v5253_v29 }
 0x54c   : >> { %v4282_v42 = vpop.f32.mrb[0].mxu0 }
 0x54d   : >> { %v4386_v4 = vpop.f32.mrb[0].mxu1  ;;  %v8576_v51 = vpop.f32.mrb[1].mxu0 }
 0x54e   : >> { %v4387_v44 = vadd.f32 %v4386_v4, %v4282_v42  ;;  %v8604_v63 = vpop.f32.mrb[1].mxu1  ;;  %v4285_v26 = vpop.f32.mrb[2].mxu0 }
 0x54f   : >> { %v4389_v60 = vpop.f32.mrb[2].mxu1  ;;  %v8577_v39 = vpop.f32.mrb[3].mxu0 }
 0x550   : >> { %v4390_v35 = vadd.f32 %v4389_v60, %v4285_v26  ;;  %v8605_v52 = vpop.f32.mrb[3].mxu1 }
 0x554   : >> { %v4290_v5 = vpop.f32.mrb[4].mxu0 }
 0x555   : >> { %v4394_v41 = vpop.f32.mrb[4].mxu1  ;;  %v8580_v36 = vpop.f32.mrb[5].mxu0 }
 0x556   : >> { %v4395_v56 = vadd.f32 %v4394_v41, %v4290_v5  ;;  %v8608_v37 = vpop.f32.mrb[5].mxu1  ;;  %v4293_v33 = vpop.f32.mrb[6].mxu0 }
 0x557   : >> { %v4397_v21 = vpop.f32.mrb[6].mxu1  ;;  %v8581_v48 = vpop.f32.mrb[7].mxu0 }
 0x558   : >> { %v4398_v2 = vadd.f32 %v4397_v21, %v4293_v33  ;;  %v8609_v27 = vpop.f32.mrb[7].mxu1 }
 0x55c   : >> { %v4298_v54 = vpop.f32.mrb[8].mxu0 }
 0x55d   : >> { %v4402_v34 = vpop.f32.mrb[8].mxu1  ;;  %v8584_v55 = vpop.f32.mrb[9].mxu0 }
 0x55e   : >> { %v8612_v62 = vpop.f32.mrb[9].mxu1  ;;  %v4403_v16 = vadd.f32 %v4402_v34, %v4298_v54  ;;  %v4301_v61 = vpop.f32.mrb[10].mxu0 }
 0x55f   : >> { %v4405_v13 = vpop.f32.mrb[10].mxu1  ;;  %v8585_v9 = vpop.f32.mrb[11].mxu0 }
 0x560   : >> { %v8613_v17 = vpop.f32.mrb[11].mxu1 }
 0x56c   : >> { %v4517_v3 = vpop.f32.mrb[12].mxu0 }
 0x56d   : >> { %v4539_v7 = vadd.f32 %v4517_v3, %v4387_v44  ;;  %v4655_v31 = vpop.f32.mrb[12].mxu1  ;;  %v8632_v53 = vpop.f32.mrb[13].mxu0 }
 0x56e   : >> { %v8660_v43 = vpop.f32.mrb[13].mxu1  ;;  %v4520_v6 = vpop.f32.mrb[14].mxu0 }
 0x56f   : >> { %v4677_v23 = vadd.f32 %v4655_v31, %v4539_v7  ;;  %v4540_v59 = vadd.f32 %v4520_v6, %v4390_v35  ;;  %v4658_v14 = vpop.f32.mrb[14].mxu1  ;;  %v8633_v10 = vpop.f32.mrb[15].mxu0 }
 0x570   : >> { %v8661_v47 = vpop.f32.mrb[15].mxu1 }
 0x571   : >> { %v4678_v45 = vadd.f32 %v4658_v14, %v4540_v59 }
 0x574   : >> { %v4525_v24 = vpop.f32.mrb[16].mxu0 }
 0x575   : >> { %v4541_v40 = vadd.f32 %v4525_v24, %v4395_v56  ;;  %v8636_v0 = vpop.f32.mrb[17].mxu0  ;;  %v4663_v15 = vpop.f32.mrb[16].mxu1 }
 0x576   : >> { %v4528_v58 = vpop.f32.mrb[18].mxu0  ;;  %v8664_v50 = vpop.f32.mrb[17].mxu1 }
 0x577   : >> { %v4542_v38 = vadd.f32 %v4528_v58, %v4398_v2  ;;  %v4679_v19 = vadd.f32 %v4663_v15, %v4541_v40  ;;  %v4666_v22 = vpop.f32.mrb[18].mxu1  ;;  %v8637_v32 = vpop.f32.mrb[19].mxu0 }
 0x578   : >> { %v8665_v25 = vpop.f32.mrb[19].mxu1 }
 0x579   : >> { %v4680_v11 = vadd.f32 %v4666_v22, %v4542_v38 }
 0x57c   : >> { %v4533_v1 = vpop.f32.mrb[20].mxu0 }
 0x57d   : >> { %v4543_v28 = vadd.f32 %v4533_v1, %v4403_v16  ;;  %v4671_v57 = vpop.f32.mrb[20].mxu1  ;;  %v8640_v49 = vpop.f32.mrb[21].mxu0 }
 0x57e   : >> { %v8668_v18 = vpop.f32.mrb[21].mxu1  ;;  %v4536_v8 = vpop.f32.mrb[22].mxu0 }
 0x57f   : >> { %v4681_v29 = vadd.f32 %v4671_v57, %v4543_v28  ;;  %v4674_v42 = vpop.f32.mrb[22].mxu1  ;;  %v8641_v4 = vpop.f32.mrb[23].mxu0 }
 0x580   : >> { %v8669_v51 = vpop.f32.mrb[23].mxu1 }
 0x58c   : >> { %v4791_v44 = vpop.f32.mrb[24].mxu0 }
 0x58d   : >> { %v4813_v63 = vadd.f32 %v4791_v44, %v4677_v23  ;;  %v4927_v26 = vpop.f32.mrb[24].mxu1  ;;  %v8688_v60 = vpop.f32.mrb[25].mxu0 }
 0x58e   : >> { %v8716_v39 = vpop.f32.mrb[25].mxu1  ;;  %v4794_v35 = vpop.f32.mrb[26].mxu0 }
 0x58f   : >> { %v4949_v52 = vadd.f32 %v4927_v26, %v4813_v63  ;;  %v4814_v5 = vadd.f32 %v4794_v35, %v4678_v45  ;;  %v4930_v41 = vpop.f32.mrb[26].mxu1  ;;  %v8689_v36 = vpop.f32.mrb[27].mxu0 }
 0x590   : >> { %v8717_v56 = vpop.f32.mrb[27].mxu1 }
 0x591   : >> { %v4950_v37 = vadd.f32 %v4930_v41, %v4814_v5 }
 0x594   : >> { %v4799_v33 = vpop.f32.mrb[28].mxu0 }
 0x595   : >> { %v4815_v21 = vadd.f32 %v4799_v33, %v4679_v19  ;;  %v8692_v48 = vpop.f32.mrb[29].mxu0  ;;  %v4935_v2 = vpop.f32.mrb[28].mxu1 }
 0x596   : >> { %v4802_v27 = vpop.f32.mrb[30].mxu0  ;;  %v8720_v54 = vpop.f32.mrb[29].mxu1 }
 0x597   : >> { %v4816_v34 = vadd.f32 %v4802_v27, %v4680_v11  ;;  %v4951_v55 = vadd.f32 %v4935_v2, %v4815_v21  ;;  %v4938_v62 = vpop.f32.mrb[30].mxu1  ;;  %v8693_v16 = vpop.f32.mrb[31].mxu0 }
 0x598   : >> { %v8721_v61 = vpop.f32.mrb[31].mxu1 }
 0x599   : >> { %v4952_v13 = vadd.f32 %v4938_v62, %v4816_v34 }
 0x59c   : >> { %v4807_v9 = vpop.f32.mrb[32].mxu0 }
 0x59d   : >> { %v4817_v17 = vadd.f32 %v4807_v9, %v4681_v29  ;;  %v4943_v3 = vpop.f32.mrb[32].mxu1  ;;  %v8696_v7 = vpop.f32.mrb[33].mxu0 }
 0x59e   : >> { %v8724_v31 = vpop.f32.mrb[33].mxu1  ;;  %v4810_v53 = vpop.f32.mrb[34].mxu0 }
 0x59f   : >> { %v4953_v43 = vadd.f32 %v4943_v3, %v4817_v17  ;;  %v4946_v6 = vpop.f32.mrb[34].mxu1  ;;  %v8697_v23 = vpop.f32.mrb[35].mxu0 }
 0x5a0   : >> { %v8725_v59 = vpop.f32.mrb[35].mxu1 }
 0x5ac   : >> { %v5064_v14 = vpop.f32.mrb[36].mxu0 }
 0x5ad   : >> { %v5086_v10 = vadd.f32 %v5064_v14, %v4949_v52  ;;  %v5200_v47 = vpop.f32.mrb[36].mxu1  ;;  %v8744_v45 = vpop.f32.mrb[37].mxu0 }
 0x5ae   : >> { %v8772_v24 = vpop.f32.mrb[37].mxu1  ;;  %v5067_v40 = vpop.f32.mrb[38].mxu0 }
 0x5af   : >> { %v5222_v0 = vadd.f32 %v5200_v47, %v5086_v10  ;;  %v5087_v15 = vadd.f32 %v5067_v40, %v4950_v37  ;;  %v5203_v58 = vpop.f32.mrb[38].mxu1  ;;  %v8745_v50 = vpop.f32.mrb[39].mxu0 }
 0x5b0   : >> { %v8773_v38 = vpop.f32.mrb[39].mxu1 }
 0x5b1   : >> { %v5223_v19 = vadd.f32 %v5203_v58, %v5087_v15 }
 0x5b4   : >> { %v5072_v22 = vpop.f32.mrb[40].mxu0 }
 0x5b5   : >> { %v5088_v32 = vadd.f32 %v5072_v22, %v4951_v55  ;;  %v8748_v25 = vpop.f32.mrb[41].mxu0  ;;  %v5208_v11 = vpop.f32.mrb[40].mxu1 }
 0x5b6   : >> { %v5075_v1 = vpop.f32.mrb[42].mxu0  ;;  %v8776_v28 = vpop.f32.mrb[41].mxu1 }
 0x5b7   : >> { %v5089_v57 = vadd.f32 %v5075_v1, %v4952_v13  ;;  %v5224_v49 = vadd.f32 %v5208_v11, %v5088_v32  ;;  %v5211_v18 = vpop.f32.mrb[42].mxu1  ;;  %v8749_v8 = vpop.f32.mrb[43].mxu0 }
 0x5b8   : >> { %v8777_v29 = vpop.f32.mrb[43].mxu1 }
 0x5b9   : >> { %v5225_v42 = vadd.f32 %v5211_v18, %v5089_v57 }
 0x5bc   : >> { %v5080_v4 = vpop.f32.mrb[44].mxu0 }
 0x5bd   : >> { %v5090_v51 = vadd.f32 %v5080_v4, %v4953_v43  ;;  %v5216_v44 = vpop.f32.mrb[44].mxu1  ;;  %v8752_v63 = vpop.f32.mrb[45].mxu0 }
 0x5be   : >> { %v8780_v26 = vpop.f32.mrb[45].mxu1  ;;  %v5083_v60 = vpop.f32.mrb[46].mxu0 }
 0x5bf   : >> { %v5226_v39 = vadd.f32 %v5216_v44, %v5090_v51  ;;  %v5219_v35 = vpop.f32.mrb[46].mxu1  ;;  %v8753_v52 = vpop.f32.mrb[47].mxu0 }
 0x5c0   : >> { %v8781_v5 = vpop.f32.mrb[47].mxu1 }
 0x5cc   : >> { %v5336_v41 = vpop.f32.mrb[48].mxu0 }
 0x5cd   : >> { %v5358_v36 = vadd.f32 %v5336_v41, %v5222_v0  ;;  %v5344_v56 = vpop.f32.mrb[48].mxu1  ;;  %v8800_v37 = vpop.f32.mrb[49].mxu0 }
 0x5ce   : >> { %v5360_v33 = vadd.f32 %v5344_v56, %v5224_v49  ;;  %v8804_v21 = vpop.f32.mrb[49].mxu1  ;;  %v5339_v48 = vpop.f32.mrb[50].mxu0 }
 0x5cf   : >> { %v5367_v2 = vadd.f32 %v11097_v30, %v5358_v36  ;;  %v5359_v27 = vadd.f32 %v5339_v48, %v5223_v19  ;;  %v5347_v54 = vpop.f32.mrb[50].mxu1  ;;  %v8801_v34 = vpop.f32.mrb[51].mxu0 }
 0x5d0   : >> { %v5369_v55 = vadd.f32 %v11097_v30, %v5360_v33  ;;  %v5361_v62 = vadd.f32 %v5347_v54, %v5225_v42  ;;  %v8805_v16 = vpop.f32.mrb[51].mxu1 }
 0x5d1   : >> { %v5372_v9 = vmax.f32 %v5367_v2, 0.0  ;;  %v5368_v7 = vadd.f32 %v11097_v30, %v5359_v27 }
 0x5d2   : >> { %v5374_v61 = vmax.f32 %v5369_v55, 0.0  ;;  %v5370_v13 = vadd.f32 %v11097_v30, %v5361_v62 }
 0x5d3   : >> { %v5381_v59 = vmul.f32 %v11102_v20, %v5372_v9  ;;  %v5373_v24 = vmax.f32 %v5368_v7, 0.0 }
 0x5d4   : >> { %v5383_v17 = vmul.f32 %v11102_v20, %v5374_v61  ;;  %v5375_v3 = vmax.f32 %v5370_v13, 0.0 }
 0x5d5   : >> { %v5352_v31 = vpop.f32.mrb[52].mxu1  ;;  %v5390_v58 = vadd.f32 %v11107_v12, %v5381_v59  ;;  %v5382_v19 = vmul.f32 %v11102_v20, %v5373_v24 }
 0x5d6   : >> { %v5392_v53 = vadd.f32 %v11107_v12, %v5383_v17  ;;  %v5384_v43 = vmul.f32 %v11102_v20, %v5375_v3  ;;  %v5362_v6 = vadd.f32 %v5352_v31, %v5226_v39  ;;  %v8808_v23 = vpop.f32.mrb[53].mxu1 }
 0x5d7   : >> { %v5355_v14 = vpop.f32.mrb[54].mxu1  ;;  %v5391_v28 = vadd.f32 %v11107_v12, %v5382_v19 }
 0x5d8   : >> { %v5393_v10 = vadd.f32 %v11107_v12, %v5384_v43  ;;  %v5371_v47 = vadd.f32 %v11097_v30, %v5362_v6  ;;  %v8809_v45 = vpop.f32.mrb[55].mxu1  ;;  %v5399_v40 = vrot.slane %v5392_v53, 2 }
 0x5da   : >> { %v5400_v0 = vrot.slane %v5393_v10, 2  ;;  %v5376_v15 = vmax.f32 %v5371_v47, 0.0 }
 0x5dc   : >> { %v5401_v50 = vsel %vm1856_vm0, %v5399_v40, %v5400_v0  ;;  %v5385_v38 = vmul.f32 %v11102_v20, %v5376_v15 }
 0x5dd   : >> { %v5406_v22 = vmax.f32 %v5390_v58, %v5401_v50 }
 0x5de   : >> { %v5394_v32 = vadd.f32 %v11107_v12, %v5385_v38 }
 0x5df   : >> { %v5410_v25 = vcombine.high %v5406_v22, %v5406_v22  ;;  %v5417_v11 = vrot.slane %v5406_v22, %v10312_v46 }
 0x5e0   : >> { %v5402_v1 = vrot.slane %v5394_v32, 2 }
 0x5e1   : >> { %v5424_v57 = vrot.slane %v5410_v25, %v10312_v46  ;;  %v5425_v49 = vcombine.high %v5417_v11, %v5417_v11  ;;  %v5453_v18 = vsel %vm2066_vm1, %v5417_v11, -inf }
 0x5e2   : >> { %v5454_v8 = vrot.slane %v5453_v18, 4  ;;  %v5403_v29 = vsel %vm1856_vm0, %v5400_v0, %v5402_v1 }
 0x5e3   : >> { %v5426_v42 = vcombine.high %v5424_v57, %v5424_v57  ;;  %v5460_v4 = vsel %vm2066_vm1, %v5425_v49, -inf  ;;  %v5467_v51 = vsel %vm2066_vm1, %v5424_v57, -inf  ;;  %v5407_v44 = vmax.f32 %v5391_v28, %v5403_v29 }
 0x5e4   : >> { %v5455_v63 = vmax.f32 %v5453_v18, %v5454_v8  ;;  %v5461_v26 = vrot.slane %v5460_v4, 4  ;;  %v5468_v60 = vrot.slane %v5467_v51, 4 }
 0x5e5   : >> { %v5474_v39 = vsel %vm2066_vm1, %v5426_v42, -inf  ;;  %v5427_v35 = vcombine.high %v5407_v44, %v5407_v44  ;;  %v5434_v52 = vrot.slane %v5407_v44, %v10312_v46 }
 0x5e6   : >> { %v5456_v5 = vrot.slane %v5455_v63, 2  ;;  %v5462_v41 = vmax.f32 %v5460_v4, %v5461_v26  ;;  %v5469_v36 = vmax.f32 %v5467_v51, %v5468_v60  ;;  %v5475_v56 = vrot.slane %v5474_v39, 4 }
 0x5e7   : >> { %v5441_v37 = vrot.slane %v5427_v35, %v10312_v46  ;;  %v5442_v33 = vcombine.high %v5434_v52, %v5434_v52  ;;  %v5481_v21 = vsel %vm2066_vm1, %v5434_v52, -inf  ;;  %v11551_v35 = vld [vmem:[%s11848_s5 + $0x9] ss:$0 sm:$0xff] (%p4143_p6)  ;;  %v11556_v52 = vld [vmem:[%s11848_s5 + $0xa] ss:$0 sm:$0xff] (%p4143_p6) }
 0x5e8   : >> { %v5457_v48 = vmax.f32 %v5455_v63, %v5456_v5  ;;  %v5463_v2 = vrot.slane %v5462_v41, 2  ;;  %v5470_v27 = vrot.slane %v5469_v36, 2  ;;  %v5476_v54 = vmax.f32 %v5474_v39, %v5475_v56  ;;  %v11561_v5 = vld [vmem:[%s11848_s5 + $0xb] ss:$0 sm:$0xff] (%p4143_p6) }
 0x5e9   : >> { %v5443_v34 = vcombine.high %v5441_v37, %v5441_v37  ;;  %v5482_v55 = vrot.slane %v5481_v21, 4  ;;  %v5488_v62 = vsel %vm2066_vm1, %v5442_v33, -inf  ;;  %v5495_v16 = vsel %vm2066_vm1, %v5441_v37, -inf }
 0x5ea   : >> { %v5458_v61 = vrot.slane %v5457_v48, 1  ;;  %v5464_v13 = vmax.f32 %v5462_v41, %v5463_v2  ;;  %v5471_v9 = vmax.f32 %v5469_v36, %v5470_v27  ;;  %v5477_v17 = vrot.slane %v5476_v54, 2 }
 0x5eb   : >> { %v5483_v3 = vmax.f32 %v5481_v21, %v5482_v55  ;;  %v5489_v7 = vrot.slane %v5488_v62, 4  ;;  %v5496_v31 = vrot.slane %v5495_v16, 4  ;;  %v5502_v53 = vsel %vm2066_vm1, %v5443_v34, -inf }
 0x5ec   : >> { %v5465_v43 = vrot.slane %v5464_v13, 1  ;;  %v5472_v6 = vrot.slane %v5471_v9, 1  ;;  %v5478_v23 = vmax.f32 %v5476_v54, %v5477_v17  ;;  %v5503_v47 = vrot.slane %v5502_v53, 4 }
 0x5ed   : >> { %v5484_v59 = vrot.slane %v5483_v3, 2  ;;  %v5490_v14 = vmax.f32 %v5488_v62, %v5489_v7  ;;  %v5497_v10 = vmax.f32 %v5495_v16, %v5496_v31  ;;  %v5459_v45 = vmax.f32 %v5457_v48, %v5458_v61 }
 0x5ee   : >> { %v5466_v24 = vmax.f32 %v5464_v13, %v5465_v43  ;;  %v5473_v40 = vmax.f32 %v5471_v9, %v5472_v6  ;;  %v5479_v0 = vrot.slane %v5478_v23, 1  ;;  %v5504_v38 = vmax.f32 %v5502_v53, %v5503_v47 }
 0x5ef   : >> { %v5485_v15 = vmax.f32 %v5483_v3, %v5484_v59  ;;  %v5491_v58 = vrot.slane %v5490_v14, 2  ;;  %v5498_v50 = vrot.slane %v5497_v10, 2 }
 0x5f0   : >> { %v5480_v19 = vmax.f32 %v5478_v23, %v5479_v0  ;;  %v5521_v22 = vsel %vm2326_vm2, %v5466_v24, %v5459_v45  ;;  %v5505_v28 = vrot.slane %v5504_v38, 2 }
 0x5f1   : >> { %v5523_v32 = vsel %vm2328_vm3, %v5473_v40, %v5521_v22  ;;  %v5486_v25 = vrot.slane %v5485_v15, 1  ;;  %v5492_v11 = vmax.f32 %v5490_v14, %v5491_v58  ;;  %v5499_v1 = vmax.f32 %v5497_v10, %v5498_v50 }
 0x5f2   : >> { %v5525_v57 = vsel %vm2330_vm4, %v5480_v19, %v5523_v32  ;;  %v5506_v29 = vmax.f32 %v5504_v38, %v5505_v28 }
 0x5f3   : >> { %v5487_v49 = vmax.f32 %v5485_v15, %v5486_v25  ;;  %v5493_v18 = vrot.slane %v5492_v11, 1  ;;  %v5500_v8 = vrot.slane %v5499_v1, 1 }
 0x5f4   : >> { %v5507_v44 = vrot.slane %v5506_v29, 1  ;;  %4145 = sbr.rel (!%p4143_p6) target bundleno = 1112 (0x458), region = 196 }
 0x5f5   : >> { %v5494_v42 = vmax.f32 %v5492_v11, %v5493_v18  ;;  %v5501_v4 = vmax.f32 %v5499_v1, %v5500_v8  ;;  %v5527_v51 = vsel %vm2332_vm5, %v5487_v49, %v5525_v57 }
 0x5f6   : >> { %v5508_v26 = vmax.f32 %v5506_v29, %v5507_v44 }
 0x5f7   : >> { %v5529_v63 = vsel %vm2334_vm6, %v5494_v42, %v5527_v51 }
 0x5f8   : >> { %v5531_v60 = vsel %vm2336_vm7, %v5501_v4, %v5529_v63 }
 0x5f9   : >> { %v5533_v39 = vsel %vm2338_vm8, %v5508_v26, %v5531_v60 }
 0x5fa   : >> { %7684 = vst [vmem:[%s6880_s18 + $0xb] sm:$0xff] %v5533_v39 }
 0x5fb LB: >> { %v9216_v30 = vld [vmem:[%s11847_s4 + $0x40] sm:$0xff]   ;;  %v9218_v12 = vld [vmem:[%s11847_s4 + $0x48] sm:$0xff]   ;;  %v9220_v36 = vld [vmem:[%s11847_s4 + $0x50] sm:$0xff]   ;;  %s5546_s20 = smul.u32 20, %s9326_s25  ;;  %s9326_s25 = sphi %s11563_s25, %s5545_s25  }
 0x5fc   : >> { %v9217_v20 = vld [vmem:[%s11847_s4] sm:$0xff]   ;;  %8810 = vmatprep.subr.bf16.mxu0 %v9216_v30  ;;  %v9219_v41 = vld [vmem:[%s11847_s4 + $0x8] sm:$0xff]   ;;  %v9221_v56 = vld [vmem:[%s11847_s4 + $0x10] sm:$0xff]  }
 0x5fd   : >> { %8830 = vmatprep.subr.bf16.mxu1 %v9217_v20  ;;  %8811 = vmatpush3.bf16.msra.mxu0 %v9216_v30  ;;  %v9222_v37 = vld [vmem:[%s11847_s4 + $0x58] sm:$0xff]   ;;  %v9224_v21 = vld [vmem:[%s11847_s4 + $0x60] sm:$0xff]   ;;  %v9226_v2 = vld [vmem:[%s11847_s4 + $0x68] sm:$0xff]   ;;  %s11602_s27 = scalar_lea.vmem [#allocation4], %s5546_s20 }
 0x5fe   : >> { %8831 = vmatpush3.bf16.msra.mxu1 %v9217_v20  ;;  %8812 = vmatprep.subr.bf16.mxu0 %v9218_v12  ;;  %v9223_v33 = vld [vmem:[%s11847_s4 + $0x18] sm:$0xff]   ;;  %v9225_v48 = vld [vmem:[%s11847_s4 + $0x20] sm:$0xff]   ;;  %v9227_v55 = vld [vmem:[%s11847_s4 + $0x28] sm:$0xff]  }
 0x5ff   : >> { %8832 = vmatprep.subr.bf16.mxu1 %v9219_v41  ;;  %v9228_v13 = vld [vmem:[%s11847_s4 + $0x70] sm:$0xff]   ;;  %v9230_v17 = vld [vmem:[%s11847_s4 + $0x78] sm:$0xff]   ;;  %v9232_v53 = vld [vmem:[%s11847_s4 + $0x80] sm:$0xff]  }
 0x600   : >> { %v9229_v9 = vld [vmem:[%s11847_s4 + $0x30] sm:$0xff]   ;;  %v9231_v3 = vld [vmem:[%s11847_s4 + $0x38] sm:$0xff]   ;;  %v9233_v43 = vld [vmem:[%s11847_s4 + $0xc0] sm:$0xff]  }
 0x601   : >> { %8813 = vmatpush3.bf16.msra.mxu0 %v9218_v12  ;;  %v7685_v27 = vld [vmem:[%s11602_s27 + $0x1] sm:$0xff]  ;;  %v7686_v54 = vld [vmem:[%s11602_s27 + $0x9] sm:$0xff]  ;;  %v7687_v7 = vld [vmem:[%s11602_s27 + $0x11] sm:$0xf] }
 0x602   : >> { %8833 = vmatpush3.bf16.msra.mxu1 %v9219_v41  ;;  %8814 = vmatprep.subr.bf16.mxu0 %v9220_v36  ;;  %v5548_v34 = vld [vmem:[%s11602_s27] sm:$0xff]  ;;  %v5591_v62 = vpack.c.bf16 %v7686_v54, %v7685_v27  ;;  %v5549_v16 = vld [vmem:[%s11602_s27 + $0x8] sm:$0xff]  ;;  %v5550_v31 = vld [vmem:[%s11602_s27 + $0x10] sm:$0xf]  ;;  %v5592_v6 = vpack.c.bf16 %v7687_v7, %v7687_v7 }
 0x603   : >> { %8834 = vmatprep.subr.bf16.mxu1 %v9221_v56  ;;  %v5567_v61 = vpack.c.bf16 %v5549_v16, %v5548_v34  ;;  %v5568_v23 = vpack.c.bf16 %v5550_v31, %v5550_v31  ;;  %v9234_v59 = vld [vmem:[%s11847_s4 + $0x88] sm:$0xff]   ;;  %v9236_v24 = vld [vmem:[%s11847_s4 + $0x90] sm:$0xff]   ;;  %v9238_v58 = vld [vmem:[%s11847_s4 + $0x98] sm:$0xff]  }
 0x604   : >> { %8826 = vmatprep.mubr.bf16.mxu0 %v5591_v62  ;;  %v9235_v14 = vld [vmem:[%s11847_s4 + $0xc8] sm:$0xff]   ;;  %v7750_v40 = vld [vmem:[%s11602_s27 + $0x12] sm:$0xff]  ;;  %v9240_v38 = vld [vmem:[%s11847_s4 + $0xa0] sm:$0xff]  }
 0x605   : >> { %8815 = vmatpush3.bf16.msra.mxu0 %v9220_v36  ;;  %8846 = vmatprep.mubr.bf16.mxu1 %v5567_v61  ;;  %v7720_v10 = vld [vmem:[%s11602_s27 + $0x2] sm:$0xff]  ;;  %v7721_v47 = vld [vmem:[%s11602_s27 + $0xa] sm:$0xff]  ;;  %v9239_v50 = vld [vmem:[%s11847_s4 + $0xd8] sm:$0xff]  }
 0x606   : >> { %8835 = vmatpush3.bf16.msra.mxu1 %v9221_v56  ;;  %8816 = vmatprep.subr.bf16.mxu0 %v9222_v37  ;;  %v5807_v45 = vpack.c.bf16 %v7721_v47, %v7720_v10  ;;  %v9237_v0 = vld [vmem:[%s11847_s4 + $0xd0] sm:$0xff]   ;;  %v5932_v15 = vpack.c.bf16 %v7750_v40, %v7721_v47  ;;  %v9241_v19 = vld [vmem:[%s11847_s4 + $0xe0] sm:$0xff]   ;;  %v9242_v22 = vld [vmem:[%s11847_s4 + $0xa8] sm:$0xff]  }
 0x607   : >> { %8836 = vmatprep.subr.bf16.mxu1 %v9223_v33  ;;  %v9243_v32 = vld [vmem:[%s11847_s4 + $0xe8] sm:$0xff]   ;;  %v9244_v25 = vld [vmem:[%s11847_s4 + $0xb0] sm:$0xff]   ;;  %v9246_v1 = vld [vmem:[%s11847_s4 + $0xb8] sm:$0xff]  }
 0x608   : >> { %v9245_v11 = vld [vmem:[%s11847_s4 + $0xf0] sm:$0xff]   ;;  %v9247_v28 = vld [vmem:[%s11847_s4 + $0xf8] sm:$0xff]   ;;  %v9248_v49 = vld [vmem:[%s11847_s4 + $0x100] sm:$0xff]  }
 0x609   : >> { %8817 = vmatpush3.bf16.msra.mxu0 %v9222_v37  ;;  %v7722_v57 = vld [vmem:[%s11602_s27 + $0x12] sm:$0xf]  ;;  %v7751_v18 = vld [vmem:[%s11602_s27 + $0x1a] sm:$0xf]  ;;  %v9249_v8 = vld [vmem:[%s11847_s4 + $0x140] sm:$0xff]  }
 0x60a   : >> { %8837 = vmatpush3.bf16.msra.mxu1 %v9223_v33  ;;  %8818 = vmatprep.subr.bf16.mxu0 %v9224_v21  ;;  %v7778_v29 = vld [vmem:[%s11602_s27 + $0xb] sm:$0xff]  ;;  %v7779_v42 = vld [vmem:[%s11602_s27 + $0x13] sm:$0xff]  ;;  %v5808_v4 = vpack.c.bf16 %v7722_v57, %v7722_v57  ;;  %v5933_v44 = vpack.c.bf16 %v7751_v18, %v7751_v18  ;;  %v9256_v56 = vld [vmem:[%s11847_s4 + $0x120] sm:$0xff]  }
 0x60b   : >> { %8838 = vmatprep.subr.bf16.mxu1 %v9225_v48  ;;  %v7807_v51 = vld [vmem:[%s11602_s27 + $0xc] sm:$0xff]  ;;  %v11688_v63 = vld [vmem:[%s11602_s27 + $0x14] sm:$0xff]  ;;  %v6055_v39 = vpack.c.bf16 %v7779_v42, %v7778_v29  ;;  %v9257_v37 = vld [vmem:[%s11847_s4 + $0x160] sm:$0xff]  }
 0x60c   : >> { %v9250_v26 = vld [vmem:[%s11847_s4 + $0x108] sm:$0xff]   ;;  %v6178_v30 = vpack.c.bf16 %v11688_v63, %v7807_v51  ;;  %v9252_v20 = vld [vmem:[%s11847_s4 + $0x110] sm:$0xff]   ;;  %v9254_v41 = vld [vmem:[%s11847_s4 + $0x118] sm:$0xff]  }
 0x60d   : >> { %8819 = vmatpush3.bf16.msra.mxu0 %v9224_v21  ;;  %v9251_v60 = vld [vmem:[%s11847_s4 + $0x148] sm:$0xff]   ;;  %v9253_v12 = vld [vmem:[%s11847_s4 + $0x150] sm:$0xff]   ;;  %v9255_v36 = vld [vmem:[%s11847_s4 + $0x158] sm:$0xff]  }
 0x60e   : >> { %8839 = vmatpush3.bf16.msra.mxu1 %v9225_v48  ;;  %8820 = vmatprep.subr.bf16.mxu0 %v9226_v2  ;;  %v9258_v33 = vld [vmem:[%s11847_s4 + $0x128] sm:$0xff]   ;;  %v9260_v48 = vld [vmem:[%s11847_s4 + $0x130] sm:$0xff]   ;;  %v9262_v27 = vld [vmem:[%s11847_s4 + $0x138] sm:$0xff]  }
 0x60f   : >> { %8840 = vmatprep.subr.bf16.mxu1 %v9227_v55  ;;  %v9259_v21 = vld [vmem:[%s11847_s4 + $0x168] sm:$0xff]   ;;  %v9263_v54 = vld [vmem:[%s11847_s4 + $0x178] sm:$0xff]   ;;  %v9265_v16 = vld [vmem:[%s11847_s4 + $0x1c0] sm:$0xff]  }
 0x610   : >> { %v7780_v34 = vld [vmem:[%s11602_s27 + $0x1b] sm:$0xf]  ;;  %v9266_v7 = vld [vmem:[%s11847_s4 + $0x188] sm:$0xff]   ;;  %v9272_v10 = vld [vmem:[%s11847_s4 + $0x1a0] sm:$0xff]  }
 0x611   : >> { %8821 = vmatpush3.bf16.msra.mxu0 %v9226_v2  ;;  %v9261_v2 = vld [vmem:[%s11847_s4 + $0x170] sm:$0xff]   ;;  %v7809_v62 = vld [vmem:[%s11602_s27 + $0x1c] sm:$0xf]  ;;  %v6056_v61 = vpack.c.bf16 %v7780_v34, %v7780_v34  ;;  %v9267_v31 = vld [vmem:[%s11847_s4 + $0x1c8] sm:$0xff]  }
 0x612   : >> { %8841 = vmatpush3.bf16.msra.mxu1 %v9227_v55  ;;  %8822 = vmatprep.subr.bf16.mxu0 %v9228_v13  ;;  %v9264_v55 = vld [vmem:[%s11847_s4 + $0x180] sm:$0xff]   ;;  %v9276_v40 = vld [vmem:[%s11847_s4 + $0x1b0] sm:$0xff]   ;;  %v9287_v42 = vld [vmem:[%s11847_s4 + $0x238] sm:$0xff]  }
 0x613   : >> { %8842 = vmatprep.subr.bf16.mxu1 %v9229_v9  ;;  %v9273_v47 = vld [vmem:[%s11847_s4 + $0x1e0] sm:$0xff]   ;;  %v9282_v57 = vld [vmem:[%s11847_s4 + $0x210] sm:$0xff]  }
 0x614   : >> { %v9284_v18 = vld [vmem:[%s11847_s4 + $0x220] sm:$0xff]   ;;  %v9286_v29 = vld [vmem:[%s11847_s4 + $0x230] sm:$0xff]  }
 0x615   : >> { %8823 = vmatpush3.bf16.msra.mxu0 %v9228_v13  ;;  %v7837_v13 = vld [vmem:[%s11602_s27 + $0x1c] sm:$0xff] }
 0x616   : >> { %8843 = vmatpush3.bf16.msra.mxu1 %v9229_v9  ;;  %8824 = vmatprep.subr.bf16.mxu0 %v9230_v17  ;;  %v6179_v9 = vpack.c.bf16 %v7809_v62, %v7809_v62 }
 0x617   : >> { %8844 = vmatprep.subr.bf16.mxu1 %v9231_v3 }
 0x619   : >> { %8825 = vmatpush3.bf16.msra.mxu0 %v9230_v17  ;;  %v7865_v17 = vld [vmem:[%s11602_s27 + $0x15] sm:$0xff] }
 0x61a   : >> { %8845 = vmatpush3.bf16.msra.mxu1 %v9231_v3  ;;  %8850 = vmatprep.subr.bf16.mxu0 %v9232_v53  ;;  %v7866_v3 = vld [vmem:[%s11602_s27 + $0x1d] sm:$0xff] }
 0x61b   : >> { %8870 = vmatprep.subr.bf16.mxu1 %v9233_v43 }
 0x61c   : >> { %8827 = vmatmul.mubr.bf16.vlgmr.msra.gmra.mrb[0].mxu0 %v5592_v6  ;;  %v9268_v6 = vld [vmem:[%s11847_s4 + $0x190] sm:$0xff]  }
 0x61d   : >> { %8847 = vmatmul.mubr.bf16.vlgmr.msra.gmra.mrb[0].mxu1 %v5568_v23  ;;  %8851 = vmatpush3.bf16.msra.mxu0 %v9232_v53  ;;  %v6302_v53 = vpack.c.bf16 %v7837_v13, %v11688_v63  ;;  %v9269_v23 = vld [vmem:[%s11847_s4 + $0x1d0] sm:$0xff]  }
 0x61e   : >> { %8871 = vmatpush3.bf16.msra.mxu1 %v9233_v43  ;;  %8852 = vmatprep.subr.bf16.mxu0 %v9234_v59  ;;  %v6425_v43 = vpack.c.bf16 %v7866_v3, %v7865_v17 }
 0x61f   : >> { %8872 = vmatprep.subr.bf16.mxu1 %v9235_v14  ;;  %8866 = vmatprep.mubr.bf16.mxu0 %v5807_v45  ;;  %v9274_v45 = vld [vmem:[%s11847_s4 + $0x1a8] sm:$0xff]  }
 0x620   : >> { %8886 = vmatprep.mubr.bf16.mxu1 %v5932_v15  ;;  %v9278_v15 = vld [vmem:[%s11847_s4 + $0x1b8] sm:$0xff]  }
 0x621   : >> { %8853 = vmatpush3.bf16.msra.mxu0 %v9234_v59  ;;  %v9270_v59 = vld [vmem:[%s11847_s4 + $0x198] sm:$0xff]  }
 0x622   : >> { %8873 = vmatpush3.bf16.msra.mxu1 %v9235_v14  ;;  %8854 = vmatprep.subr.bf16.mxu0 %v9236_v24  ;;  %v9271_v14 = vld [vmem:[%s11847_s4 + $0x1d8] sm:$0xff]  }
 0x623   : >> { %8874 = vmatprep.subr.bf16.mxu1 %v9237_v0 }
 0x625   : >> { %8855 = vmatpush3.bf16.msra.mxu0 %v9236_v24  ;;  %v9275_v24 = vld [vmem:[%s11847_s4 + $0x1e8] sm:$0xff]  }
 0x626   : >> { %8875 = vmatpush3.bf16.msra.mxu1 %v9237_v0  ;;  %8856 = vmatprep.subr.bf16.mxu0 %v9238_v58  ;;  %v9277_v0 = vld [vmem:[%s11847_s4 + $0x1f0] sm:$0xff]  }
 0x627   : >> { %8876 = vmatprep.subr.bf16.mxu1 %v9239_v50 }
 0x629   : >> { %8857 = vmatpush3.bf16.msra.mxu0 %v9238_v58  ;;  %v9279_v58 = vld [vmem:[%s11847_s4 + $0x1f8] sm:$0xff]  }
 0x62a   : >> { %8877 = vmatpush3.bf16.msra.mxu1 %v9239_v50  ;;  %8858 = vmatprep.subr.bf16.mxu0 %v9240_v38  ;;  %v7838_v50 = vld [vmem:[%s11602_s27 + $0x24] sm:$0xf] }
 0x62b   : >> { %8878 = vmatprep.subr.bf16.mxu1 %v9241_v19 }
 0x62d   : >> { %8859 = vmatpush3.bf16.msra.mxu0 %v9240_v38  ;;  %v9280_v38 = vld [vmem:[%s11847_s4 + $0x200] sm:$0xff]  }
 0x62e   : >> { %8879 = vmatpush3.bf16.msra.mxu1 %v9241_v19  ;;  %8860 = vmatprep.subr.bf16.mxu0 %v9242_v22  ;;  %v7867_v19 = vld [vmem:[%s11602_s27 + $0x25] sm:$0xf] }
 0x62f   : >> { %8880 = vmatprep.subr.bf16.mxu1 %v9243_v32 }
 0x631   : >> { %8861 = vmatpush3.bf16.msra.mxu0 %v9242_v22  ;;  %v7894_v22 = vld [vmem:[%s11602_s27 + $0x16] sm:$0xff] }
 0x632   : >> { %8881 = vmatpush3.bf16.msra.mxu1 %v9243_v32  ;;  %8862 = vmatprep.subr.bf16.mxu0 %v9244_v25  ;;  %v7895_v32 = vld [vmem:[%s11602_s27 + $0x1e] sm:$0xff] }
 0x633   : >> { %8882 = vmatprep.subr.bf16.mxu1 %v9245_v11 }
 0x635   : >> { %8863 = vmatpush3.bf16.msra.mxu0 %v9244_v25  ;;  %v6303_v25 = vpack.c.bf16 %v7838_v50, %v7838_v50 }
 0x636   : >> { %8883 = vmatpush3.bf16.msra.mxu1 %v9245_v11  ;;  %8864 = vmatprep.subr.bf16.mxu0 %v9246_v1  ;;  %v6426_v11 = vpack.c.bf16 %v7867_v19, %v7867_v19 }
 0x637   : >> { %8884 = vmatprep.subr.bf16.mxu1 %v9247_v28 }
 0x639   : >> { %8865 = vmatpush3.bf16.msra.mxu0 %v9246_v1  ;;  %v9281_v1 = vld [vmem:[%s11847_s4 + $0x208] sm:$0xff]  }
 0x63a   : >> { %8885 = vmatpush3.bf16.msra.mxu1 %v9247_v28  ;;  %8890 = vmatprep.subr.bf16.mxu0 %v9248_v49  ;;  %v6548_v28 = vpack.c.bf16 %v7895_v32, %v7894_v22 }
 0x63b   : >> { %8910 = vmatprep.subr.bf16.mxu1 %v9249_v8 }
 0x63c   : >> { %8867 = vmatmul.mubr.bf16.vlgmr.msra.gmra.mrb[4].mxu0 %v5808_v4  ;;  %v7896_v4 = vld [vmem:[%s11602_s27 + $0x26] sm:$0xf]  ;;  %s7924_s27 = sshll.u32 %s9326_s25, 2  ;;  %s5545_s25 = sadd.s32 1, %s9326_s25  }
 0x63d   : >> { %8891 = vmatpush3.bf16.msra.mxu0 %v9248_v49  ;;  %8887 = vmatmul.mubr.bf16.vlgmr.msra.gmra.mrb[4].mxu1 %v5933_v44  ;;  %v9283_v49 = vld [vmem:[%s11847_s4 + $0x218] sm:$0xff]   ;;  %v6549_v51 = vpack.c.bf16 %v7896_v4, %v7896_v4  ;;  %s6744_s30 = scalar_lea.vmem %s9612_s10, %s7924_s27  ;;  %p5542_p7 = scmp.ge.s32.totalorder %s5545_s25, 4  }
 0x63e   : >> { %8911 = vmatpush3.bf16.msra.mxu1 %v9249_v8  ;;  %8892 = vmatprep.subr.bf16.mxu0 %v9250_v26  ;;  %v9285_v8 = vld [vmem:[%s11847_s4 + $0x228] sm:$0xff]  }
 0x63f   : >> { %8912 = vmatprep.subr.bf16.mxu1 %v9251_v60  ;;  %8906 = vmatprep.mubr.bf16.mxu0 %v6055_v39 }
 0x640   : >> { %8926 = vmatprep.mubr.bf16.mxu1 %v6178_v30 }
 0x641   : >> { %8893 = vmatpush3.bf16.msra.mxu0 %v9250_v26 }
 0x642   : >> { %8913 = vmatpush3.bf16.msra.mxu1 %v9251_v60  ;;  %8894 = vmatprep.subr.bf16.mxu0 %v9252_v20 }
 0x643   : >> { %8914 = vmatprep.subr.bf16.mxu1 %v9253_v12 }
 0x645   : >> { %8895 = vmatpush3.bf16.msra.mxu0 %v9252_v20 }
 0x646   : >> { %8915 = vmatpush3.bf16.msra.mxu1 %v9253_v12  ;;  %8896 = vmatprep.subr.bf16.mxu0 %v9254_v41 }
 0x647   : >> { %8916 = vmatprep.subr.bf16.mxu1 %v9255_v36 }
 0x649   : >> { %8897 = vmatpush3.bf16.msra.mxu0 %v9254_v41 }
 0x64a   : >> { %8917 = vmatpush3.bf16.msra.mxu1 %v9255_v36  ;;  %8898 = vmatprep.subr.bf16.mxu0 %v9256_v56 }
 0x64b   : >> { %8918 = vmatprep.subr.bf16.mxu1 %v9257_v37 }
 0x64d   : >> { %8899 = vmatpush3.bf16.msra.mxu0 %v9256_v56 }
 0x64e   : >> { %8919 = vmatpush3.bf16.msra.mxu1 %v9257_v37  ;;  %8900 = vmatprep.subr.bf16.mxu0 %v9258_v33 }
 0x64f   : >> { %8920 = vmatprep.subr.bf16.mxu1 %v9259_v21 }
 0x651   : >> { %8901 = vmatpush3.bf16.msra.mxu0 %v9258_v33 }
 0x652   : >> { %8921 = vmatpush3.bf16.msra.mxu1 %v9259_v21  ;;  %8902 = vmatprep.subr.bf16.mxu0 %v9260_v48 }
 0x653   : >> { %8922 = vmatprep.subr.bf16.mxu1 %v9261_v2 }
 0x655   : >> { %8903 = vmatpush3.bf16.msra.mxu0 %v9260_v48 }
 0x656   : >> { %8923 = vmatpush3.bf16.msra.mxu1 %v9261_v2  ;;  %8904 = vmatprep.subr.bf16.mxu0 %v9262_v27 }
 0x657   : >> { %8924 = vmatprep.subr.bf16.mxu1 %v9263_v54 }
 0x659   : >> { %8905 = vmatpush3.bf16.msra.mxu0 %v9262_v27 }
 0x65a   : >> { %8925 = vmatpush3.bf16.msra.mxu1 %v9263_v54  ;;  %8930 = vmatprep.subr.bf16.mxu0 %v9264_v55 }
 0x65b   : >> { %8950 = vmatprep.subr.bf16.mxu1 %v9265_v16 }
 0x65c   : >> { %8907 = vmatmul.mubr.bf16.vlgmr.msra.gmra.mrb[8].mxu0 %v6056_v61 }
 0x65d   : >> { %8931 = vmatpush3.bf16.msra.mxu0 %v9264_v55  ;;  %8927 = vmatmul.mubr.bf16.vlgmr.msra.gmra.mrb[8].mxu1 %v6179_v9 }
 0x65e   : >> { %8951 = vmatpush3.bf16.msra.mxu1 %v9265_v16  ;;  %8932 = vmatprep.subr.bf16.mxu0 %v9266_v7 }
 0x65f   : >> { %8952 = vmatprep.subr.bf16.mxu1 %v9267_v31  ;;  %8946 = vmatprep.mubr.bf16.mxu0 %v6302_v53 }
 0x660   : >> { %8966 = vmatprep.mubr.bf16.mxu1 %v6425_v43 }
 0x661   : >> { %8933 = vmatpush3.bf16.msra.mxu0 %v9266_v7 }
 0x662   : >> { %8953 = vmatpush3.bf16.msra.mxu1 %v9267_v31  ;;  %8934 = vmatprep.subr.bf16.mxu0 %v9268_v6 }
 0x663   : >> { %8954 = vmatprep.subr.bf16.mxu1 %v9269_v23 }
 0x665   : >> { %8935 = vmatpush3.bf16.msra.mxu0 %v9268_v6 }
 0x666   : >> { %8955 = vmatpush3.bf16.msra.mxu1 %v9269_v23  ;;  %8936 = vmatprep.subr.bf16.mxu0 %v9270_v59 }
 0x667   : >> { %8956 = vmatprep.subr.bf16.mxu1 %v9271_v14 }
 0x669   : >> { %8937 = vmatpush3.bf16.msra.mxu0 %v9270_v59 }
 0x66a   : >> { %8957 = vmatpush3.bf16.msra.mxu1 %v9271_v14  ;;  %8938 = vmatprep.subr.bf16.mxu0 %v9272_v10 }
 0x66b   : >> { %8958 = vmatprep.subr.bf16.mxu1 %v9273_v47 }
 0x66d   : >> { %8939 = vmatpush3.bf16.msra.mxu0 %v9272_v10 }
 0x66e   : >> { %8959 = vmatpush3.bf16.msra.mxu1 %v9273_v47  ;;  %8940 = vmatprep.subr.bf16.mxu0 %v9274_v45 }
 0x66f   : >> { %8960 = vmatprep.subr.bf16.mxu1 %v9275_v24 }
 0x671   : >> { %8941 = vmatpush3.bf16.msra.mxu0 %v9274_v45 }
 0x672   : >> { %8961 = vmatpush3.bf16.msra.mxu1 %v9275_v24  ;;  %8942 = vmatprep.subr.bf16.mxu0 %v9276_v40 }
 0x673   : >> { %8962 = vmatprep.subr.bf16.mxu1 %v9277_v0 }
 0x675   : >> { %8943 = vmatpush3.bf16.msra.mxu0 %v9276_v40 }
 0x676   : >> { %8963 = vmatpush3.bf16.msra.mxu1 %v9277_v0  ;;  %8944 = vmatprep.subr.bf16.mxu0 %v9278_v15 }
 0x677   : >> { %8964 = vmatprep.subr.bf16.mxu1 %v9279_v58 }
 0x679   : >> { %8945 = vmatpush3.bf16.msra.mxu0 %v9278_v15 }
 0x67a   : >> { %8965 = vmatpush3.bf16.msra.mxu1 %v9279_v58  ;;  %8970 = vmatprep.subr.bf16.mxu0 %v9280_v38 }
 0x67c   : >> { %8947 = vmatmul.mubr.bf16.vlgmr.msra.gmra.mrb[12].mxu0 %v6303_v25 }
 0x67d   : >> { %8971 = vmatpush3.bf16.msra.mxu0 %v9280_v38  ;;  %8967 = vmatmul.mubr.bf16.vlgmr.msra.gmra.mrb[12].mxu1 %v6426_v11 }
 0x67e   : >> { %8972 = vmatprep.subr.bf16.mxu0 %v9281_v1  ;;  %8986 = vmatprep.mubr.bf16.mxu0 %v6548_v28 }
 0x681   : >> { %8973 = vmatpush3.bf16.msra.mxu0 %v9281_v1 }
 0x682   : >> { %8974 = vmatprep.subr.bf16.mxu0 %v9282_v57 }
 0x685   : >> { %8975 = vmatpush3.bf16.msra.mxu0 %v9282_v57 }
 0x686   : >> { %8976 = vmatprep.subr.bf16.mxu0 %v9283_v49 }
 0x689   : >> { %8977 = vmatpush3.bf16.msra.mxu0 %v9283_v49 }
 0x68a   : >> { %8978 = vmatprep.subr.bf16.mxu0 %v9284_v18 }
 0x68d   : >> { %8979 = vmatpush3.bf16.msra.mxu0 %v9284_v18 }
 0x68e   : >> { %8980 = vmatprep.subr.bf16.mxu0 %v9285_v8 }
 0x691   : >> { %8981 = vmatpush3.bf16.msra.mxu0 %v9285_v8 }
 0x692   : >> { %8982 = vmatprep.subr.bf16.mxu0 %v9286_v29 }
 0x695   : >> { %8983 = vmatpush3.bf16.msra.mxu0 %v9286_v29 }
 0x696   : >> { %8984 = vmatprep.subr.bf16.mxu0 %v9287_v42 }
 0x699   : >> { %8985 = vmatpush3.bf16.msra.mxu0 %v9287_v42 }
 0x69c   : >> { %8987 = vmatmul.mubr.bf16.vlgmr.msra.gmra.mrb[16].mxu0 %v6549_v51 }
 0x6ef   : >> { %v8828_v44 = vpop.f32.mrb[0].mxu0 }
 0x6f0   : >> { %v8848_v63 = vpop.f32.mrb[0].mxu1  ;;  %v5675_v26 = vpop.f32.mrb[1].mxu0 }
 0x6f1   : >> { %v5780_v60 = vadd.f32 %v8848_v63, %v8828_v44  ;;  %v5771_v39 = vpop.f32.mrb[1].mxu1  ;;  %v8829_v30 = vpop.f32.mrb[2].mxu0 }
 0x6f2   : >> { %v5772_v20 = vadd.f32 %v5771_v39, %v5675_v26  ;;  %v8849_v12 = vpop.f32.mrb[2].mxu1  ;;  %v5678_v41 = vpop.f32.mrb[3].mxu0 }
 0x6f3   : >> { %v5774_v36 = vpop.f32.mrb[3].mxu1 }
 0x6f4   : >> { %v5775_v56 = vadd.f32 %v5774_v36, %v5678_v41 }
 0x70f   : >> { %v8868_v37 = vpop.f32.mrb[4].mxu0 }
 0x710   : >> { %v5907_v33 = vadd.f32 %v8868_v37, %v5780_v60  ;;  %v5891_v21 = vpop.f32.mrb[5].mxu0  ;;  %v8888_v48 = vpop.f32.mrb[4].mxu1 }
 0x711   : >> { %v5905_v2 = vadd.f32 %v5891_v21, %v5772_v20  ;;  %v8869_v27 = vpop.f32.mrb[6].mxu0  ;;  %v6016_v54 = vpop.f32.mrb[5].mxu1 }
 0x712   : >> { %v6032_v34 = vadd.f32 %v8888_v48, %v5907_v33  ;;  %v5894_v55 = vpop.f32.mrb[7].mxu0  ;;  %v8889_v62 = vpop.f32.mrb[6].mxu1 }
 0x713   : >> { %v5906_v16 = vadd.f32 %v5894_v55, %v5775_v56  ;;  %v6030_v61 = vadd.f32 %v6016_v54, %v5905_v2  ;;  %v6019_v13 = vpop.f32.mrb[7].mxu1 }
 0x715   : >> { %v6031_v9 = vadd.f32 %v6019_v13, %v5906_v16 }
 0x72f   : >> { %v8908_v17 = vpop.f32.mrb[8].mxu0 }
 0x730   : >> { %v6155_v3 = vadd.f32 %v8908_v17, %v6032_v34  ;;  %v6139_v7 = vpop.f32.mrb[9].mxu0  ;;  %v8928_v31 = vpop.f32.mrb[8].mxu1 }
 0x731   : >> { %v6153_v53 = vadd.f32 %v6139_v7, %v6030_v61  ;;  %v8909_v43 = vpop.f32.mrb[10].mxu0  ;;  %v6262_v6 = vpop.f32.mrb[9].mxu1 }
 0x732   : >> { %v6278_v23 = vadd.f32 %v8928_v31, %v6155_v3  ;;  %v6142_v59 = vpop.f32.mrb[11].mxu0  ;;  %v8929_v14 = vpop.f32.mrb[10].mxu1 }
 0x733   : >> { %v6154_v10 = vadd.f32 %v6142_v59, %v6031_v9  ;;  %v6276_v47 = vadd.f32 %v6262_v6, %v6153_v53  ;;  %v6265_v45 = vpop.f32.mrb[11].mxu1 }
 0x735   : >> { %v6277_v24 = vadd.f32 %v6265_v45, %v6154_v10 }
 0x74f   : >> { %v8948_v40 = vpop.f32.mrb[12].mxu0 }
 0x750   : >> { %v6402_v0 = vadd.f32 %v8948_v40, %v6278_v23  ;;  %v6386_v15 = vpop.f32.mrb[13].mxu0  ;;  %v8968_v58 = vpop.f32.mrb[12].mxu1 }
 0x751   : >> { %v6400_v50 = vadd.f32 %v6386_v15, %v6276_v47  ;;  %v8949_v38 = vpop.f32.mrb[14].mxu0  ;;  %v6509_v19 = vpop.f32.mrb[13].mxu1 }
 0x752   : >> { %v6525_v22 = vadd.f32 %v8968_v58, %v6402_v0  ;;  %v6389_v32 = vpop.f32.mrb[15].mxu0  ;;  %v8969_v25 = vpop.f32.mrb[14].mxu1 }
 0x753   : >> { %v6401_v11 = vadd.f32 %v6389_v32, %v6277_v24  ;;  %v6523_v1 = vadd.f32 %v6509_v19, %v6400_v50  ;;  %v6512_v28 = vpop.f32.mrb[15].mxu1 }
 0x755   : >> { %v6524_v57 = vadd.f32 %v6512_v28, %v6401_v11 }
 0x76f   : >> { %v8988_v49 = vpop.f32.mrb[16].mxu0 }
 0x770   : >> { %v6648_v18 = vadd.f32 %v8988_v49, %v6525_v22  ;;  %v6632_v8 = vpop.f32.mrb[17].mxu0 }
 0x771   : >> { %v6646_v29 = vadd.f32 %v6632_v8, %v6523_v1  ;;  %v8989_v42 = vpop.f32.mrb[18].mxu0 }
 0x772   : >> { %v6655_v4 = vadd.f32 %v11551_v35, %v6648_v18  ;;  %v6635_v51 = vpop.f32.mrb[19].mxu0 }
 0x773   : >> { %v6653_v44 = vadd.f32 %v11551_v35, %v6646_v29  ;;  %v6647_v63 = vadd.f32 %v6635_v51, %v6524_v57 }
 0x774   : >> { %v6658_v26 = vmax.f32 %v6655_v4, 0.0 }
 0x775   : >> { %v6654_v60 = vadd.f32 %v11551_v35, %v6647_v63  ;;  %v6656_v30 = vmax.f32 %v6653_v44, 0.0 }
 0x776   : >> { %v6665_v39 = vmul.f32 %v11556_v52, %v6658_v26 }
 0x777   : >> { %v6657_v20 = vmax.f32 %v6654_v60, 0.0  ;;  %v6663_v36 = vmul.f32 %v11556_v52, %v6656_v30 }
 0x778   : >> { %v6672_v12 = vadd.f32 %v11561_v5, %v6665_v39 }
 0x779   : >> { %v6664_v41 = vmul.f32 %v11556_v52, %v6657_v20  ;;  %v6670_v21 = vadd.f32 %v11561_v5, %v6663_v36 }
 0x77a   : >> { %v6677_v37 = vrot.slane %v6672_v12, 2 }
 0x77b   : >> { %v6671_v56 = vadd.f32 %v11561_v5, %v6664_v41 }
 0x77d   : >> { %v6676_v33 = vrot.slane %v6671_v56, 2 }
 0x77f   : >> { %v6678_v48 = vsel %vm1856_vm0, %v6676_v33, %v6677_v37 }
 0x780   : >> { %v6680_v2 = vmax.f32 %v6670_v21, %v6678_v48 }
 0x782   : >> { %v6682_v27 = vcombine.high %v6680_v2, %v6680_v2  ;;  %v6689_v54 = vrot.slane %v6680_v2, %v10312_v46 }
 0x784   : >> { %v6696_v34 = vrot.slane %v6682_v27, %v10312_v46  ;;  %v6697_v55 = vcombine.high %v6689_v54, %v6689_v54  ;;  %v6704_v62 = vsel %vm2066_vm1, %v6689_v54, -inf }
 0x785   : >> { %v6705_v16 = vrot.slane %v6704_v62, 4 }
 0x786   : >> { %v6698_v61 = vcombine.high %v6696_v34, %v6696_v34  ;;  %v6711_v13 = vsel %vm2066_vm1, %v6697_v55, -inf  ;;  %v6718_v9 = vsel %vm2066_vm1, %v6696_v34, -inf }
 0x787   : >> { %v6706_v17 = vmax.f32 %v6704_v62, %v6705_v16  ;;  %v6712_v3 = vrot.slane %v6711_v13, 4  ;;  %v6719_v7 = vrot.slane %v6718_v9, 4 }
 0x788   : >> { %v6725_v31 = vsel %vm2066_vm1, %v6698_v61, -inf }
 0x789   : >> { %v6707_v53 = vrot.slane %v6706_v17, 2  ;;  %v6713_v43 = vmax.f32 %v6711_v13, %v6712_v3  ;;  %v6720_v6 = vmax.f32 %v6718_v9, %v6719_v7  ;;  %v6726_v23 = vrot.slane %v6725_v31, 4 }
 0x78b   : >> { %v6708_v59 = vmax.f32 %v6706_v17, %v6707_v53  ;;  %v6714_v14 = vrot.slane %v6713_v43, 2  ;;  %v6721_v10 = vrot.slane %v6720_v6, 2  ;;  %v6727_v47 = vmax.f32 %v6725_v31, %v6726_v23 }
 0x78d   : >> { %v6709_v45 = vrot.slane %v6708_v59, 1  ;;  %v6715_v24 = vmax.f32 %v6713_v43, %v6714_v14  ;;  %v6722_v40 = vmax.f32 %v6720_v6, %v6721_v10  ;;  %v6728_v0 = vrot.slane %v6727_v47, 2 }
 0x78f   : >> { %v6716_v15 = vrot.slane %v6715_v24, 1  ;;  %v6723_v58 = vrot.slane %v6722_v40, 1  ;;  %v6729_v50 = vmax.f32 %v6727_v47, %v6728_v0  ;;  %v6710_v38 = vmax.f32 %v6708_v59, %v6709_v45 }
 0x790   : > { %5544 = sbr.rel (!%p5542_p7) target bundleno = 1531 (0x5fb), region = 207 }
 0x791   : >> { %v6717_v19 = vmax.f32 %v6715_v24, %v6716_v15  ;;  %v6724_v22 = vmax.f32 %v6722_v40, %v6723_v58  ;;  %v6730_v32 = vrot.slane %v6729_v50, 1 }
 0x793   : >> { %v6731_v25 = vmax.f32 %v6729_v50, %v6730_v32  ;;  %v6738_v11 = vsel %vm2326_vm2, %v6717_v19, %v6710_v38 }
 0x794   : >> { %v6740_v1 = vsel %vm2328_vm3, %v6724_v22, %v6738_v11 }
 0x795   : >> { %v6742_v28 = vsel %vm2330_vm4, %v6731_v25, %v6740_v1 }
 0x796   : >> { %6745 = vst [vmem:[%s6744_s30] sm:$0xf] %v6742_v28 }
 0x797 PF: > { %s16_s21 = sadd.s32 1, %s9310_s21  }
 0x798   : > { %p13_p8 = scmp.ge.s32.totalorder %s16_s21, 4  }
 0x79a   :  { %15 = sbr.rel (!%p13_p8) target bundleno = 1 (0x1), region = 218 }

</bundles_post_ra>
